<compile_context>
chip_gen: v6e
topology: v6e:2x2x1
jax: 0.10.0
libtpu: 0.0.40
codegen_flags: <defaults>
</compile_context>

<pallas_src>
import numpy as np
import jax
import jax.numpy as jnp
from jax.experimental import pallas as pl
from jax.experimental.pallas import tpu as pltpu

BN_EPS = 1e-5


# ---------------------------------------------------------------------------
# Trace-time constants (numpy): border masks, pool-compaction and upsample
# selection matrices.  Passed as VMEM inputs with constant index_maps.
# ---------------------------------------------------------------------------
def _border_masks(H, W):
    """(9, H*W) 0/1: row k = validity of 3x3 tap k under flattened lane rolls."""
    S = H * W
    pos = np.arange(S)
    row, col = pos // W, pos % W
    m = np.zeros((9, S), np.float32)
    for k in range(9):
        dy, dx = k // 3 - 1, k % 3 - 1
        valid = ((row + dy >= 0) & (row + dy < H) &
                 (col + dx >= 0) & (col + dx < W))
        m[k] = valid.astype(np.float32)
    return m


def _pool_sel(H, W):
    """(H*W, (H/2)*(W/2)) 0/1 compaction matrix: picks position 2y*W + 2x."""
    h, w = H // 2, W // 2
    S, s = H * W, h * w
    sel = np.zeros((S, s), np.float32)
    q = np.arange(s)
    sel[2 * (q // w) * W + 2 * (q % w), q] = 1.0
    return sel


def _up_mat(h, w):
    """(h*w, 4*h*w) 0/1 nearest-neighbor 2x upsample matrix."""
    H, W = 2 * h, 2 * w
    s, S = h * w, H * W
    up = np.zeros((s, S), np.float32)
    p = np.arange(S)
    up[(p // W // 2) * w + (p % W) // 2, p] = 1.0
    return up


# ---------------------------------------------------------------------------
# Parameter initialization (deterministic, synthetic, eval-mode folded BN)
# ---------------------------------------------------------------------------
def _init_residual(key, cin, cout):
    cmid = cout // 2
    ks = jax.random.split(key, 12)

    def bn_fold(k, c):
        k1, k2, k3, k4 = jax.random.split(k, 4)
        gamma = jax.random.uniform(k1, (c,), jnp.float32, 0.5, 1.5)
        beta = jax.random.normal(k2, (c,), jnp.float32) * 0.1
        mean = jax.random.normal(k3, (c,), jnp.float32) * 0.1
        var = jax.random.uniform(k4, (c,), jnp.float32, 0.5, 1.5)
        scale = gamma / jnp.sqrt(var + BN_EPS)
        bias = beta - mean * scale
        return scale.reshape(1, c), bias.reshape(1, c)

    p = {}
    p["s1"], p["b1"] = bn_fold(ks[0], cin)
    p["w1"] = jax.random.normal(ks[1], (cin, cmid), jnp.float32) * 0.3
    p["cb1"] = (jax.random.normal(ks[2], (cmid,), jnp.float32) * 0.1).reshape(1, cmid)
    p["s2"], p["b2"] = bn_fold(ks[3], cmid)
    p["w2"] = jax.random.normal(ks[4], (3, 3, cmid, cmid), jnp.float32) * 0.2
    p["cb2"] = (jax.random.normal(ks[5], (cmid,), jnp.float32) * 0.1).reshape(1, cmid)
    p["s3"], p["b3"] = bn_fold(ks[6], cmid)
    p["w3"] = jax.random.normal(ks[7], (cmid, cout), jnp.float32) * 0.3
    p["cb3"] = (jax.random.normal(ks[8], (cout,), jnp.float32) * 0.1).reshape(1, cout)
    if cin != cout:
        p["wsk"] = jax.random.normal(ks[9], (cin, cout), jnp.float32) * 0.3
        p["bsk"] = (jax.random.normal(ks[10], (cout,), jnp.float32) * 0.1).reshape(1, cout)
    return p


def _init_hourglass(key, depth, nc, expansion):
    nce = nc + expansion
    ks = jax.random.split(key, 4)
    p = {"depth": depth,
         "up1": _init_residual(ks[0], nc, nc),
         "low1": _init_residual(ks[1], nc, nce),
         "low3": _init_residual(ks[3], nce, nc)}
    if depth > 1:
        p["low2"] = _init_hourglass(ks[2], depth - 1, nce, expansion)
    else:
        p["low2"] = _init_residual(ks[2], nce, nce)
    return p


# ---------------------------------------------------------------------------
# Host-side packing: per-residual (vecs, wts) VMEM tiles
#   vecs: (max(cin,cout), 10) columns = [s1 b1 cb1 s2 b2 cb2 s3 b3 cb3 bsk]
#   wts : rows = [w1^T (cmid) | 9 x w2tap^T (cmid each) | w3^T (cout) | wsk^T (cout)]
# ---------------------------------------------------------------------------
def _pack_residual(p, cin, cout):
    cmid = cout // 2
    has_skip = "wsk" in p
    rows = max(cin, cout)
    vecs = np.zeros((rows, 10), np.float32)

    def put(col, arr):
        a = np.asarray(arr, np.float32).reshape(-1)
        vecs[:a.shape[0], col] = a

    put(0, p["s1"]); put(1, p["b1"]); put(2, p["cb1"])
    put(3, p["s2"]); put(4, p["b2"]); put(5, p["cb2"])
    put(6, p["s3"]); put(7, p["b3"]); put(8, p["cb3"])
    if has_skip:
        put(9, p["bsk"])

    cols = max(cin, cmid)
    nrows = 10 * cmid + cout + (cout if has_skip else 0)
    wts = np.zeros((nrows, cols), np.float32)
    wts[0:cmid, :cin] = np.asarray(p["w1"], np.float32).T            # (cmid, cin)
    w2 = np.asarray(p["w2"], np.float32)                             # (3,3,ci,co) HWIO
    for k in range(9):
        ky, kx = k // 3, k % 3
        wts[cmid + k * cmid:cmid + (k + 1) * cmid, :cmid] = w2[ky, kx].T
    wts[10 * cmid:10 * cmid + cout, :cmid] = np.asarray(p["w3"], np.float32).T
    if has_skip:
        wts[10 * cmid + cout:10 * cmid + 2 * cout, :cin] = \
            np.asarray(p["wsk"], np.float32).T
    meta = dict(cin=cin, cout=cout, cmid=cmid, has_skip=has_skip)
    return vecs, wts, meta


def _build_hourglass_spec(raw, nc, expansion, H, W, consts, const_idx, params_list):
    """Recursively pack params/constants; returns a static meta tree for the kernel."""
    nce = nc + expansion
    h, w = H // 2, W // 2

    def need_const(kind, a, b, builder):
        key = (kind, a, b)
        if key not in const_idx:
            const_idx[key] = len(consts)
            consts.append(builder(a, b))
        return const_idx[key]

    def add_res(p, cin, cout):
        vecs, wts, meta = _pack_residual(p, cin, cout)
        meta["vecs_idx"] = len(params_list)
        params_list.append(vecs)
        meta["wts_idx"] = len(params_list)
        params_list.append(wts)
        return meta

    level = dict(H=H, W=W, nc=nc, nce=nce)
    level["mask_full"] = need_const("mask", H, W, _border_masks)
    level["mask_half"] = need_const("mask", h, w, _border_masks)
    level["pool"] = need_const("pool", H, W, _pool_sel)
    level["up"] = need_const("up", h, w, _up_mat)
    level["up1"] = add_res(raw["up1"], nc, nc)
    level["low1"] = add_res(raw["low1"], nc, nce)
    level["low3"] = add_res(raw["low3"], nce, nc)
    if raw["depth"] > 1:
        level["inner"] = _build_hourglass_spec(raw["low2"], nce, expansion, h, w,
                                               consts, const_idx, params_list)
    else:
        level["inner_res"] = add_res(raw["low2"], nce, nce)
    return level


# ---------------------------------------------------------------------------
# The fused kernel body (whole hourglass, one grid step per batch element)
# ---------------------------------------------------------------------------
def _make_kernel(level, n_consts, n_params):
    def kernel(*refs):
        const_refs = refs[:n_consts]
        param_refs = refs[n_consts:n_consts + n_params]
        x_ref = refs[n_consts + n_params]
        o_ref = refs[n_consts + n_params + 1]

        def mix(x, w):
            """(m, S) = w @ x with w:(m,k), x:(k,S); exact-f32 VPU broadcast FMAs.

            Channel counts here are 2..8, so this beats a degenerate MXU matmul
            and avoids any SMEM scalar-weight path (weights are VMEM columns).
            """
            acc = w[:, 0:1] * x[0:1, :]
            for ci in range(1, x.shape[0]):
                acc = acc + w[:, ci:ci + 1] * x[ci:ci + 1, :]
            return acc

        def residual(x, meta, maskb, W):
            S = x.shape[1]
            cin, cout, cmid = meta["cin"], meta["cout"], meta["cmid"]
            vecs = param_refs[meta["vecs_idx"]][...]
            wts = param_refs[meta["wts_idx"]][...]

            def col(c, j):
                return vecs[:c, j:j + 1]

            # bn1 -> relu -> conv1 (1x1)
            h = jnp.maximum(x * col(cin, 0) + col(cin, 1), 0.0)
            h = mix(h, wts[0:cmid, :cin]) + col(cmid, 2)
            # bn2 -> relu -> conv2 (3x3, pad 1): lane rolls + precomputed masks
            h = jnp.maximum(h * col(cmid, 3) + col(cmid, 4), 0.0)
            acc = jnp.zeros((cmid, S), jnp.float32) + col(cmid, 5)
            for k in range(9):
                dy, dx = k // 3 - 1, k % 3 - 1
                off = dy * W + dx
                sh = h if off == 0 else pltpu.roll(h, (-off) % S, axis=1)
                if not (dy == 0 and dx == 0):
                    sh = jnp.where(maskb[k:k + 1, :], sh, 0.0)
                acc = acc + mix(sh, wts[cmid + k * cmid:cmid + (k + 1) * cmid, :cmid])
            # bn3 -> relu -> conv3 (1x1)
            h = jnp.maximum(acc * col(cmid, 6) + col(cmid, 7), 0.0)
            out = mix(h, wts[10 * cmid:10 * cmid + cout, :cmid]) + col(cout, 8)
            # residual path on the raw block input
            if meta["has_skip"]:
                out = (out + mix(x, wts[10 * cmid + cout:10 * cmid + 2 * cout, :cin])
                       + col(cout, 9))
            else:
                out = out + x
            return out

        def pool2x2(x, sel_ref, W):
            """2x2/stride-2 max pool on (C, H*W) slabs, batched across channels."""
            S = x.shape[1]
            m = jnp.maximum(x, pltpu.roll(x, S - 1, axis=1))   # right-neighbor max
            m = jnp.maximum(m, pltpu.roll(m, S - W, axis=1))   # below-neighbor max
            return jnp.dot(m, sel_ref[...], preferred_element_type=jnp.float32)

        def apply_level(x, lv):
            W, w = lv["W"], lv["W"] // 2
            maskf = const_refs[lv["mask_full"]][...] != 0.0
            maskh = const_refs[lv["mask_half"]][...] != 0.0
            pooled = pool2x2(x, const_refs[lv["pool"]], W)
            low1 = residual(pooled, lv["low1"], maskh, w)
            if "inner" in lv:
                low2 = apply_level(low1, lv["inner"])
            else:
                low2 = residual(low1, lv["inner_res"], maskh, w)
            low3 = residual(low2, lv["low3"], maskh, w)
            up1 = residual(x, lv["up1"], maskf, W)
            up2 = jnp.dot(low3, const_refs[lv["up"]][...],
                          preferred_element_type=jnp.float32)   # nearest-2x upsample
            return up1 + up2

        o_ref[0] = apply_level(x_ref[0], level).astype(o_ref.dtype)

    return kernel


# ---------------------------------------------------------------------------
# Wrapper: one pallas_call for the whole hourglass, activations (N, C, H*W)
# ---------------------------------------------------------------------------
def make_hourglass_fn(raw_params, nc, expansion, H, W):
    consts, const_idx, params_list = [], {}, []
    level = _build_hourglass_spec(raw_params, nc, expansion, H, W,
                                  consts, const_idx, params_list)
    n_consts, n_params = len(consts), len(params_list)
    kernel = _make_kernel(level, n_consts, n_params)

    const_ops = [jnp.asarray(c) for c in consts]
    param_ops = [jnp.asarray(p) for p in params_list]
    S = H * W

    def apply(x_flat):
        N = x_flat.shape[0]
        assert x_flat.shape == (N, nc, S)
        const_specs = [pl.BlockSpec(a.shape, lambda n: (0, 0)) for a in const_ops]
        param_specs = [pl.BlockSpec(a.shape, lambda n: (0, 0)) for a in param_ops]
        x_spec = pl.BlockSpec((1, nc, S), lambda n: (n, 0, 0))
        return pl.pallas_call(
            kernel,
            grid=(N,),
            in_specs=const_specs + param_specs + [x_spec],
            out_specs=pl.BlockSpec((1, nc, S), lambda n: (n, 0, 0)),
            out_shape=jax.ShapeDtypeStruct((N, nc, S), jnp.float32),
            compiler_params=pltpu.CompilerParams(
                dimension_semantics=("parallel",)),   # batch across v7x TCs
        )(*const_ops, *param_ops, x_flat)

    return apply


# ---------------------------------------------------------------------------
# Pure-JAX reference (NHWC, same folded-BN parameters), HIGHEST precision
# ---------------------------------------------------------------------------
_HI = jax.lax.Precision.HIGHEST


def _residual_ref(x, p):
    def bn_relu(v, s, b):
        return jnp.maximum(v * s[0] + b[0], 0.0)
    h = bn_relu(x, p["s1"], p["b1"])
    h = jnp.einsum("nhwc,co->nhwo", h, p["w1"], precision=_HI) + p["cb1"][0]
    h = bn_relu(h, p["s2"], p["b2"])
    h = jax.lax.conv_general_dilated(
        h, p["w2"], (1, 1), "SAME",
        dimension_numbers=("NHWC", "HWIO", "NHWC"), precision=_HI) + p["cb2"][0]
    h = bn_relu(h, p["s3"], p["b3"])
    out = jnp.einsum("nhwc,co->nhwo", h, p["w3"], precision=_HI) + p["cb3"][0]
    if "wsk" in p:
        res = jnp.einsum("nhwc,co->nhwo", x, p["wsk"], precision=_HI) + p["bsk"][0]
    else:
        res = x
    return out + res


def _maxpool_ref(x):
    N, H, W, C = x.shape
    return jnp.max(x.reshape(N, H // 2, 2, W // 2, 2, C), axis=(2, 4))


def _upsample_ref(x):
    return jnp.repeat(jnp.repeat(x, 2, axis=1), 2, axis=2)


def _hourglass_ref(x, p):
    pool = _maxpool_ref(x)
    low1 = _residual_ref(pool, p["low1"])
    if p["depth"] > 1:
        low2 = _hourglass_ref(low1, p["low2"])
    else:
        low2 = _residual_ref(low1, p["low2"])
    low3 = _residual_ref(low2, p["low3"])
    up1 = _residual_ref(x, p["up1"])
    return up1 + _upsample_ref(low3)


# ---------------------------------------------------------------------------
if __name__ == "__main__":
    key = jax.random.PRNGKey(0)
    kx, kp = jax.random.split(key)

    # Hourglass(depth=2, nc=4, expansion=2), input NCHW = (2, 4, 16, 16)
    N, C, H, W = 2, 4, 16, 16
    depth, expansion = 2, 2

    x_nchw = jax.random.normal(kx, (N, C, H, W), jnp.float32)
    raw_params = _init_hourglass(kp, depth, C, expansion)

    hourglass = make_hourglass_fn(raw_params, C, expansion, H, W)
    x_flat = x_nchw.reshape(N, C, H * W)            # free row-major reshape
    out_flat = jax.block_until_ready(hourglass(x_flat))
    out_nchw = out_flat.reshape(N, C, H, W)         # back to PyTorch NCHW view
    assert out_nchw.shape == (N, C, H, W), out_nchw.shape

    # pure-JAX reference with the same folded-BN parameters
    x_nhwc = jnp.transpose(x_nchw, (0, 2, 3, 1))
    ref_nchw = jnp.transpose(_hourglass_ref(x_nhwc, raw_params), (0, 3, 1, 2))
    scale = jnp.maximum(jnp.max(jnp.abs(ref_nchw)), 1.0)
    err = float(jnp.max(jnp.abs(out_nchw - ref_nchw)) / scale)
    # Conv/BN math is exact-f32 VPU FMAs; the only non-exact ops are the tiny
    # 0/1 selection matmuls (pool compaction / upsample), covered by 5e-3.
    assert err < 5e-3, f"mismatch vs reference: rel err {err}"

    print("KERNEL_OK")
</pallas_src>

<mosaic_0001>
module attributes {stable_mosaic.version = 11 : i64} {
  func.func @kernel(%arg0: i32, %arg1: memref<9x256xf32, #tpu.memory_space<vmem>>, %arg2: memref<9x64xf32, #tpu.memory_space<vmem>>, %arg3: memref<256x64xf32, #tpu.memory_space<vmem>>, %arg4: memref<64x256xf32, #tpu.memory_space<vmem>>, %arg5: memref<9x16xf32, #tpu.memory_space<vmem>>, %arg6: memref<64x16xf32, #tpu.memory_space<vmem>>, %arg7: memref<16x64xf32, #tpu.memory_space<vmem>>, %arg8: memref<4x10xf32, #tpu.memory_space<vmem>>, %arg9: memref<24x4xf32, #tpu.memory_space<vmem>>, %arg10: memref<6x10xf32, #tpu.memory_space<vmem>>, %arg11: memref<42x4xf32, #tpu.memory_space<vmem>>, %arg12: memref<6x10xf32, #tpu.memory_space<vmem>>, %arg13: memref<28x6xf32, #tpu.memory_space<vmem>>, %arg14: memref<6x10xf32, #tpu.memory_space<vmem>>, %arg15: memref<36x6xf32, #tpu.memory_space<vmem>>, %arg16: memref<8x10xf32, #tpu.memory_space<vmem>>, %arg17: memref<56x6xf32, #tpu.memory_space<vmem>>, %arg18: memref<8x10xf32, #tpu.memory_space<vmem>>, %arg19: memref<42x8xf32, #tpu.memory_space<vmem>>, %arg20: memref<8x10xf32, #tpu.memory_space<vmem>>, %arg21: memref<48x8xf32, #tpu.memory_space<vmem>>, %arg22: memref<1x4x256xf32, #tpu.memory_space<vmem>>, %arg23: memref<1x4x256xf32, #tpu.memory_space<vmem>>) attributes {dimension_semantics = [#tpu.dimension_semantics<parallel>], iteration_bounds = array<i64: 2>, scalar_prefetch = 0 : i64, scratch_operands = 0 : i64, tpu.core_type = #tpu.core_type<tc>, window_params = [{pipeline_mode = #tpu.pipeline_mode<synchronous>, transform_indices = @transform_0, window_bounds = array<i64: 9, 256>}, {pipeline_mode = #tpu.pipeline_mode<synchronous>, transform_indices = @transform_1, window_bounds = array<i64: 9, 64>}, {pipeline_mode = #tpu.pipeline_mode<synchronous>, transform_indices = @transform_2, window_bounds = array<i64: 256, 64>}, {pipeline_mode = #tpu.pipeline_mode<synchronous>, transform_indices = @transform_3, window_bounds = array<i64: 64, 256>}, {pipeline_mode = #tpu.pipeline_mode<synchronous>, transform_indices = @transform_4, window_bounds = array<i64: 9, 16>}, {pipeline_mode = #tpu.pipeline_mode<synchronous>, transform_indices = @transform_5, window_bounds = array<i64: 64, 16>}, {pipeline_mode = #tpu.pipeline_mode<synchronous>, transform_indices = @transform_6, window_bounds = array<i64: 16, 64>}, {pipeline_mode = #tpu.pipeline_mode<synchronous>, transform_indices = @transform_7, window_bounds = array<i64: 4, 10>}, {pipeline_mode = #tpu.pipeline_mode<synchronous>, transform_indices = @transform_8, window_bounds = array<i64: 24, 4>}, {pipeline_mode = #tpu.pipeline_mode<synchronous>, transform_indices = @transform_9, window_bounds = array<i64: 6, 10>}, {pipeline_mode = #tpu.pipeline_mode<synchronous>, transform_indices = @transform_10, window_bounds = array<i64: 42, 4>}, {pipeline_mode = #tpu.pipeline_mode<synchronous>, transform_indices = @transform_11, window_bounds = array<i64: 6, 10>}, {pipeline_mode = #tpu.pipeline_mode<synchronous>, transform_indices = @transform_12, window_bounds = array<i64: 28, 6>}, {pipeline_mode = #tpu.pipeline_mode<synchronous>, transform_indices = @transform_13, window_bounds = array<i64: 6, 10>}, {pipeline_mode = #tpu.pipeline_mode<synchronous>, transform_indices = @transform_14, window_bounds = array<i64: 36, 6>}, {pipeline_mode = #tpu.pipeline_mode<synchronous>, transform_indices = @transform_15, window_bounds = array<i64: 8, 10>}, {pipeline_mode = #tpu.pipeline_mode<synchronous>, transform_indices = @transform_16, window_bounds = array<i64: 56, 6>}, {pipeline_mode = #tpu.pipeline_mode<synchronous>, transform_indices = @transform_17, window_bounds = array<i64: 8, 10>}, {pipeline_mode = #tpu.pipeline_mode<synchronous>, transform_indices = @transform_18, window_bounds = array<i64: 42, 8>}, {pipeline_mode = #tpu.pipeline_mode<synchronous>, transform_indices = @transform_19, window_bounds = array<i64: 8, 10>}, {pipeline_mode = #tpu.pipeline_mode<synchronous>, transform_indices = @transform_20, window_bounds = array<i64: 48, 8>}, {transform_indices = @transform_21, window_bounds = array<i64: 1, 4, 256>}, {transform_indices = @transform_22, window_bounds = array<i64: 1, 4, 256>}]} {
    %c0 = arith.constant 0 : index
    %c0_0 = arith.constant 0 : index
    %c0_1 = arith.constant 0 : index
    %0 = vector.load %arg22[%c0, %c0_0, %c0_1] : memref<1x4x256xf32, #tpu.memory_space<vmem>>, vector<1x4x256xf32>
    %1 = vector.shape_cast %0 : vector<1x4x256xf32> to vector<4x256xf32>
    %c0_2 = arith.constant 0 : index
    %c0_3 = arith.constant 0 : index
    %2 = vector.load %arg1[%c0_2, %c0_3] : memref<9x256xf32, #tpu.memory_space<vmem>>, vector<9x256xf32>
    %cst = arith.constant 0.000000e+00 : f32
    %3 = vector.broadcast %cst : f32 to vector<9x256xf32>
    %4 = arith.cmpf one, %2, %3 : vector<9x256xf32>
    %c0_4 = arith.constant 0 : index
    %c0_5 = arith.constant 0 : index
    %5 = vector.load %arg2[%c0_4, %c0_5] : memref<9x64xf32, #tpu.memory_space<vmem>>, vector<9x64xf32>
    %cst_6 = arith.constant 0.000000e+00 : f32
    %6 = vector.broadcast %cst_6 : f32 to vector<9x64xf32>
    %7 = arith.cmpf one, %5, %6 : vector<9x64xf32>
    %c255_i32 = arith.constant 255 : i32
    %8 = tpu.dynamic_rotate %1 by %c255_i32 dim 1 : vector<4x256xf32>, i32 -> vector<4x256xf32>
    %9 = arith.maximumf %1, %8 : vector<4x256xf32>
    %c240_i32 = arith.constant 240 : i32
    %10 = tpu.dynamic_rotate %9 by %c240_i32 dim 1 : vector<4x256xf32>, i32 -> vector<4x256xf32>
    %11 = arith.maximumf %9, %10 : vector<4x256xf32>
    %c0_7 = arith.constant 0 : index
    %c0_8 = arith.constant 0 : index
    %12 = vector.load %arg3[%c0_7, %c0_8] : memref<256x64xf32, #tpu.memory_space<vmem>>, vector<256x64xf32>
    %cst_9 = arith.constant dense<0.000000e+00> : vector<4x64xf32>
    %13 = tpu.matmul %11, %12, %cst_9 {dimension_numbers = #tpu.dot_dimension_numbers<[1], [0], [0], [1], [0, 0, 1, 1], [], []>} : vector<4x256xf32>, vector<256x64xf32>, vector<4x64xf32> -> vector<4x64xf32>
    %c0_10 = arith.constant 0 : index
    %c0_11 = arith.constant 0 : index
    %14 = vector.load %arg10[%c0_10, %c0_11] : memref<6x10xf32, #tpu.memory_space<vmem>>, vector<6x10xf32>
    %c0_12 = arith.constant 0 : index
    %c0_13 = arith.constant 0 : index
    %15 = vector.load %arg11[%c0_12, %c0_13] : memref<42x4xf32, #tpu.memory_space<vmem>>, vector<42x4xf32>
    %16 = vector.extract_strided_slice %14 {offsets = [0, 0], sizes = [4, 1], strides = [1, 1]} : vector<6x10xf32> to vector<4x1xf32>
    %17 = vector.broadcast %16 : vector<4x1xf32> to vector<4x64xf32>
    %18 = arith.mulf %13, %17 : vector<4x64xf32>
    %19 = vector.extract_strided_slice %14 {offsets = [0, 1], sizes = [4, 1], strides = [1, 1]} : vector<6x10xf32> to vector<4x1xf32>
    %20 = vector.broadcast %19 : vector<4x1xf32> to vector<4x64xf32>
    %21 = arith.addf %18, %20 : vector<4x64xf32>
    %cst_14 = arith.constant 0.000000e+00 : f32
    %22 = vector.broadcast %cst_14 : f32 to vector<4x64xf32>
    %23 = arith.maximumf %21, %22 : vector<4x64xf32>
    %24 = vector.extract_strided_slice %15 {offsets = [0, 0], sizes = [3, 4], strides = [1, 1]} : vector<42x4xf32> to vector<3x4xf32>
    %25 = vector.extract_strided_slice %24 {offsets = [0, 0], sizes = [3, 1], strides = [1, 1]} : vector<3x4xf32> to vector<3x1xf32>
    %26 = vector.extract_strided_slice %23 {offsets = [0, 0], sizes = [1, 64], strides = [1, 1]} : vector<4x64xf32> to vector<1x64xf32>
    %27 = vector.broadcast %25 : vector<3x1xf32> to vector<3x64xf32>
    %28 = vector.broadcast %26 : vector<1x64xf32> to vector<3x64xf32>
    %29 = arith.mulf %27, %28 : vector<3x64xf32>
    %30 = vector.extract_strided_slice %24 {offsets = [0, 1], sizes = [3, 1], strides = [1, 1]} : vector<3x4xf32> to vector<3x1xf32>
    %31 = vector.extract_strided_slice %23 {offsets = [1, 0], sizes = [1, 64], strides = [1, 1]} : vector<4x64xf32> to vector<1x64xf32>
    %32 = vector.broadcast %30 : vector<3x1xf32> to vector<3x64xf32>
    %33 = vector.broadcast %31 : vector<1x64xf32> to vector<3x64xf32>
    %34 = arith.mulf %32, %33 : vector<3x64xf32>
    %35 = arith.addf %29, %34 : vector<3x64xf32>
    %36 = vector.extract_strided_slice %24 {offsets = [0, 2], sizes = [3, 1], strides = [1, 1]} : vector<3x4xf32> to vector<3x1xf32>
    %37 = vector.extract_strided_slice %23 {offsets = [2, 0], sizes = [1, 64], strides = [1, 1]} : vector<4x64xf32> to vector<1x64xf32>
    %38 = vector.broadcast %36 : vector<3x1xf32> to vector<3x64xf32>
    %39 = vector.broadcast %37 : vector<1x64xf32> to vector<3x64xf32>
    %40 = arith.mulf %38, %39 : vector<3x64xf32>
    %41 = arith.addf %35, %40 : vector<3x64xf32>
    %42 = vector.extract_strided_slice %24 {offsets = [0, 3], sizes = [3, 1], strides = [1, 1]} : vector<3x4xf32> to vector<3x1xf32>
    %43 = vector.extract_strided_slice %23 {offsets = [3, 0], sizes = [1, 64], strides = [1, 1]} : vector<4x64xf32> to vector<1x64xf32>
    %44 = vector.broadcast %42 : vector<3x1xf32> to vector<3x64xf32>
    %45 = vector.broadcast %43 : vector<1x64xf32> to vector<3x64xf32>
    %46 = arith.mulf %44, %45 : vector<3x64xf32>
    %47 = arith.addf %41, %46 : vector<3x64xf32>
    %48 = vector.extract_strided_slice %14 {offsets = [0, 2], sizes = [3, 1], strides = [1, 1]} : vector<6x10xf32> to vector<3x1xf32>
    %49 = vector.broadcast %48 : vector<3x1xf32> to vector<3x64xf32>
    %50 = arith.addf %47, %49 : vector<3x64xf32>
    %51 = vector.extract_strided_slice %14 {offsets = [0, 3], sizes = [3, 1], strides = [1, 1]} : vector<6x10xf32> to vector<3x1xf32>
    %52 = vector.broadcast %51 : vector<3x1xf32> to vector<3x64xf32>
    %53 = arith.mulf %50, %52 : vector<3x64xf32>
    %54 = vector.extract_strided_slice %14 {offsets = [0, 4], sizes = [3, 1], strides = [1, 1]} : vector<6x10xf32> to vector<3x1xf32>
    %55 = vector.broadcast %54 : vector<3x1xf32> to vector<3x64xf32>
    %56 = arith.addf %53, %55 : vector<3x64xf32>
    %cst_15 = arith.constant 0.000000e+00 : f32
    %57 = vector.broadcast %cst_15 : f32 to vector<3x64xf32>
    %58 = arith.maximumf %56, %57 : vector<3x64xf32>
    %cst_16 = arith.constant 0.000000e+00 : f32
    %59 = vector.broadcast %cst_16 : f32 to vector<3x64xf32>
    %60 = vector.extract_strided_slice %14 {offsets = [0, 5], sizes = [3, 1], strides = [1, 1]} : vector<6x10xf32> to vector<3x1xf32>
    %61 = vector.broadcast %60 : vector<3x1xf32> to vector<3x64xf32>
    %62 = arith.addf %59, %61 : vector<3x64xf32>
    %c9_i32 = arith.constant 9 : i32
    %63 = tpu.dynamic_rotate %58 by %c9_i32 dim 1 : vector<3x64xf32>, i32 -> vector<3x64xf32>
    %64 = vector.extract_strided_slice %7 {offsets = [0, 0], sizes = [1, 64], strides = [1, 1]} : vector<9x64xi1> to vector<1x64xi1>
    %cst_17 = arith.constant 0.000000e+00 : f32
    %65 = vector.shape_cast %64 : vector<1x64xi1> to vector<1x64xi1>
    %66 = vector.broadcast %65 : vector<1x64xi1> to vector<3x64xi1>
    %67 = vector.broadcast %cst_17 : f32 to vector<3x64xf32>
    %68 = arith.select %66, %63, %67 : vector<3x64xi1>, vector<3x64xf32>
    %69 = vector.extract_strided_slice %15 {offsets = [3, 0], sizes = [3, 3], strides = [1, 1]} : vector<42x4xf32> to vector<3x3xf32>
    %70 = vector.extract_strided_slice %69 {offsets = [0, 0], sizes = [3, 1], strides = [1, 1]} : vector<3x3xf32> to vector<3x1xf32>
    %71 = vector.extract_strided_slice %68 {offsets = [0, 0], sizes = [1, 64], strides = [1, 1]} : vector<3x64xf32> to vector<1x64xf32>
    %72 = vector.broadcast %70 : vector<3x1xf32> to vector<3x64xf32>
    %73 = vector.broadcast %71 : vector<1x64xf32> to vector<3x64xf32>
    %74 = arith.mulf %72, %73 : vector<3x64xf32>
    %75 = vector.extract_strided_slice %69 {offsets = [0, 1], sizes = [3, 1], strides = [1, 1]} : vector<3x3xf32> to vector<3x1xf32>
    %76 = vector.extract_strided_slice %68 {offsets = [1, 0], sizes = [1, 64], strides = [1, 1]} : vector<3x64xf32> to vector<1x64xf32>
    %77 = vector.broadcast %75 : vector<3x1xf32> to vector<3x64xf32>
    %78 = vector.broadcast %76 : vector<1x64xf32> to vector<3x64xf32>
    %79 = arith.mulf %77, %78 : vector<3x64xf32>
    %80 = arith.addf %74, %79 : vector<3x64xf32>
    %81 = vector.extract_strided_slice %69 {offsets = [0, 2], sizes = [3, 1], strides = [1, 1]} : vector<3x3xf32> to vector<3x1xf32>
    %82 = vector.extract_strided_slice %68 {offsets = [2, 0], sizes = [1, 64], strides = [1, 1]} : vector<3x64xf32> to vector<1x64xf32>
    %83 = vector.broadcast %81 : vector<3x1xf32> to vector<3x64xf32>
    %84 = vector.broadcast %82 : vector<1x64xf32> to vector<3x64xf32>
    %85 = arith.mulf %83, %84 : vector<3x64xf32>
    %86 = arith.addf %80, %85 : vector<3x64xf32>
    %87 = arith.addf %62, %86 : vector<3x64xf32>
    %c8_i32 = arith.constant 8 : i32
    %88 = tpu.dynamic_rotate %58 by %c8_i32 dim 1 : vector<3x64xf32>, i32 -> vector<3x64xf32>
    %89 = vector.extract_strided_slice %7 {offsets = [1, 0], sizes = [1, 64], strides = [1, 1]} : vector<9x64xi1> to vector<1x64xi1>
    %cst_18 = arith.constant 0.000000e+00 : f32
    %90 = vector.shape_cast %89 : vector<1x64xi1> to vector<1x64xi1>
    %91 = vector.broadcast %90 : vector<1x64xi1> to vector<3x64xi1>
    %92 = vector.broadcast %cst_18 : f32 to vector<3x64xf32>
    %93 = arith.select %91, %88, %92 : vector<3x64xi1>, vector<3x64xf32>
    %94 = vector.extract_strided_slice %15 {offsets = [6, 0], sizes = [3, 3], strides = [1, 1]} : vector<42x4xf32> to vector<3x3xf32>
    %95 = vector.extract_strided_slice %94 {offsets = [0, 0], sizes = [3, 1], strides = [1, 1]} : vector<3x3xf32> to vector<3x1xf32>
    %96 = vector.extract_strided_slice %93 {offsets = [0, 0], sizes = [1, 64], strides = [1, 1]} : vector<3x64xf32> to vector<1x64xf32>
    %97 = vector.broadcast %95 : vector<3x1xf32> to vector<3x64xf32>
    %98 = vector.broadcast %96 : vector<1x64xf32> to vector<3x64xf32>
    %99 = arith.mulf %97, %98 : vector<3x64xf32>
    %100 = vector.extract_strided_slice %94 {offsets = [0, 1], sizes = [3, 1], strides = [1, 1]} : vector<3x3xf32> to vector<3x1xf32>
    %101 = vector.extract_strided_slice %93 {offsets = [1, 0], sizes = [1, 64], strides = [1, 1]} : vector<3x64xf32> to vector<1x64xf32>
    %102 = vector.broadcast %100 : vector<3x1xf32> to vector<3x64xf32>
    %103 = vector.broadcast %101 : vector<1x64xf32> to vector<3x64xf32>
    %104 = arith.mulf %102, %103 : vector<3x64xf32>
    %105 = arith.addf %99, %104 : vector<3x64xf32>
    %106 = vector.extract_strided_slice %94 {offsets = [0, 2], sizes = [3, 1], strides = [1, 1]} : vector<3x3xf32> to vector<3x1xf32>
    %107 = vector.extract_strided_slice %93 {offsets = [2, 0], sizes = [1, 64], strides = [1, 1]} : vector<3x64xf32> to vector<1x64xf32>
    %108 = vector.broadcast %106 : vector<3x1xf32> to vector<3x64xf32>
    %109 = vector.broadcast %107 : vector<1x64xf32> to vector<3x64xf32>
    %110 = arith.mulf %108, %109 : vector<3x64xf32>
    %111 = arith.addf %105, %110 : vector<3x64xf32>
    %112 = arith.addf %87, %111 : vector<3x64xf32>
    %c7_i32 = arith.constant 7 : i32
    %113 = tpu.dynamic_rotate %58 by %c7_i32 dim 1 : vector<3x64xf32>, i32 -> vector<3x64xf32>
    %114 = vector.extract_strided_slice %7 {offsets = [2, 0], sizes = [1, 64], strides = [1, 1]} : vector<9x64xi1> to vector<1x64xi1>
    %cst_19 = arith.constant 0.000000e+00 : f32
    %115 = vector.shape_cast %114 : vector<1x64xi1> to vector<1x64xi1>
    %116 = vector.broadcast %115 : vector<1x64xi1> to vector<3x64xi1>
    %117 = vector.broadcast %cst_19 : f32 to vector<3x64xf32>
    %118 = arith.select %116, %113, %117 : vector<3x64xi1>, vector<3x64xf32>
    %119 = vector.extract_strided_slice %15 {offsets = [9, 0], sizes = [3, 3], strides = [1, 1]} : vector<42x4xf32> to vector<3x3xf32>
    %120 = vector.extract_strided_slice %119 {offsets = [0, 0], sizes = [3, 1], strides = [1, 1]} : vector<3x3xf32> to vector<3x1xf32>
    %121 = vector.extract_strided_slice %118 {offsets = [0, 0], sizes = [1, 64], strides = [1, 1]} : vector<3x64xf32> to vector<1x64xf32>
    %122 = vector.broadcast %120 : vector<3x1xf32> to vector<3x64xf32>
    %123 = vector.broadcast %121 : vector<1x64xf32> to vector<3x64xf32>
    %124 = arith.mulf %122, %123 : vector<3x64xf32>
    %125 = vector.extract_strided_slice %119 {offsets = [0, 1], sizes = [3, 1], strides = [1, 1]} : vector<3x3xf32> to vector<3x1xf32>
    %126 = vector.extract_strided_slice %118 {offsets = [1, 0], sizes = [1, 64], strides = [1, 1]} : vector<3x64xf32> to vector<1x64xf32>
    %127 = vector.broadcast %125 : vector<3x1xf32> to vector<3x64xf32>
    %128 = vector.broadcast %126 : vector<1x64xf32> to vector<3x64xf32>
    %129 = arith.mulf %127, %128 : vector<3x64xf32>
    %130 = arith.addf %124, %129 : vector<3x64xf32>
    %131 = vector.extract_strided_slice %119 {offsets = [0, 2], sizes = [3, 1], strides = [1, 1]} : vector<3x3xf32> to vector<3x1xf32>
    %132 = vector.extract_strided_slice %118 {offsets = [2, 0], sizes = [1, 64], strides = [1, 1]} : vector<3x64xf32> to vector<1x64xf32>
    %133 = vector.broadcast %131 : vector<3x1xf32> to vector<3x64xf32>
    %134 = vector.broadcast %132 : vector<1x64xf32> to vector<3x64xf32>
    %135 = arith.mulf %133, %134 : vector<3x64xf32>
    %136 = arith.addf %130, %135 : vector<3x64xf32>
    %137 = arith.addf %112, %136 : vector<3x64xf32>
    %c1_i32 = arith.constant 1 : i32
    %138 = tpu.dynamic_rotate %58 by %c1_i32 dim 1 : vector<3x64xf32>, i32 -> vector<3x64xf32>
    %139 = vector.extract_strided_slice %7 {offsets = [3, 0], sizes = [1, 64], strides = [1, 1]} : vector<9x64xi1> to vector<1x64xi1>
    %cst_20 = arith.constant 0.000000e+00 : f32
    %140 = vector.shape_cast %139 : vector<1x64xi1> to vector<1x64xi1>
    %141 = vector.broadcast %140 : vector<1x64xi1> to vector<3x64xi1>
    %142 = vector.broadcast %cst_20 : f32 to vector<3x64xf32>
    %143 = arith.select %141, %138, %142 : vector<3x64xi1>, vector<3x64xf32>
    %144 = vector.extract_strided_slice %15 {offsets = [12, 0], sizes = [3, 3], strides = [1, 1]} : vector<42x4xf32> to vector<3x3xf32>
    %145 = vector.extract_strided_slice %144 {offsets = [0, 0], sizes = [3, 1], strides = [1, 1]} : vector<3x3xf32> to vector<3x1xf32>
    %146 = vector.extract_strided_slice %143 {offsets = [0, 0], sizes = [1, 64], strides = [1, 1]} : vector<3x64xf32> to vector<1x64xf32>
    %147 = vector.broadcast %145 : vector<3x1xf32> to vector<3x64xf32>
    %148 = vector.broadcast %146 : vector<1x64xf32> to vector<3x64xf32>
    %149 = arith.mulf %147, %148 : vector<3x64xf32>
    %150 = vector.extract_strided_slice %144 {offsets = [0, 1], sizes = [3, 1], strides = [1, 1]} : vector<3x3xf32> to vector<3x1xf32>
    %151 = vector.extract_strided_slice %143 {offsets = [1, 0], sizes = [1, 64], strides = [1, 1]} : vector<3x64xf32> to vector<1x64xf32>
    %152 = vector.broadcast %150 : vector<3x1xf32> to vector<3x64xf32>
    %153 = vector.broadcast %151 : vector<1x64xf32> to vector<3x64xf32>
    %154 = arith.mulf %152, %153 : vector<3x64xf32>
    %155 = arith.addf %149, %154 : vector<3x64xf32>
    %156 = vector.extract_strided_slice %144 {offsets = [0, 2], sizes = [3, 1], strides = [1, 1]} : vector<3x3xf32> to vector<3x1xf32>
    %157 = vector.extract_strided_slice %143 {offsets = [2, 0], sizes = [1, 64], strides = [1, 1]} : vector<3x64xf32> to vector<1x64xf32>
    %158 = vector.broadcast %156 : vector<3x1xf32> to vector<3x64xf32>
    %159 = vector.broadcast %157 : vector<1x64xf32> to vector<3x64xf32>
    %160 = arith.mulf %158, %159 : vector<3x64xf32>
    %161 = arith.addf %155, %160 : vector<3x64xf32>
    %162 = arith.addf %137, %161 : vector<3x64xf32>
    %163 = vector.extract_strided_slice %15 {offsets = [15, 0], sizes = [3, 3], strides = [1, 1]} : vector<42x4xf32> to vector<3x3xf32>
    %164 = vector.extract_strided_slice %163 {offsets = [0, 0], sizes = [3, 1], strides = [1, 1]} : vector<3x3xf32> to vector<3x1xf32>
    %165 = vector.extract_strided_slice %58 {offsets = [0, 0], sizes = [1, 64], strides = [1, 1]} : vector<3x64xf32> to vector<1x64xf32>
    %166 = vector.broadcast %164 : vector<3x1xf32> to vector<3x64xf32>
    %167 = vector.broadcast %165 : vector<1x64xf32> to vector<3x64xf32>
    %168 = arith.mulf %166, %167 : vector<3x64xf32>
    %169 = vector.extract_strided_slice %163 {offsets = [0, 1], sizes = [3, 1], strides = [1, 1]} : vector<3x3xf32> to vector<3x1xf32>
    %170 = vector.extract_strided_slice %58 {offsets = [1, 0], sizes = [1, 64], strides = [1, 1]} : vector<3x64xf32> to vector<1x64xf32>
    %171 = vector.broadcast %169 : vector<3x1xf32> to vector<3x64xf32>
    %172 = vector.broadcast %170 : vector<1x64xf32> to vector<3x64xf32>
    %173 = arith.mulf %171, %172 : vector<3x64xf32>
    %174 = arith.addf %168, %173 : vector<3x64xf32>
    %175 = vector.extract_strided_slice %163 {offsets = [0, 2], sizes = [3, 1], strides = [1, 1]} : vector<3x3xf32> to vector<3x1xf32>
    %176 = vector.extract_strided_slice %58 {offsets = [2, 0], sizes = [1, 64], strides = [1, 1]} : vector<3x64xf32> to vector<1x64xf32>
    %177 = vector.broadcast %175 : vector<3x1xf32> to vector<3x64xf32>
    %178 = vector.broadcast %176 : vector<1x64xf32> to vector<3x64xf32>
    %179 = arith.mulf %177, %178 : vector<3x64xf32>
    %180 = arith.addf %174, %179 : vector<3x64xf32>
    %181 = arith.addf %162, %180 : vector<3x64xf32>
    %c63_i32 = arith.constant 63 : i32
    %182 = tpu.dynamic_rotate %58 by %c63_i32 dim 1 : vector<3x64xf32>, i32 -> vector<3x64xf32>
    %183 = vector.extract_strided_slice %7 {offsets = [5, 0], sizes = [1, 64], strides = [1, 1]} : vector<9x64xi1> to vector<1x64xi1>
    %cst_21 = arith.constant 0.000000e+00 : f32
    %184 = vector.shape_cast %183 : vector<1x64xi1> to vector<1x64xi1>
    %185 = vector.broadcast %184 : vector<1x64xi1> to vector<3x64xi1>
    %186 = vector.broadcast %cst_21 : f32 to vector<3x64xf32>
    %187 = arith.select %185, %182, %186 : vector<3x64xi1>, vector<3x64xf32>
    %188 = vector.extract_strided_slice %15 {offsets = [18, 0], sizes = [3, 3], strides = [1, 1]} : vector<42x4xf32> to vector<3x3xf32>
    %189 = vector.extract_strided_slice %188 {offsets = [0, 0], sizes = [3, 1], strides = [1, 1]} : vector<3x3xf32> to vector<3x1xf32>
    %190 = vector.extract_strided_slice %187 {offsets = [0, 0], sizes = [1, 64], strides = [1, 1]} : vector<3x64xf32> to vector<1x64xf32>
    %191 = vector.broadcast %189 : vector<3x1xf32> to vector<3x64xf32>
    %192 = vector.broadcast %190 : vector<1x64xf32> to vector<3x64xf32>
    %193 = arith.mulf %191, %192 : vector<3x64xf32>
    %194 = vector.extract_strided_slice %188 {offsets = [0, 1], sizes = [3, 1], strides = [1, 1]} : vector<3x3xf32> to vector<3x1xf32>
    %195 = vector.extract_strided_slice %187 {offsets = [1, 0], sizes = [1, 64], strides = [1, 1]} : vector<3x64xf32> to vector<1x64xf32>
    %196 = vector.broadcast %194 : vector<3x1xf32> to vector<3x64xf32>
    %197 = vector.broadcast %195 : vector<1x64xf32> to vector<3x64xf32>
    %198 = arith.mulf %196, %197 : vector<3x64xf32>
    %199 = arith.addf %193, %198 : vector<3x64xf32>
    %200 = vector.extract_strided_slice %188 {offsets = [0, 2], sizes = [3, 1], strides = [1, 1]} : vector<3x3xf32> to vector<3x1xf32>
    %201 = vector.extract_strided_slice %187 {offsets = [2, 0], sizes = [1, 64], strides = [1, 1]} : vector<3x64xf32> to vector<1x64xf32>
    %202 = vector.broadcast %200 : vector<3x1xf32> to vector<3x64xf32>
    %203 = vector.broadcast %201 : vector<1x64xf32> to vector<3x64xf32>
    %204 = arith.mulf %202, %203 : vector<3x64xf32>
    %205 = arith.addf %199, %204 : vector<3x64xf32>
    %206 = arith.addf %181, %205 : vector<3x64xf32>
    %c57_i32 = arith.constant 57 : i32
    %207 = tpu.dynamic_rotate %58 by %c57_i32 dim 1 : vector<3x64xf32>, i32 -> vector<3x64xf32>
    %208 = vector.extract_strided_slice %7 {offsets = [6, 0], sizes = [1, 64], strides = [1, 1]} : vector<9x64xi1> to vector<1x64xi1>
    %cst_22 = arith.constant 0.000000e+00 : f32
    %209 = vector.shape_cast %208 : vector<1x64xi1> to vector<1x64xi1>
    %210 = vector.broadcast %209 : vector<1x64xi1> to vector<3x64xi1>
    %211 = vector.broadcast %cst_22 : f32 to vector<3x64xf32>
    %212 = arith.select %210, %207, %211 : vector<3x64xi1>, vector<3x64xf32>
    %213 = vector.extract_strided_slice %15 {offsets = [21, 0], sizes = [3, 3], strides = [1, 1]} : vector<42x4xf32> to vector<3x3xf32>
    %214 = vector.extract_strided_slice %213 {offsets = [0, 0], sizes = [3, 1], strides = [1, 1]} : vector<3x3xf32> to vector<3x1xf32>
    %215 = vector.extract_strided_slice %212 {offsets = [0, 0], sizes = [1, 64], strides = [1, 1]} : vector<3x64xf32> to vector<1x64xf32>
    %216 = vector.broadcast %214 : vector<3x1xf32> to vector<3x64xf32>
    %217 = vector.broadcast %215 : vector<1x64xf32> to vector<3x64xf32>
    %218 = arith.mulf %216, %217 : vector<3x64xf32>
    %219 = vector.extract_strided_slice %213 {offsets = [0, 1], sizes = [3, 1], strides = [1, 1]} : vector<3x3xf32> to vector<3x1xf32>
    %220 = vector.extract_strided_slice %212 {offsets = [1, 0], sizes = [1, 64], strides = [1, 1]} : vector<3x64xf32> to vector<1x64xf32>
    %221 = vector.broadcast %219 : vector<3x1xf32> to vector<3x64xf32>
    %222 = vector.broadcast %220 : vector<1x64xf32> to vector<3x64xf32>
    %223 = arith.mulf %221, %222 : vector<3x64xf32>
    %224 = arith.addf %218, %223 : vector<3x64xf32>
    %225 = vector.extract_strided_slice %213 {offsets = [0, 2], sizes = [3, 1], strides = [1, 1]} : vector<3x3xf32> to vector<3x1xf32>
    %226 = vector.extract_strided_slice %212 {offsets = [2, 0], sizes = [1, 64], strides = [1, 1]} : vector<3x64xf32> to vector<1x64xf32>
    %227 = vector.broadcast %225 : vector<3x1xf32> to vector<3x64xf32>
    %228 = vector.broadcast %226 : vector<1x64xf32> to vector<3x64xf32>
    %229 = arith.mulf %227, %228 : vector<3x64xf32>
    %230 = arith.addf %224, %229 : vector<3x64xf32>
    %231 = arith.addf %206, %230 : vector<3x64xf32>
    %c56_i32 = arith.constant 56 : i32
    %232 = tpu.dynamic_rotate %58 by %c56_i32 dim 1 : vector<3x64xf32>, i32 -> vector<3x64xf32>
    %233 = vector.extract_strided_slice %7 {offsets = [7, 0], sizes = [1, 64], strides = [1, 1]} : vector<9x64xi1> to vector<1x64xi1>
    %cst_23 = arith.constant 0.000000e+00 : f32
    %234 = vector.shape_cast %233 : vector<1x64xi1> to vector<1x64xi1>
    %235 = vector.broadcast %234 : vector<1x64xi1> to vector<3x64xi1>
    %236 = vector.broadcast %cst_23 : f32 to vector<3x64xf32>
    %237 = arith.select %235, %232, %236 : vector<3x64xi1>, vector<3x64xf32>
    %238 = vector.extract_strided_slice %15 {offsets = [24, 0], sizes = [3, 3], strides = [1, 1]} : vector<42x4xf32> to vector<3x3xf32>
    %239 = vector.extract_strided_slice %238 {offsets = [0, 0], sizes = [3, 1], strides = [1, 1]} : vector<3x3xf32> to vector<3x1xf32>
    %240 = vector.extract_strided_slice %237 {offsets = [0, 0], sizes = [1, 64], strides = [1, 1]} : vector<3x64xf32> to vector<1x64xf32>
    %241 = vector.broadcast %239 : vector<3x1xf32> to vector<3x64xf32>
    %242 = vector.broadcast %240 : vector<1x64xf32> to vector<3x64xf32>
    %243 = arith.mulf %241, %242 : vector<3x64xf32>
    %244 = vector.extract_strided_slice %238 {offsets = [0, 1], sizes = [3, 1], strides = [1, 1]} : vector<3x3xf32> to vector<3x1xf32>
    %245 = vector.extract_strided_slice %237 {offsets = [1, 0], sizes = [1, 64], strides = [1, 1]} : vector<3x64xf32> to vector<1x64xf32>
    %246 = vector.broadcast %244 : vector<3x1xf32> to vector<3x64xf32>
    %247 = vector.broadcast %245 : vector<1x64xf32> to vector<3x64xf32>
    %248 = arith.mulf %246, %247 : vector<3x64xf32>
    %249 = arith.addf %243, %248 : vector<3x64xf32>
    %250 = vector.extract_strided_slice %238 {offsets = [0, 2], sizes = [3, 1], strides = [1, 1]} : vector<3x3xf32> to vector<3x1xf32>
    %251 = vector.extract_strided_slice %237 {offsets = [2, 0], sizes = [1, 64], strides = [1, 1]} : vector<3x64xf32> to vector<1x64xf32>
    %252 = vector.broadcast %250 : vector<3x1xf32> to vector<3x64xf32>
    %253 = vector.broadcast %251 : vector<1x64xf32> to vector<3x64xf32>
    %254 = arith.mulf %252, %253 : vector<3x64xf32>
    %255 = arith.addf %249, %254 : vector<3x64xf32>
    %256 = arith.addf %231, %255 : vector<3x64xf32>
    %c55_i32 = arith.constant 55 : i32
    %257 = tpu.dynamic_rotate %58 by %c55_i32 dim 1 : vector<3x64xf32>, i32 -> vector<3x64xf32>
    %258 = vector.extract_strided_slice %7 {offsets = [8, 0], sizes = [1, 64], strides = [1, 1]} : vector<9x64xi1> to vector<1x64xi1>
    %cst_24 = arith.constant 0.000000e+00 : f32
    %259 = vector.shape_cast %258 : vector<1x64xi1> to vector<1x64xi1>
    %260 = vector.broadcast %259 : vector<1x64xi1> to vector<3x64xi1>
    %261 = vector.broadcast %cst_24 : f32 to vector<3x64xf32>
    %262 = arith.select %260, %257, %261 : vector<3x64xi1>, vector<3x64xf32>
    %263 = vector.extract_strided_slice %15 {offsets = [27, 0], sizes = [3, 3], strides = [1, 1]} : vector<42x4xf32> to vector<3x3xf32>
    %264 = vector.extract_strided_slice %263 {offsets = [0, 0], sizes = [3, 1], strides = [1, 1]} : vector<3x3xf32> to vector<3x1xf32>
    %265 = vector.extract_strided_slice %262 {offsets = [0, 0], sizes = [1, 64], strides = [1, 1]} : vector<3x64xf32> to vector<1x64xf32>
    %266 = vector.broadcast %264 : vector<3x1xf32> to vector<3x64xf32>
    %267 = vector.broadcast %265 : vector<1x64xf32> to vector<3x64xf32>
    %268 = arith.mulf %266, %267 : vector<3x64xf32>
    %269 = vector.extract_strided_slice %263 {offsets = [0, 1], sizes = [3, 1], strides = [1, 1]} : vector<3x3xf32> to vector<3x1xf32>
    %270 = vector.extract_strided_slice %262 {offsets = [1, 0], sizes = [1, 64], strides = [1, 1]} : vector<3x64xf32> to vector<1x64xf32>
    %271 = vector.broadcast %269 : vector<3x1xf32> to vector<3x64xf32>
    %272 = vector.broadcast %270 : vector<1x64xf32> to vector<3x64xf32>
    %273 = arith.mulf %271, %272 : vector<3x64xf32>
    %274 = arith.addf %268, %273 : vector<3x64xf32>
    %275 = vector.extract_strided_slice %263 {offsets = [0, 2], sizes = [3, 1], strides = [1, 1]} : vector<3x3xf32> to vector<3x1xf32>
    %276 = vector.extract_strided_slice %262 {offsets = [2, 0], sizes = [1, 64], strides = [1, 1]} : vector<3x64xf32> to vector<1x64xf32>
    %277 = vector.broadcast %275 : vector<3x1xf32> to vector<3x64xf32>
    %278 = vector.broadcast %276 : vector<1x64xf32> to vector<3x64xf32>
    %279 = arith.mulf %277, %278 : vector<3x64xf32>
    %280 = arith.addf %274, %279 : vector<3x64xf32>
    %281 = arith.addf %256, %280 : vector<3x64xf32>
    %282 = vector.extract_strided_slice %14 {offsets = [0, 6], sizes = [3, 1], strides = [1, 1]} : vector<6x10xf32> to vector<3x1xf32>
    %283 = vector.broadcast %282 : vector<3x1xf32> to vector<3x64xf32>
    %284 = arith.mulf %281, %283 : vector<3x64xf32>
    %285 = vector.extract_strided_slice %14 {offsets = [0, 7], sizes = [3, 1], strides = [1, 1]} : vector<6x10xf32> to vector<3x1xf32>
    %286 = vector.broadcast %285 : vector<3x1xf32> to vector<3x64xf32>
    %287 = arith.addf %284, %286 : vector<3x64xf32>
    %cst_25 = arith.constant 0.000000e+00 : f32
    %288 = vector.broadcast %cst_25 : f32 to vector<3x64xf32>
    %289 = arith.maximumf %287, %288 : vector<3x64xf32>
    %290 = vector.extract_strided_slice %15 {offsets = [30, 0], sizes = [6, 3], strides = [1, 1]} : vector<42x4xf32> to vector<6x3xf32>
    %291 = vector.extract_strided_slice %290 {offsets = [0, 0], sizes = [6, 1], strides = [1, 1]} : vector<6x3xf32> to vector<6x1xf32>
    %292 = vector.extract_strided_slice %289 {offsets = [0, 0], sizes = [1, 64], strides = [1, 1]} : vector<3x64xf32> to vector<1x64xf32>
    %293 = vector.broadcast %291 : vector<6x1xf32> to vector<6x64xf32>
    %294 = vector.broadcast %292 : vector<1x64xf32> to vector<6x64xf32>
    %295 = arith.mulf %293, %294 : vector<6x64xf32>
    %296 = vector.extract_strided_slice %290 {offsets = [0, 1], sizes = [6, 1], strides = [1, 1]} : vector<6x3xf32> to vector<6x1xf32>
    %297 = vector.extract_strided_slice %289 {offsets = [1, 0], sizes = [1, 64], strides = [1, 1]} : vector<3x64xf32> to vector<1x64xf32>
    %298 = vector.broadcast %296 : vector<6x1xf32> to vector<6x64xf32>
    %299 = vector.broadcast %297 : vector<1x64xf32> to vector<6x64xf32>
    %300 = arith.mulf %298, %299 : vector<6x64xf32>
    %301 = arith.addf %295, %300 : vector<6x64xf32>
    %302 = vector.extract_strided_slice %290 {offsets = [0, 2], sizes = [6, 1], strides = [1, 1]} : vector<6x3xf32> to vector<6x1xf32>
    %303 = vector.extract_strided_slice %289 {offsets = [2, 0], sizes = [1, 64], strides = [1, 1]} : vector<3x64xf32> to vector<1x64xf32>
    %304 = vector.broadcast %302 : vector<6x1xf32> to vector<6x64xf32>
    %305 = vector.broadcast %303 : vector<1x64xf32> to vector<6x64xf32>
    %306 = arith.mulf %304, %305 : vector<6x64xf32>
    %307 = arith.addf %301, %306 : vector<6x64xf32>
    %308 = vector.extract_strided_slice %14 {offsets = [0, 8], sizes = [6, 1], strides = [1, 1]} : vector<6x10xf32> to vector<6x1xf32>
    %309 = vector.broadcast %308 : vector<6x1xf32> to vector<6x64xf32>
    %310 = arith.addf %307, %309 : vector<6x64xf32>
    %311 = vector.extract_strided_slice %15 {offsets = [36, 0], sizes = [6, 4], strides = [1, 1]} : vector<42x4xf32> to vector<6x4xf32>
    %312 = vector.extract_strided_slice %311 {offsets = [0, 0], sizes = [6, 1], strides = [1, 1]} : vector<6x4xf32> to vector<6x1xf32>
    %313 = vector.extract_strided_slice %13 {offsets = [0, 0], sizes = [1, 64], strides = [1, 1]} : vector<4x64xf32> to vector<1x64xf32>
    %314 = vector.broadcast %312 : vector<6x1xf32> to vector<6x64xf32>
    %315 = vector.broadcast %313 : vector<1x64xf32> to vector<6x64xf32>
    %316 = arith.mulf %314, %315 : vector<6x64xf32>
    %317 = vector.extract_strided_slice %311 {offsets = [0, 1], sizes = [6, 1], strides = [1, 1]} : vector<6x4xf32> to vector<6x1xf32>
    %318 = vector.extract_strided_slice %13 {offsets = [1, 0], sizes = [1, 64], strides = [1, 1]} : vector<4x64xf32> to vector<1x64xf32>
    %319 = vector.broadcast %317 : vector<6x1xf32> to vector<6x64xf32>
    %320 = vector.broadcast %318 : vector<1x64xf32> to vector<6x64xf32>
    %321 = arith.mulf %319, %320 : vector<6x64xf32>
    %322 = arith.addf %316, %321 : vector<6x64xf32>
    %323 = vector.extract_strided_slice %311 {offsets = [0, 2], sizes = [6, 1], strides = [1, 1]} : vector<6x4xf32> to vector<6x1xf32>
    %324 = vector.extract_strided_slice %13 {offsets = [2, 0], sizes = [1, 64], strides = [1, 1]} : vector<4x64xf32> to vector<1x64xf32>
    %325 = vector.broadcast %323 : vector<6x1xf32> to vector<6x64xf32>
    %326 = vector.broadcast %324 : vector<1x64xf32> to vector<6x64xf32>
    %327 = arith.mulf %325, %326 : vector<6x64xf32>
    %328 = arith.addf %322, %327 : vector<6x64xf32>
    %329 = vector.extract_strided_slice %311 {offsets = [0, 3], sizes = [6, 1], strides = [1, 1]} : vector<6x4xf32> to vector<6x1xf32>
    %330 = vector.extract_strided_slice %13 {offsets = [3, 0], sizes = [1, 64], strides = [1, 1]} : vector<4x64xf32> to vector<1x64xf32>
    %331 = vector.broadcast %329 : vector<6x1xf32> to vector<6x64xf32>
    %332 = vector.broadcast %330 : vector<1x64xf32> to vector<6x64xf32>
    %333 = arith.mulf %331, %332 : vector<6x64xf32>
    %334 = arith.addf %328, %333 : vector<6x64xf32>
    %335 = arith.addf %310, %334 : vector<6x64xf32>
    %336 = vector.extract_strided_slice %14 {offsets = [0, 9], sizes = [6, 1], strides = [1, 1]} : vector<6x10xf32> to vector<6x1xf32>
    %337 = vector.broadcast %336 : vector<6x1xf32> to vector<6x64xf32>
    %338 = arith.addf %335, %337 : vector<6x64xf32>
    %c0_26 = arith.constant 0 : index
    %c0_27 = arith.constant 0 : index
    %339 = vector.load %arg2[%c0_26, %c0_27] : memref<9x64xf32, #tpu.memory_space<vmem>>, vector<9x64xf32>
    %cst_28 = arith.constant 0.000000e+00 : f32
    %340 = vector.broadcast %cst_28 : f32 to vector<9x64xf32>
    %341 = arith.cmpf one, %339, %340 : vector<9x64xf32>
    %c0_29 = arith.constant 0 : index
    %c0_30 = arith.constant 0 : index
    %342 = vector.load %arg5[%c0_29, %c0_30] : memref<9x16xf32, #tpu.memory_space<vmem>>, vector<9x16xf32>
    %cst_31 = arith.constant 0.000000e+00 : f32
    %343 = vector.broadcast %cst_31 : f32 to vector<9x16xf32>
    %344 = arith.cmpf one, %342, %343 : vector<9x16xf32>
    %c63_i32_32 = arith.constant 63 : i32
    %345 = tpu.dynamic_rotate %338 by %c63_i32_32 dim 1 : vector<6x64xf32>, i32 -> vector<6x64xf32>
    %346 = arith.maximumf %338, %345 : vector<6x64xf32>
    %c56_i32_33 = arith.constant 56 : i32
    %347 = tpu.dynamic_rotate %346 by %c56_i32_33 dim 1 : vector<6x64xf32>, i32 -> vector<6x64xf32>
    %348 = arith.maximumf %346, %347 : vector<6x64xf32>
    %c0_34 = arith.constant 0 : index
    %c0_35 = arith.constant 0 : index
    %349 = vector.load %arg6[%c0_34, %c0_35] : memref<64x16xf32, #tpu.memory_space<vmem>>, vector<64x16xf32>
    %cst_36 = arith.constant dense<0.000000e+00> : vector<6x16xf32>
    %350 = tpu.matmul %348, %349, %cst_36 {dimension_numbers = #tpu.dot_dimension_numbers<[1], [0], [0], [1], [0, 0, 1, 1], [], []>} : vector<6x64xf32>, vector<64x16xf32>, vector<6x16xf32> -> vector<6x16xf32>
    %c0_37 = arith.constant 0 : index
    %c0_38 = arith.constant 0 : index
    %351 = vector.load %arg16[%c0_37, %c0_38] : memref<8x10xf32, #tpu.memory_space<vmem>>, vector<8x10xf32>
    %c0_39 = arith.constant 0 : index
    %c0_40 = arith.constant 0 : index
    %352 = vector.load %arg17[%c0_39, %c0_40] : memref<56x6xf32, #tpu.memory_space<vmem>>, vector<56x6xf32>
    %353 = vector.extract_strided_slice %351 {offsets = [0, 0], sizes = [6, 1], strides = [1, 1]} : vector<8x10xf32> to vector<6x1xf32>
    %354 = vector.broadcast %353 : vector<6x1xf32> to vector<6x16xf32>
    %355 = arith.mulf %350, %354 : vector<6x16xf32>
    %356 = vector.extract_strided_slice %351 {offsets = [0, 1], sizes = [6, 1], strides = [1, 1]} : vector<8x10xf32> to vector<6x1xf32>
    %357 = vector.broadcast %356 : vector<6x1xf32> to vector<6x16xf32>
    %358 = arith.addf %355, %357 : vector<6x16xf32>
    %cst_41 = arith.constant 0.000000e+00 : f32
    %359 = vector.broadcast %cst_41 : f32 to vector<6x16xf32>
    %360 = arith.maximumf %358, %359 : vector<6x16xf32>
    %361 = vector.extract_strided_slice %352 {offsets = [0, 0], sizes = [4, 6], strides = [1, 1]} : vector<56x6xf32> to vector<4x6xf32>
    %362 = vector.extract_strided_slice %361 {offsets = [0, 0], sizes = [4, 1], strides = [1, 1]} : vector<4x6xf32> to vector<4x1xf32>
    %363 = vector.extract_strided_slice %360 {offsets = [0, 0], sizes = [1, 16], strides = [1, 1]} : vector<6x16xf32> to vector<1x16xf32>
    %364 = vector.broadcast %362 : vector<4x1xf32> to vector<4x16xf32>
    %365 = vector.broadcast %363 : vector<1x16xf32> to vector<4x16xf32>
    %366 = arith.mulf %364, %365 : vector<4x16xf32>
    %367 = vector.extract_strided_slice %361 {offsets = [0, 1], sizes = [4, 1], strides = [1, 1]} : vector<4x6xf32> to vector<4x1xf32>
    %368 = vector.extract_strided_slice %360 {offsets = [1, 0], sizes = [1, 16], strides = [1, 1]} : vector<6x16xf32> to vector<1x16xf32>
    %369 = vector.broadcast %367 : vector<4x1xf32> to vector<4x16xf32>
    %370 = vector.broadcast %368 : vector<1x16xf32> to vector<4x16xf32>
    %371 = arith.mulf %369, %370 : vector<4x16xf32>
    %372 = arith.addf %366, %371 : vector<4x16xf32>
    %373 = vector.extract_strided_slice %361 {offsets = [0, 2], sizes = [4, 1], strides = [1, 1]} : vector<4x6xf32> to vector<4x1xf32>
    %374 = vector.extract_strided_slice %360 {offsets = [2, 0], sizes = [1, 16], strides = [1, 1]} : vector<6x16xf32> to vector<1x16xf32>
    %375 = vector.broadcast %373 : vector<4x1xf32> to vector<4x16xf32>
    %376 = vector.broadcast %374 : vector<1x16xf32> to vector<4x16xf32>
    %377 = arith.mulf %375, %376 : vector<4x16xf32>
    %378 = arith.addf %372, %377 : vector<4x16xf32>
    %379 = vector.extract_strided_slice %361 {offsets = [0, 3], sizes = [4, 1], strides = [1, 1]} : vector<4x6xf32> to vector<4x1xf32>
    %380 = vector.extract_strided_slice %360 {offsets = [3, 0], sizes = [1, 16], strides = [1, 1]} : vector<6x16xf32> to vector<1x16xf32>
    %381 = vector.broadcast %379 : vector<4x1xf32> to vector<4x16xf32>
    %382 = vector.broadcast %380 : vector<1x16xf32> to vector<4x16xf32>
    %383 = arith.mulf %381, %382 : vector<4x16xf32>
    %384 = arith.addf %378, %383 : vector<4x16xf32>
    %385 = vector.extract_strided_slice %361 {offsets = [0, 4], sizes = [4, 1], strides = [1, 1]} : vector<4x6xf32> to vector<4x1xf32>
    %386 = vector.extract_strided_slice %360 {offsets = [4, 0], sizes = [1, 16], strides = [1, 1]} : vector<6x16xf32> to vector<1x16xf32>
    %387 = vector.broadcast %385 : vector<4x1xf32> to vector<4x16xf32>
    %388 = vector.broadcast %386 : vector<1x16xf32> to vector<4x16xf32>
    %389 = arith.mulf %387, %388 : vector<4x16xf32>
    %390 = arith.addf %384, %389 : vector<4x16xf32>
    %391 = vector.extract_strided_slice %361 {offsets = [0, 5], sizes = [4, 1], strides = [1, 1]} : vector<4x6xf32> to vector<4x1xf32>
    %392 = vector.extract_strided_slice %360 {offsets = [5, 0], sizes = [1, 16], strides = [1, 1]} : vector<6x16xf32> to vector<1x16xf32>
    %393 = vector.broadcast %391 : vector<4x1xf32> to vector<4x16xf32>
    %394 = vector.broadcast %392 : vector<1x16xf32> to vector<4x16xf32>
    %395 = arith.mulf %393, %394 : vector<4x16xf32>
    %396 = arith.addf %390, %395 : vector<4x16xf32>
    %397 = vector.extract_strided_slice %351 {offsets = [0, 2], sizes = [4, 1], strides = [1, 1]} : vector<8x10xf32> to vector<4x1xf32>
    %398 = vector.broadcast %397 : vector<4x1xf32> to vector<4x16xf32>
    %399 = arith.addf %396, %398 : vector<4x16xf32>
    %400 = vector.extract_strided_slice %351 {offsets = [0, 3], sizes = [4, 1], strides = [1, 1]} : vector<8x10xf32> to vector<4x1xf32>
    %401 = vector.broadcast %400 : vector<4x1xf32> to vector<4x16xf32>
    %402 = arith.mulf %399, %401 : vector<4x16xf32>
    %403 = vector.extract_strided_slice %351 {offsets = [0, 4], sizes = [4, 1], strides = [1, 1]} : vector<8x10xf32> to vector<4x1xf32>
    %404 = vector.broadcast %403 : vector<4x1xf32> to vector<4x16xf32>
    %405 = arith.addf %402, %404 : vector<4x16xf32>
    %cst_42 = arith.constant 0.000000e+00 : f32
    %406 = vector.broadcast %cst_42 : f32 to vector<4x16xf32>
    %407 = arith.maximumf %405, %406 : vector<4x16xf32>
    %cst_43 = arith.constant 0.000000e+00 : f32
    %408 = vector.broadcast %cst_43 : f32 to vector<4x16xf32>
    %409 = vector.extract_strided_slice %351 {offsets = [0, 5], sizes = [4, 1], strides = [1, 1]} : vector<8x10xf32> to vector<4x1xf32>
    %410 = vector.broadcast %409 : vector<4x1xf32> to vector<4x16xf32>
    %411 = arith.addf %408, %410 : vector<4x16xf32>
    %c5_i32 = arith.constant 5 : i32
    %412 = tpu.dynamic_rotate %407 by %c5_i32 dim 1 : vector<4x16xf32>, i32 -> vector<4x16xf32>
    %413 = vector.extract_strided_slice %344 {offsets = [0, 0], sizes = [1, 16], strides = [1, 1]} : vector<9x16xi1> to vector<1x16xi1>
    %cst_44 = arith.constant 0.000000e+00 : f32
    %414 = vector.shape_cast %413 : vector<1x16xi1> to vector<1x16xi1>
    %415 = vector.broadcast %414 : vector<1x16xi1> to vector<4x16xi1>
    %416 = vector.broadcast %cst_44 : f32 to vector<4x16xf32>
    %417 = arith.select %415, %412, %416 : vector<4x16xi1>, vector<4x16xf32>
    %418 = vector.extract_strided_slice %352 {offsets = [4, 0], sizes = [4, 4], strides = [1, 1]} : vector<56x6xf32> to vector<4x4xf32>
    %419 = vector.extract_strided_slice %418 {offsets = [0, 0], sizes = [4, 1], strides = [1, 1]} : vector<4x4xf32> to vector<4x1xf32>
    %420 = vector.extract_strided_slice %417 {offsets = [0, 0], sizes = [1, 16], strides = [1, 1]} : vector<4x16xf32> to vector<1x16xf32>
    %421 = vector.broadcast %419 : vector<4x1xf32> to vector<4x16xf32>
    %422 = vector.broadcast %420 : vector<1x16xf32> to vector<4x16xf32>
    %423 = arith.mulf %421, %422 : vector<4x16xf32>
    %424 = vector.extract_strided_slice %418 {offsets = [0, 1], sizes = [4, 1], strides = [1, 1]} : vector<4x4xf32> to vector<4x1xf32>
    %425 = vector.extract_strided_slice %417 {offsets = [1, 0], sizes = [1, 16], strides = [1, 1]} : vector<4x16xf32> to vector<1x16xf32>
    %426 = vector.broadcast %424 : vector<4x1xf32> to vector<4x16xf32>
    %427 = vector.broadcast %425 : vector<1x16xf32> to vector<4x16xf32>
    %428 = arith.mulf %426, %427 : vector<4x16xf32>
    %429 = arith.addf %423, %428 : vector<4x16xf32>
    %430 = vector.extract_strided_slice %418 {offsets = [0, 2], sizes = [4, 1], strides = [1, 1]} : vector<4x4xf32> to vector<4x1xf32>
    %431 = vector.extract_strided_slice %417 {offsets = [2, 0], sizes = [1, 16], strides = [1, 1]} : vector<4x16xf32> to vector<1x16xf32>
    %432 = vector.broadcast %430 : vector<4x1xf32> to vector<4x16xf32>
    %433 = vector.broadcast %431 : vector<1x16xf32> to vector<4x16xf32>
    %434 = arith.mulf %432, %433 : vector<4x16xf32>
    %435 = arith.addf %429, %434 : vector<4x16xf32>
    %436 = vector.extract_strided_slice %418 {offsets = [0, 3], sizes = [4, 1], strides = [1, 1]} : vector<4x4xf32> to vector<4x1xf32>
    %437 = vector.extract_strided_slice %417 {offsets = [3, 0], sizes = [1, 16], strides = [1, 1]} : vector<4x16xf32> to vector<1x16xf32>
    %438 = vector.broadcast %436 : vector<4x1xf32> to vector<4x16xf32>
    %439 = vector.broadcast %437 : vector<1x16xf32> to vector<4x16xf32>
    %440 = arith.mulf %438, %439 : vector<4x16xf32>
    %441 = arith.addf %435, %440 : vector<4x16xf32>
    %442 = arith.addf %411, %441 : vector<4x16xf32>
    %c4_i32 = arith.constant 4 : i32
    %443 = tpu.dynamic_rotate %407 by %c4_i32 dim 1 : vector<4x16xf32>, i32 -> vector<4x16xf32>
    %444 = vector.extract_strided_slice %344 {offsets = [1, 0], sizes = [1, 16], strides = [1, 1]} : vector<9x16xi1> to vector<1x16xi1>
    %cst_45 = arith.constant 0.000000e+00 : f32
    %445 = vector.shape_cast %444 : vector<1x16xi1> to vector<1x16xi1>
    %446 = vector.broadcast %445 : vector<1x16xi1> to vector<4x16xi1>
    %447 = vector.broadcast %cst_45 : f32 to vector<4x16xf32>
    %448 = arith.select %446, %443, %447 : vector<4x16xi1>, vector<4x16xf32>
    %449 = vector.extract_strided_slice %352 {offsets = [8, 0], sizes = [4, 4], strides = [1, 1]} : vector<56x6xf32> to vector<4x4xf32>
    %450 = vector.extract_strided_slice %449 {offsets = [0, 0], sizes = [4, 1], strides = [1, 1]} : vector<4x4xf32> to vector<4x1xf32>
    %451 = vector.extract_strided_slice %448 {offsets = [0, 0], sizes = [1, 16], strides = [1, 1]} : vector<4x16xf32> to vector<1x16xf32>
    %452 = vector.broadcast %450 : vector<4x1xf32> to vector<4x16xf32>
    %453 = vector.broadcast %451 : vector<1x16xf32> to vector<4x16xf32>
    %454 = arith.mulf %452, %453 : vector<4x16xf32>
    %455 = vector.extract_strided_slice %449 {offsets = [0, 1], sizes = [4, 1], strides = [1, 1]} : vector<4x4xf32> to vector<4x1xf32>
    %456 = vector.extract_strided_slice %448 {offsets = [1, 0], sizes = [1, 16], strides = [1, 1]} : vector<4x16xf32> to vector<1x16xf32>
    %457 = vector.broadcast %455 : vector<4x1xf32> to vector<4x16xf32>
    %458 = vector.broadcast %456 : vector<1x16xf32> to vector<4x16xf32>
    %459 = arith.mulf %457, %458 : vector<4x16xf32>
    %460 = arith.addf %454, %459 : vector<4x16xf32>
    %461 = vector.extract_strided_slice %449 {offsets = [0, 2], sizes = [4, 1], strides = [1, 1]} : vector<4x4xf32> to vector<4x1xf32>
    %462 = vector.extract_strided_slice %448 {offsets = [2, 0], sizes = [1, 16], strides = [1, 1]} : vector<4x16xf32> to vector<1x16xf32>
    %463 = vector.broadcast %461 : vector<4x1xf32> to vector<4x16xf32>
    %464 = vector.broadcast %462 : vector<1x16xf32> to vector<4x16xf32>
    %465 = arith.mulf %463, %464 : vector<4x16xf32>
    %466 = arith.addf %460, %465 : vector<4x16xf32>
    %467 = vector.extract_strided_slice %449 {offsets = [0, 3], sizes = [4, 1], strides = [1, 1]} : vector<4x4xf32> to vector<4x1xf32>
    %468 = vector.extract_strided_slice %448 {offsets = [3, 0], sizes = [1, 16], strides = [1, 1]} : vector<4x16xf32> to vector<1x16xf32>
    %469 = vector.broadcast %467 : vector<4x1xf32> to vector<4x16xf32>
    %470 = vector.broadcast %468 : vector<1x16xf32> to vector<4x16xf32>
    %471 = arith.mulf %469, %470 : vector<4x16xf32>
    %472 = arith.addf %466, %471 : vector<4x16xf32>
    %473 = arith.addf %442, %472 : vector<4x16xf32>
    %c3_i32 = arith.constant 3 : i32
    %474 = tpu.dynamic_rotate %407 by %c3_i32 dim 1 : vector<4x16xf32>, i32 -> vector<4x16xf32>
    %475 = vector.extract_strided_slice %344 {offsets = [2, 0], sizes = [1, 16], strides = [1, 1]} : vector<9x16xi1> to vector<1x16xi1>
    %cst_46 = arith.constant 0.000000e+00 : f32
    %476 = vector.shape_cast %475 : vector<1x16xi1> to vector<1x16xi1>
    %477 = vector.broadcast %476 : vector<1x16xi1> to vector<4x16xi1>
    %478 = vector.broadcast %cst_46 : f32 to vector<4x16xf32>
    %479 = arith.select %477, %474, %478 : vector<4x16xi1>, vector<4x16xf32>
    %480 = vector.extract_strided_slice %352 {offsets = [12, 0], sizes = [4, 4], strides = [1, 1]} : vector<56x6xf32> to vector<4x4xf32>
    %481 = vector.extract_strided_slice %480 {offsets = [0, 0], sizes = [4, 1], strides = [1, 1]} : vector<4x4xf32> to vector<4x1xf32>
    %482 = vector.extract_strided_slice %479 {offsets = [0, 0], sizes = [1, 16], strides = [1, 1]} : vector<4x16xf32> to vector<1x16xf32>
    %483 = vector.broadcast %481 : vector<4x1xf32> to vector<4x16xf32>
    %484 = vector.broadcast %482 : vector<1x16xf32> to vector<4x16xf32>
    %485 = arith.mulf %483, %484 : vector<4x16xf32>
    %486 = vector.extract_strided_slice %480 {offsets = [0, 1], sizes = [4, 1], strides = [1, 1]} : vector<4x4xf32> to vector<4x1xf32>
    %487 = vector.extract_strided_slice %479 {offsets = [1, 0], sizes = [1, 16], strides = [1, 1]} : vector<4x16xf32> to vector<1x16xf32>
    %488 = vector.broadcast %486 : vector<4x1xf32> to vector<4x16xf32>
    %489 = vector.broadcast %487 : vector<1x16xf32> to vector<4x16xf32>
    %490 = arith.mulf %488, %489 : vector<4x16xf32>
    %491 = arith.addf %485, %490 : vector<4x16xf32>
    %492 = vector.extract_strided_slice %480 {offsets = [0, 2], sizes = [4, 1], strides = [1, 1]} : vector<4x4xf32> to vector<4x1xf32>
    %493 = vector.extract_strided_slice %479 {offsets = [2, 0], sizes = [1, 16], strides = [1, 1]} : vector<4x16xf32> to vector<1x16xf32>
    %494 = vector.broadcast %492 : vector<4x1xf32> to vector<4x16xf32>
    %495 = vector.broadcast %493 : vector<1x16xf32> to vector<4x16xf32>
    %496 = arith.mulf %494, %495 : vector<4x16xf32>
    %497 = arith.addf %491, %496 : vector<4x16xf32>
    %498 = vector.extract_strided_slice %480 {offsets = [0, 3], sizes = [4, 1], strides = [1, 1]} : vector<4x4xf32> to vector<4x1xf32>
    %499 = vector.extract_strided_slice %479 {offsets = [3, 0], sizes = [1, 16], strides = [1, 1]} : vector<4x16xf32> to vector<1x16xf32>
    %500 = vector.broadcast %498 : vector<4x1xf32> to vector<4x16xf32>
    %501 = vector.broadcast %499 : vector<1x16xf32> to vector<4x16xf32>
    %502 = arith.mulf %500, %501 : vector<4x16xf32>
    %503 = arith.addf %497, %502 : vector<4x16xf32>
    %504 = arith.addf %473, %503 : vector<4x16xf32>
    %c1_i32_47 = arith.constant 1 : i32
    %505 = tpu.dynamic_rotate %407 by %c1_i32_47 dim 1 : vector<4x16xf32>, i32 -> vector<4x16xf32>
    %506 = vector.extract_strided_slice %344 {offsets = [3, 0], sizes = [1, 16], strides = [1, 1]} : vector<9x16xi1> to vector<1x16xi1>
    %cst_48 = arith.constant 0.000000e+00 : f32
    %507 = vector.shape_cast %506 : vector<1x16xi1> to vector<1x16xi1>
    %508 = vector.broadcast %507 : vector<1x16xi1> to vector<4x16xi1>
    %509 = vector.broadcast %cst_48 : f32 to vector<4x16xf32>
    %510 = arith.select %508, %505, %509 : vector<4x16xi1>, vector<4x16xf32>
    %511 = vector.extract_strided_slice %352 {offsets = [16, 0], sizes = [4, 4], strides = [1, 1]} : vector<56x6xf32> to vector<4x4xf32>
    %512 = vector.extract_strided_slice %511 {offsets = [0, 0], sizes = [4, 1], strides = [1, 1]} : vector<4x4xf32> to vector<4x1xf32>
    %513 = vector.extract_strided_slice %510 {offsets = [0, 0], sizes = [1, 16], strides = [1, 1]} : vector<4x16xf32> to vector<1x16xf32>
    %514 = vector.broadcast %512 : vector<4x1xf32> to vector<4x16xf32>
    %515 = vector.broadcast %513 : vector<1x16xf32> to vector<4x16xf32>
    %516 = arith.mulf %514, %515 : vector<4x16xf32>
    %517 = vector.extract_strided_slice %511 {offsets = [0, 1], sizes = [4, 1], strides = [1, 1]} : vector<4x4xf32> to vector<4x1xf32>
    %518 = vector.extract_strided_slice %510 {offsets = [1, 0], sizes = [1, 16], strides = [1, 1]} : vector<4x16xf32> to vector<1x16xf32>
    %519 = vector.broadcast %517 : vector<4x1xf32> to vector<4x16xf32>
    %520 = vector.broadcast %518 : vector<1x16xf32> to vector<4x16xf32>
    %521 = arith.mulf %519, %520 : vector<4x16xf32>
    %522 = arith.addf %516, %521 : vector<4x16xf32>
    %523 = vector.extract_strided_slice %511 {offsets = [0, 2], sizes = [4, 1], strides = [1, 1]} : vector<4x4xf32> to vector<4x1xf32>
    %524 = vector.extract_strided_slice %510 {offsets = [2, 0], sizes = [1, 16], strides = [1, 1]} : vector<4x16xf32> to vector<1x16xf32>
    %525 = vector.broadcast %523 : vector<4x1xf32> to vector<4x16xf32>
    %526 = vector.broadcast %524 : vector<1x16xf32> to vector<4x16xf32>
    %527 = arith.mulf %525, %526 : vector<4x16xf32>
    %528 = arith.addf %522, %527 : vector<4x16xf32>
    %529 = vector.extract_strided_slice %511 {offsets = [0, 3], sizes = [4, 1], strides = [1, 1]} : vector<4x4xf32> to vector<4x1xf32>
    %530 = vector.extract_strided_slice %510 {offsets = [3, 0], sizes = [1, 16], strides = [1, 1]} : vector<4x16xf32> to vector<1x16xf32>
    %531 = vector.broadcast %529 : vector<4x1xf32> to vector<4x16xf32>
    %532 = vector.broadcast %530 : vector<1x16xf32> to vector<4x16xf32>
    %533 = arith.mulf %531, %532 : vector<4x16xf32>
    %534 = arith.addf %528, %533 : vector<4x16xf32>
    %535 = arith.addf %504, %534 : vector<4x16xf32>
    %536 = vector.extract_strided_slice %352 {offsets = [20, 0], sizes = [4, 4], strides = [1, 1]} : vector<56x6xf32> to vector<4x4xf32>
    %537 = vector.extract_strided_slice %536 {offsets = [0, 0], sizes = [4, 1], strides = [1, 1]} : vector<4x4xf32> to vector<4x1xf32>
    %538 = vector.extract_strided_slice %407 {offsets = [0, 0], sizes = [1, 16], strides = [1, 1]} : vector<4x16xf32> to vector<1x16xf32>
    %539 = vector.broadcast %537 : vector<4x1xf32> to vector<4x16xf32>
    %540 = vector.broadcast %538 : vector<1x16xf32> to vector<4x16xf32>
    %541 = arith.mulf %539, %540 : vector<4x16xf32>
    %542 = vector.extract_strided_slice %536 {offsets = [0, 1], sizes = [4, 1], strides = [1, 1]} : vector<4x4xf32> to vector<4x1xf32>
    %543 = vector.extract_strided_slice %407 {offsets = [1, 0], sizes = [1, 16], strides = [1, 1]} : vector<4x16xf32> to vector<1x16xf32>
    %544 = vector.broadcast %542 : vector<4x1xf32> to vector<4x16xf32>
    %545 = vector.broadcast %543 : vector<1x16xf32> to vector<4x16xf32>
    %546 = arith.mulf %544, %545 : vector<4x16xf32>
    %547 = arith.addf %541, %546 : vector<4x16xf32>
    %548 = vector.extract_strided_slice %536 {offsets = [0, 2], sizes = [4, 1], strides = [1, 1]} : vector<4x4xf32> to vector<4x1xf32>
    %549 = vector.extract_strided_slice %407 {offsets = [2, 0], sizes = [1, 16], strides = [1, 1]} : vector<4x16xf32> to vector<1x16xf32>
    %550 = vector.broadcast %548 : vector<4x1xf32> to vector<4x16xf32>
    %551 = vector.broadcast %549 : vector<1x16xf32> to vector<4x16xf32>
    %552 = arith.mulf %550, %551 : vector<4x16xf32>
    %553 = arith.addf %547, %552 : vector<4x16xf32>
    %554 = vector.extract_strided_slice %536 {offsets = [0, 3], sizes = [4, 1], strides = [1, 1]} : vector<4x4xf32> to vector<4x1xf32>
    %555 = vector.extract_strided_slice %407 {offsets = [3, 0], sizes = [1, 16], strides = [1, 1]} : vector<4x16xf32> to vector<1x16xf32>
    %556 = vector.broadcast %554 : vector<4x1xf32> to vector<4x16xf32>
    %557 = vector.broadcast %555 : vector<1x16xf32> to vector<4x16xf32>
    %558 = arith.mulf %556, %557 : vector<4x16xf32>
    %559 = arith.addf %553, %558 : vector<4x16xf32>
    %560 = arith.addf %535, %559 : vector<4x16xf32>
    %c15_i32 = arith.constant 15 : i32
    %561 = tpu.dynamic_rotate %407 by %c15_i32 dim 1 : vector<4x16xf32>, i32 -> vector<4x16xf32>
    %562 = vector.extract_strided_slice %344 {offsets = [5, 0], sizes = [1, 16], strides = [1, 1]} : vector<9x16xi1> to vector<1x16xi1>
    %cst_49 = arith.constant 0.000000e+00 : f32
    %563 = vector.shape_cast %562 : vector<1x16xi1> to vector<1x16xi1>
    %564 = vector.broadcast %563 : vector<1x16xi1> to vector<4x16xi1>
    %565 = vector.broadcast %cst_49 : f32 to vector<4x16xf32>
    %566 = arith.select %564, %561, %565 : vector<4x16xi1>, vector<4x16xf32>
    %567 = vector.extract_strided_slice %352 {offsets = [24, 0], sizes = [4, 4], strides = [1, 1]} : vector<56x6xf32> to vector<4x4xf32>
    %568 = vector.extract_strided_slice %567 {offsets = [0, 0], sizes = [4, 1], strides = [1, 1]} : vector<4x4xf32> to vector<4x1xf32>
    %569 = vector.extract_strided_slice %566 {offsets = [0, 0], sizes = [1, 16], strides = [1, 1]} : vector<4x16xf32> to vector<1x16xf32>
    %570 = vector.broadcast %568 : vector<4x1xf32> to vector<4x16xf32>
    %571 = vector.broadcast %569 : vector<1x16xf32> to vector<4x16xf32>
    %572 = arith.mulf %570, %571 : vector<4x16xf32>
    %573 = vector.extract_strided_slice %567 {offsets = [0, 1], sizes = [4, 1], strides = [1, 1]} : vector<4x4xf32> to vector<4x1xf32>
    %574 = vector.extract_strided_slice %566 {offsets = [1, 0], sizes = [1, 16], strides = [1, 1]} : vector<4x16xf32> to vector<1x16xf32>
    %575 = vector.broadcast %573 : vector<4x1xf32> to vector<4x16xf32>
    %576 = vector.broadcast %574 : vector<1x16xf32> to vector<4x16xf32>
    %577 = arith.mulf %575, %576 : vector<4x16xf32>
    %578 = arith.addf %572, %577 : vector<4x16xf32>
    %579 = vector.extract_strided_slice %567 {offsets = [0, 2], sizes = [4, 1], strides = [1, 1]} : vector<4x4xf32> to vector<4x1xf32>
    %580 = vector.extract_strided_slice %566 {offsets = [2, 0], sizes = [1, 16], strides = [1, 1]} : vector<4x16xf32> to vector<1x16xf32>
    %581 = vector.broadcast %579 : vector<4x1xf32> to vector<4x16xf32>
    %582 = vector.broadcast %580 : vector<1x16xf32> to vector<4x16xf32>
    %583 = arith.mulf %581, %582 : vector<4x16xf32>
    %584 = arith.addf %578, %583 : vector<4x16xf32>
    %585 = vector.extract_strided_slice %567 {offsets = [0, 3], sizes = [4, 1], strides = [1, 1]} : vector<4x4xf32> to vector<4x1xf32>
    %586 = vector.extract_strided_slice %566 {offsets = [3, 0], sizes = [1, 16], strides = [1, 1]} : vector<4x16xf32> to vector<1x16xf32>
    %587 = vector.broadcast %585 : vector<4x1xf32> to vector<4x16xf32>
    %588 = vector.broadcast %586 : vector<1x16xf32> to vector<4x16xf32>
    %589 = arith.mulf %587, %588 : vector<4x16xf32>
    %590 = arith.addf %584, %589 : vector<4x16xf32>
    %591 = arith.addf %560, %590 : vector<4x16xf32>
    %c13_i32 = arith.constant 13 : i32
    %592 = tpu.dynamic_rotate %407 by %c13_i32 dim 1 : vector<4x16xf32>, i32 -> vector<4x16xf32>
    %593 = vector.extract_strided_slice %344 {offsets = [6, 0], sizes = [1, 16], strides = [1, 1]} : vector<9x16xi1> to vector<1x16xi1>
    %cst_50 = arith.constant 0.000000e+00 : f32
    %594 = vector.shape_cast %593 : vector<1x16xi1> to vector<1x16xi1>
    %595 = vector.broadcast %594 : vector<1x16xi1> to vector<4x16xi1>
    %596 = vector.broadcast %cst_50 : f32 to vector<4x16xf32>
    %597 = arith.select %595, %592, %596 : vector<4x16xi1>, vector<4x16xf32>
    %598 = vector.extract_strided_slice %352 {offsets = [28, 0], sizes = [4, 4], strides = [1, 1]} : vector<56x6xf32> to vector<4x4xf32>
    %599 = vector.extract_strided_slice %598 {offsets = [0, 0], sizes = [4, 1], strides = [1, 1]} : vector<4x4xf32> to vector<4x1xf32>
    %600 = vector.extract_strided_slice %597 {offsets = [0, 0], sizes = [1, 16], strides = [1, 1]} : vector<4x16xf32> to vector<1x16xf32>
    %601 = vector.broadcast %599 : vector<4x1xf32> to vector<4x16xf32>
    %602 = vector.broadcast %600 : vector<1x16xf32> to vector<4x16xf32>
    %603 = arith.mulf %601, %602 : vector<4x16xf32>
    %604 = vector.extract_strided_slice %598 {offsets = [0, 1], sizes = [4, 1], strides = [1, 1]} : vector<4x4xf32> to vector<4x1xf32>
    %605 = vector.extract_strided_slice %597 {offsets = [1, 0], sizes = [1, 16], strides = [1, 1]} : vector<4x16xf32> to vector<1x16xf32>
    %606 = vector.broadcast %604 : vector<4x1xf32> to vector<4x16xf32>
    %607 = vector.broadcast %605 : vector<1x16xf32> to vector<4x16xf32>
    %608 = arith.mulf %606, %607 : vector<4x16xf32>
    %609 = arith.addf %603, %608 : vector<4x16xf32>
    %610 = vector.extract_strided_slice %598 {offsets = [0, 2], sizes = [4, 1], strides = [1, 1]} : vector<4x4xf32> to vector<4x1xf32>
    %611 = vector.extract_strided_slice %597 {offsets = [2, 0], sizes = [1, 16], strides = [1, 1]} : vector<4x16xf32> to vector<1x16xf32>
    %612 = vector.broadcast %610 : vector<4x1xf32> to vector<4x16xf32>
    %613 = vector.broadcast %611 : vector<1x16xf32> to vector<4x16xf32>
    %614 = arith.mulf %612, %613 : vector<4x16xf32>
    %615 = arith.addf %609, %614 : vector<4x16xf32>
    %616 = vector.extract_strided_slice %598 {offsets = [0, 3], sizes = [4, 1], strides = [1, 1]} : vector<4x4xf32> to vector<4x1xf32>
    %617 = vector.extract_strided_slice %597 {offsets = [3, 0], sizes = [1, 16], strides = [1, 1]} : vector<4x16xf32> to vector<1x16xf32>
    %618 = vector.broadcast %616 : vector<4x1xf32> to vector<4x16xf32>
    %619 = vector.broadcast %617 : vector<1x16xf32> to vector<4x16xf32>
    %620 = arith.mulf %618, %619 : vector<4x16xf32>
    %621 = arith.addf %615, %620 : vector<4x16xf32>
    %622 = arith.addf %591, %621 : vector<4x16xf32>
    %c12_i32 = arith.constant 12 : i32
    %623 = tpu.dynamic_rotate %407 by %c12_i32 dim 1 : vector<4x16xf32>, i32 -> vector<4x16xf32>
    %624 = vector.extract_strided_slice %344 {offsets = [7, 0], sizes = [1, 16], strides = [1, 1]} : vector<9x16xi1> to vector<1x16xi1>
    %cst_51 = arith.constant 0.000000e+00 : f32
    %625 = vector.shape_cast %624 : vector<1x16xi1> to vector<1x16xi1>
    %626 = vector.broadcast %625 : vector<1x16xi1> to vector<4x16xi1>
    %627 = vector.broadcast %cst_51 : f32 to vector<4x16xf32>
    %628 = arith.select %626, %623, %627 : vector<4x16xi1>, vector<4x16xf32>
    %629 = vector.extract_strided_slice %352 {offsets = [32, 0], sizes = [4, 4], strides = [1, 1]} : vector<56x6xf32> to vector<4x4xf32>
    %630 = vector.extract_strided_slice %629 {offsets = [0, 0], sizes = [4, 1], strides = [1, 1]} : vector<4x4xf32> to vector<4x1xf32>
    %631 = vector.extract_strided_slice %628 {offsets = [0, 0], sizes = [1, 16], strides = [1, 1]} : vector<4x16xf32> to vector<1x16xf32>
    %632 = vector.broadcast %630 : vector<4x1xf32> to vector<4x16xf32>
    %633 = vector.broadcast %631 : vector<1x16xf32> to vector<4x16xf32>
    %634 = arith.mulf %632, %633 : vector<4x16xf32>
    %635 = vector.extract_strided_slice %629 {offsets = [0, 1], sizes = [4, 1], strides = [1, 1]} : vector<4x4xf32> to vector<4x1xf32>
    %636 = vector.extract_strided_slice %628 {offsets = [1, 0], sizes = [1, 16], strides = [1, 1]} : vector<4x16xf32> to vector<1x16xf32>
    %637 = vector.broadcast %635 : vector<4x1xf32> to vector<4x16xf32>
    %638 = vector.broadcast %636 : vector<1x16xf32> to vector<4x16xf32>
    %639 = arith.mulf %637, %638 : vector<4x16xf32>
    %640 = arith.addf %634, %639 : vector<4x16xf32>
    %641 = vector.extract_strided_slice %629 {offsets = [0, 2], sizes = [4, 1], strides = [1, 1]} : vector<4x4xf32> to vector<4x1xf32>
    %642 = vector.extract_strided_slice %628 {offsets = [2, 0], sizes = [1, 16], strides = [1, 1]} : vector<4x16xf32> to vector<1x16xf32>
    %643 = vector.broadcast %641 : vector<4x1xf32> to vector<4x16xf32>
    %644 = vector.broadcast %642 : vector<1x16xf32> to vector<4x16xf32>
    %645 = arith.mulf %643, %644 : vector<4x16xf32>
    %646 = arith.addf %640, %645 : vector<4x16xf32>
    %647 = vector.extract_strided_slice %629 {offsets = [0, 3], sizes = [4, 1], strides = [1, 1]} : vector<4x4xf32> to vector<4x1xf32>
    %648 = vector.extract_strided_slice %628 {offsets = [3, 0], sizes = [1, 16], strides = [1, 1]} : vector<4x16xf32> to vector<1x16xf32>
    %649 = vector.broadcast %647 : vector<4x1xf32> to vector<4x16xf32>
    %650 = vector.broadcast %648 : vector<1x16xf32> to vector<4x16xf32>
    %651 = arith.mulf %649, %650 : vector<4x16xf32>
    %652 = arith.addf %646, %651 : vector<4x16xf32>
    %653 = arith.addf %622, %652 : vector<4x16xf32>
    %c11_i32 = arith.constant 11 : i32
    %654 = tpu.dynamic_rotate %407 by %c11_i32 dim 1 : vector<4x16xf32>, i32 -> vector<4x16xf32>
    %655 = vector.extract_strided_slice %344 {offsets = [8, 0], sizes = [1, 16], strides = [1, 1]} : vector<9x16xi1> to vector<1x16xi1>
    %cst_52 = arith.constant 0.000000e+00 : f32
    %656 = vector.shape_cast %655 : vector<1x16xi1> to vector<1x16xi1>
    %657 = vector.broadcast %656 : vector<1x16xi1> to vector<4x16xi1>
    %658 = vector.broadcast %cst_52 : f32 to vector<4x16xf32>
    %659 = arith.select %657, %654, %658 : vector<4x16xi1>, vector<4x16xf32>
    %660 = vector.extract_strided_slice %352 {offsets = [36, 0], sizes = [4, 4], strides = [1, 1]} : vector<56x6xf32> to vector<4x4xf32>
    %661 = vector.extract_strided_slice %660 {offsets = [0, 0], sizes = [4, 1], strides = [1, 1]} : vector<4x4xf32> to vector<4x1xf32>
    %662 = vector.extract_strided_slice %659 {offsets = [0, 0], sizes = [1, 16], strides = [1, 1]} : vector<4x16xf32> to vector<1x16xf32>
    %663 = vector.broadcast %661 : vector<4x1xf32> to vector<4x16xf32>
    %664 = vector.broadcast %662 : vector<1x16xf32> to vector<4x16xf32>
    %665 = arith.mulf %663, %664 : vector<4x16xf32>
    %666 = vector.extract_strided_slice %660 {offsets = [0, 1], sizes = [4, 1], strides = [1, 1]} : vector<4x4xf32> to vector<4x1xf32>
    %667 = vector.extract_strided_slice %659 {offsets = [1, 0], sizes = [1, 16], strides = [1, 1]} : vector<4x16xf32> to vector<1x16xf32>
    %668 = vector.broadcast %666 : vector<4x1xf32> to vector<4x16xf32>
    %669 = vector.broadcast %667 : vector<1x16xf32> to vector<4x16xf32>
    %670 = arith.mulf %668, %669 : vector<4x16xf32>
    %671 = arith.addf %665, %670 : vector<4x16xf32>
    %672 = vector.extract_strided_slice %660 {offsets = [0, 2], sizes = [4, 1], strides = [1, 1]} : vector<4x4xf32> to vector<4x1xf32>
    %673 = vector.extract_strided_slice %659 {offsets = [2, 0], sizes = [1, 16], strides = [1, 1]} : vector<4x16xf32> to vector<1x16xf32>
    %674 = vector.broadcast %672 : vector<4x1xf32> to vector<4x16xf32>
    %675 = vector.broadcast %673 : vector<1x16xf32> to vector<4x16xf32>
    %676 = arith.mulf %674, %675 : vector<4x16xf32>
    %677 = arith.addf %671, %676 : vector<4x16xf32>
    %678 = vector.extract_strided_slice %660 {offsets = [0, 3], sizes = [4, 1], strides = [1, 1]} : vector<4x4xf32> to vector<4x1xf32>
    %679 = vector.extract_strided_slice %659 {offsets = [3, 0], sizes = [1, 16], strides = [1, 1]} : vector<4x16xf32> to vector<1x16xf32>
    %680 = vector.broadcast %678 : vector<4x1xf32> to vector<4x16xf32>
    %681 = vector.broadcast %679 : vector<1x16xf32> to vector<4x16xf32>
    %682 = arith.mulf %680, %681 : vector<4x16xf32>
    %683 = arith.addf %677, %682 : vector<4x16xf32>
    %684 = arith.addf %653, %683 : vector<4x16xf32>
    %685 = vector.extract_strided_slice %351 {offsets = [0, 6], sizes = [4, 1], strides = [1, 1]} : vector<8x10xf32> to vector<4x1xf32>
    %686 = vector.broadcast %685 : vector<4x1xf32> to vector<4x16xf32>
    %687 = arith.mulf %684, %686 : vector<4x16xf32>
    %688 = vector.extract_strided_slice %351 {offsets = [0, 7], sizes = [4, 1], strides = [1, 1]} : vector<8x10xf32> to vector<4x1xf32>
    %689 = vector.broadcast %688 : vector<4x1xf32> to vector<4x16xf32>
    %690 = arith.addf %687, %689 : vector<4x16xf32>
    %cst_53 = arith.constant 0.000000e+00 : f32
    %691 = vector.broadcast %cst_53 : f32 to vector<4x16xf32>
    %692 = arith.maximumf %690, %691 : vector<4x16xf32>
    %693 = vector.extract_strided_slice %352 {offsets = [40, 0], sizes = [8, 4], strides = [1, 1]} : vector<56x6xf32> to vector<8x4xf32>
    %694 = vector.extract_strided_slice %693 {offsets = [0, 0], sizes = [8, 1], strides = [1, 1]} : vector<8x4xf32> to vector<8x1xf32>
    %695 = vector.extract_strided_slice %692 {offsets = [0, 0], sizes = [1, 16], strides = [1, 1]} : vector<4x16xf32> to vector<1x16xf32>
    %696 = vector.broadcast %694 : vector<8x1xf32> to vector<8x16xf32>
    %697 = vector.broadcast %695 : vector<1x16xf32> to vector<8x16xf32>
    %698 = arith.mulf %696, %697 : vector<8x16xf32>
    %699 = vector.extract_strided_slice %693 {offsets = [0, 1], sizes = [8, 1], strides = [1, 1]} : vector<8x4xf32> to vector<8x1xf32>
    %700 = vector.extract_strided_slice %692 {offsets = [1, 0], sizes = [1, 16], strides = [1, 1]} : vector<4x16xf32> to vector<1x16xf32>
    %701 = vector.broadcast %699 : vector<8x1xf32> to vector<8x16xf32>
    %702 = vector.broadcast %700 : vector<1x16xf32> to vector<8x16xf32>
    %703 = arith.mulf %701, %702 : vector<8x16xf32>
    %704 = arith.addf %698, %703 : vector<8x16xf32>
    %705 = vector.extract_strided_slice %693 {offsets = [0, 2], sizes = [8, 1], strides = [1, 1]} : vector<8x4xf32> to vector<8x1xf32>
    %706 = vector.extract_strided_slice %692 {offsets = [2, 0], sizes = [1, 16], strides = [1, 1]} : vector<4x16xf32> to vector<1x16xf32>
    %707 = vector.broadcast %705 : vector<8x1xf32> to vector<8x16xf32>
    %708 = vector.broadcast %706 : vector<1x16xf32> to vector<8x16xf32>
    %709 = arith.mulf %707, %708 : vector<8x16xf32>
    %710 = arith.addf %704, %709 : vector<8x16xf32>
    %711 = vector.extract_strided_slice %693 {offsets = [0, 3], sizes = [8, 1], strides = [1, 1]} : vector<8x4xf32> to vector<8x1xf32>
    %712 = vector.extract_strided_slice %692 {offsets = [3, 0], sizes = [1, 16], strides = [1, 1]} : vector<4x16xf32> to vector<1x16xf32>
    %713 = vector.broadcast %711 : vector<8x1xf32> to vector<8x16xf32>
    %714 = vector.broadcast %712 : vector<1x16xf32> to vector<8x16xf32>
    %715 = arith.mulf %713, %714 : vector<8x16xf32>
    %716 = arith.addf %710, %715 : vector<8x16xf32>
    %717 = vector.extract_strided_slice %351 {offsets = [0, 8], sizes = [8, 1], strides = [1, 1]} : vector<8x10xf32> to vector<8x1xf32>
    %718 = vector.broadcast %717 : vector<8x1xf32> to vector<8x16xf32>
    %719 = arith.addf %716, %718 : vector<8x16xf32>
    %720 = vector.extract_strided_slice %352 {offsets = [48, 0], sizes = [8, 6], strides = [1, 1]} : vector<56x6xf32> to vector<8x6xf32>
    %721 = vector.extract_strided_slice %720 {offsets = [0, 0], sizes = [8, 1], strides = [1, 1]} : vector<8x6xf32> to vector<8x1xf32>
    %722 = vector.extract_strided_slice %350 {offsets = [0, 0], sizes = [1, 16], strides = [1, 1]} : vector<6x16xf32> to vector<1x16xf32>
    %723 = vector.broadcast %721 : vector<8x1xf32> to vector<8x16xf32>
    %724 = vector.broadcast %722 : vector<1x16xf32> to vector<8x16xf32>
    %725 = arith.mulf %723, %724 : vector<8x16xf32>
    %726 = vector.extract_strided_slice %720 {offsets = [0, 1], sizes = [8, 1], strides = [1, 1]} : vector<8x6xf32> to vector<8x1xf32>
    %727 = vector.extract_strided_slice %350 {offsets = [1, 0], sizes = [1, 16], strides = [1, 1]} : vector<6x16xf32> to vector<1x16xf32>
    %728 = vector.broadcast %726 : vector<8x1xf32> to vector<8x16xf32>
    %729 = vector.broadcast %727 : vector<1x16xf32> to vector<8x16xf32>
    %730 = arith.mulf %728, %729 : vector<8x16xf32>
    %731 = arith.addf %725, %730 : vector<8x16xf32>
    %732 = vector.extract_strided_slice %720 {offsets = [0, 2], sizes = [8, 1], strides = [1, 1]} : vector<8x6xf32> to vector<8x1xf32>
    %733 = vector.extract_strided_slice %350 {offsets = [2, 0], sizes = [1, 16], strides = [1, 1]} : vector<6x16xf32> to vector<1x16xf32>
    %734 = vector.broadcast %732 : vector<8x1xf32> to vector<8x16xf32>
    %735 = vector.broadcast %733 : vector<1x16xf32> to vector<8x16xf32>
    %736 = arith.mulf %734, %735 : vector<8x16xf32>
    %737 = arith.addf %731, %736 : vector<8x16xf32>
    %738 = vector.extract_strided_slice %720 {offsets = [0, 3], sizes = [8, 1], strides = [1, 1]} : vector<8x6xf32> to vector<8x1xf32>
    %739 = vector.extract_strided_slice %350 {offsets = [3, 0], sizes = [1, 16], strides = [1, 1]} : vector<6x16xf32> to vector<1x16xf32>
    %740 = vector.broadcast %738 : vector<8x1xf32> to vector<8x16xf32>
    %741 = vector.broadcast %739 : vector<1x16xf32> to vector<8x16xf32>
    %742 = arith.mulf %740, %741 : vector<8x16xf32>
    %743 = arith.addf %737, %742 : vector<8x16xf32>
    %744 = vector.extract_strided_slice %720 {offsets = [0, 4], sizes = [8, 1], strides = [1, 1]} : vector<8x6xf32> to vector<8x1xf32>
    %745 = vector.extract_strided_slice %350 {offsets = [4, 0], sizes = [1, 16], strides = [1, 1]} : vector<6x16xf32> to vector<1x16xf32>
    %746 = vector.broadcast %744 : vector<8x1xf32> to vector<8x16xf32>
    %747 = vector.broadcast %745 : vector<1x16xf32> to vector<8x16xf32>
    %748 = arith.mulf %746, %747 : vector<8x16xf32>
    %749 = arith.addf %743, %748 : vector<8x16xf32>
    %750 = vector.extract_strided_slice %720 {offsets = [0, 5], sizes = [8, 1], strides = [1, 1]} : vector<8x6xf32> to vector<8x1xf32>
    %751 = vector.extract_strided_slice %350 {offsets = [5, 0], sizes = [1, 16], strides = [1, 1]} : vector<6x16xf32> to vector<1x16xf32>
    %752 = vector.broadcast %750 : vector<8x1xf32> to vector<8x16xf32>
    %753 = vector.broadcast %751 : vector<1x16xf32> to vector<8x16xf32>
    %754 = arith.mulf %752, %753 : vector<8x16xf32>
    %755 = arith.addf %749, %754 : vector<8x16xf32>
    %756 = arith.addf %719, %755 : vector<8x16xf32>
    %757 = vector.extract_strided_slice %351 {offsets = [0, 9], sizes = [8, 1], strides = [1, 1]} : vector<8x10xf32> to vector<8x1xf32>
    %758 = vector.broadcast %757 : vector<8x1xf32> to vector<8x16xf32>
    %759 = arith.addf %756, %758 : vector<8x16xf32>
    %c0_54 = arith.constant 0 : index
    %c0_55 = arith.constant 0 : index
    %760 = vector.load %arg20[%c0_54, %c0_55] : memref<8x10xf32, #tpu.memory_space<vmem>>, vector<8x10xf32>
    %c0_56 = arith.constant 0 : index
    %c0_57 = arith.constant 0 : index
    %761 = vector.load %arg21[%c0_56, %c0_57] : memref<48x8xf32, #tpu.memory_space<vmem>>, vector<48x8xf32>
    %762 = vector.extract_strided_slice %760 {offsets = [0, 0], sizes = [8, 1], strides = [1, 1]} : vector<8x10xf32> to vector<8x1xf32>
    %763 = vector.broadcast %762 : vector<8x1xf32> to vector<8x16xf32>
    %764 = arith.mulf %759, %763 : vector<8x16xf32>
    %765 = vector.extract_strided_slice %760 {offsets = [0, 1], sizes = [8, 1], strides = [1, 1]} : vector<8x10xf32> to vector<8x1xf32>
    %766 = vector.broadcast %765 : vector<8x1xf32> to vector<8x16xf32>
    %767 = arith.addf %764, %766 : vector<8x16xf32>
    %cst_58 = arith.constant 0.000000e+00 : f32
    %768 = vector.broadcast %cst_58 : f32 to vector<8x16xf32>
    %769 = arith.maximumf %767, %768 : vector<8x16xf32>
    %770 = vector.extract_strided_slice %761 {offsets = [0, 0], sizes = [4, 8], strides = [1, 1]} : vector<48x8xf32> to vector<4x8xf32>
    %771 = vector.extract_strided_slice %770 {offsets = [0, 0], sizes = [4, 1], strides = [1, 1]} : vector<4x8xf32> to vector<4x1xf32>
    %772 = vector.extract_strided_slice %769 {offsets = [0, 0], sizes = [1, 16], strides = [1, 1]} : vector<8x16xf32> to vector<1x16xf32>
    %773 = vector.broadcast %771 : vector<4x1xf32> to vector<4x16xf32>
    %774 = vector.broadcast %772 : vector<1x16xf32> to vector<4x16xf32>
    %775 = arith.mulf %773, %774 : vector<4x16xf32>
    %776 = vector.extract_strided_slice %770 {offsets = [0, 1], sizes = [4, 1], strides = [1, 1]} : vector<4x8xf32> to vector<4x1xf32>
    %777 = vector.extract_strided_slice %769 {offsets = [1, 0], sizes = [1, 16], strides = [1, 1]} : vector<8x16xf32> to vector<1x16xf32>
    %778 = vector.broadcast %776 : vector<4x1xf32> to vector<4x16xf32>
    %779 = vector.broadcast %777 : vector<1x16xf32> to vector<4x16xf32>
    %780 = arith.mulf %778, %779 : vector<4x16xf32>
    %781 = arith.addf %775, %780 : vector<4x16xf32>
    %782 = vector.extract_strided_slice %770 {offsets = [0, 2], sizes = [4, 1], strides = [1, 1]} : vector<4x8xf32> to vector<4x1xf32>
    %783 = vector.extract_strided_slice %769 {offsets = [2, 0], sizes = [1, 16], strides = [1, 1]} : vector<8x16xf32> to vector<1x16xf32>
    %784 = vector.broadcast %782 : vector<4x1xf32> to vector<4x16xf32>
    %785 = vector.broadcast %783 : vector<1x16xf32> to vector<4x16xf32>
    %786 = arith.mulf %784, %785 : vector<4x16xf32>
    %787 = arith.addf %781, %786 : vector<4x16xf32>
    %788 = vector.extract_strided_slice %770 {offsets = [0, 3], sizes = [4, 1], strides = [1, 1]} : vector<4x8xf32> to vector<4x1xf32>
    %789 = vector.extract_strided_slice %769 {offsets = [3, 0], sizes = [1, 16], strides = [1, 1]} : vector<8x16xf32> to vector<1x16xf32>
    %790 = vector.broadcast %788 : vector<4x1xf32> to vector<4x16xf32>
    %791 = vector.broadcast %789 : vector<1x16xf32> to vector<4x16xf32>
    %792 = arith.mulf %790, %791 : vector<4x16xf32>
    %793 = arith.addf %787, %792 : vector<4x16xf32>
    %794 = vector.extract_strided_slice %770 {offsets = [0, 4], sizes = [4, 1], strides = [1, 1]} : vector<4x8xf32> to vector<4x1xf32>
    %795 = vector.extract_strided_slice %769 {offsets = [4, 0], sizes = [1, 16], strides = [1, 1]} : vector<8x16xf32> to vector<1x16xf32>
    %796 = vector.broadcast %794 : vector<4x1xf32> to vector<4x16xf32>
    %797 = vector.broadcast %795 : vector<1x16xf32> to vector<4x16xf32>
    %798 = arith.mulf %796, %797 : vector<4x16xf32>
    %799 = arith.addf %793, %798 : vector<4x16xf32>
    %800 = vector.extract_strided_slice %770 {offsets = [0, 5], sizes = [4, 1], strides = [1, 1]} : vector<4x8xf32> to vector<4x1xf32>
    %801 = vector.extract_strided_slice %769 {offsets = [5, 0], sizes = [1, 16], strides = [1, 1]} : vector<8x16xf32> to vector<1x16xf32>
    %802 = vector.broadcast %800 : vector<4x1xf32> to vector<4x16xf32>
    %803 = vector.broadcast %801 : vector<1x16xf32> to vector<4x16xf32>
    %804 = arith.mulf %802, %803 : vector<4x16xf32>
    %805 = arith.addf %799, %804 : vector<4x16xf32>
    %806 = vector.extract_strided_slice %770 {offsets = [0, 6], sizes = [4, 1], strides = [1, 1]} : vector<4x8xf32> to vector<4x1xf32>
    %807 = vector.extract_strided_slice %769 {offsets = [6, 0], sizes = [1, 16], strides = [1, 1]} : vector<8x16xf32> to vector<1x16xf32>
    %808 = vector.broadcast %806 : vector<4x1xf32> to vector<4x16xf32>
    %809 = vector.broadcast %807 : vector<1x16xf32> to vector<4x16xf32>
    %810 = arith.mulf %808, %809 : vector<4x16xf32>
    %811 = arith.addf %805, %810 : vector<4x16xf32>
    %812 = vector.extract_strided_slice %770 {offsets = [0, 7], sizes = [4, 1], strides = [1, 1]} : vector<4x8xf32> to vector<4x1xf32>
    %813 = vector.extract_strided_slice %769 {offsets = [7, 0], sizes = [1, 16], strides = [1, 1]} : vector<8x16xf32> to vector<1x16xf32>
    %814 = vector.broadcast %812 : vector<4x1xf32> to vector<4x16xf32>
    %815 = vector.broadcast %813 : vector<1x16xf32> to vector<4x16xf32>
    %816 = arith.mulf %814, %815 : vector<4x16xf32>
    %817 = arith.addf %811, %816 : vector<4x16xf32>
    %818 = vector.extract_strided_slice %760 {offsets = [0, 2], sizes = [4, 1], strides = [1, 1]} : vector<8x10xf32> to vector<4x1xf32>
    %819 = vector.broadcast %818 : vector<4x1xf32> to vector<4x16xf32>
    %820 = arith.addf %817, %819 : vector<4x16xf32>
    %821 = vector.extract_strided_slice %760 {offsets = [0, 3], sizes = [4, 1], strides = [1, 1]} : vector<8x10xf32> to vector<4x1xf32>
    %822 = vector.broadcast %821 : vector<4x1xf32> to vector<4x16xf32>
    %823 = arith.mulf %820, %822 : vector<4x16xf32>
    %824 = vector.extract_strided_slice %760 {offsets = [0, 4], sizes = [4, 1], strides = [1, 1]} : vector<8x10xf32> to vector<4x1xf32>
    %825 = vector.broadcast %824 : vector<4x1xf32> to vector<4x16xf32>
    %826 = arith.addf %823, %825 : vector<4x16xf32>
    %cst_59 = arith.constant 0.000000e+00 : f32
    %827 = vector.broadcast %cst_59 : f32 to vector<4x16xf32>
    %828 = arith.maximumf %826, %827 : vector<4x16xf32>
    %cst_60 = arith.constant 0.000000e+00 : f32
    %829 = vector.broadcast %cst_60 : f32 to vector<4x16xf32>
    %830 = vector.extract_strided_slice %760 {offsets = [0, 5], sizes = [4, 1], strides = [1, 1]} : vector<8x10xf32> to vector<4x1xf32>
    %831 = vector.broadcast %830 : vector<4x1xf32> to vector<4x16xf32>
    %832 = arith.addf %829, %831 : vector<4x16xf32>
    %c5_i32_61 = arith.constant 5 : i32
    %833 = tpu.dynamic_rotate %828 by %c5_i32_61 dim 1 : vector<4x16xf32>, i32 -> vector<4x16xf32>
    %834 = vector.extract_strided_slice %344 {offsets = [0, 0], sizes = [1, 16], strides = [1, 1]} : vector<9x16xi1> to vector<1x16xi1>
    %cst_62 = arith.constant 0.000000e+00 : f32
    %835 = vector.shape_cast %834 : vector<1x16xi1> to vector<1x16xi1>
    %836 = vector.broadcast %835 : vector<1x16xi1> to vector<4x16xi1>
    %837 = vector.broadcast %cst_62 : f32 to vector<4x16xf32>
    %838 = arith.select %836, %833, %837 : vector<4x16xi1>, vector<4x16xf32>
    %839 = vector.extract_strided_slice %761 {offsets = [4, 0], sizes = [4, 4], strides = [1, 1]} : vector<48x8xf32> to vector<4x4xf32>
    %840 = vector.extract_strided_slice %839 {offsets = [0, 0], sizes = [4, 1], strides = [1, 1]} : vector<4x4xf32> to vector<4x1xf32>
    %841 = vector.extract_strided_slice %838 {offsets = [0, 0], sizes = [1, 16], strides = [1, 1]} : vector<4x16xf32> to vector<1x16xf32>
    %842 = vector.broadcast %840 : vector<4x1xf32> to vector<4x16xf32>
    %843 = vector.broadcast %841 : vector<1x16xf32> to vector<4x16xf32>
    %844 = arith.mulf %842, %843 : vector<4x16xf32>
    %845 = vector.extract_strided_slice %839 {offsets = [0, 1], sizes = [4, 1], strides = [1, 1]} : vector<4x4xf32> to vector<4x1xf32>
    %846 = vector.extract_strided_slice %838 {offsets = [1, 0], sizes = [1, 16], strides = [1, 1]} : vector<4x16xf32> to vector<1x16xf32>
    %847 = vector.broadcast %845 : vector<4x1xf32> to vector<4x16xf32>
    %848 = vector.broadcast %846 : vector<1x16xf32> to vector<4x16xf32>
    %849 = arith.mulf %847, %848 : vector<4x16xf32>
    %850 = arith.addf %844, %849 : vector<4x16xf32>
    %851 = vector.extract_strided_slice %839 {offsets = [0, 2], sizes = [4, 1], strides = [1, 1]} : vector<4x4xf32> to vector<4x1xf32>
    %852 = vector.extract_strided_slice %838 {offsets = [2, 0], sizes = [1, 16], strides = [1, 1]} : vector<4x16xf32> to vector<1x16xf32>
    %853 = vector.broadcast %851 : vector<4x1xf32> to vector<4x16xf32>
    %854 = vector.broadcast %852 : vector<1x16xf32> to vector<4x16xf32>
    %855 = arith.mulf %853, %854 : vector<4x16xf32>
    %856 = arith.addf %850, %855 : vector<4x16xf32>
    %857 = vector.extract_strided_slice %839 {offsets = [0, 3], sizes = [4, 1], strides = [1, 1]} : vector<4x4xf32> to vector<4x1xf32>
    %858 = vector.extract_strided_slice %838 {offsets = [3, 0], sizes = [1, 16], strides = [1, 1]} : vector<4x16xf32> to vector<1x16xf32>
    %859 = vector.broadcast %857 : vector<4x1xf32> to vector<4x16xf32>
    %860 = vector.broadcast %858 : vector<1x16xf32> to vector<4x16xf32>
    %861 = arith.mulf %859, %860 : vector<4x16xf32>
    %862 = arith.addf %856, %861 : vector<4x16xf32>
    %863 = arith.addf %832, %862 : vector<4x16xf32>
    %c4_i32_63 = arith.constant 4 : i32
    %864 = tpu.dynamic_rotate %828 by %c4_i32_63 dim 1 : vector<4x16xf32>, i32 -> vector<4x16xf32>
    %865 = vector.extract_strided_slice %344 {offsets = [1, 0], sizes = [1, 16], strides = [1, 1]} : vector<9x16xi1> to vector<1x16xi1>
    %cst_64 = arith.constant 0.000000e+00 : f32
    %866 = vector.shape_cast %865 : vector<1x16xi1> to vector<1x16xi1>
    %867 = vector.broadcast %866 : vector<1x16xi1> to vector<4x16xi1>
    %868 = vector.broadcast %cst_64 : f32 to vector<4x16xf32>
    %869 = arith.select %867, %864, %868 : vector<4x16xi1>, vector<4x16xf32>
    %870 = vector.extract_strided_slice %761 {offsets = [8, 0], sizes = [4, 4], strides = [1, 1]} : vector<48x8xf32> to vector<4x4xf32>
    %871 = vector.extract_strided_slice %870 {offsets = [0, 0], sizes = [4, 1], strides = [1, 1]} : vector<4x4xf32> to vector<4x1xf32>
    %872 = vector.extract_strided_slice %869 {offsets = [0, 0], sizes = [1, 16], strides = [1, 1]} : vector<4x16xf32> to vector<1x16xf32>
    %873 = vector.broadcast %871 : vector<4x1xf32> to vector<4x16xf32>
    %874 = vector.broadcast %872 : vector<1x16xf32> to vector<4x16xf32>
    %875 = arith.mulf %873, %874 : vector<4x16xf32>
    %876 = vector.extract_strided_slice %870 {offsets = [0, 1], sizes = [4, 1], strides = [1, 1]} : vector<4x4xf32> to vector<4x1xf32>
    %877 = vector.extract_strided_slice %869 {offsets = [1, 0], sizes = [1, 16], strides = [1, 1]} : vector<4x16xf32> to vector<1x16xf32>
    %878 = vector.broadcast %876 : vector<4x1xf32> to vector<4x16xf32>
    %879 = vector.broadcast %877 : vector<1x16xf32> to vector<4x16xf32>
    %880 = arith.mulf %878, %879 : vector<4x16xf32>
    %881 = arith.addf %875, %880 : vector<4x16xf32>
    %882 = vector.extract_strided_slice %870 {offsets = [0, 2], sizes = [4, 1], strides = [1, 1]} : vector<4x4xf32> to vector<4x1xf32>
    %883 = vector.extract_strided_slice %869 {offsets = [2, 0], sizes = [1, 16], strides = [1, 1]} : vector<4x16xf32> to vector<1x16xf32>
    %884 = vector.broadcast %882 : vector<4x1xf32> to vector<4x16xf32>
    %885 = vector.broadcast %883 : vector<1x16xf32> to vector<4x16xf32>
    %886 = arith.mulf %884, %885 : vector<4x16xf32>
    %887 = arith.addf %881, %886 : vector<4x16xf32>
    %888 = vector.extract_strided_slice %870 {offsets = [0, 3], sizes = [4, 1], strides = [1, 1]} : vector<4x4xf32> to vector<4x1xf32>
    %889 = vector.extract_strided_slice %869 {offsets = [3, 0], sizes = [1, 16], strides = [1, 1]} : vector<4x16xf32> to vector<1x16xf32>
    %890 = vector.broadcast %888 : vector<4x1xf32> to vector<4x16xf32>
    %891 = vector.broadcast %889 : vector<1x16xf32> to vector<4x16xf32>
    %892 = arith.mulf %890, %891 : vector<4x16xf32>
    %893 = arith.addf %887, %892 : vector<4x16xf32>
    %894 = arith.addf %863, %893 : vector<4x16xf32>
    %c3_i32_65 = arith.constant 3 : i32
    %895 = tpu.dynamic_rotate %828 by %c3_i32_65 dim 1 : vector<4x16xf32>, i32 -> vector<4x16xf32>
    %896 = vector.extract_strided_slice %344 {offsets = [2, 0], sizes = [1, 16], strides = [1, 1]} : vector<9x16xi1> to vector<1x16xi1>
    %cst_66 = arith.constant 0.000000e+00 : f32
    %897 = vector.shape_cast %896 : vector<1x16xi1> to vector<1x16xi1>
    %898 = vector.broadcast %897 : vector<1x16xi1> to vector<4x16xi1>
    %899 = vector.broadcast %cst_66 : f32 to vector<4x16xf32>
    %900 = arith.select %898, %895, %899 : vector<4x16xi1>, vector<4x16xf32>
    %901 = vector.extract_strided_slice %761 {offsets = [12, 0], sizes = [4, 4], strides = [1, 1]} : vector<48x8xf32> to vector<4x4xf32>
    %902 = vector.extract_strided_slice %901 {offsets = [0, 0], sizes = [4, 1], strides = [1, 1]} : vector<4x4xf32> to vector<4x1xf32>
    %903 = vector.extract_strided_slice %900 {offsets = [0, 0], sizes = [1, 16], strides = [1, 1]} : vector<4x16xf32> to vector<1x16xf32>
    %904 = vector.broadcast %902 : vector<4x1xf32> to vector<4x16xf32>
    %905 = vector.broadcast %903 : vector<1x16xf32> to vector<4x16xf32>
    %906 = arith.mulf %904, %905 : vector<4x16xf32>
    %907 = vector.extract_strided_slice %901 {offsets = [0, 1], sizes = [4, 1], strides = [1, 1]} : vector<4x4xf32> to vector<4x1xf32>
    %908 = vector.extract_strided_slice %900 {offsets = [1, 0], sizes = [1, 16], strides = [1, 1]} : vector<4x16xf32> to vector<1x16xf32>
    %909 = vector.broadcast %907 : vector<4x1xf32> to vector<4x16xf32>
    %910 = vector.broadcast %908 : vector<1x16xf32> to vector<4x16xf32>
    %911 = arith.mulf %909, %910 : vector<4x16xf32>
    %912 = arith.addf %906, %911 : vector<4x16xf32>
    %913 = vector.extract_strided_slice %901 {offsets = [0, 2], sizes = [4, 1], strides = [1, 1]} : vector<4x4xf32> to vector<4x1xf32>
    %914 = vector.extract_strided_slice %900 {offsets = [2, 0], sizes = [1, 16], strides = [1, 1]} : vector<4x16xf32> to vector<1x16xf32>
    %915 = vector.broadcast %913 : vector<4x1xf32> to vector<4x16xf32>
    %916 = vector.broadcast %914 : vector<1x16xf32> to vector<4x16xf32>
    %917 = arith.mulf %915, %916 : vector<4x16xf32>
    %918 = arith.addf %912, %917 : vector<4x16xf32>
    %919 = vector.extract_strided_slice %901 {offsets = [0, 3], sizes = [4, 1], strides = [1, 1]} : vector<4x4xf32> to vector<4x1xf32>
    %920 = vector.extract_strided_slice %900 {offsets = [3, 0], sizes = [1, 16], strides = [1, 1]} : vector<4x16xf32> to vector<1x16xf32>
    %921 = vector.broadcast %919 : vector<4x1xf32> to vector<4x16xf32>
    %922 = vector.broadcast %920 : vector<1x16xf32> to vector<4x16xf32>
    %923 = arith.mulf %921, %922 : vector<4x16xf32>
    %924 = arith.addf %918, %923 : vector<4x16xf32>
    %925 = arith.addf %894, %924 : vector<4x16xf32>
    %c1_i32_67 = arith.constant 1 : i32
    %926 = tpu.dynamic_rotate %828 by %c1_i32_67 dim 1 : vector<4x16xf32>, i32 -> vector<4x16xf32>
    %927 = vector.extract_strided_slice %344 {offsets = [3, 0], sizes = [1, 16], strides = [1, 1]} : vector<9x16xi1> to vector<1x16xi1>
    %cst_68 = arith.constant 0.000000e+00 : f32
    %928 = vector.shape_cast %927 : vector<1x16xi1> to vector<1x16xi1>
    %929 = vector.broadcast %928 : vector<1x16xi1> to vector<4x16xi1>
    %930 = vector.broadcast %cst_68 : f32 to vector<4x16xf32>
    %931 = arith.select %929, %926, %930 : vector<4x16xi1>, vector<4x16xf32>
    %932 = vector.extract_strided_slice %761 {offsets = [16, 0], sizes = [4, 4], strides = [1, 1]} : vector<48x8xf32> to vector<4x4xf32>
    %933 = vector.extract_strided_slice %932 {offsets = [0, 0], sizes = [4, 1], strides = [1, 1]} : vector<4x4xf32> to vector<4x1xf32>
    %934 = vector.extract_strided_slice %931 {offsets = [0, 0], sizes = [1, 16], strides = [1, 1]} : vector<4x16xf32> to vector<1x16xf32>
    %935 = vector.broadcast %933 : vector<4x1xf32> to vector<4x16xf32>
    %936 = vector.broadcast %934 : vector<1x16xf32> to vector<4x16xf32>
    %937 = arith.mulf %935, %936 : vector<4x16xf32>
    %938 = vector.extract_strided_slice %932 {offsets = [0, 1], sizes = [4, 1], strides = [1, 1]} : vector<4x4xf32> to vector<4x1xf32>
    %939 = vector.extract_strided_slice %931 {offsets = [1, 0], sizes = [1, 16], strides = [1, 1]} : vector<4x16xf32> to vector<1x16xf32>
    %940 = vector.broadcast %938 : vector<4x1xf32> to vector<4x16xf32>
    %941 = vector.broadcast %939 : vector<1x16xf32> to vector<4x16xf32>
    %942 = arith.mulf %940, %941 : vector<4x16xf32>
    %943 = arith.addf %937, %942 : vector<4x16xf32>
    %944 = vector.extract_strided_slice %932 {offsets = [0, 2], sizes = [4, 1], strides = [1, 1]} : vector<4x4xf32> to vector<4x1xf32>
    %945 = vector.extract_strided_slice %931 {offsets = [2, 0], sizes = [1, 16], strides = [1, 1]} : vector<4x16xf32> to vector<1x16xf32>
    %946 = vector.broadcast %944 : vector<4x1xf32> to vector<4x16xf32>
    %947 = vector.broadcast %945 : vector<1x16xf32> to vector<4x16xf32>
    %948 = arith.mulf %946, %947 : vector<4x16xf32>
    %949 = arith.addf %943, %948 : vector<4x16xf32>
    %950 = vector.extract_strided_slice %932 {offsets = [0, 3], sizes = [4, 1], strides = [1, 1]} : vector<4x4xf32> to vector<4x1xf32>
    %951 = vector.extract_strided_slice %931 {offsets = [3, 0], sizes = [1, 16], strides = [1, 1]} : vector<4x16xf32> to vector<1x16xf32>
    %952 = vector.broadcast %950 : vector<4x1xf32> to vector<4x16xf32>
    %953 = vector.broadcast %951 : vector<1x16xf32> to vector<4x16xf32>
    %954 = arith.mulf %952, %953 : vector<4x16xf32>
    %955 = arith.addf %949, %954 : vector<4x16xf32>
    %956 = arith.addf %925, %955 : vector<4x16xf32>
    %957 = vector.extract_strided_slice %761 {offsets = [20, 0], sizes = [4, 4], strides = [1, 1]} : vector<48x8xf32> to vector<4x4xf32>
    %958 = vector.extract_strided_slice %957 {offsets = [0, 0], sizes = [4, 1], strides = [1, 1]} : vector<4x4xf32> to vector<4x1xf32>
    %959 = vector.extract_strided_slice %828 {offsets = [0, 0], sizes = [1, 16], strides = [1, 1]} : vector<4x16xf32> to vector<1x16xf32>
    %960 = vector.broadcast %958 : vector<4x1xf32> to vector<4x16xf32>
    %961 = vector.broadcast %959 : vector<1x16xf32> to vector<4x16xf32>
    %962 = arith.mulf %960, %961 : vector<4x16xf32>
    %963 = vector.extract_strided_slice %957 {offsets = [0, 1], sizes = [4, 1], strides = [1, 1]} : vector<4x4xf32> to vector<4x1xf32>
    %964 = vector.extract_strided_slice %828 {offsets = [1, 0], sizes = [1, 16], strides = [1, 1]} : vector<4x16xf32> to vector<1x16xf32>
    %965 = vector.broadcast %963 : vector<4x1xf32> to vector<4x16xf32>
    %966 = vector.broadcast %964 : vector<1x16xf32> to vector<4x16xf32>
    %967 = arith.mulf %965, %966 : vector<4x16xf32>
    %968 = arith.addf %962, %967 : vector<4x16xf32>
    %969 = vector.extract_strided_slice %957 {offsets = [0, 2], sizes = [4, 1], strides = [1, 1]} : vector<4x4xf32> to vector<4x1xf32>
    %970 = vector.extract_strided_slice %828 {offsets = [2, 0], sizes = [1, 16], strides = [1, 1]} : vector<4x16xf32> to vector<1x16xf32>
    %971 = vector.broadcast %969 : vector<4x1xf32> to vector<4x16xf32>
    %972 = vector.broadcast %970 : vector<1x16xf32> to vector<4x16xf32>
    %973 = arith.mulf %971, %972 : vector<4x16xf32>
    %974 = arith.addf %968, %973 : vector<4x16xf32>
    %975 = vector.extract_strided_slice %957 {offsets = [0, 3], sizes = [4, 1], strides = [1, 1]} : vector<4x4xf32> to vector<4x1xf32>
    %976 = vector.extract_strided_slice %828 {offsets = [3, 0], sizes = [1, 16], strides = [1, 1]} : vector<4x16xf32> to vector<1x16xf32>
    %977 = vector.broadcast %975 : vector<4x1xf32> to vector<4x16xf32>
    %978 = vector.broadcast %976 : vector<1x16xf32> to vector<4x16xf32>
    %979 = arith.mulf %977, %978 : vector<4x16xf32>
    %980 = arith.addf %974, %979 : vector<4x16xf32>
    %981 = arith.addf %956, %980 : vector<4x16xf32>
    %c15_i32_69 = arith.constant 15 : i32
    %982 = tpu.dynamic_rotate %828 by %c15_i32_69 dim 1 : vector<4x16xf32>, i32 -> vector<4x16xf32>
    %983 = vector.extract_strided_slice %344 {offsets = [5, 0], sizes = [1, 16], strides = [1, 1]} : vector<9x16xi1> to vector<1x16xi1>
    %cst_70 = arith.constant 0.000000e+00 : f32
    %984 = vector.shape_cast %983 : vector<1x16xi1> to vector<1x16xi1>
    %985 = vector.broadcast %984 : vector<1x16xi1> to vector<4x16xi1>
    %986 = vector.broadcast %cst_70 : f32 to vector<4x16xf32>
    %987 = arith.select %985, %982, %986 : vector<4x16xi1>, vector<4x16xf32>
    %988 = vector.extract_strided_slice %761 {offsets = [24, 0], sizes = [4, 4], strides = [1, 1]} : vector<48x8xf32> to vector<4x4xf32>
    %989 = vector.extract_strided_slice %988 {offsets = [0, 0], sizes = [4, 1], strides = [1, 1]} : vector<4x4xf32> to vector<4x1xf32>
    %990 = vector.extract_strided_slice %987 {offsets = [0, 0], sizes = [1, 16], strides = [1, 1]} : vector<4x16xf32> to vector<1x16xf32>
    %991 = vector.broadcast %989 : vector<4x1xf32> to vector<4x16xf32>
    %992 = vector.broadcast %990 : vector<1x16xf32> to vector<4x16xf32>
    %993 = arith.mulf %991, %992 : vector<4x16xf32>
    %994 = vector.extract_strided_slice %988 {offsets = [0, 1], sizes = [4, 1], strides = [1, 1]} : vector<4x4xf32> to vector<4x1xf32>
    %995 = vector.extract_strided_slice %987 {offsets = [1, 0], sizes = [1, 16], strides = [1, 1]} : vector<4x16xf32> to vector<1x16xf32>
    %996 = vector.broadcast %994 : vector<4x1xf32> to vector<4x16xf32>
    %997 = vector.broadcast %995 : vector<1x16xf32> to vector<4x16xf32>
    %998 = arith.mulf %996, %997 : vector<4x16xf32>
    %999 = arith.addf %993, %998 : vector<4x16xf32>
    %1000 = vector.extract_strided_slice %988 {offsets = [0, 2], sizes = [4, 1], strides = [1, 1]} : vector<4x4xf32> to vector<4x1xf32>
    %1001 = vector.extract_strided_slice %987 {offsets = [2, 0], sizes = [1, 16], strides = [1, 1]} : vector<4x16xf32> to vector<1x16xf32>
    %1002 = vector.broadcast %1000 : vector<4x1xf32> to vector<4x16xf32>
    %1003 = vector.broadcast %1001 : vector<1x16xf32> to vector<4x16xf32>
    %1004 = arith.mulf %1002, %1003 : vector<4x16xf32>
    %1005 = arith.addf %999, %1004 : vector<4x16xf32>
    %1006 = vector.extract_strided_slice %988 {offsets = [0, 3], sizes = [4, 1], strides = [1, 1]} : vector<4x4xf32> to vector<4x1xf32>
    %1007 = vector.extract_strided_slice %987 {offsets = [3, 0], sizes = [1, 16], strides = [1, 1]} : vector<4x16xf32> to vector<1x16xf32>
    %1008 = vector.broadcast %1006 : vector<4x1xf32> to vector<4x16xf32>
    %1009 = vector.broadcast %1007 : vector<1x16xf32> to vector<4x16xf32>
    %1010 = arith.mulf %1008, %1009 : vector<4x16xf32>
    %1011 = arith.addf %1005, %1010 : vector<4x16xf32>
    %1012 = arith.addf %981, %1011 : vector<4x16xf32>
    %c13_i32_71 = arith.constant 13 : i32
    %1013 = tpu.dynamic_rotate %828 by %c13_i32_71 dim 1 : vector<4x16xf32>, i32 -> vector<4x16xf32>
    %1014 = vector.extract_strided_slice %344 {offsets = [6, 0], sizes = [1, 16], strides = [1, 1]} : vector<9x16xi1> to vector<1x16xi1>
    %cst_72 = arith.constant 0.000000e+00 : f32
    %1015 = vector.shape_cast %1014 : vector<1x16xi1> to vector<1x16xi1>
    %1016 = vector.broadcast %1015 : vector<1x16xi1> to vector<4x16xi1>
    %1017 = vector.broadcast %cst_72 : f32 to vector<4x16xf32>
    %1018 = arith.select %1016, %1013, %1017 : vector<4x16xi1>, vector<4x16xf32>
    %1019 = vector.extract_strided_slice %761 {offsets = [28, 0], sizes = [4, 4], strides = [1, 1]} : vector<48x8xf32> to vector<4x4xf32>
    %1020 = vector.extract_strided_slice %1019 {offsets = [0, 0], sizes = [4, 1], strides = [1, 1]} : vector<4x4xf32> to vector<4x1xf32>
    %1021 = vector.extract_strided_slice %1018 {offsets = [0, 0], sizes = [1, 16], strides = [1, 1]} : vector<4x16xf32> to vector<1x16xf32>
    %1022 = vector.broadcast %1020 : vector<4x1xf32> to vector<4x16xf32>
    %1023 = vector.broadcast %1021 : vector<1x16xf32> to vector<4x16xf32>
    %1024 = arith.mulf %1022, %1023 : vector<4x16xf32>
    %1025 = vector.extract_strided_slice %1019 {offsets = [0, 1], sizes = [4, 1], strides = [1, 1]} : vector<4x4xf32> to vector<4x1xf32>
    %1026 = vector.extract_strided_slice %1018 {offsets = [1, 0], sizes = [1, 16], strides = [1, 1]} : vector<4x16xf32> to vector<1x16xf32>
    %1027 = vector.broadcast %1025 : vector<4x1xf32> to vector<4x16xf32>
    %1028 = vector.broadcast %1026 : vector<1x16xf32> to vector<4x16xf32>
    %1029 = arith.mulf %1027, %1028 : vector<4x16xf32>
    %1030 = arith.addf %1024, %1029 : vector<4x16xf32>
    %1031 = vector.extract_strided_slice %1019 {offsets = [0, 2], sizes = [4, 1], strides = [1, 1]} : vector<4x4xf32> to vector<4x1xf32>
    %1032 = vector.extract_strided_slice %1018 {offsets = [2, 0], sizes = [1, 16], strides = [1, 1]} : vector<4x16xf32> to vector<1x16xf32>
    %1033 = vector.broadcast %1031 : vector<4x1xf32> to vector<4x16xf32>
    %1034 = vector.broadcast %1032 : vector<1x16xf32> to vector<4x16xf32>
    %1035 = arith.mulf %1033, %1034 : vector<4x16xf32>
    %1036 = arith.addf %1030, %1035 : vector<4x16xf32>
    %1037 = vector.extract_strided_slice %1019 {offsets = [0, 3], sizes = [4, 1], strides = [1, 1]} : vector<4x4xf32> to vector<4x1xf32>
    %1038 = vector.extract_strided_slice %1018 {offsets = [3, 0], sizes = [1, 16], strides = [1, 1]} : vector<4x16xf32> to vector<1x16xf32>
    %1039 = vector.broadcast %1037 : vector<4x1xf32> to vector<4x16xf32>
    %1040 = vector.broadcast %1038 : vector<1x16xf32> to vector<4x16xf32>
    %1041 = arith.mulf %1039, %1040 : vector<4x16xf32>
    %1042 = arith.addf %1036, %1041 : vector<4x16xf32>
    %1043 = arith.addf %1012, %1042 : vector<4x16xf32>
    %c12_i32_73 = arith.constant 12 : i32
    %1044 = tpu.dynamic_rotate %828 by %c12_i32_73 dim 1 : vector<4x16xf32>, i32 -> vector<4x16xf32>
    %1045 = vector.extract_strided_slice %344 {offsets = [7, 0], sizes = [1, 16], strides = [1, 1]} : vector<9x16xi1> to vector<1x16xi1>
    %cst_74 = arith.constant 0.000000e+00 : f32
    %1046 = vector.shape_cast %1045 : vector<1x16xi1> to vector<1x16xi1>
    %1047 = vector.broadcast %1046 : vector<1x16xi1> to vector<4x16xi1>
    %1048 = vector.broadcast %cst_74 : f32 to vector<4x16xf32>
    %1049 = arith.select %1047, %1044, %1048 : vector<4x16xi1>, vector<4x16xf32>
    %1050 = vector.extract_strided_slice %761 {offsets = [32, 0], sizes = [4, 4], strides = [1, 1]} : vector<48x8xf32> to vector<4x4xf32>
    %1051 = vector.extract_strided_slice %1050 {offsets = [0, 0], sizes = [4, 1], strides = [1, 1]} : vector<4x4xf32> to vector<4x1xf32>
    %1052 = vector.extract_strided_slice %1049 {offsets = [0, 0], sizes = [1, 16], strides = [1, 1]} : vector<4x16xf32> to vector<1x16xf32>
    %1053 = vector.broadcast %1051 : vector<4x1xf32> to vector<4x16xf32>
    %1054 = vector.broadcast %1052 : vector<1x16xf32> to vector<4x16xf32>
    %1055 = arith.mulf %1053, %1054 : vector<4x16xf32>
    %1056 = vector.extract_strided_slice %1050 {offsets = [0, 1], sizes = [4, 1], strides = [1, 1]} : vector<4x4xf32> to vector<4x1xf32>
    %1057 = vector.extract_strided_slice %1049 {offsets = [1, 0], sizes = [1, 16], strides = [1, 1]} : vector<4x16xf32> to vector<1x16xf32>
    %1058 = vector.broadcast %1056 : vector<4x1xf32> to vector<4x16xf32>
    %1059 = vector.broadcast %1057 : vector<1x16xf32> to vector<4x16xf32>
    %1060 = arith.mulf %1058, %1059 : vector<4x16xf32>
    %1061 = arith.addf %1055, %1060 : vector<4x16xf32>
    %1062 = vector.extract_strided_slice %1050 {offsets = [0, 2], sizes = [4, 1], strides = [1, 1]} : vector<4x4xf32> to vector<4x1xf32>
    %1063 = vector.extract_strided_slice %1049 {offsets = [2, 0], sizes = [1, 16], strides = [1, 1]} : vector<4x16xf32> to vector<1x16xf32>
    %1064 = vector.broadcast %1062 : vector<4x1xf32> to vector<4x16xf32>
    %1065 = vector.broadcast %1063 : vector<1x16xf32> to vector<4x16xf32>
    %1066 = arith.mulf %1064, %1065 : vector<4x16xf32>
    %1067 = arith.addf %1061, %1066 : vector<4x16xf32>
    %1068 = vector.extract_strided_slice %1050 {offsets = [0, 3], sizes = [4, 1], strides = [1, 1]} : vector<4x4xf32> to vector<4x1xf32>
    %1069 = vector.extract_strided_slice %1049 {offsets = [3, 0], sizes = [1, 16], strides = [1, 1]} : vector<4x16xf32> to vector<1x16xf32>
    %1070 = vector.broadcast %1068 : vector<4x1xf32> to vector<4x16xf32>
    %1071 = vector.broadcast %1069 : vector<1x16xf32> to vector<4x16xf32>
    %1072 = arith.mulf %1070, %1071 : vector<4x16xf32>
    %1073 = arith.addf %1067, %1072 : vector<4x16xf32>
    %1074 = arith.addf %1043, %1073 : vector<4x16xf32>
    %c11_i32_75 = arith.constant 11 : i32
    %1075 = tpu.dynamic_rotate %828 by %c11_i32_75 dim 1 : vector<4x16xf32>, i32 -> vector<4x16xf32>
    %1076 = vector.extract_strided_slice %344 {offsets = [8, 0], sizes = [1, 16], strides = [1, 1]} : vector<9x16xi1> to vector<1x16xi1>
    %cst_76 = arith.constant 0.000000e+00 : f32
    %1077 = vector.shape_cast %1076 : vector<1x16xi1> to vector<1x16xi1>
    %1078 = vector.broadcast %1077 : vector<1x16xi1> to vector<4x16xi1>
    %1079 = vector.broadcast %cst_76 : f32 to vector<4x16xf32>
    %1080 = arith.select %1078, %1075, %1079 : vector<4x16xi1>, vector<4x16xf32>
    %1081 = vector.extract_strided_slice %761 {offsets = [36, 0], sizes = [4, 4], strides = [1, 1]} : vector<48x8xf32> to vector<4x4xf32>
    %1082 = vector.extract_strided_slice %1081 {offsets = [0, 0], sizes = [4, 1], strides = [1, 1]} : vector<4x4xf32> to vector<4x1xf32>
    %1083 = vector.extract_strided_slice %1080 {offsets = [0, 0], sizes = [1, 16], strides = [1, 1]} : vector<4x16xf32> to vector<1x16xf32>
    %1084 = vector.broadcast %1082 : vector<4x1xf32> to vector<4x16xf32>
    %1085 = vector.broadcast %1083 : vector<1x16xf32> to vector<4x16xf32>
    %1086 = arith.mulf %1084, %1085 : vector<4x16xf32>
    %1087 = vector.extract_strided_slice %1081 {offsets = [0, 1], sizes = [4, 1], strides = [1, 1]} : vector<4x4xf32> to vector<4x1xf32>
    %1088 = vector.extract_strided_slice %1080 {offsets = [1, 0], sizes = [1, 16], strides = [1, 1]} : vector<4x16xf32> to vector<1x16xf32>
    %1089 = vector.broadcast %1087 : vector<4x1xf32> to vector<4x16xf32>
    %1090 = vector.broadcast %1088 : vector<1x16xf32> to vector<4x16xf32>
    %1091 = arith.mulf %1089, %1090 : vector<4x16xf32>
    %1092 = arith.addf %1086, %1091 : vector<4x16xf32>
    %1093 = vector.extract_strided_slice %1081 {offsets = [0, 2], sizes = [4, 1], strides = [1, 1]} : vector<4x4xf32> to vector<4x1xf32>
    %1094 = vector.extract_strided_slice %1080 {offsets = [2, 0], sizes = [1, 16], strides = [1, 1]} : vector<4x16xf32> to vector<1x16xf32>
    %1095 = vector.broadcast %1093 : vector<4x1xf32> to vector<4x16xf32>
    %1096 = vector.broadcast %1094 : vector<1x16xf32> to vector<4x16xf32>
    %1097 = arith.mulf %1095, %1096 : vector<4x16xf32>
    %1098 = arith.addf %1092, %1097 : vector<4x16xf32>
    %1099 = vector.extract_strided_slice %1081 {offsets = [0, 3], sizes = [4, 1], strides = [1, 1]} : vector<4x4xf32> to vector<4x1xf32>
    %1100 = vector.extract_strided_slice %1080 {offsets = [3, 0], sizes = [1, 16], strides = [1, 1]} : vector<4x16xf32> to vector<1x16xf32>
    %1101 = vector.broadcast %1099 : vector<4x1xf32> to vector<4x16xf32>
    %1102 = vector.broadcast %1100 : vector<1x16xf32> to vector<4x16xf32>
    %1103 = arith.mulf %1101, %1102 : vector<4x16xf32>
    %1104 = arith.addf %1098, %1103 : vector<4x16xf32>
    %1105 = arith.addf %1074, %1104 : vector<4x16xf32>
    %1106 = vector.extract_strided_slice %760 {offsets = [0, 6], sizes = [4, 1], strides = [1, 1]} : vector<8x10xf32> to vector<4x1xf32>
    %1107 = vector.broadcast %1106 : vector<4x1xf32> to vector<4x16xf32>
    %1108 = arith.mulf %1105, %1107 : vector<4x16xf32>
    %1109 = vector.extract_strided_slice %760 {offsets = [0, 7], sizes = [4, 1], strides = [1, 1]} : vector<8x10xf32> to vector<4x1xf32>
    %1110 = vector.broadcast %1109 : vector<4x1xf32> to vector<4x16xf32>
    %1111 = arith.addf %1108, %1110 : vector<4x16xf32>
    %cst_77 = arith.constant 0.000000e+00 : f32
    %1112 = vector.broadcast %cst_77 : f32 to vector<4x16xf32>
    %1113 = arith.maximumf %1111, %1112 : vector<4x16xf32>
    %1114 = vector.extract_strided_slice %761 {offsets = [40, 0], sizes = [8, 4], strides = [1, 1]} : vector<48x8xf32> to vector<8x4xf32>
    %1115 = vector.extract_strided_slice %1114 {offsets = [0, 0], sizes = [8, 1], strides = [1, 1]} : vector<8x4xf32> to vector<8x1xf32>
    %1116 = vector.extract_strided_slice %1113 {offsets = [0, 0], sizes = [1, 16], strides = [1, 1]} : vector<4x16xf32> to vector<1x16xf32>
    %1117 = vector.broadcast %1115 : vector<8x1xf32> to vector<8x16xf32>
    %1118 = vector.broadcast %1116 : vector<1x16xf32> to vector<8x16xf32>
    %1119 = arith.mulf %1117, %1118 : vector<8x16xf32>
    %1120 = vector.extract_strided_slice %1114 {offsets = [0, 1], sizes = [8, 1], strides = [1, 1]} : vector<8x4xf32> to vector<8x1xf32>
    %1121 = vector.extract_strided_slice %1113 {offsets = [1, 0], sizes = [1, 16], strides = [1, 1]} : vector<4x16xf32> to vector<1x16xf32>
    %1122 = vector.broadcast %1120 : vector<8x1xf32> to vector<8x16xf32>
    %1123 = vector.broadcast %1121 : vector<1x16xf32> to vector<8x16xf32>
    %1124 = arith.mulf %1122, %1123 : vector<8x16xf32>
    %1125 = arith.addf %1119, %1124 : vector<8x16xf32>
    %1126 = vector.extract_strided_slice %1114 {offsets = [0, 2], sizes = [8, 1], strides = [1, 1]} : vector<8x4xf32> to vector<8x1xf32>
    %1127 = vector.extract_strided_slice %1113 {offsets = [2, 0], sizes = [1, 16], strides = [1, 1]} : vector<4x16xf32> to vector<1x16xf32>
    %1128 = vector.broadcast %1126 : vector<8x1xf32> to vector<8x16xf32>
    %1129 = vector.broadcast %1127 : vector<1x16xf32> to vector<8x16xf32>
    %1130 = arith.mulf %1128, %1129 : vector<8x16xf32>
    %1131 = arith.addf %1125, %1130 : vector<8x16xf32>
    %1132 = vector.extract_strided_slice %1114 {offsets = [0, 3], sizes = [8, 1], strides = [1, 1]} : vector<8x4xf32> to vector<8x1xf32>
    %1133 = vector.extract_strided_slice %1113 {offsets = [3, 0], sizes = [1, 16], strides = [1, 1]} : vector<4x16xf32> to vector<1x16xf32>
    %1134 = vector.broadcast %1132 : vector<8x1xf32> to vector<8x16xf32>
    %1135 = vector.broadcast %1133 : vector<1x16xf32> to vector<8x16xf32>
    %1136 = arith.mulf %1134, %1135 : vector<8x16xf32>
    %1137 = arith.addf %1131, %1136 : vector<8x16xf32>
    %1138 = vector.extract_strided_slice %760 {offsets = [0, 8], sizes = [8, 1], strides = [1, 1]} : vector<8x10xf32> to vector<8x1xf32>
    %1139 = vector.broadcast %1138 : vector<8x1xf32> to vector<8x16xf32>
    %1140 = arith.addf %1137, %1139 : vector<8x16xf32>
    %1141 = arith.addf %1140, %759 : vector<8x16xf32>
    %c0_78 = arith.constant 0 : index
    %c0_79 = arith.constant 0 : index
    %1142 = vector.load %arg18[%c0_78, %c0_79] : memref<8x10xf32, #tpu.memory_space<vmem>>, vector<8x10xf32>
    %c0_80 = arith.constant 0 : index
    %c0_81 = arith.constant 0 : index
    %1143 = vector.load %arg19[%c0_80, %c0_81] : memref<42x8xf32, #tpu.memory_space<vmem>>, vector<42x8xf32>
    %1144 = vector.extract_strided_slice %1142 {offsets = [0, 0], sizes = [8, 1], strides = [1, 1]} : vector<8x10xf32> to vector<8x1xf32>
    %1145 = vector.broadcast %1144 : vector<8x1xf32> to vector<8x16xf32>
    %1146 = arith.mulf %1141, %1145 : vector<8x16xf32>
    %1147 = vector.extract_strided_slice %1142 {offsets = [0, 1], sizes = [8, 1], strides = [1, 1]} : vector<8x10xf32> to vector<8x1xf32>
    %1148 = vector.broadcast %1147 : vector<8x1xf32> to vector<8x16xf32>
    %1149 = arith.addf %1146, %1148 : vector<8x16xf32>
    %cst_82 = arith.constant 0.000000e+00 : f32
    %1150 = vector.broadcast %cst_82 : f32 to vector<8x16xf32>
    %1151 = arith.maximumf %1149, %1150 : vector<8x16xf32>
    %1152 = vector.extract_strided_slice %1143 {offsets = [0, 0], sizes = [3, 8], strides = [1, 1]} : vector<42x8xf32> to vector<3x8xf32>
    %1153 = vector.extract_strided_slice %1152 {offsets = [0, 0], sizes = [3, 1], strides = [1, 1]} : vector<3x8xf32> to vector<3x1xf32>
    %1154 = vector.extract_strided_slice %1151 {offsets = [0, 0], sizes = [1, 16], strides = [1, 1]} : vector<8x16xf32> to vector<1x16xf32>
    %1155 = vector.broadcast %1153 : vector<3x1xf32> to vector<3x16xf32>
    %1156 = vector.broadcast %1154 : vector<1x16xf32> to vector<3x16xf32>
    %1157 = arith.mulf %1155, %1156 : vector<3x16xf32>
    %1158 = vector.extract_strided_slice %1152 {offsets = [0, 1], sizes = [3, 1], strides = [1, 1]} : vector<3x8xf32> to vector<3x1xf32>
    %1159 = vector.extract_strided_slice %1151 {offsets = [1, 0], sizes = [1, 16], strides = [1, 1]} : vector<8x16xf32> to vector<1x16xf32>
    %1160 = vector.broadcast %1158 : vector<3x1xf32> to vector<3x16xf32>
    %1161 = vector.broadcast %1159 : vector<1x16xf32> to vector<3x16xf32>
    %1162 = arith.mulf %1160, %1161 : vector<3x16xf32>
    %1163 = arith.addf %1157, %1162 : vector<3x16xf32>
    %1164 = vector.extract_strided_slice %1152 {offsets = [0, 2], sizes = [3, 1], strides = [1, 1]} : vector<3x8xf32> to vector<3x1xf32>
    %1165 = vector.extract_strided_slice %1151 {offsets = [2, 0], sizes = [1, 16], strides = [1, 1]} : vector<8x16xf32> to vector<1x16xf32>
    %1166 = vector.broadcast %1164 : vector<3x1xf32> to vector<3x16xf32>
    %1167 = vector.broadcast %1165 : vector<1x16xf32> to vector<3x16xf32>
    %1168 = arith.mulf %1166, %1167 : vector<3x16xf32>
    %1169 = arith.addf %1163, %1168 : vector<3x16xf32>
    %1170 = vector.extract_strided_slice %1152 {offsets = [0, 3], sizes = [3, 1], strides = [1, 1]} : vector<3x8xf32> to vector<3x1xf32>
    %1171 = vector.extract_strided_slice %1151 {offsets = [3, 0], sizes = [1, 16], strides = [1, 1]} : vector<8x16xf32> to vector<1x16xf32>
    %1172 = vector.broadcast %1170 : vector<3x1xf32> to vector<3x16xf32>
    %1173 = vector.broadcast %1171 : vector<1x16xf32> to vector<3x16xf32>
    %1174 = arith.mulf %1172, %1173 : vector<3x16xf32>
    %1175 = arith.addf %1169, %1174 : vector<3x16xf32>
    %1176 = vector.extract_strided_slice %1152 {offsets = [0, 4], sizes = [3, 1], strides = [1, 1]} : vector<3x8xf32> to vector<3x1xf32>
    %1177 = vector.extract_strided_slice %1151 {offsets = [4, 0], sizes = [1, 16], strides = [1, 1]} : vector<8x16xf32> to vector<1x16xf32>
    %1178 = vector.broadcast %1176 : vector<3x1xf32> to vector<3x16xf32>
    %1179 = vector.broadcast %1177 : vector<1x16xf32> to vector<3x16xf32>
    %1180 = arith.mulf %1178, %1179 : vector<3x16xf32>
    %1181 = arith.addf %1175, %1180 : vector<3x16xf32>
    %1182 = vector.extract_strided_slice %1152 {offsets = [0, 5], sizes = [3, 1], strides = [1, 1]} : vector<3x8xf32> to vector<3x1xf32>
    %1183 = vector.extract_strided_slice %1151 {offsets = [5, 0], sizes = [1, 16], strides = [1, 1]} : vector<8x16xf32> to vector<1x16xf32>
    %1184 = vector.broadcast %1182 : vector<3x1xf32> to vector<3x16xf32>
    %1185 = vector.broadcast %1183 : vector<1x16xf32> to vector<3x16xf32>
    %1186 = arith.mulf %1184, %1185 : vector<3x16xf32>
    %1187 = arith.addf %1181, %1186 : vector<3x16xf32>
    %1188 = vector.extract_strided_slice %1152 {offsets = [0, 6], sizes = [3, 1], strides = [1, 1]} : vector<3x8xf32> to vector<3x1xf32>
    %1189 = vector.extract_strided_slice %1151 {offsets = [6, 0], sizes = [1, 16], strides = [1, 1]} : vector<8x16xf32> to vector<1x16xf32>
    %1190 = vector.broadcast %1188 : vector<3x1xf32> to vector<3x16xf32>
    %1191 = vector.broadcast %1189 : vector<1x16xf32> to vector<3x16xf32>
    %1192 = arith.mulf %1190, %1191 : vector<3x16xf32>
    %1193 = arith.addf %1187, %1192 : vector<3x16xf32>
    %1194 = vector.extract_strided_slice %1152 {offsets = [0, 7], sizes = [3, 1], strides = [1, 1]} : vector<3x8xf32> to vector<3x1xf32>
    %1195 = vector.extract_strided_slice %1151 {offsets = [7, 0], sizes = [1, 16], strides = [1, 1]} : vector<8x16xf32> to vector<1x16xf32>
    %1196 = vector.broadcast %1194 : vector<3x1xf32> to vector<3x16xf32>
    %1197 = vector.broadcast %1195 : vector<1x16xf32> to vector<3x16xf32>
    %1198 = arith.mulf %1196, %1197 : vector<3x16xf32>
    %1199 = arith.addf %1193, %1198 : vector<3x16xf32>
    %1200 = vector.extract_strided_slice %1142 {offsets = [0, 2], sizes = [3, 1], strides = [1, 1]} : vector<8x10xf32> to vector<3x1xf32>
    %1201 = vector.broadcast %1200 : vector<3x1xf32> to vector<3x16xf32>
    %1202 = arith.addf %1199, %1201 : vector<3x16xf32>
    %1203 = vector.extract_strided_slice %1142 {offsets = [0, 3], sizes = [3, 1], strides = [1, 1]} : vector<8x10xf32> to vector<3x1xf32>
    %1204 = vector.broadcast %1203 : vector<3x1xf32> to vector<3x16xf32>
    %1205 = arith.mulf %1202, %1204 : vector<3x16xf32>
    %1206 = vector.extract_strided_slice %1142 {offsets = [0, 4], sizes = [3, 1], strides = [1, 1]} : vector<8x10xf32> to vector<3x1xf32>
    %1207 = vector.broadcast %1206 : vector<3x1xf32> to vector<3x16xf32>
    %1208 = arith.addf %1205, %1207 : vector<3x16xf32>
    %cst_83 = arith.constant 0.000000e+00 : f32
    %1209 = vector.broadcast %cst_83 : f32 to vector<3x16xf32>
    %1210 = arith.maximumf %1208, %1209 : vector<3x16xf32>
    %cst_84 = arith.constant 0.000000e+00 : f32
    %1211 = vector.broadcast %cst_84 : f32 to vector<3x16xf32>
    %1212 = vector.extract_strided_slice %1142 {offsets = [0, 5], sizes = [3, 1], strides = [1, 1]} : vector<8x10xf32> to vector<3x1xf32>
    %1213 = vector.broadcast %1212 : vector<3x1xf32> to vector<3x16xf32>
    %1214 = arith.addf %1211, %1213 : vector<3x16xf32>
    %c5_i32_85 = arith.constant 5 : i32
    %1215 = tpu.dynamic_rotate %1210 by %c5_i32_85 dim 1 : vector<3x16xf32>, i32 -> vector<3x16xf32>
    %1216 = vector.extract_strided_slice %344 {offsets = [0, 0], sizes = [1, 16], strides = [1, 1]} : vector<9x16xi1> to vector<1x16xi1>
    %cst_86 = arith.constant 0.000000e+00 : f32
    %1217 = vector.shape_cast %1216 : vector<1x16xi1> to vector<1x16xi1>
    %1218 = vector.broadcast %1217 : vector<1x16xi1> to vector<3x16xi1>
    %1219 = vector.broadcast %cst_86 : f32 to vector<3x16xf32>
    %1220 = arith.select %1218, %1215, %1219 : vector<3x16xi1>, vector<3x16xf32>
    %1221 = vector.extract_strided_slice %1143 {offsets = [3, 0], sizes = [3, 3], strides = [1, 1]} : vector<42x8xf32> to vector<3x3xf32>
    %1222 = vector.extract_strided_slice %1221 {offsets = [0, 0], sizes = [3, 1], strides = [1, 1]} : vector<3x3xf32> to vector<3x1xf32>
    %1223 = vector.extract_strided_slice %1220 {offsets = [0, 0], sizes = [1, 16], strides = [1, 1]} : vector<3x16xf32> to vector<1x16xf32>
    %1224 = vector.broadcast %1222 : vector<3x1xf32> to vector<3x16xf32>
    %1225 = vector.broadcast %1223 : vector<1x16xf32> to vector<3x16xf32>
    %1226 = arith.mulf %1224, %1225 : vector<3x16xf32>
    %1227 = vector.extract_strided_slice %1221 {offsets = [0, 1], sizes = [3, 1], strides = [1, 1]} : vector<3x3xf32> to vector<3x1xf32>
    %1228 = vector.extract_strided_slice %1220 {offsets = [1, 0], sizes = [1, 16], strides = [1, 1]} : vector<3x16xf32> to vector<1x16xf32>
    %1229 = vector.broadcast %1227 : vector<3x1xf32> to vector<3x16xf32>
    %1230 = vector.broadcast %1228 : vector<1x16xf32> to vector<3x16xf32>
    %1231 = arith.mulf %1229, %1230 : vector<3x16xf32>
    %1232 = arith.addf %1226, %1231 : vector<3x16xf32>
    %1233 = vector.extract_strided_slice %1221 {offsets = [0, 2], sizes = [3, 1], strides = [1, 1]} : vector<3x3xf32> to vector<3x1xf32>
    %1234 = vector.extract_strided_slice %1220 {offsets = [2, 0], sizes = [1, 16], strides = [1, 1]} : vector<3x16xf32> to vector<1x16xf32>
    %1235 = vector.broadcast %1233 : vector<3x1xf32> to vector<3x16xf32>
    %1236 = vector.broadcast %1234 : vector<1x16xf32> to vector<3x16xf32>
    %1237 = arith.mulf %1235, %1236 : vector<3x16xf32>
    %1238 = arith.addf %1232, %1237 : vector<3x16xf32>
    %1239 = arith.addf %1214, %1238 : vector<3x16xf32>
    %c4_i32_87 = arith.constant 4 : i32
    %1240 = tpu.dynamic_rotate %1210 by %c4_i32_87 dim 1 : vector<3x16xf32>, i32 -> vector<3x16xf32>
    %1241 = vector.extract_strided_slice %344 {offsets = [1, 0], sizes = [1, 16], strides = [1, 1]} : vector<9x16xi1> to vector<1x16xi1>
    %cst_88 = arith.constant 0.000000e+00 : f32
    %1242 = vector.shape_cast %1241 : vector<1x16xi1> to vector<1x16xi1>
    %1243 = vector.broadcast %1242 : vector<1x16xi1> to vector<3x16xi1>
    %1244 = vector.broadcast %cst_88 : f32 to vector<3x16xf32>
    %1245 = arith.select %1243, %1240, %1244 : vector<3x16xi1>, vector<3x16xf32>
    %1246 = vector.extract_strided_slice %1143 {offsets = [6, 0], sizes = [3, 3], strides = [1, 1]} : vector<42x8xf32> to vector<3x3xf32>
    %1247 = vector.extract_strided_slice %1246 {offsets = [0, 0], sizes = [3, 1], strides = [1, 1]} : vector<3x3xf32> to vector<3x1xf32>
    %1248 = vector.extract_strided_slice %1245 {offsets = [0, 0], sizes = [1, 16], strides = [1, 1]} : vector<3x16xf32> to vector<1x16xf32>
    %1249 = vector.broadcast %1247 : vector<3x1xf32> to vector<3x16xf32>
    %1250 = vector.broadcast %1248 : vector<1x16xf32> to vector<3x16xf32>
    %1251 = arith.mulf %1249, %1250 : vector<3x16xf32>
    %1252 = vector.extract_strided_slice %1246 {offsets = [0, 1], sizes = [3, 1], strides = [1, 1]} : vector<3x3xf32> to vector<3x1xf32>
    %1253 = vector.extract_strided_slice %1245 {offsets = [1, 0], sizes = [1, 16], strides = [1, 1]} : vector<3x16xf32> to vector<1x16xf32>
    %1254 = vector.broadcast %1252 : vector<3x1xf32> to vector<3x16xf32>
    %1255 = vector.broadcast %1253 : vector<1x16xf32> to vector<3x16xf32>
    %1256 = arith.mulf %1254, %1255 : vector<3x16xf32>
    %1257 = arith.addf %1251, %1256 : vector<3x16xf32>
    %1258 = vector.extract_strided_slice %1246 {offsets = [0, 2], sizes = [3, 1], strides = [1, 1]} : vector<3x3xf32> to vector<3x1xf32>
    %1259 = vector.extract_strided_slice %1245 {offsets = [2, 0], sizes = [1, 16], strides = [1, 1]} : vector<3x16xf32> to vector<1x16xf32>
    %1260 = vector.broadcast %1258 : vector<3x1xf32> to vector<3x16xf32>
    %1261 = vector.broadcast %1259 : vector<1x16xf32> to vector<3x16xf32>
    %1262 = arith.mulf %1260, %1261 : vector<3x16xf32>
    %1263 = arith.addf %1257, %1262 : vector<3x16xf32>
    %1264 = arith.addf %1239, %1263 : vector<3x16xf32>
    %c3_i32_89 = arith.constant 3 : i32
    %1265 = tpu.dynamic_rotate %1210 by %c3_i32_89 dim 1 : vector<3x16xf32>, i32 -> vector<3x16xf32>
    %1266 = vector.extract_strided_slice %344 {offsets = [2, 0], sizes = [1, 16], strides = [1, 1]} : vector<9x16xi1> to vector<1x16xi1>
    %cst_90 = arith.constant 0.000000e+00 : f32
    %1267 = vector.shape_cast %1266 : vector<1x16xi1> to vector<1x16xi1>
    %1268 = vector.broadcast %1267 : vector<1x16xi1> to vector<3x16xi1>
    %1269 = vector.broadcast %cst_90 : f32 to vector<3x16xf32>
    %1270 = arith.select %1268, %1265, %1269 : vector<3x16xi1>, vector<3x16xf32>
    %1271 = vector.extract_strided_slice %1143 {offsets = [9, 0], sizes = [3, 3], strides = [1, 1]} : vector<42x8xf32> to vector<3x3xf32>
    %1272 = vector.extract_strided_slice %1271 {offsets = [0, 0], sizes = [3, 1], strides = [1, 1]} : vector<3x3xf32> to vector<3x1xf32>
    %1273 = vector.extract_strided_slice %1270 {offsets = [0, 0], sizes = [1, 16], strides = [1, 1]} : vector<3x16xf32> to vector<1x16xf32>
    %1274 = vector.broadcast %1272 : vector<3x1xf32> to vector<3x16xf32>
    %1275 = vector.broadcast %1273 : vector<1x16xf32> to vector<3x16xf32>
    %1276 = arith.mulf %1274, %1275 : vector<3x16xf32>
    %1277 = vector.extract_strided_slice %1271 {offsets = [0, 1], sizes = [3, 1], strides = [1, 1]} : vector<3x3xf32> to vector<3x1xf32>
    %1278 = vector.extract_strided_slice %1270 {offsets = [1, 0], sizes = [1, 16], strides = [1, 1]} : vector<3x16xf32> to vector<1x16xf32>
    %1279 = vector.broadcast %1277 : vector<3x1xf32> to vector<3x16xf32>
    %1280 = vector.broadcast %1278 : vector<1x16xf32> to vector<3x16xf32>
    %1281 = arith.mulf %1279, %1280 : vector<3x16xf32>
    %1282 = arith.addf %1276, %1281 : vector<3x16xf32>
    %1283 = vector.extract_strided_slice %1271 {offsets = [0, 2], sizes = [3, 1], strides = [1, 1]} : vector<3x3xf32> to vector<3x1xf32>
    %1284 = vector.extract_strided_slice %1270 {offsets = [2, 0], sizes = [1, 16], strides = [1, 1]} : vector<3x16xf32> to vector<1x16xf32>
    %1285 = vector.broadcast %1283 : vector<3x1xf32> to vector<3x16xf32>
    %1286 = vector.broadcast %1284 : vector<1x16xf32> to vector<3x16xf32>
    %1287 = arith.mulf %1285, %1286 : vector<3x16xf32>
    %1288 = arith.addf %1282, %1287 : vector<3x16xf32>
    %1289 = arith.addf %1264, %1288 : vector<3x16xf32>
    %c1_i32_91 = arith.constant 1 : i32
    %1290 = tpu.dynamic_rotate %1210 by %c1_i32_91 dim 1 : vector<3x16xf32>, i32 -> vector<3x16xf32>
    %1291 = vector.extract_strided_slice %344 {offsets = [3, 0], sizes = [1, 16], strides = [1, 1]} : vector<9x16xi1> to vector<1x16xi1>
    %cst_92 = arith.constant 0.000000e+00 : f32
    %1292 = vector.shape_cast %1291 : vector<1x16xi1> to vector<1x16xi1>
    %1293 = vector.broadcast %1292 : vector<1x16xi1> to vector<3x16xi1>
    %1294 = vector.broadcast %cst_92 : f32 to vector<3x16xf32>
    %1295 = arith.select %1293, %1290, %1294 : vector<3x16xi1>, vector<3x16xf32>
    %1296 = vector.extract_strided_slice %1143 {offsets = [12, 0], sizes = [3, 3], strides = [1, 1]} : vector<42x8xf32> to vector<3x3xf32>
    %1297 = vector.extract_strided_slice %1296 {offsets = [0, 0], sizes = [3, 1], strides = [1, 1]} : vector<3x3xf32> to vector<3x1xf32>
    %1298 = vector.extract_strided_slice %1295 {offsets = [0, 0], sizes = [1, 16], strides = [1, 1]} : vector<3x16xf32> to vector<1x16xf32>
    %1299 = vector.broadcast %1297 : vector<3x1xf32> to vector<3x16xf32>
    %1300 = vector.broadcast %1298 : vector<1x16xf32> to vector<3x16xf32>
    %1301 = arith.mulf %1299, %1300 : vector<3x16xf32>
    %1302 = vector.extract_strided_slice %1296 {offsets = [0, 1], sizes = [3, 1], strides = [1, 1]} : vector<3x3xf32> to vector<3x1xf32>
    %1303 = vector.extract_strided_slice %1295 {offsets = [1, 0], sizes = [1, 16], strides = [1, 1]} : vector<3x16xf32> to vector<1x16xf32>
    %1304 = vector.broadcast %1302 : vector<3x1xf32> to vector<3x16xf32>
    %1305 = vector.broadcast %1303 : vector<1x16xf32> to vector<3x16xf32>
    %1306 = arith.mulf %1304, %1305 : vector<3x16xf32>
    %1307 = arith.addf %1301, %1306 : vector<3x16xf32>
    %1308 = vector.extract_strided_slice %1296 {offsets = [0, 2], sizes = [3, 1], strides = [1, 1]} : vector<3x3xf32> to vector<3x1xf32>
    %1309 = vector.extract_strided_slice %1295 {offsets = [2, 0], sizes = [1, 16], strides = [1, 1]} : vector<3x16xf32> to vector<1x16xf32>
    %1310 = vector.broadcast %1308 : vector<3x1xf32> to vector<3x16xf32>
    %1311 = vector.broadcast %1309 : vector<1x16xf32> to vector<3x16xf32>
    %1312 = arith.mulf %1310, %1311 : vector<3x16xf32>
    %1313 = arith.addf %1307, %1312 : vector<3x16xf32>
    %1314 = arith.addf %1289, %1313 : vector<3x16xf32>
    %1315 = vector.extract_strided_slice %1143 {offsets = [15, 0], sizes = [3, 3], strides = [1, 1]} : vector<42x8xf32> to vector<3x3xf32>
    %1316 = vector.extract_strided_slice %1315 {offsets = [0, 0], sizes = [3, 1], strides = [1, 1]} : vector<3x3xf32> to vector<3x1xf32>
    %1317 = vector.extract_strided_slice %1210 {offsets = [0, 0], sizes = [1, 16], strides = [1, 1]} : vector<3x16xf32> to vector<1x16xf32>
    %1318 = vector.broadcast %1316 : vector<3x1xf32> to vector<3x16xf32>
    %1319 = vector.broadcast %1317 : vector<1x16xf32> to vector<3x16xf32>
    %1320 = arith.mulf %1318, %1319 : vector<3x16xf32>
    %1321 = vector.extract_strided_slice %1315 {offsets = [0, 1], sizes = [3, 1], strides = [1, 1]} : vector<3x3xf32> to vector<3x1xf32>
    %1322 = vector.extract_strided_slice %1210 {offsets = [1, 0], sizes = [1, 16], strides = [1, 1]} : vector<3x16xf32> to vector<1x16xf32>
    %1323 = vector.broadcast %1321 : vector<3x1xf32> to vector<3x16xf32>
    %1324 = vector.broadcast %1322 : vector<1x16xf32> to vector<3x16xf32>
    %1325 = arith.mulf %1323, %1324 : vector<3x16xf32>
    %1326 = arith.addf %1320, %1325 : vector<3x16xf32>
    %1327 = vector.extract_strided_slice %1315 {offsets = [0, 2], sizes = [3, 1], strides = [1, 1]} : vector<3x3xf32> to vector<3x1xf32>
    %1328 = vector.extract_strided_slice %1210 {offsets = [2, 0], sizes = [1, 16], strides = [1, 1]} : vector<3x16xf32> to vector<1x16xf32>
    %1329 = vector.broadcast %1327 : vector<3x1xf32> to vector<3x16xf32>
    %1330 = vector.broadcast %1328 : vector<1x16xf32> to vector<3x16xf32>
    %1331 = arith.mulf %1329, %1330 : vector<3x16xf32>
    %1332 = arith.addf %1326, %1331 : vector<3x16xf32>
    %1333 = arith.addf %1314, %1332 : vector<3x16xf32>
    %c15_i32_93 = arith.constant 15 : i32
    %1334 = tpu.dynamic_rotate %1210 by %c15_i32_93 dim 1 : vector<3x16xf32>, i32 -> vector<3x16xf32>
    %1335 = vector.extract_strided_slice %344 {offsets = [5, 0], sizes = [1, 16], strides = [1, 1]} : vector<9x16xi1> to vector<1x16xi1>
    %cst_94 = arith.constant 0.000000e+00 : f32
    %1336 = vector.shape_cast %1335 : vector<1x16xi1> to vector<1x16xi1>
    %1337 = vector.broadcast %1336 : vector<1x16xi1> to vector<3x16xi1>
    %1338 = vector.broadcast %cst_94 : f32 to vector<3x16xf32>
    %1339 = arith.select %1337, %1334, %1338 : vector<3x16xi1>, vector<3x16xf32>
    %1340 = vector.extract_strided_slice %1143 {offsets = [18, 0], sizes = [3, 3], strides = [1, 1]} : vector<42x8xf32> to vector<3x3xf32>
    %1341 = vector.extract_strided_slice %1340 {offsets = [0, 0], sizes = [3, 1], strides = [1, 1]} : vector<3x3xf32> to vector<3x1xf32>
    %1342 = vector.extract_strided_slice %1339 {offsets = [0, 0], sizes = [1, 16], strides = [1, 1]} : vector<3x16xf32> to vector<1x16xf32>
    %1343 = vector.broadcast %1341 : vector<3x1xf32> to vector<3x16xf32>
    %1344 = vector.broadcast %1342 : vector<1x16xf32> to vector<3x16xf32>
    %1345 = arith.mulf %1343, %1344 : vector<3x16xf32>
    %1346 = vector.extract_strided_slice %1340 {offsets = [0, 1], sizes = [3, 1], strides = [1, 1]} : vector<3x3xf32> to vector<3x1xf32>
    %1347 = vector.extract_strided_slice %1339 {offsets = [1, 0], sizes = [1, 16], strides = [1, 1]} : vector<3x16xf32> to vector<1x16xf32>
    %1348 = vector.broadcast %1346 : vector<3x1xf32> to vector<3x16xf32>
    %1349 = vector.broadcast %1347 : vector<1x16xf32> to vector<3x16xf32>
    %1350 = arith.mulf %1348, %1349 : vector<3x16xf32>
    %1351 = arith.addf %1345, %1350 : vector<3x16xf32>
    %1352 = vector.extract_strided_slice %1340 {offsets = [0, 2], sizes = [3, 1], strides = [1, 1]} : vector<3x3xf32> to vector<3x1xf32>
    %1353 = vector.extract_strided_slice %1339 {offsets = [2, 0], sizes = [1, 16], strides = [1, 1]} : vector<3x16xf32> to vector<1x16xf32>
    %1354 = vector.broadcast %1352 : vector<3x1xf32> to vector<3x16xf32>
    %1355 = vector.broadcast %1353 : vector<1x16xf32> to vector<3x16xf32>
    %1356 = arith.mulf %1354, %1355 : vector<3x16xf32>
    %1357 = arith.addf %1351, %1356 : vector<3x16xf32>
    %1358 = arith.addf %1333, %1357 : vector<3x16xf32>
    %c13_i32_95 = arith.constant 13 : i32
    %1359 = tpu.dynamic_rotate %1210 by %c13_i32_95 dim 1 : vector<3x16xf32>, i32 -> vector<3x16xf32>
    %1360 = vector.extract_strided_slice %344 {offsets = [6, 0], sizes = [1, 16], strides = [1, 1]} : vector<9x16xi1> to vector<1x16xi1>
    %cst_96 = arith.constant 0.000000e+00 : f32
    %1361 = vector.shape_cast %1360 : vector<1x16xi1> to vector<1x16xi1>
    %1362 = vector.broadcast %1361 : vector<1x16xi1> to vector<3x16xi1>
    %1363 = vector.broadcast %cst_96 : f32 to vector<3x16xf32>
    %1364 = arith.select %1362, %1359, %1363 : vector<3x16xi1>, vector<3x16xf32>
    %1365 = vector.extract_strided_slice %1143 {offsets = [21, 0], sizes = [3, 3], strides = [1, 1]} : vector<42x8xf32> to vector<3x3xf32>
    %1366 = vector.extract_strided_slice %1365 {offsets = [0, 0], sizes = [3, 1], strides = [1, 1]} : vector<3x3xf32> to vector<3x1xf32>
    %1367 = vector.extract_strided_slice %1364 {offsets = [0, 0], sizes = [1, 16], strides = [1, 1]} : vector<3x16xf32> to vector<1x16xf32>
    %1368 = vector.broadcast %1366 : vector<3x1xf32> to vector<3x16xf32>
    %1369 = vector.broadcast %1367 : vector<1x16xf32> to vector<3x16xf32>
    %1370 = arith.mulf %1368, %1369 : vector<3x16xf32>
    %1371 = vector.extract_strided_slice %1365 {offsets = [0, 1], sizes = [3, 1], strides = [1, 1]} : vector<3x3xf32> to vector<3x1xf32>
    %1372 = vector.extract_strided_slice %1364 {offsets = [1, 0], sizes = [1, 16], strides = [1, 1]} : vector<3x16xf32> to vector<1x16xf32>
    %1373 = vector.broadcast %1371 : vector<3x1xf32> to vector<3x16xf32>
    %1374 = vector.broadcast %1372 : vector<1x16xf32> to vector<3x16xf32>
    %1375 = arith.mulf %1373, %1374 : vector<3x16xf32>
    %1376 = arith.addf %1370, %1375 : vector<3x16xf32>
    %1377 = vector.extract_strided_slice %1365 {offsets = [0, 2], sizes = [3, 1], strides = [1, 1]} : vector<3x3xf32> to vector<3x1xf32>
    %1378 = vector.extract_strided_slice %1364 {offsets = [2, 0], sizes = [1, 16], strides = [1, 1]} : vector<3x16xf32> to vector<1x16xf32>
    %1379 = vector.broadcast %1377 : vector<3x1xf32> to vector<3x16xf32>
    %1380 = vector.broadcast %1378 : vector<1x16xf32> to vector<3x16xf32>
    %1381 = arith.mulf %1379, %1380 : vector<3x16xf32>
    %1382 = arith.addf %1376, %1381 : vector<3x16xf32>
    %1383 = arith.addf %1358, %1382 : vector<3x16xf32>
    %c12_i32_97 = arith.constant 12 : i32
    %1384 = tpu.dynamic_rotate %1210 by %c12_i32_97 dim 1 : vector<3x16xf32>, i32 -> vector<3x16xf32>
    %1385 = vector.extract_strided_slice %344 {offsets = [7, 0], sizes = [1, 16], strides = [1, 1]} : vector<9x16xi1> to vector<1x16xi1>
    %cst_98 = arith.constant 0.000000e+00 : f32
    %1386 = vector.shape_cast %1385 : vector<1x16xi1> to vector<1x16xi1>
    %1387 = vector.broadcast %1386 : vector<1x16xi1> to vector<3x16xi1>
    %1388 = vector.broadcast %cst_98 : f32 to vector<3x16xf32>
    %1389 = arith.select %1387, %1384, %1388 : vector<3x16xi1>, vector<3x16xf32>
    %1390 = vector.extract_strided_slice %1143 {offsets = [24, 0], sizes = [3, 3], strides = [1, 1]} : vector<42x8xf32> to vector<3x3xf32>
    %1391 = vector.extract_strided_slice %1390 {offsets = [0, 0], sizes = [3, 1], strides = [1, 1]} : vector<3x3xf32> to vector<3x1xf32>
    %1392 = vector.extract_strided_slice %1389 {offsets = [0, 0], sizes = [1, 16], strides = [1, 1]} : vector<3x16xf32> to vector<1x16xf32>
    %1393 = vector.broadcast %1391 : vector<3x1xf32> to vector<3x16xf32>
    %1394 = vector.broadcast %1392 : vector<1x16xf32> to vector<3x16xf32>
    %1395 = arith.mulf %1393, %1394 : vector<3x16xf32>
    %1396 = vector.extract_strided_slice %1390 {offsets = [0, 1], sizes = [3, 1], strides = [1, 1]} : vector<3x3xf32> to vector<3x1xf32>
    %1397 = vector.extract_strided_slice %1389 {offsets = [1, 0], sizes = [1, 16], strides = [1, 1]} : vector<3x16xf32> to vector<1x16xf32>
    %1398 = vector.broadcast %1396 : vector<3x1xf32> to vector<3x16xf32>
    %1399 = vector.broadcast %1397 : vector<1x16xf32> to vector<3x16xf32>
    %1400 = arith.mulf %1398, %1399 : vector<3x16xf32>
    %1401 = arith.addf %1395, %1400 : vector<3x16xf32>
    %1402 = vector.extract_strided_slice %1390 {offsets = [0, 2], sizes = [3, 1], strides = [1, 1]} : vector<3x3xf32> to vector<3x1xf32>
    %1403 = vector.extract_strided_slice %1389 {offsets = [2, 0], sizes = [1, 16], strides = [1, 1]} : vector<3x16xf32> to vector<1x16xf32>
    %1404 = vector.broadcast %1402 : vector<3x1xf32> to vector<3x16xf32>
    %1405 = vector.broadcast %1403 : vector<1x16xf32> to vector<3x16xf32>
    %1406 = arith.mulf %1404, %1405 : vector<3x16xf32>
    %1407 = arith.addf %1401, %1406 : vector<3x16xf32>
    %1408 = arith.addf %1383, %1407 : vector<3x16xf32>
    %c11_i32_99 = arith.constant 11 : i32
    %1409 = tpu.dynamic_rotate %1210 by %c11_i32_99 dim 1 : vector<3x16xf32>, i32 -> vector<3x16xf32>
    %1410 = vector.extract_strided_slice %344 {offsets = [8, 0], sizes = [1, 16], strides = [1, 1]} : vector<9x16xi1> to vector<1x16xi1>
    %cst_100 = arith.constant 0.000000e+00 : f32
    %1411 = vector.shape_cast %1410 : vector<1x16xi1> to vector<1x16xi1>
    %1412 = vector.broadcast %1411 : vector<1x16xi1> to vector<3x16xi1>
    %1413 = vector.broadcast %cst_100 : f32 to vector<3x16xf32>
    %1414 = arith.select %1412, %1409, %1413 : vector<3x16xi1>, vector<3x16xf32>
    %1415 = vector.extract_strided_slice %1143 {offsets = [27, 0], sizes = [3, 3], strides = [1, 1]} : vector<42x8xf32> to vector<3x3xf32>
    %1416 = vector.extract_strided_slice %1415 {offsets = [0, 0], sizes = [3, 1], strides = [1, 1]} : vector<3x3xf32> to vector<3x1xf32>
    %1417 = vector.extract_strided_slice %1414 {offsets = [0, 0], sizes = [1, 16], strides = [1, 1]} : vector<3x16xf32> to vector<1x16xf32>
    %1418 = vector.broadcast %1416 : vector<3x1xf32> to vector<3x16xf32>
    %1419 = vector.broadcast %1417 : vector<1x16xf32> to vector<3x16xf32>
    %1420 = arith.mulf %1418, %1419 : vector<3x16xf32>
    %1421 = vector.extract_strided_slice %1415 {offsets = [0, 1], sizes = [3, 1], strides = [1, 1]} : vector<3x3xf32> to vector<3x1xf32>
    %1422 = vector.extract_strided_slice %1414 {offsets = [1, 0], sizes = [1, 16], strides = [1, 1]} : vector<3x16xf32> to vector<1x16xf32>
    %1423 = vector.broadcast %1421 : vector<3x1xf32> to vector<3x16xf32>
    %1424 = vector.broadcast %1422 : vector<1x16xf32> to vector<3x16xf32>
    %1425 = arith.mulf %1423, %1424 : vector<3x16xf32>
    %1426 = arith.addf %1420, %1425 : vector<3x16xf32>
    %1427 = vector.extract_strided_slice %1415 {offsets = [0, 2], sizes = [3, 1], strides = [1, 1]} : vector<3x3xf32> to vector<3x1xf32>
    %1428 = vector.extract_strided_slice %1414 {offsets = [2, 0], sizes = [1, 16], strides = [1, 1]} : vector<3x16xf32> to vector<1x16xf32>
    %1429 = vector.broadcast %1427 : vector<3x1xf32> to vector<3x16xf32>
    %1430 = vector.broadcast %1428 : vector<1x16xf32> to vector<3x16xf32>
    %1431 = arith.mulf %1429, %1430 : vector<3x16xf32>
    %1432 = arith.addf %1426, %1431 : vector<3x16xf32>
    %1433 = arith.addf %1408, %1432 : vector<3x16xf32>
    %1434 = vector.extract_strided_slice %1142 {offsets = [0, 6], sizes = [3, 1], strides = [1, 1]} : vector<8x10xf32> to vector<3x1xf32>
    %1435 = vector.broadcast %1434 : vector<3x1xf32> to vector<3x16xf32>
    %1436 = arith.mulf %1433, %1435 : vector<3x16xf32>
    %1437 = vector.extract_strided_slice %1142 {offsets = [0, 7], sizes = [3, 1], strides = [1, 1]} : vector<8x10xf32> to vector<3x1xf32>
    %1438 = vector.broadcast %1437 : vector<3x1xf32> to vector<3x16xf32>
    %1439 = arith.addf %1436, %1438 : vector<3x16xf32>
    %cst_101 = arith.constant 0.000000e+00 : f32
    %1440 = vector.broadcast %cst_101 : f32 to vector<3x16xf32>
    %1441 = arith.maximumf %1439, %1440 : vector<3x16xf32>
    %1442 = vector.extract_strided_slice %1143 {offsets = [30, 0], sizes = [6, 3], strides = [1, 1]} : vector<42x8xf32> to vector<6x3xf32>
    %1443 = vector.extract_strided_slice %1442 {offsets = [0, 0], sizes = [6, 1], strides = [1, 1]} : vector<6x3xf32> to vector<6x1xf32>
    %1444 = vector.extract_strided_slice %1441 {offsets = [0, 0], sizes = [1, 16], strides = [1, 1]} : vector<3x16xf32> to vector<1x16xf32>
    %1445 = vector.broadcast %1443 : vector<6x1xf32> to vector<6x16xf32>
    %1446 = vector.broadcast %1444 : vector<1x16xf32> to vector<6x16xf32>
    %1447 = arith.mulf %1445, %1446 : vector<6x16xf32>
    %1448 = vector.extract_strided_slice %1442 {offsets = [0, 1], sizes = [6, 1], strides = [1, 1]} : vector<6x3xf32> to vector<6x1xf32>
    %1449 = vector.extract_strided_slice %1441 {offsets = [1, 0], sizes = [1, 16], strides = [1, 1]} : vector<3x16xf32> to vector<1x16xf32>
    %1450 = vector.broadcast %1448 : vector<6x1xf32> to vector<6x16xf32>
    %1451 = vector.broadcast %1449 : vector<1x16xf32> to vector<6x16xf32>
    %1452 = arith.mulf %1450, %1451 : vector<6x16xf32>
    %1453 = arith.addf %1447, %1452 : vector<6x16xf32>
    %1454 = vector.extract_strided_slice %1442 {offsets = [0, 2], sizes = [6, 1], strides = [1, 1]} : vector<6x3xf32> to vector<6x1xf32>
    %1455 = vector.extract_strided_slice %1441 {offsets = [2, 0], sizes = [1, 16], strides = [1, 1]} : vector<3x16xf32> to vector<1x16xf32>
    %1456 = vector.broadcast %1454 : vector<6x1xf32> to vector<6x16xf32>
    %1457 = vector.broadcast %1455 : vector<1x16xf32> to vector<6x16xf32>
    %1458 = arith.mulf %1456, %1457 : vector<6x16xf32>
    %1459 = arith.addf %1453, %1458 : vector<6x16xf32>
    %1460 = vector.extract_strided_slice %1142 {offsets = [0, 8], sizes = [6, 1], strides = [1, 1]} : vector<8x10xf32> to vector<6x1xf32>
    %1461 = vector.broadcast %1460 : vector<6x1xf32> to vector<6x16xf32>
    %1462 = arith.addf %1459, %1461 : vector<6x16xf32>
    %1463 = vector.extract_strided_slice %1143 {offsets = [36, 0], sizes = [6, 8], strides = [1, 1]} : vector<42x8xf32> to vector<6x8xf32>
    %1464 = vector.extract_strided_slice %1463 {offsets = [0, 0], sizes = [6, 1], strides = [1, 1]} : vector<6x8xf32> to vector<6x1xf32>
    %1465 = vector.extract_strided_slice %1141 {offsets = [0, 0], sizes = [1, 16], strides = [1, 1]} : vector<8x16xf32> to vector<1x16xf32>
    %1466 = vector.broadcast %1464 : vector<6x1xf32> to vector<6x16xf32>
    %1467 = vector.broadcast %1465 : vector<1x16xf32> to vector<6x16xf32>
    %1468 = arith.mulf %1466, %1467 : vector<6x16xf32>
    %1469 = vector.extract_strided_slice %1463 {offsets = [0, 1], sizes = [6, 1], strides = [1, 1]} : vector<6x8xf32> to vector<6x1xf32>
    %1470 = vector.extract_strided_slice %1141 {offsets = [1, 0], sizes = [1, 16], strides = [1, 1]} : vector<8x16xf32> to vector<1x16xf32>
    %1471 = vector.broadcast %1469 : vector<6x1xf32> to vector<6x16xf32>
    %1472 = vector.broadcast %1470 : vector<1x16xf32> to vector<6x16xf32>
    %1473 = arith.mulf %1471, %1472 : vector<6x16xf32>
    %1474 = arith.addf %1468, %1473 : vector<6x16xf32>
    %1475 = vector.extract_strided_slice %1463 {offsets = [0, 2], sizes = [6, 1], strides = [1, 1]} : vector<6x8xf32> to vector<6x1xf32>
    %1476 = vector.extract_strided_slice %1141 {offsets = [2, 0], sizes = [1, 16], strides = [1, 1]} : vector<8x16xf32> to vector<1x16xf32>
    %1477 = vector.broadcast %1475 : vector<6x1xf32> to vector<6x16xf32>
    %1478 = vector.broadcast %1476 : vector<1x16xf32> to vector<6x16xf32>
    %1479 = arith.mulf %1477, %1478 : vector<6x16xf32>
    %1480 = arith.addf %1474, %1479 : vector<6x16xf32>
    %1481 = vector.extract_strided_slice %1463 {offsets = [0, 3], sizes = [6, 1], strides = [1, 1]} : vector<6x8xf32> to vector<6x1xf32>
    %1482 = vector.extract_strided_slice %1141 {offsets = [3, 0], sizes = [1, 16], strides = [1, 1]} : vector<8x16xf32> to vector<1x16xf32>
    %1483 = vector.broadcast %1481 : vector<6x1xf32> to vector<6x16xf32>
    %1484 = vector.broadcast %1482 : vector<1x16xf32> to vector<6x16xf32>
    %1485 = arith.mulf %1483, %1484 : vector<6x16xf32>
    %1486 = arith.addf %1480, %1485 : vector<6x16xf32>
    %1487 = vector.extract_strided_slice %1463 {offsets = [0, 4], sizes = [6, 1], strides = [1, 1]} : vector<6x8xf32> to vector<6x1xf32>
    %1488 = vector.extract_strided_slice %1141 {offsets = [4, 0], sizes = [1, 16], strides = [1, 1]} : vector<8x16xf32> to vector<1x16xf32>
    %1489 = vector.broadcast %1487 : vector<6x1xf32> to vector<6x16xf32>
    %1490 = vector.broadcast %1488 : vector<1x16xf32> to vector<6x16xf32>
    %1491 = arith.mulf %1489, %1490 : vector<6x16xf32>
    %1492 = arith.addf %1486, %1491 : vector<6x16xf32>
    %1493 = vector.extract_strided_slice %1463 {offsets = [0, 5], sizes = [6, 1], strides = [1, 1]} : vector<6x8xf32> to vector<6x1xf32>
    %1494 = vector.extract_strided_slice %1141 {offsets = [5, 0], sizes = [1, 16], strides = [1, 1]} : vector<8x16xf32> to vector<1x16xf32>
    %1495 = vector.broadcast %1493 : vector<6x1xf32> to vector<6x16xf32>
    %1496 = vector.broadcast %1494 : vector<1x16xf32> to vector<6x16xf32>
    %1497 = arith.mulf %1495, %1496 : vector<6x16xf32>
    %1498 = arith.addf %1492, %1497 : vector<6x16xf32>
    %1499 = vector.extract_strided_slice %1463 {offsets = [0, 6], sizes = [6, 1], strides = [1, 1]} : vector<6x8xf32> to vector<6x1xf32>
    %1500 = vector.extract_strided_slice %1141 {offsets = [6, 0], sizes = [1, 16], strides = [1, 1]} : vector<8x16xf32> to vector<1x16xf32>
    %1501 = vector.broadcast %1499 : vector<6x1xf32> to vector<6x16xf32>
    %1502 = vector.broadcast %1500 : vector<1x16xf32> to vector<6x16xf32>
    %1503 = arith.mulf %1501, %1502 : vector<6x16xf32>
    %1504 = arith.addf %1498, %1503 : vector<6x16xf32>
    %1505 = vector.extract_strided_slice %1463 {offsets = [0, 7], sizes = [6, 1], strides = [1, 1]} : vector<6x8xf32> to vector<6x1xf32>
    %1506 = vector.extract_strided_slice %1141 {offsets = [7, 0], sizes = [1, 16], strides = [1, 1]} : vector<8x16xf32> to vector<1x16xf32>
    %1507 = vector.broadcast %1505 : vector<6x1xf32> to vector<6x16xf32>
    %1508 = vector.broadcast %1506 : vector<1x16xf32> to vector<6x16xf32>
    %1509 = arith.mulf %1507, %1508 : vector<6x16xf32>
    %1510 = arith.addf %1504, %1509 : vector<6x16xf32>
    %1511 = arith.addf %1462, %1510 : vector<6x16xf32>
    %1512 = vector.extract_strided_slice %1142 {offsets = [0, 9], sizes = [6, 1], strides = [1, 1]} : vector<8x10xf32> to vector<6x1xf32>
    %1513 = vector.broadcast %1512 : vector<6x1xf32> to vector<6x16xf32>
    %1514 = arith.addf %1511, %1513 : vector<6x16xf32>
    %c0_102 = arith.constant 0 : index
    %c0_103 = arith.constant 0 : index
    %1515 = vector.load %arg14[%c0_102, %c0_103] : memref<6x10xf32, #tpu.memory_space<vmem>>, vector<6x10xf32>
    %c0_104 = arith.constant 0 : index
    %c0_105 = arith.constant 0 : index
    %1516 = vector.load %arg15[%c0_104, %c0_105] : memref<36x6xf32, #tpu.memory_space<vmem>>, vector<36x6xf32>
    %1517 = vector.extract_strided_slice %1515 {offsets = [0, 0], sizes = [6, 1], strides = [1, 1]} : vector<6x10xf32> to vector<6x1xf32>
    %1518 = vector.broadcast %1517 : vector<6x1xf32> to vector<6x64xf32>
    %1519 = arith.mulf %338, %1518 : vector<6x64xf32>
    %1520 = vector.extract_strided_slice %1515 {offsets = [0, 1], sizes = [6, 1], strides = [1, 1]} : vector<6x10xf32> to vector<6x1xf32>
    %1521 = vector.broadcast %1520 : vector<6x1xf32> to vector<6x64xf32>
    %1522 = arith.addf %1519, %1521 : vector<6x64xf32>
    %cst_106 = arith.constant 0.000000e+00 : f32
    %1523 = vector.broadcast %cst_106 : f32 to vector<6x64xf32>
    %1524 = arith.maximumf %1522, %1523 : vector<6x64xf32>
    %1525 = vector.extract_strided_slice %1516 {offsets = [0, 0], sizes = [3, 6], strides = [1, 1]} : vector<36x6xf32> to vector<3x6xf32>
    %1526 = vector.extract_strided_slice %1525 {offsets = [0, 0], sizes = [3, 1], strides = [1, 1]} : vector<3x6xf32> to vector<3x1xf32>
    %1527 = vector.extract_strided_slice %1524 {offsets = [0, 0], sizes = [1, 64], strides = [1, 1]} : vector<6x64xf32> to vector<1x64xf32>
    %1528 = vector.broadcast %1526 : vector<3x1xf32> to vector<3x64xf32>
    %1529 = vector.broadcast %1527 : vector<1x64xf32> to vector<3x64xf32>
    %1530 = arith.mulf %1528, %1529 : vector<3x64xf32>
    %1531 = vector.extract_strided_slice %1525 {offsets = [0, 1], sizes = [3, 1], strides = [1, 1]} : vector<3x6xf32> to vector<3x1xf32>
    %1532 = vector.extract_strided_slice %1524 {offsets = [1, 0], sizes = [1, 64], strides = [1, 1]} : vector<6x64xf32> to vector<1x64xf32>
    %1533 = vector.broadcast %1531 : vector<3x1xf32> to vector<3x64xf32>
    %1534 = vector.broadcast %1532 : vector<1x64xf32> to vector<3x64xf32>
    %1535 = arith.mulf %1533, %1534 : vector<3x64xf32>
    %1536 = arith.addf %1530, %1535 : vector<3x64xf32>
    %1537 = vector.extract_strided_slice %1525 {offsets = [0, 2], sizes = [3, 1], strides = [1, 1]} : vector<3x6xf32> to vector<3x1xf32>
    %1538 = vector.extract_strided_slice %1524 {offsets = [2, 0], sizes = [1, 64], strides = [1, 1]} : vector<6x64xf32> to vector<1x64xf32>
    %1539 = vector.broadcast %1537 : vector<3x1xf32> to vector<3x64xf32>
    %1540 = vector.broadcast %1538 : vector<1x64xf32> to vector<3x64xf32>
    %1541 = arith.mulf %1539, %1540 : vector<3x64xf32>
    %1542 = arith.addf %1536, %1541 : vector<3x64xf32>
    %1543 = vector.extract_strided_slice %1525 {offsets = [0, 3], sizes = [3, 1], strides = [1, 1]} : vector<3x6xf32> to vector<3x1xf32>
    %1544 = vector.extract_strided_slice %1524 {offsets = [3, 0], sizes = [1, 64], strides = [1, 1]} : vector<6x64xf32> to vector<1x64xf32>
    %1545 = vector.broadcast %1543 : vector<3x1xf32> to vector<3x64xf32>
    %1546 = vector.broadcast %1544 : vector<1x64xf32> to vector<3x64xf32>
    %1547 = arith.mulf %1545, %1546 : vector<3x64xf32>
    %1548 = arith.addf %1542, %1547 : vector<3x64xf32>
    %1549 = vector.extract_strided_slice %1525 {offsets = [0, 4], sizes = [3, 1], strides = [1, 1]} : vector<3x6xf32> to vector<3x1xf32>
    %1550 = vector.extract_strided_slice %1524 {offsets = [4, 0], sizes = [1, 64], strides = [1, 1]} : vector<6x64xf32> to vector<1x64xf32>
    %1551 = vector.broadcast %1549 : vector<3x1xf32> to vector<3x64xf32>
    %1552 = vector.broadcast %1550 : vector<1x64xf32> to vector<3x64xf32>
    %1553 = arith.mulf %1551, %1552 : vector<3x64xf32>
    %1554 = arith.addf %1548, %1553 : vector<3x64xf32>
    %1555 = vector.extract_strided_slice %1525 {offsets = [0, 5], sizes = [3, 1], strides = [1, 1]} : vector<3x6xf32> to vector<3x1xf32>
    %1556 = vector.extract_strided_slice %1524 {offsets = [5, 0], sizes = [1, 64], strides = [1, 1]} : vector<6x64xf32> to vector<1x64xf32>
    %1557 = vector.broadcast %1555 : vector<3x1xf32> to vector<3x64xf32>
    %1558 = vector.broadcast %1556 : vector<1x64xf32> to vector<3x64xf32>
    %1559 = arith.mulf %1557, %1558 : vector<3x64xf32>
    %1560 = arith.addf %1554, %1559 : vector<3x64xf32>
    %1561 = vector.extract_strided_slice %1515 {offsets = [0, 2], sizes = [3, 1], strides = [1, 1]} : vector<6x10xf32> to vector<3x1xf32>
    %1562 = vector.broadcast %1561 : vector<3x1xf32> to vector<3x64xf32>
    %1563 = arith.addf %1560, %1562 : vector<3x64xf32>
    %1564 = vector.extract_strided_slice %1515 {offsets = [0, 3], sizes = [3, 1], strides = [1, 1]} : vector<6x10xf32> to vector<3x1xf32>
    %1565 = vector.broadcast %1564 : vector<3x1xf32> to vector<3x64xf32>
    %1566 = arith.mulf %1563, %1565 : vector<3x64xf32>
    %1567 = vector.extract_strided_slice %1515 {offsets = [0, 4], sizes = [3, 1], strides = [1, 1]} : vector<6x10xf32> to vector<3x1xf32>
    %1568 = vector.broadcast %1567 : vector<3x1xf32> to vector<3x64xf32>
    %1569 = arith.addf %1566, %1568 : vector<3x64xf32>
    %cst_107 = arith.constant 0.000000e+00 : f32
    %1570 = vector.broadcast %cst_107 : f32 to vector<3x64xf32>
    %1571 = arith.maximumf %1569, %1570 : vector<3x64xf32>
    %cst_108 = arith.constant 0.000000e+00 : f32
    %1572 = vector.broadcast %cst_108 : f32 to vector<3x64xf32>
    %1573 = vector.extract_strided_slice %1515 {offsets = [0, 5], sizes = [3, 1], strides = [1, 1]} : vector<6x10xf32> to vector<3x1xf32>
    %1574 = vector.broadcast %1573 : vector<3x1xf32> to vector<3x64xf32>
    %1575 = arith.addf %1572, %1574 : vector<3x64xf32>
    %c9_i32_109 = arith.constant 9 : i32
    %1576 = tpu.dynamic_rotate %1571 by %c9_i32_109 dim 1 : vector<3x64xf32>, i32 -> vector<3x64xf32>
    %1577 = vector.extract_strided_slice %341 {offsets = [0, 0], sizes = [1, 64], strides = [1, 1]} : vector<9x64xi1> to vector<1x64xi1>
    %cst_110 = arith.constant 0.000000e+00 : f32
    %1578 = vector.shape_cast %1577 : vector<1x64xi1> to vector<1x64xi1>
    %1579 = vector.broadcast %1578 : vector<1x64xi1> to vector<3x64xi1>
    %1580 = vector.broadcast %cst_110 : f32 to vector<3x64xf32>
    %1581 = arith.select %1579, %1576, %1580 : vector<3x64xi1>, vector<3x64xf32>
    %1582 = vector.extract_strided_slice %1516 {offsets = [3, 0], sizes = [3, 3], strides = [1, 1]} : vector<36x6xf32> to vector<3x3xf32>
    %1583 = vector.extract_strided_slice %1582 {offsets = [0, 0], sizes = [3, 1], strides = [1, 1]} : vector<3x3xf32> to vector<3x1xf32>
    %1584 = vector.extract_strided_slice %1581 {offsets = [0, 0], sizes = [1, 64], strides = [1, 1]} : vector<3x64xf32> to vector<1x64xf32>
    %1585 = vector.broadcast %1583 : vector<3x1xf32> to vector<3x64xf32>
    %1586 = vector.broadcast %1584 : vector<1x64xf32> to vector<3x64xf32>
    %1587 = arith.mulf %1585, %1586 : vector<3x64xf32>
    %1588 = vector.extract_strided_slice %1582 {offsets = [0, 1], sizes = [3, 1], strides = [1, 1]} : vector<3x3xf32> to vector<3x1xf32>
    %1589 = vector.extract_strided_slice %1581 {offsets = [1, 0], sizes = [1, 64], strides = [1, 1]} : vector<3x64xf32> to vector<1x64xf32>
    %1590 = vector.broadcast %1588 : vector<3x1xf32> to vector<3x64xf32>
    %1591 = vector.broadcast %1589 : vector<1x64xf32> to vector<3x64xf32>
    %1592 = arith.mulf %1590, %1591 : vector<3x64xf32>
    %1593 = arith.addf %1587, %1592 : vector<3x64xf32>
    %1594 = vector.extract_strided_slice %1582 {offsets = [0, 2], sizes = [3, 1], strides = [1, 1]} : vector<3x3xf32> to vector<3x1xf32>
    %1595 = vector.extract_strided_slice %1581 {offsets = [2, 0], sizes = [1, 64], strides = [1, 1]} : vector<3x64xf32> to vector<1x64xf32>
    %1596 = vector.broadcast %1594 : vector<3x1xf32> to vector<3x64xf32>
    %1597 = vector.broadcast %1595 : vector<1x64xf32> to vector<3x64xf32>
    %1598 = arith.mulf %1596, %1597 : vector<3x64xf32>
    %1599 = arith.addf %1593, %1598 : vector<3x64xf32>
    %1600 = arith.addf %1575, %1599 : vector<3x64xf32>
    %c8_i32_111 = arith.constant 8 : i32
    %1601 = tpu.dynamic_rotate %1571 by %c8_i32_111 dim 1 : vector<3x64xf32>, i32 -> vector<3x64xf32>
    %1602 = vector.extract_strided_slice %341 {offsets = [1, 0], sizes = [1, 64], strides = [1, 1]} : vector<9x64xi1> to vector<1x64xi1>
    %cst_112 = arith.constant 0.000000e+00 : f32
    %1603 = vector.shape_cast %1602 : vector<1x64xi1> to vector<1x64xi1>
    %1604 = vector.broadcast %1603 : vector<1x64xi1> to vector<3x64xi1>
    %1605 = vector.broadcast %cst_112 : f32 to vector<3x64xf32>
    %1606 = arith.select %1604, %1601, %1605 : vector<3x64xi1>, vector<3x64xf32>
    %1607 = vector.extract_strided_slice %1516 {offsets = [6, 0], sizes = [3, 3], strides = [1, 1]} : vector<36x6xf32> to vector<3x3xf32>
    %1608 = vector.extract_strided_slice %1607 {offsets = [0, 0], sizes = [3, 1], strides = [1, 1]} : vector<3x3xf32> to vector<3x1xf32>
    %1609 = vector.extract_strided_slice %1606 {offsets = [0, 0], sizes = [1, 64], strides = [1, 1]} : vector<3x64xf32> to vector<1x64xf32>
    %1610 = vector.broadcast %1608 : vector<3x1xf32> to vector<3x64xf32>
    %1611 = vector.broadcast %1609 : vector<1x64xf32> to vector<3x64xf32>
    %1612 = arith.mulf %1610, %1611 : vector<3x64xf32>
    %1613 = vector.extract_strided_slice %1607 {offsets = [0, 1], sizes = [3, 1], strides = [1, 1]} : vector<3x3xf32> to vector<3x1xf32>
    %1614 = vector.extract_strided_slice %1606 {offsets = [1, 0], sizes = [1, 64], strides = [1, 1]} : vector<3x64xf32> to vector<1x64xf32>
    %1615 = vector.broadcast %1613 : vector<3x1xf32> to vector<3x64xf32>
    %1616 = vector.broadcast %1614 : vector<1x64xf32> to vector<3x64xf32>
    %1617 = arith.mulf %1615, %1616 : vector<3x64xf32>
    %1618 = arith.addf %1612, %1617 : vector<3x64xf32>
    %1619 = vector.extract_strided_slice %1607 {offsets = [0, 2], sizes = [3, 1], strides = [1, 1]} : vector<3x3xf32> to vector<3x1xf32>
    %1620 = vector.extract_strided_slice %1606 {offsets = [2, 0], sizes = [1, 64], strides = [1, 1]} : vector<3x64xf32> to vector<1x64xf32>
    %1621 = vector.broadcast %1619 : vector<3x1xf32> to vector<3x64xf32>
    %1622 = vector.broadcast %1620 : vector<1x64xf32> to vector<3x64xf32>
    %1623 = arith.mulf %1621, %1622 : vector<3x64xf32>
    %1624 = arith.addf %1618, %1623 : vector<3x64xf32>
    %1625 = arith.addf %1600, %1624 : vector<3x64xf32>
    %c7_i32_113 = arith.constant 7 : i32
    %1626 = tpu.dynamic_rotate %1571 by %c7_i32_113 dim 1 : vector<3x64xf32>, i32 -> vector<3x64xf32>
    %1627 = vector.extract_strided_slice %341 {offsets = [2, 0], sizes = [1, 64], strides = [1, 1]} : vector<9x64xi1> to vector<1x64xi1>
    %cst_114 = arith.constant 0.000000e+00 : f32
    %1628 = vector.shape_cast %1627 : vector<1x64xi1> to vector<1x64xi1>
    %1629 = vector.broadcast %1628 : vector<1x64xi1> to vector<3x64xi1>
    %1630 = vector.broadcast %cst_114 : f32 to vector<3x64xf32>
    %1631 = arith.select %1629, %1626, %1630 : vector<3x64xi1>, vector<3x64xf32>
    %1632 = vector.extract_strided_slice %1516 {offsets = [9, 0], sizes = [3, 3], strides = [1, 1]} : vector<36x6xf32> to vector<3x3xf32>
    %1633 = vector.extract_strided_slice %1632 {offsets = [0, 0], sizes = [3, 1], strides = [1, 1]} : vector<3x3xf32> to vector<3x1xf32>
    %1634 = vector.extract_strided_slice %1631 {offsets = [0, 0], sizes = [1, 64], strides = [1, 1]} : vector<3x64xf32> to vector<1x64xf32>
    %1635 = vector.broadcast %1633 : vector<3x1xf32> to vector<3x64xf32>
    %1636 = vector.broadcast %1634 : vector<1x64xf32> to vector<3x64xf32>
    %1637 = arith.mulf %1635, %1636 : vector<3x64xf32>
    %1638 = vector.extract_strided_slice %1632 {offsets = [0, 1], sizes = [3, 1], strides = [1, 1]} : vector<3x3xf32> to vector<3x1xf32>
    %1639 = vector.extract_strided_slice %1631 {offsets = [1, 0], sizes = [1, 64], strides = [1, 1]} : vector<3x64xf32> to vector<1x64xf32>
    %1640 = vector.broadcast %1638 : vector<3x1xf32> to vector<3x64xf32>
    %1641 = vector.broadcast %1639 : vector<1x64xf32> to vector<3x64xf32>
    %1642 = arith.mulf %1640, %1641 : vector<3x64xf32>
    %1643 = arith.addf %1637, %1642 : vector<3x64xf32>
    %1644 = vector.extract_strided_slice %1632 {offsets = [0, 2], sizes = [3, 1], strides = [1, 1]} : vector<3x3xf32> to vector<3x1xf32>
    %1645 = vector.extract_strided_slice %1631 {offsets = [2, 0], sizes = [1, 64], strides = [1, 1]} : vector<3x64xf32> to vector<1x64xf32>
    %1646 = vector.broadcast %1644 : vector<3x1xf32> to vector<3x64xf32>
    %1647 = vector.broadcast %1645 : vector<1x64xf32> to vector<3x64xf32>
    %1648 = arith.mulf %1646, %1647 : vector<3x64xf32>
    %1649 = arith.addf %1643, %1648 : vector<3x64xf32>
    %1650 = arith.addf %1625, %1649 : vector<3x64xf32>
    %c1_i32_115 = arith.constant 1 : i32
    %1651 = tpu.dynamic_rotate %1571 by %c1_i32_115 dim 1 : vector<3x64xf32>, i32 -> vector<3x64xf32>
    %1652 = vector.extract_strided_slice %341 {offsets = [3, 0], sizes = [1, 64], strides = [1, 1]} : vector<9x64xi1> to vector<1x64xi1>
    %cst_116 = arith.constant 0.000000e+00 : f32
    %1653 = vector.shape_cast %1652 : vector<1x64xi1> to vector<1x64xi1>
    %1654 = vector.broadcast %1653 : vector<1x64xi1> to vector<3x64xi1>
    %1655 = vector.broadcast %cst_116 : f32 to vector<3x64xf32>
    %1656 = arith.select %1654, %1651, %1655 : vector<3x64xi1>, vector<3x64xf32>
    %1657 = vector.extract_strided_slice %1516 {offsets = [12, 0], sizes = [3, 3], strides = [1, 1]} : vector<36x6xf32> to vector<3x3xf32>
    %1658 = vector.extract_strided_slice %1657 {offsets = [0, 0], sizes = [3, 1], strides = [1, 1]} : vector<3x3xf32> to vector<3x1xf32>
    %1659 = vector.extract_strided_slice %1656 {offsets = [0, 0], sizes = [1, 64], strides = [1, 1]} : vector<3x64xf32> to vector<1x64xf32>
    %1660 = vector.broadcast %1658 : vector<3x1xf32> to vector<3x64xf32>
    %1661 = vector.broadcast %1659 : vector<1x64xf32> to vector<3x64xf32>
    %1662 = arith.mulf %1660, %1661 : vector<3x64xf32>
    %1663 = vector.extract_strided_slice %1657 {offsets = [0, 1], sizes = [3, 1], strides = [1, 1]} : vector<3x3xf32> to vector<3x1xf32>
    %1664 = vector.extract_strided_slice %1656 {offsets = [1, 0], sizes = [1, 64], strides = [1, 1]} : vector<3x64xf32> to vector<1x64xf32>
    %1665 = vector.broadcast %1663 : vector<3x1xf32> to vector<3x64xf32>
    %1666 = vector.broadcast %1664 : vector<1x64xf32> to vector<3x64xf32>
    %1667 = arith.mulf %1665, %1666 : vector<3x64xf32>
    %1668 = arith.addf %1662, %1667 : vector<3x64xf32>
    %1669 = vector.extract_strided_slice %1657 {offsets = [0, 2], sizes = [3, 1], strides = [1, 1]} : vector<3x3xf32> to vector<3x1xf32>
    %1670 = vector.extract_strided_slice %1656 {offsets = [2, 0], sizes = [1, 64], strides = [1, 1]} : vector<3x64xf32> to vector<1x64xf32>
    %1671 = vector.broadcast %1669 : vector<3x1xf32> to vector<3x64xf32>
    %1672 = vector.broadcast %1670 : vector<1x64xf32> to vector<3x64xf32>
    %1673 = arith.mulf %1671, %1672 : vector<3x64xf32>
    %1674 = arith.addf %1668, %1673 : vector<3x64xf32>
    %1675 = arith.addf %1650, %1674 : vector<3x64xf32>
    %1676 = vector.extract_strided_slice %1516 {offsets = [15, 0], sizes = [3, 3], strides = [1, 1]} : vector<36x6xf32> to vector<3x3xf32>
    %1677 = vector.extract_strided_slice %1676 {offsets = [0, 0], sizes = [3, 1], strides = [1, 1]} : vector<3x3xf32> to vector<3x1xf32>
    %1678 = vector.extract_strided_slice %1571 {offsets = [0, 0], sizes = [1, 64], strides = [1, 1]} : vector<3x64xf32> to vector<1x64xf32>
    %1679 = vector.broadcast %1677 : vector<3x1xf32> to vector<3x64xf32>
    %1680 = vector.broadcast %1678 : vector<1x64xf32> to vector<3x64xf32>
    %1681 = arith.mulf %1679, %1680 : vector<3x64xf32>
    %1682 = vector.extract_strided_slice %1676 {offsets = [0, 1], sizes = [3, 1], strides = [1, 1]} : vector<3x3xf32> to vector<3x1xf32>
    %1683 = vector.extract_strided_slice %1571 {offsets = [1, 0], sizes = [1, 64], strides = [1, 1]} : vector<3x64xf32> to vector<1x64xf32>
    %1684 = vector.broadcast %1682 : vector<3x1xf32> to vector<3x64xf32>
    %1685 = vector.broadcast %1683 : vector<1x64xf32> to vector<3x64xf32>
    %1686 = arith.mulf %1684, %1685 : vector<3x64xf32>
    %1687 = arith.addf %1681, %1686 : vector<3x64xf32>
    %1688 = vector.extract_strided_slice %1676 {offsets = [0, 2], sizes = [3, 1], strides = [1, 1]} : vector<3x3xf32> to vector<3x1xf32>
    %1689 = vector.extract_strided_slice %1571 {offsets = [2, 0], sizes = [1, 64], strides = [1, 1]} : vector<3x64xf32> to vector<1x64xf32>
    %1690 = vector.broadcast %1688 : vector<3x1xf32> to vector<3x64xf32>
    %1691 = vector.broadcast %1689 : vector<1x64xf32> to vector<3x64xf32>
    %1692 = arith.mulf %1690, %1691 : vector<3x64xf32>
    %1693 = arith.addf %1687, %1692 : vector<3x64xf32>
    %1694 = arith.addf %1675, %1693 : vector<3x64xf32>
    %c63_i32_117 = arith.constant 63 : i32
    %1695 = tpu.dynamic_rotate %1571 by %c63_i32_117 dim 1 : vector<3x64xf32>, i32 -> vector<3x64xf32>
    %1696 = vector.extract_strided_slice %341 {offsets = [5, 0], sizes = [1, 64], strides = [1, 1]} : vector<9x64xi1> to vector<1x64xi1>
    %cst_118 = arith.constant 0.000000e+00 : f32
    %1697 = vector.shape_cast %1696 : vector<1x64xi1> to vector<1x64xi1>
    %1698 = vector.broadcast %1697 : vector<1x64xi1> to vector<3x64xi1>
    %1699 = vector.broadcast %cst_118 : f32 to vector<3x64xf32>
    %1700 = arith.select %1698, %1695, %1699 : vector<3x64xi1>, vector<3x64xf32>
    %1701 = vector.extract_strided_slice %1516 {offsets = [18, 0], sizes = [3, 3], strides = [1, 1]} : vector<36x6xf32> to vector<3x3xf32>
    %1702 = vector.extract_strided_slice %1701 {offsets = [0, 0], sizes = [3, 1], strides = [1, 1]} : vector<3x3xf32> to vector<3x1xf32>
    %1703 = vector.extract_strided_slice %1700 {offsets = [0, 0], sizes = [1, 64], strides = [1, 1]} : vector<3x64xf32> to vector<1x64xf32>
    %1704 = vector.broadcast %1702 : vector<3x1xf32> to vector<3x64xf32>
    %1705 = vector.broadcast %1703 : vector<1x64xf32> to vector<3x64xf32>
    %1706 = arith.mulf %1704, %1705 : vector<3x64xf32>
    %1707 = vector.extract_strided_slice %1701 {offsets = [0, 1], sizes = [3, 1], strides = [1, 1]} : vector<3x3xf32> to vector<3x1xf32>
    %1708 = vector.extract_strided_slice %1700 {offsets = [1, 0], sizes = [1, 64], strides = [1, 1]} : vector<3x64xf32> to vector<1x64xf32>
    %1709 = vector.broadcast %1707 : vector<3x1xf32> to vector<3x64xf32>
    %1710 = vector.broadcast %1708 : vector<1x64xf32> to vector<3x64xf32>
    %1711 = arith.mulf %1709, %1710 : vector<3x64xf32>
    %1712 = arith.addf %1706, %1711 : vector<3x64xf32>
    %1713 = vector.extract_strided_slice %1701 {offsets = [0, 2], sizes = [3, 1], strides = [1, 1]} : vector<3x3xf32> to vector<3x1xf32>
    %1714 = vector.extract_strided_slice %1700 {offsets = [2, 0], sizes = [1, 64], strides = [1, 1]} : vector<3x64xf32> to vector<1x64xf32>
    %1715 = vector.broadcast %1713 : vector<3x1xf32> to vector<3x64xf32>
    %1716 = vector.broadcast %1714 : vector<1x64xf32> to vector<3x64xf32>
    %1717 = arith.mulf %1715, %1716 : vector<3x64xf32>
    %1718 = arith.addf %1712, %1717 : vector<3x64xf32>
    %1719 = arith.addf %1694, %1718 : vector<3x64xf32>
    %c57_i32_119 = arith.constant 57 : i32
    %1720 = tpu.dynamic_rotate %1571 by %c57_i32_119 dim 1 : vector<3x64xf32>, i32 -> vector<3x64xf32>
    %1721 = vector.extract_strided_slice %341 {offsets = [6, 0], sizes = [1, 64], strides = [1, 1]} : vector<9x64xi1> to vector<1x64xi1>
    %cst_120 = arith.constant 0.000000e+00 : f32
    %1722 = vector.shape_cast %1721 : vector<1x64xi1> to vector<1x64xi1>
    %1723 = vector.broadcast %1722 : vector<1x64xi1> to vector<3x64xi1>
    %1724 = vector.broadcast %cst_120 : f32 to vector<3x64xf32>
    %1725 = arith.select %1723, %1720, %1724 : vector<3x64xi1>, vector<3x64xf32>
    %1726 = vector.extract_strided_slice %1516 {offsets = [21, 0], sizes = [3, 3], strides = [1, 1]} : vector<36x6xf32> to vector<3x3xf32>
    %1727 = vector.extract_strided_slice %1726 {offsets = [0, 0], sizes = [3, 1], strides = [1, 1]} : vector<3x3xf32> to vector<3x1xf32>
    %1728 = vector.extract_strided_slice %1725 {offsets = [0, 0], sizes = [1, 64], strides = [1, 1]} : vector<3x64xf32> to vector<1x64xf32>
    %1729 = vector.broadcast %1727 : vector<3x1xf32> to vector<3x64xf32>
    %1730 = vector.broadcast %1728 : vector<1x64xf32> to vector<3x64xf32>
    %1731 = arith.mulf %1729, %1730 : vector<3x64xf32>
    %1732 = vector.extract_strided_slice %1726 {offsets = [0, 1], sizes = [3, 1], strides = [1, 1]} : vector<3x3xf32> to vector<3x1xf32>
    %1733 = vector.extract_strided_slice %1725 {offsets = [1, 0], sizes = [1, 64], strides = [1, 1]} : vector<3x64xf32> to vector<1x64xf32>
    %1734 = vector.broadcast %1732 : vector<3x1xf32> to vector<3x64xf32>
    %1735 = vector.broadcast %1733 : vector<1x64xf32> to vector<3x64xf32>
    %1736 = arith.mulf %1734, %1735 : vector<3x64xf32>
    %1737 = arith.addf %1731, %1736 : vector<3x64xf32>
    %1738 = vector.extract_strided_slice %1726 {offsets = [0, 2], sizes = [3, 1], strides = [1, 1]} : vector<3x3xf32> to vector<3x1xf32>
    %1739 = vector.extract_strided_slice %1725 {offsets = [2, 0], sizes = [1, 64], strides = [1, 1]} : vector<3x64xf32> to vector<1x64xf32>
    %1740 = vector.broadcast %1738 : vector<3x1xf32> to vector<3x64xf32>
    %1741 = vector.broadcast %1739 : vector<1x64xf32> to vector<3x64xf32>
    %1742 = arith.mulf %1740, %1741 : vector<3x64xf32>
    %1743 = arith.addf %1737, %1742 : vector<3x64xf32>
    %1744 = arith.addf %1719, %1743 : vector<3x64xf32>
    %c56_i32_121 = arith.constant 56 : i32
    %1745 = tpu.dynamic_rotate %1571 by %c56_i32_121 dim 1 : vector<3x64xf32>, i32 -> vector<3x64xf32>
    %1746 = vector.extract_strided_slice %341 {offsets = [7, 0], sizes = [1, 64], strides = [1, 1]} : vector<9x64xi1> to vector<1x64xi1>
    %cst_122 = arith.constant 0.000000e+00 : f32
    %1747 = vector.shape_cast %1746 : vector<1x64xi1> to vector<1x64xi1>
    %1748 = vector.broadcast %1747 : vector<1x64xi1> to vector<3x64xi1>
    %1749 = vector.broadcast %cst_122 : f32 to vector<3x64xf32>
    %1750 = arith.select %1748, %1745, %1749 : vector<3x64xi1>, vector<3x64xf32>
    %1751 = vector.extract_strided_slice %1516 {offsets = [24, 0], sizes = [3, 3], strides = [1, 1]} : vector<36x6xf32> to vector<3x3xf32>
    %1752 = vector.extract_strided_slice %1751 {offsets = [0, 0], sizes = [3, 1], strides = [1, 1]} : vector<3x3xf32> to vector<3x1xf32>
    %1753 = vector.extract_strided_slice %1750 {offsets = [0, 0], sizes = [1, 64], strides = [1, 1]} : vector<3x64xf32> to vector<1x64xf32>
    %1754 = vector.broadcast %1752 : vector<3x1xf32> to vector<3x64xf32>
    %1755 = vector.broadcast %1753 : vector<1x64xf32> to vector<3x64xf32>
    %1756 = arith.mulf %1754, %1755 : vector<3x64xf32>
    %1757 = vector.extract_strided_slice %1751 {offsets = [0, 1], sizes = [3, 1], strides = [1, 1]} : vector<3x3xf32> to vector<3x1xf32>
    %1758 = vector.extract_strided_slice %1750 {offsets = [1, 0], sizes = [1, 64], strides = [1, 1]} : vector<3x64xf32> to vector<1x64xf32>
    %1759 = vector.broadcast %1757 : vector<3x1xf32> to vector<3x64xf32>
    %1760 = vector.broadcast %1758 : vector<1x64xf32> to vector<3x64xf32>
    %1761 = arith.mulf %1759, %1760 : vector<3x64xf32>
    %1762 = arith.addf %1756, %1761 : vector<3x64xf32>
    %1763 = vector.extract_strided_slice %1751 {offsets = [0, 2], sizes = [3, 1], strides = [1, 1]} : vector<3x3xf32> to vector<3x1xf32>
    %1764 = vector.extract_strided_slice %1750 {offsets = [2, 0], sizes = [1, 64], strides = [1, 1]} : vector<3x64xf32> to vector<1x64xf32>
    %1765 = vector.broadcast %1763 : vector<3x1xf32> to vector<3x64xf32>
    %1766 = vector.broadcast %1764 : vector<1x64xf32> to vector<3x64xf32>
    %1767 = arith.mulf %1765, %1766 : vector<3x64xf32>
    %1768 = arith.addf %1762, %1767 : vector<3x64xf32>
    %1769 = arith.addf %1744, %1768 : vector<3x64xf32>
    %c55_i32_123 = arith.constant 55 : i32
    %1770 = tpu.dynamic_rotate %1571 by %c55_i32_123 dim 1 : vector<3x64xf32>, i32 -> vector<3x64xf32>
    %1771 = vector.extract_strided_slice %341 {offsets = [8, 0], sizes = [1, 64], strides = [1, 1]} : vector<9x64xi1> to vector<1x64xi1>
    %cst_124 = arith.constant 0.000000e+00 : f32
    %1772 = vector.shape_cast %1771 : vector<1x64xi1> to vector<1x64xi1>
    %1773 = vector.broadcast %1772 : vector<1x64xi1> to vector<3x64xi1>
    %1774 = vector.broadcast %cst_124 : f32 to vector<3x64xf32>
    %1775 = arith.select %1773, %1770, %1774 : vector<3x64xi1>, vector<3x64xf32>
    %1776 = vector.extract_strided_slice %1516 {offsets = [27, 0], sizes = [3, 3], strides = [1, 1]} : vector<36x6xf32> to vector<3x3xf32>
    %1777 = vector.extract_strided_slice %1776 {offsets = [0, 0], sizes = [3, 1], strides = [1, 1]} : vector<3x3xf32> to vector<3x1xf32>
    %1778 = vector.extract_strided_slice %1775 {offsets = [0, 0], sizes = [1, 64], strides = [1, 1]} : vector<3x64xf32> to vector<1x64xf32>
    %1779 = vector.broadcast %1777 : vector<3x1xf32> to vector<3x64xf32>
    %1780 = vector.broadcast %1778 : vector<1x64xf32> to vector<3x64xf32>
    %1781 = arith.mulf %1779, %1780 : vector<3x64xf32>
    %1782 = vector.extract_strided_slice %1776 {offsets = [0, 1], sizes = [3, 1], strides = [1, 1]} : vector<3x3xf32> to vector<3x1xf32>
    %1783 = vector.extract_strided_slice %1775 {offsets = [1, 0], sizes = [1, 64], strides = [1, 1]} : vector<3x64xf32> to vector<1x64xf32>
    %1784 = vector.broadcast %1782 : vector<3x1xf32> to vector<3x64xf32>
    %1785 = vector.broadcast %1783 : vector<1x64xf32> to vector<3x64xf32>
    %1786 = arith.mulf %1784, %1785 : vector<3x64xf32>
    %1787 = arith.addf %1781, %1786 : vector<3x64xf32>
    %1788 = vector.extract_strided_slice %1776 {offsets = [0, 2], sizes = [3, 1], strides = [1, 1]} : vector<3x3xf32> to vector<3x1xf32>
    %1789 = vector.extract_strided_slice %1775 {offsets = [2, 0], sizes = [1, 64], strides = [1, 1]} : vector<3x64xf32> to vector<1x64xf32>
    %1790 = vector.broadcast %1788 : vector<3x1xf32> to vector<3x64xf32>
    %1791 = vector.broadcast %1789 : vector<1x64xf32> to vector<3x64xf32>
    %1792 = arith.mulf %1790, %1791 : vector<3x64xf32>
    %1793 = arith.addf %1787, %1792 : vector<3x64xf32>
    %1794 = arith.addf %1769, %1793 : vector<3x64xf32>
    %1795 = vector.extract_strided_slice %1515 {offsets = [0, 6], sizes = [3, 1], strides = [1, 1]} : vector<6x10xf32> to vector<3x1xf32>
    %1796 = vector.broadcast %1795 : vector<3x1xf32> to vector<3x64xf32>
    %1797 = arith.mulf %1794, %1796 : vector<3x64xf32>
    %1798 = vector.extract_strided_slice %1515 {offsets = [0, 7], sizes = [3, 1], strides = [1, 1]} : vector<6x10xf32> to vector<3x1xf32>
    %1799 = vector.broadcast %1798 : vector<3x1xf32> to vector<3x64xf32>
    %1800 = arith.addf %1797, %1799 : vector<3x64xf32>
    %cst_125 = arith.constant 0.000000e+00 : f32
    %1801 = vector.broadcast %cst_125 : f32 to vector<3x64xf32>
    %1802 = arith.maximumf %1800, %1801 : vector<3x64xf32>
    %1803 = vector.extract_strided_slice %1516 {offsets = [30, 0], sizes = [6, 3], strides = [1, 1]} : vector<36x6xf32> to vector<6x3xf32>
    %1804 = vector.extract_strided_slice %1803 {offsets = [0, 0], sizes = [6, 1], strides = [1, 1]} : vector<6x3xf32> to vector<6x1xf32>
    %1805 = vector.extract_strided_slice %1802 {offsets = [0, 0], sizes = [1, 64], strides = [1, 1]} : vector<3x64xf32> to vector<1x64xf32>
    %1806 = vector.broadcast %1804 : vector<6x1xf32> to vector<6x64xf32>
    %1807 = vector.broadcast %1805 : vector<1x64xf32> to vector<6x64xf32>
    %1808 = arith.mulf %1806, %1807 : vector<6x64xf32>
    %1809 = vector.extract_strided_slice %1803 {offsets = [0, 1], sizes = [6, 1], strides = [1, 1]} : vector<6x3xf32> to vector<6x1xf32>
    %1810 = vector.extract_strided_slice %1802 {offsets = [1, 0], sizes = [1, 64], strides = [1, 1]} : vector<3x64xf32> to vector<1x64xf32>
    %1811 = vector.broadcast %1809 : vector<6x1xf32> to vector<6x64xf32>
    %1812 = vector.broadcast %1810 : vector<1x64xf32> to vector<6x64xf32>
    %1813 = arith.mulf %1811, %1812 : vector<6x64xf32>
    %1814 = arith.addf %1808, %1813 : vector<6x64xf32>
    %1815 = vector.extract_strided_slice %1803 {offsets = [0, 2], sizes = [6, 1], strides = [1, 1]} : vector<6x3xf32> to vector<6x1xf32>
    %1816 = vector.extract_strided_slice %1802 {offsets = [2, 0], sizes = [1, 64], strides = [1, 1]} : vector<3x64xf32> to vector<1x64xf32>
    %1817 = vector.broadcast %1815 : vector<6x1xf32> to vector<6x64xf32>
    %1818 = vector.broadcast %1816 : vector<1x64xf32> to vector<6x64xf32>
    %1819 = arith.mulf %1817, %1818 : vector<6x64xf32>
    %1820 = arith.addf %1814, %1819 : vector<6x64xf32>
    %1821 = vector.extract_strided_slice %1515 {offsets = [0, 8], sizes = [6, 1], strides = [1, 1]} : vector<6x10xf32> to vector<6x1xf32>
    %1822 = vector.broadcast %1821 : vector<6x1xf32> to vector<6x64xf32>
    %1823 = arith.addf %1820, %1822 : vector<6x64xf32>
    %1824 = arith.addf %1823, %338 : vector<6x64xf32>
    %c0_126 = arith.constant 0 : index
    %c0_127 = arith.constant 0 : index
    %1825 = vector.load %arg7[%c0_126, %c0_127] : memref<16x64xf32, #tpu.memory_space<vmem>>, vector<16x64xf32>
    %cst_128 = arith.constant dense<0.000000e+00> : vector<6x64xf32>
    %1826 = tpu.matmul %1514, %1825, %cst_128 {dimension_numbers = #tpu.dot_dimension_numbers<[1], [0], [0], [1], [0, 0, 1, 1], [], []>} : vector<6x16xf32>, vector<16x64xf32>, vector<6x64xf32> -> vector<6x64xf32>
    %1827 = arith.addf %1824, %1826 : vector<6x64xf32>
    %c0_129 = arith.constant 0 : index
    %c0_130 = arith.constant 0 : index
    %1828 = vector.load %arg12[%c0_129, %c0_130] : memref<6x10xf32, #tpu.memory_space<vmem>>, vector<6x10xf32>
    %c0_131 = arith.constant 0 : index
    %c0_132 = arith.constant 0 : index
    %1829 = vector.load %arg13[%c0_131, %c0_132] : memref<28x6xf32, #tpu.memory_space<vmem>>, vector<28x6xf32>
    %1830 = vector.extract_strided_slice %1828 {offsets = [0, 0], sizes = [6, 1], strides = [1, 1]} : vector<6x10xf32> to vector<6x1xf32>
    %1831 = vector.broadcast %1830 : vector<6x1xf32> to vector<6x64xf32>
    %1832 = arith.mulf %1827, %1831 : vector<6x64xf32>
    %1833 = vector.extract_strided_slice %1828 {offsets = [0, 1], sizes = [6, 1], strides = [1, 1]} : vector<6x10xf32> to vector<6x1xf32>
    %1834 = vector.broadcast %1833 : vector<6x1xf32> to vector<6x64xf32>
    %1835 = arith.addf %1832, %1834 : vector<6x64xf32>
    %cst_133 = arith.constant 0.000000e+00 : f32
    %1836 = vector.broadcast %cst_133 : f32 to vector<6x64xf32>
    %1837 = arith.maximumf %1835, %1836 : vector<6x64xf32>
    %1838 = vector.extract_strided_slice %1829 {offsets = [0, 0], sizes = [2, 6], strides = [1, 1]} : vector<28x6xf32> to vector<2x6xf32>
    %1839 = vector.extract_strided_slice %1838 {offsets = [0, 0], sizes = [2, 1], strides = [1, 1]} : vector<2x6xf32> to vector<2x1xf32>
    %1840 = vector.extract_strided_slice %1837 {offsets = [0, 0], sizes = [1, 64], strides = [1, 1]} : vector<6x64xf32> to vector<1x64xf32>
    %1841 = vector.broadcast %1839 : vector<2x1xf32> to vector<2x64xf32>
    %1842 = vector.broadcast %1840 : vector<1x64xf32> to vector<2x64xf32>
    %1843 = arith.mulf %1841, %1842 : vector<2x64xf32>
    %1844 = vector.extract_strided_slice %1838 {offsets = [0, 1], sizes = [2, 1], strides = [1, 1]} : vector<2x6xf32> to vector<2x1xf32>
    %1845 = vector.extract_strided_slice %1837 {offsets = [1, 0], sizes = [1, 64], strides = [1, 1]} : vector<6x64xf32> to vector<1x64xf32>
    %1846 = vector.broadcast %1844 : vector<2x1xf32> to vector<2x64xf32>
    %1847 = vector.broadcast %1845 : vector<1x64xf32> to vector<2x64xf32>
    %1848 = arith.mulf %1846, %1847 : vector<2x64xf32>
    %1849 = arith.addf %1843, %1848 : vector<2x64xf32>
    %1850 = vector.extract_strided_slice %1838 {offsets = [0, 2], sizes = [2, 1], strides = [1, 1]} : vector<2x6xf32> to vector<2x1xf32>
    %1851 = vector.extract_strided_slice %1837 {offsets = [2, 0], sizes = [1, 64], strides = [1, 1]} : vector<6x64xf32> to vector<1x64xf32>
    %1852 = vector.broadcast %1850 : vector<2x1xf32> to vector<2x64xf32>
    %1853 = vector.broadcast %1851 : vector<1x64xf32> to vector<2x64xf32>
    %1854 = arith.mulf %1852, %1853 : vector<2x64xf32>
    %1855 = arith.addf %1849, %1854 : vector<2x64xf32>
    %1856 = vector.extract_strided_slice %1838 {offsets = [0, 3], sizes = [2, 1], strides = [1, 1]} : vector<2x6xf32> to vector<2x1xf32>
    %1857 = vector.extract_strided_slice %1837 {offsets = [3, 0], sizes = [1, 64], strides = [1, 1]} : vector<6x64xf32> to vector<1x64xf32>
    %1858 = vector.broadcast %1856 : vector<2x1xf32> to vector<2x64xf32>
    %1859 = vector.broadcast %1857 : vector<1x64xf32> to vector<2x64xf32>
    %1860 = arith.mulf %1858, %1859 : vector<2x64xf32>
    %1861 = arith.addf %1855, %1860 : vector<2x64xf32>
    %1862 = vector.extract_strided_slice %1838 {offsets = [0, 4], sizes = [2, 1], strides = [1, 1]} : vector<2x6xf32> to vector<2x1xf32>
    %1863 = vector.extract_strided_slice %1837 {offsets = [4, 0], sizes = [1, 64], strides = [1, 1]} : vector<6x64xf32> to vector<1x64xf32>
    %1864 = vector.broadcast %1862 : vector<2x1xf32> to vector<2x64xf32>
    %1865 = vector.broadcast %1863 : vector<1x64xf32> to vector<2x64xf32>
    %1866 = arith.mulf %1864, %1865 : vector<2x64xf32>
    %1867 = arith.addf %1861, %1866 : vector<2x64xf32>
    %1868 = vector.extract_strided_slice %1838 {offsets = [0, 5], sizes = [2, 1], strides = [1, 1]} : vector<2x6xf32> to vector<2x1xf32>
    %1869 = vector.extract_strided_slice %1837 {offsets = [5, 0], sizes = [1, 64], strides = [1, 1]} : vector<6x64xf32> to vector<1x64xf32>
    %1870 = vector.broadcast %1868 : vector<2x1xf32> to vector<2x64xf32>
    %1871 = vector.broadcast %1869 : vector<1x64xf32> to vector<2x64xf32>
    %1872 = arith.mulf %1870, %1871 : vector<2x64xf32>
    %1873 = arith.addf %1867, %1872 : vector<2x64xf32>
    %1874 = vector.extract_strided_slice %1828 {offsets = [0, 2], sizes = [2, 1], strides = [1, 1]} : vector<6x10xf32> to vector<2x1xf32>
    %1875 = vector.broadcast %1874 : vector<2x1xf32> to vector<2x64xf32>
    %1876 = arith.addf %1873, %1875 : vector<2x64xf32>
    %1877 = vector.extract_strided_slice %1828 {offsets = [0, 3], sizes = [2, 1], strides = [1, 1]} : vector<6x10xf32> to vector<2x1xf32>
    %1878 = vector.broadcast %1877 : vector<2x1xf32> to vector<2x64xf32>
    %1879 = arith.mulf %1876, %1878 : vector<2x64xf32>
    %1880 = vector.extract_strided_slice %1828 {offsets = [0, 4], sizes = [2, 1], strides = [1, 1]} : vector<6x10xf32> to vector<2x1xf32>
    %1881 = vector.broadcast %1880 : vector<2x1xf32> to vector<2x64xf32>
    %1882 = arith.addf %1879, %1881 : vector<2x64xf32>
    %cst_134 = arith.constant 0.000000e+00 : f32
    %1883 = vector.broadcast %cst_134 : f32 to vector<2x64xf32>
    %1884 = arith.maximumf %1882, %1883 : vector<2x64xf32>
    %cst_135 = arith.constant 0.000000e+00 : f32
    %1885 = vector.broadcast %cst_135 : f32 to vector<2x64xf32>
    %1886 = vector.extract_strided_slice %1828 {offsets = [0, 5], sizes = [2, 1], strides = [1, 1]} : vector<6x10xf32> to vector<2x1xf32>
    %1887 = vector.broadcast %1886 : vector<2x1xf32> to vector<2x64xf32>
    %1888 = arith.addf %1885, %1887 : vector<2x64xf32>
    %c9_i32_136 = arith.constant 9 : i32
    %1889 = tpu.dynamic_rotate %1884 by %c9_i32_136 dim 1 : vector<2x64xf32>, i32 -> vector<2x64xf32>
    %1890 = vector.extract_strided_slice %7 {offsets = [0, 0], sizes = [1, 64], strides = [1, 1]} : vector<9x64xi1> to vector<1x64xi1>
    %cst_137 = arith.constant 0.000000e+00 : f32
    %1891 = vector.shape_cast %1890 : vector<1x64xi1> to vector<1x64xi1>
    %1892 = vector.broadcast %1891 : vector<1x64xi1> to vector<2x64xi1>
    %1893 = vector.broadcast %cst_137 : f32 to vector<2x64xf32>
    %1894 = arith.select %1892, %1889, %1893 : vector<2x64xi1>, vector<2x64xf32>
    %1895 = vector.extract_strided_slice %1829 {offsets = [2, 0], sizes = [2, 2], strides = [1, 1]} : vector<28x6xf32> to vector<2x2xf32>
    %1896 = vector.extract_strided_slice %1895 {offsets = [0, 0], sizes = [2, 1], strides = [1, 1]} : vector<2x2xf32> to vector<2x1xf32>
    %1897 = vector.extract_strided_slice %1894 {offsets = [0, 0], sizes = [1, 64], strides = [1, 1]} : vector<2x64xf32> to vector<1x64xf32>
    %1898 = vector.broadcast %1896 : vector<2x1xf32> to vector<2x64xf32>
    %1899 = vector.broadcast %1897 : vector<1x64xf32> to vector<2x64xf32>
    %1900 = arith.mulf %1898, %1899 : vector<2x64xf32>
    %1901 = vector.extract_strided_slice %1895 {offsets = [0, 1], sizes = [2, 1], strides = [1, 1]} : vector<2x2xf32> to vector<2x1xf32>
    %1902 = vector.extract_strided_slice %1894 {offsets = [1, 0], sizes = [1, 64], strides = [1, 1]} : vector<2x64xf32> to vector<1x64xf32>
    %1903 = vector.broadcast %1901 : vector<2x1xf32> to vector<2x64xf32>
    %1904 = vector.broadcast %1902 : vector<1x64xf32> to vector<2x64xf32>
    %1905 = arith.mulf %1903, %1904 : vector<2x64xf32>
    %1906 = arith.addf %1900, %1905 : vector<2x64xf32>
    %1907 = arith.addf %1888, %1906 : vector<2x64xf32>
    %c8_i32_138 = arith.constant 8 : i32
    %1908 = tpu.dynamic_rotate %1884 by %c8_i32_138 dim 1 : vector<2x64xf32>, i32 -> vector<2x64xf32>
    %1909 = vector.extract_strided_slice %7 {offsets = [1, 0], sizes = [1, 64], strides = [1, 1]} : vector<9x64xi1> to vector<1x64xi1>
    %cst_139 = arith.constant 0.000000e+00 : f32
    %1910 = vector.shape_cast %1909 : vector<1x64xi1> to vector<1x64xi1>
    %1911 = vector.broadcast %1910 : vector<1x64xi1> to vector<2x64xi1>
    %1912 = vector.broadcast %cst_139 : f32 to vector<2x64xf32>
    %1913 = arith.select %1911, %1908, %1912 : vector<2x64xi1>, vector<2x64xf32>
    %1914 = vector.extract_strided_slice %1829 {offsets = [4, 0], sizes = [2, 2], strides = [1, 1]} : vector<28x6xf32> to vector<2x2xf32>
    %1915 = vector.extract_strided_slice %1914 {offsets = [0, 0], sizes = [2, 1], strides = [1, 1]} : vector<2x2xf32> to vector<2x1xf32>
    %1916 = vector.extract_strided_slice %1913 {offsets = [0, 0], sizes = [1, 64], strides = [1, 1]} : vector<2x64xf32> to vector<1x64xf32>
    %1917 = vector.broadcast %1915 : vector<2x1xf32> to vector<2x64xf32>
    %1918 = vector.broadcast %1916 : vector<1x64xf32> to vector<2x64xf32>
    %1919 = arith.mulf %1917, %1918 : vector<2x64xf32>
    %1920 = vector.extract_strided_slice %1914 {offsets = [0, 1], sizes = [2, 1], strides = [1, 1]} : vector<2x2xf32> to vector<2x1xf32>
    %1921 = vector.extract_strided_slice %1913 {offsets = [1, 0], sizes = [1, 64], strides = [1, 1]} : vector<2x64xf32> to vector<1x64xf32>
    %1922 = vector.broadcast %1920 : vector<2x1xf32> to vector<2x64xf32>
    %1923 = vector.broadcast %1921 : vector<1x64xf32> to vector<2x64xf32>
    %1924 = arith.mulf %1922, %1923 : vector<2x64xf32>
    %1925 = arith.addf %1919, %1924 : vector<2x64xf32>
    %1926 = arith.addf %1907, %1925 : vector<2x64xf32>
    %c7_i32_140 = arith.constant 7 : i32
    %1927 = tpu.dynamic_rotate %1884 by %c7_i32_140 dim 1 : vector<2x64xf32>, i32 -> vector<2x64xf32>
    %1928 = vector.extract_strided_slice %7 {offsets = [2, 0], sizes = [1, 64], strides = [1, 1]} : vector<9x64xi1> to vector<1x64xi1>
    %cst_141 = arith.constant 0.000000e+00 : f32
    %1929 = vector.shape_cast %1928 : vector<1x64xi1> to vector<1x64xi1>
    %1930 = vector.broadcast %1929 : vector<1x64xi1> to vector<2x64xi1>
    %1931 = vector.broadcast %cst_141 : f32 to vector<2x64xf32>
    %1932 = arith.select %1930, %1927, %1931 : vector<2x64xi1>, vector<2x64xf32>
    %1933 = vector.extract_strided_slice %1829 {offsets = [6, 0], sizes = [2, 2], strides = [1, 1]} : vector<28x6xf32> to vector<2x2xf32>
    %1934 = vector.extract_strided_slice %1933 {offsets = [0, 0], sizes = [2, 1], strides = [1, 1]} : vector<2x2xf32> to vector<2x1xf32>
    %1935 = vector.extract_strided_slice %1932 {offsets = [0, 0], sizes = [1, 64], strides = [1, 1]} : vector<2x64xf32> to vector<1x64xf32>
    %1936 = vector.broadcast %1934 : vector<2x1xf32> to vector<2x64xf32>
    %1937 = vector.broadcast %1935 : vector<1x64xf32> to vector<2x64xf32>
    %1938 = arith.mulf %1936, %1937 : vector<2x64xf32>
    %1939 = vector.extract_strided_slice %1933 {offsets = [0, 1], sizes = [2, 1], strides = [1, 1]} : vector<2x2xf32> to vector<2x1xf32>
    %1940 = vector.extract_strided_slice %1932 {offsets = [1, 0], sizes = [1, 64], strides = [1, 1]} : vector<2x64xf32> to vector<1x64xf32>
    %1941 = vector.broadcast %1939 : vector<2x1xf32> to vector<2x64xf32>
    %1942 = vector.broadcast %1940 : vector<1x64xf32> to vector<2x64xf32>
    %1943 = arith.mulf %1941, %1942 : vector<2x64xf32>
    %1944 = arith.addf %1938, %1943 : vector<2x64xf32>
    %1945 = arith.addf %1926, %1944 : vector<2x64xf32>
    %c1_i32_142 = arith.constant 1 : i32
    %1946 = tpu.dynamic_rotate %1884 by %c1_i32_142 dim 1 : vector<2x64xf32>, i32 -> vector<2x64xf32>
    %1947 = vector.extract_strided_slice %7 {offsets = [3, 0], sizes = [1, 64], strides = [1, 1]} : vector<9x64xi1> to vector<1x64xi1>
    %cst_143 = arith.constant 0.000000e+00 : f32
    %1948 = vector.shape_cast %1947 : vector<1x64xi1> to vector<1x64xi1>
    %1949 = vector.broadcast %1948 : vector<1x64xi1> to vector<2x64xi1>
    %1950 = vector.broadcast %cst_143 : f32 to vector<2x64xf32>
    %1951 = arith.select %1949, %1946, %1950 : vector<2x64xi1>, vector<2x64xf32>
    %1952 = vector.extract_strided_slice %1829 {offsets = [8, 0], sizes = [2, 2], strides = [1, 1]} : vector<28x6xf32> to vector<2x2xf32>
    %1953 = vector.extract_strided_slice %1952 {offsets = [0, 0], sizes = [2, 1], strides = [1, 1]} : vector<2x2xf32> to vector<2x1xf32>
    %1954 = vector.extract_strided_slice %1951 {offsets = [0, 0], sizes = [1, 64], strides = [1, 1]} : vector<2x64xf32> to vector<1x64xf32>
    %1955 = vector.broadcast %1953 : vector<2x1xf32> to vector<2x64xf32>
    %1956 = vector.broadcast %1954 : vector<1x64xf32> to vector<2x64xf32>
    %1957 = arith.mulf %1955, %1956 : vector<2x64xf32>
    %1958 = vector.extract_strided_slice %1952 {offsets = [0, 1], sizes = [2, 1], strides = [1, 1]} : vector<2x2xf32> to vector<2x1xf32>
    %1959 = vector.extract_strided_slice %1951 {offsets = [1, 0], sizes = [1, 64], strides = [1, 1]} : vector<2x64xf32> to vector<1x64xf32>
    %1960 = vector.broadcast %1958 : vector<2x1xf32> to vector<2x64xf32>
    %1961 = vector.broadcast %1959 : vector<1x64xf32> to vector<2x64xf32>
    %1962 = arith.mulf %1960, %1961 : vector<2x64xf32>
    %1963 = arith.addf %1957, %1962 : vector<2x64xf32>
    %1964 = arith.addf %1945, %1963 : vector<2x64xf32>
    %1965 = vector.extract_strided_slice %1829 {offsets = [10, 0], sizes = [2, 2], strides = [1, 1]} : vector<28x6xf32> to vector<2x2xf32>
    %1966 = vector.extract_strided_slice %1965 {offsets = [0, 0], sizes = [2, 1], strides = [1, 1]} : vector<2x2xf32> to vector<2x1xf32>
    %1967 = vector.extract_strided_slice %1884 {offsets = [0, 0], sizes = [1, 64], strides = [1, 1]} : vector<2x64xf32> to vector<1x64xf32>
    %1968 = vector.broadcast %1966 : vector<2x1xf32> to vector<2x64xf32>
    %1969 = vector.broadcast %1967 : vector<1x64xf32> to vector<2x64xf32>
    %1970 = arith.mulf %1968, %1969 : vector<2x64xf32>
    %1971 = vector.extract_strided_slice %1965 {offsets = [0, 1], sizes = [2, 1], strides = [1, 1]} : vector<2x2xf32> to vector<2x1xf32>
    %1972 = vector.extract_strided_slice %1884 {offsets = [1, 0], sizes = [1, 64], strides = [1, 1]} : vector<2x64xf32> to vector<1x64xf32>
    %1973 = vector.broadcast %1971 : vector<2x1xf32> to vector<2x64xf32>
    %1974 = vector.broadcast %1972 : vector<1x64xf32> to vector<2x64xf32>
    %1975 = arith.mulf %1973, %1974 : vector<2x64xf32>
    %1976 = arith.addf %1970, %1975 : vector<2x64xf32>
    %1977 = arith.addf %1964, %1976 : vector<2x64xf32>
    %c63_i32_144 = arith.constant 63 : i32
    %1978 = tpu.dynamic_rotate %1884 by %c63_i32_144 dim 1 : vector<2x64xf32>, i32 -> vector<2x64xf32>
    %1979 = vector.extract_strided_slice %7 {offsets = [5, 0], sizes = [1, 64], strides = [1, 1]} : vector<9x64xi1> to vector<1x64xi1>
    %cst_145 = arith.constant 0.000000e+00 : f32
    %1980 = vector.shape_cast %1979 : vector<1x64xi1> to vector<1x64xi1>
    %1981 = vector.broadcast %1980 : vector<1x64xi1> to vector<2x64xi1>
    %1982 = vector.broadcast %cst_145 : f32 to vector<2x64xf32>
    %1983 = arith.select %1981, %1978, %1982 : vector<2x64xi1>, vector<2x64xf32>
    %1984 = vector.extract_strided_slice %1829 {offsets = [12, 0], sizes = [2, 2], strides = [1, 1]} : vector<28x6xf32> to vector<2x2xf32>
    %1985 = vector.extract_strided_slice %1984 {offsets = [0, 0], sizes = [2, 1], strides = [1, 1]} : vector<2x2xf32> to vector<2x1xf32>
    %1986 = vector.extract_strided_slice %1983 {offsets = [0, 0], sizes = [1, 64], strides = [1, 1]} : vector<2x64xf32> to vector<1x64xf32>
    %1987 = vector.broadcast %1985 : vector<2x1xf32> to vector<2x64xf32>
    %1988 = vector.broadcast %1986 : vector<1x64xf32> to vector<2x64xf32>
    %1989 = arith.mulf %1987, %1988 : vector<2x64xf32>
    %1990 = vector.extract_strided_slice %1984 {offsets = [0, 1], sizes = [2, 1], strides = [1, 1]} : vector<2x2xf32> to vector<2x1xf32>
    %1991 = vector.extract_strided_slice %1983 {offsets = [1, 0], sizes = [1, 64], strides = [1, 1]} : vector<2x64xf32> to vector<1x64xf32>
    %1992 = vector.broadcast %1990 : vector<2x1xf32> to vector<2x64xf32>
    %1993 = vector.broadcast %1991 : vector<1x64xf32> to vector<2x64xf32>
    %1994 = arith.mulf %1992, %1993 : vector<2x64xf32>
    %1995 = arith.addf %1989, %1994 : vector<2x64xf32>
    %1996 = arith.addf %1977, %1995 : vector<2x64xf32>
    %c57_i32_146 = arith.constant 57 : i32
    %1997 = tpu.dynamic_rotate %1884 by %c57_i32_146 dim 1 : vector<2x64xf32>, i32 -> vector<2x64xf32>
    %1998 = vector.extract_strided_slice %7 {offsets = [6, 0], sizes = [1, 64], strides = [1, 1]} : vector<9x64xi1> to vector<1x64xi1>
    %cst_147 = arith.constant 0.000000e+00 : f32
    %1999 = vector.shape_cast %1998 : vector<1x64xi1> to vector<1x64xi1>
    %2000 = vector.broadcast %1999 : vector<1x64xi1> to vector<2x64xi1>
    %2001 = vector.broadcast %cst_147 : f32 to vector<2x64xf32>
    %2002 = arith.select %2000, %1997, %2001 : vector<2x64xi1>, vector<2x64xf32>
    %2003 = vector.extract_strided_slice %1829 {offsets = [14, 0], sizes = [2, 2], strides = [1, 1]} : vector<28x6xf32> to vector<2x2xf32>
    %2004 = vector.extract_strided_slice %2003 {offsets = [0, 0], sizes = [2, 1], strides = [1, 1]} : vector<2x2xf32> to vector<2x1xf32>
    %2005 = vector.extract_strided_slice %2002 {offsets = [0, 0], sizes = [1, 64], strides = [1, 1]} : vector<2x64xf32> to vector<1x64xf32>
    %2006 = vector.broadcast %2004 : vector<2x1xf32> to vector<2x64xf32>
    %2007 = vector.broadcast %2005 : vector<1x64xf32> to vector<2x64xf32>
    %2008 = arith.mulf %2006, %2007 : vector<2x64xf32>
    %2009 = vector.extract_strided_slice %2003 {offsets = [0, 1], sizes = [2, 1], strides = [1, 1]} : vector<2x2xf32> to vector<2x1xf32>
    %2010 = vector.extract_strided_slice %2002 {offsets = [1, 0], sizes = [1, 64], strides = [1, 1]} : vector<2x64xf32> to vector<1x64xf32>
    %2011 = vector.broadcast %2009 : vector<2x1xf32> to vector<2x64xf32>
    %2012 = vector.broadcast %2010 : vector<1x64xf32> to vector<2x64xf32>
    %2013 = arith.mulf %2011, %2012 : vector<2x64xf32>
    %2014 = arith.addf %2008, %2013 : vector<2x64xf32>
    %2015 = arith.addf %1996, %2014 : vector<2x64xf32>
    %c56_i32_148 = arith.constant 56 : i32
    %2016 = tpu.dynamic_rotate %1884 by %c56_i32_148 dim 1 : vector<2x64xf32>, i32 -> vector<2x64xf32>
    %2017 = vector.extract_strided_slice %7 {offsets = [7, 0], sizes = [1, 64], strides = [1, 1]} : vector<9x64xi1> to vector<1x64xi1>
    %cst_149 = arith.constant 0.000000e+00 : f32
    %2018 = vector.shape_cast %2017 : vector<1x64xi1> to vector<1x64xi1>
    %2019 = vector.broadcast %2018 : vector<1x64xi1> to vector<2x64xi1>
    %2020 = vector.broadcast %cst_149 : f32 to vector<2x64xf32>
    %2021 = arith.select %2019, %2016, %2020 : vector<2x64xi1>, vector<2x64xf32>
    %2022 = vector.extract_strided_slice %1829 {offsets = [16, 0], sizes = [2, 2], strides = [1, 1]} : vector<28x6xf32> to vector<2x2xf32>
    %2023 = vector.extract_strided_slice %2022 {offsets = [0, 0], sizes = [2, 1], strides = [1, 1]} : vector<2x2xf32> to vector<2x1xf32>
    %2024 = vector.extract_strided_slice %2021 {offsets = [0, 0], sizes = [1, 64], strides = [1, 1]} : vector<2x64xf32> to vector<1x64xf32>
    %2025 = vector.broadcast %2023 : vector<2x1xf32> to vector<2x64xf32>
    %2026 = vector.broadcast %2024 : vector<1x64xf32> to vector<2x64xf32>
    %2027 = arith.mulf %2025, %2026 : vector<2x64xf32>
    %2028 = vector.extract_strided_slice %2022 {offsets = [0, 1], sizes = [2, 1], strides = [1, 1]} : vector<2x2xf32> to vector<2x1xf32>
    %2029 = vector.extract_strided_slice %2021 {offsets = [1, 0], sizes = [1, 64], strides = [1, 1]} : vector<2x64xf32> to vector<1x64xf32>
    %2030 = vector.broadcast %2028 : vector<2x1xf32> to vector<2x64xf32>
    %2031 = vector.broadcast %2029 : vector<1x64xf32> to vector<2x64xf32>
    %2032 = arith.mulf %2030, %2031 : vector<2x64xf32>
    %2033 = arith.addf %2027, %2032 : vector<2x64xf32>
    %2034 = arith.addf %2015, %2033 : vector<2x64xf32>
    %c55_i32_150 = arith.constant 55 : i32
    %2035 = tpu.dynamic_rotate %1884 by %c55_i32_150 dim 1 : vector<2x64xf32>, i32 -> vector<2x64xf32>
    %2036 = vector.extract_strided_slice %7 {offsets = [8, 0], sizes = [1, 64], strides = [1, 1]} : vector<9x64xi1> to vector<1x64xi1>
    %cst_151 = arith.constant 0.000000e+00 : f32
    %2037 = vector.shape_cast %2036 : vector<1x64xi1> to vector<1x64xi1>
    %2038 = vector.broadcast %2037 : vector<1x64xi1> to vector<2x64xi1>
    %2039 = vector.broadcast %cst_151 : f32 to vector<2x64xf32>
    %2040 = arith.select %2038, %2035, %2039 : vector<2x64xi1>, vector<2x64xf32>
    %2041 = vector.extract_strided_slice %1829 {offsets = [18, 0], sizes = [2, 2], strides = [1, 1]} : vector<28x6xf32> to vector<2x2xf32>
    %2042 = vector.extract_strided_slice %2041 {offsets = [0, 0], sizes = [2, 1], strides = [1, 1]} : vector<2x2xf32> to vector<2x1xf32>
    %2043 = vector.extract_strided_slice %2040 {offsets = [0, 0], sizes = [1, 64], strides = [1, 1]} : vector<2x64xf32> to vector<1x64xf32>
    %2044 = vector.broadcast %2042 : vector<2x1xf32> to vector<2x64xf32>
    %2045 = vector.broadcast %2043 : vector<1x64xf32> to vector<2x64xf32>
    %2046 = arith.mulf %2044, %2045 : vector<2x64xf32>
    %2047 = vector.extract_strided_slice %2041 {offsets = [0, 1], sizes = [2, 1], strides = [1, 1]} : vector<2x2xf32> to vector<2x1xf32>
    %2048 = vector.extract_strided_slice %2040 {offsets = [1, 0], sizes = [1, 64], strides = [1, 1]} : vector<2x64xf32> to vector<1x64xf32>
    %2049 = vector.broadcast %2047 : vector<2x1xf32> to vector<2x64xf32>
    %2050 = vector.broadcast %2048 : vector<1x64xf32> to vector<2x64xf32>
    %2051 = arith.mulf %2049, %2050 : vector<2x64xf32>
    %2052 = arith.addf %2046, %2051 : vector<2x64xf32>
    %2053 = arith.addf %2034, %2052 : vector<2x64xf32>
    %2054 = vector.extract_strided_slice %1828 {offsets = [0, 6], sizes = [2, 1], strides = [1, 1]} : vector<6x10xf32> to vector<2x1xf32>
    %2055 = vector.broadcast %2054 : vector<2x1xf32> to vector<2x64xf32>
    %2056 = arith.mulf %2053, %2055 : vector<2x64xf32>
    %2057 = vector.extract_strided_slice %1828 {offsets = [0, 7], sizes = [2, 1], strides = [1, 1]} : vector<6x10xf32> to vector<2x1xf32>
    %2058 = vector.broadcast %2057 : vector<2x1xf32> to vector<2x64xf32>
    %2059 = arith.addf %2056, %2058 : vector<2x64xf32>
    %cst_152 = arith.constant 0.000000e+00 : f32
    %2060 = vector.broadcast %cst_152 : f32 to vector<2x64xf32>
    %2061 = arith.maximumf %2059, %2060 : vector<2x64xf32>
    %2062 = vector.extract_strided_slice %1829 {offsets = [20, 0], sizes = [4, 2], strides = [1, 1]} : vector<28x6xf32> to vector<4x2xf32>
    %2063 = vector.extract_strided_slice %2062 {offsets = [0, 0], sizes = [4, 1], strides = [1, 1]} : vector<4x2xf32> to vector<4x1xf32>
    %2064 = vector.extract_strided_slice %2061 {offsets = [0, 0], sizes = [1, 64], strides = [1, 1]} : vector<2x64xf32> to vector<1x64xf32>
    %2065 = vector.broadcast %2063 : vector<4x1xf32> to vector<4x64xf32>
    %2066 = vector.broadcast %2064 : vector<1x64xf32> to vector<4x64xf32>
    %2067 = arith.mulf %2065, %2066 : vector<4x64xf32>
    %2068 = vector.extract_strided_slice %2062 {offsets = [0, 1], sizes = [4, 1], strides = [1, 1]} : vector<4x2xf32> to vector<4x1xf32>
    %2069 = vector.extract_strided_slice %2061 {offsets = [1, 0], sizes = [1, 64], strides = [1, 1]} : vector<2x64xf32> to vector<1x64xf32>
    %2070 = vector.broadcast %2068 : vector<4x1xf32> to vector<4x64xf32>
    %2071 = vector.broadcast %2069 : vector<1x64xf32> to vector<4x64xf32>
    %2072 = arith.mulf %2070, %2071 : vector<4x64xf32>
    %2073 = arith.addf %2067, %2072 : vector<4x64xf32>
    %2074 = vector.extract_strided_slice %1828 {offsets = [0, 8], sizes = [4, 1], strides = [1, 1]} : vector<6x10xf32> to vector<4x1xf32>
    %2075 = vector.broadcast %2074 : vector<4x1xf32> to vector<4x64xf32>
    %2076 = arith.addf %2073, %2075 : vector<4x64xf32>
    %2077 = vector.extract_strided_slice %1829 {offsets = [24, 0], sizes = [4, 6], strides = [1, 1]} : vector<28x6xf32> to vector<4x6xf32>
    %2078 = vector.extract_strided_slice %2077 {offsets = [0, 0], sizes = [4, 1], strides = [1, 1]} : vector<4x6xf32> to vector<4x1xf32>
    %2079 = vector.extract_strided_slice %1827 {offsets = [0, 0], sizes = [1, 64], strides = [1, 1]} : vector<6x64xf32> to vector<1x64xf32>
    %2080 = vector.broadcast %2078 : vector<4x1xf32> to vector<4x64xf32>
    %2081 = vector.broadcast %2079 : vector<1x64xf32> to vector<4x64xf32>
    %2082 = arith.mulf %2080, %2081 : vector<4x64xf32>
    %2083 = vector.extract_strided_slice %2077 {offsets = [0, 1], sizes = [4, 1], strides = [1, 1]} : vector<4x6xf32> to vector<4x1xf32>
    %2084 = vector.extract_strided_slice %1827 {offsets = [1, 0], sizes = [1, 64], strides = [1, 1]} : vector<6x64xf32> to vector<1x64xf32>
    %2085 = vector.broadcast %2083 : vector<4x1xf32> to vector<4x64xf32>
    %2086 = vector.broadcast %2084 : vector<1x64xf32> to vector<4x64xf32>
    %2087 = arith.mulf %2085, %2086 : vector<4x64xf32>
    %2088 = arith.addf %2082, %2087 : vector<4x64xf32>
    %2089 = vector.extract_strided_slice %2077 {offsets = [0, 2], sizes = [4, 1], strides = [1, 1]} : vector<4x6xf32> to vector<4x1xf32>
    %2090 = vector.extract_strided_slice %1827 {offsets = [2, 0], sizes = [1, 64], strides = [1, 1]} : vector<6x64xf32> to vector<1x64xf32>
    %2091 = vector.broadcast %2089 : vector<4x1xf32> to vector<4x64xf32>
    %2092 = vector.broadcast %2090 : vector<1x64xf32> to vector<4x64xf32>
    %2093 = arith.mulf %2091, %2092 : vector<4x64xf32>
    %2094 = arith.addf %2088, %2093 : vector<4x64xf32>
    %2095 = vector.extract_strided_slice %2077 {offsets = [0, 3], sizes = [4, 1], strides = [1, 1]} : vector<4x6xf32> to vector<4x1xf32>
    %2096 = vector.extract_strided_slice %1827 {offsets = [3, 0], sizes = [1, 64], strides = [1, 1]} : vector<6x64xf32> to vector<1x64xf32>
    %2097 = vector.broadcast %2095 : vector<4x1xf32> to vector<4x64xf32>
    %2098 = vector.broadcast %2096 : vector<1x64xf32> to vector<4x64xf32>
    %2099 = arith.mulf %2097, %2098 : vector<4x64xf32>
    %2100 = arith.addf %2094, %2099 : vector<4x64xf32>
    %2101 = vector.extract_strided_slice %2077 {offsets = [0, 4], sizes = [4, 1], strides = [1, 1]} : vector<4x6xf32> to vector<4x1xf32>
    %2102 = vector.extract_strided_slice %1827 {offsets = [4, 0], sizes = [1, 64], strides = [1, 1]} : vector<6x64xf32> to vector<1x64xf32>
    %2103 = vector.broadcast %2101 : vector<4x1xf32> to vector<4x64xf32>
    %2104 = vector.broadcast %2102 : vector<1x64xf32> to vector<4x64xf32>
    %2105 = arith.mulf %2103, %2104 : vector<4x64xf32>
    %2106 = arith.addf %2100, %2105 : vector<4x64xf32>
    %2107 = vector.extract_strided_slice %2077 {offsets = [0, 5], sizes = [4, 1], strides = [1, 1]} : vector<4x6xf32> to vector<4x1xf32>
    %2108 = vector.extract_strided_slice %1827 {offsets = [5, 0], sizes = [1, 64], strides = [1, 1]} : vector<6x64xf32> to vector<1x64xf32>
    %2109 = vector.broadcast %2107 : vector<4x1xf32> to vector<4x64xf32>
    %2110 = vector.broadcast %2108 : vector<1x64xf32> to vector<4x64xf32>
    %2111 = arith.mulf %2109, %2110 : vector<4x64xf32>
    %2112 = arith.addf %2106, %2111 : vector<4x64xf32>
    %2113 = arith.addf %2076, %2112 : vector<4x64xf32>
    %2114 = vector.extract_strided_slice %1828 {offsets = [0, 9], sizes = [4, 1], strides = [1, 1]} : vector<6x10xf32> to vector<4x1xf32>
    %2115 = vector.broadcast %2114 : vector<4x1xf32> to vector<4x64xf32>
    %2116 = arith.addf %2113, %2115 : vector<4x64xf32>
    %c0_153 = arith.constant 0 : index
    %c0_154 = arith.constant 0 : index
    %2117 = vector.load %arg8[%c0_153, %c0_154] : memref<4x10xf32, #tpu.memory_space<vmem>>, vector<4x10xf32>
    %c0_155 = arith.constant 0 : index
    %c0_156 = arith.constant 0 : index
    %2118 = vector.load %arg9[%c0_155, %c0_156] : memref<24x4xf32, #tpu.memory_space<vmem>>, vector<24x4xf32>
    %2119 = vector.extract_strided_slice %2117 {offsets = [0, 0], sizes = [4, 1], strides = [1, 1]} : vector<4x10xf32> to vector<4x1xf32>
    %2120 = vector.broadcast %2119 : vector<4x1xf32> to vector<4x256xf32>
    %2121 = arith.mulf %1, %2120 : vector<4x256xf32>
    %2122 = vector.extract_strided_slice %2117 {offsets = [0, 1], sizes = [4, 1], strides = [1, 1]} : vector<4x10xf32> to vector<4x1xf32>
    %2123 = vector.broadcast %2122 : vector<4x1xf32> to vector<4x256xf32>
    %2124 = arith.addf %2121, %2123 : vector<4x256xf32>
    %cst_157 = arith.constant 0.000000e+00 : f32
    %2125 = vector.broadcast %cst_157 : f32 to vector<4x256xf32>
    %2126 = arith.maximumf %2124, %2125 : vector<4x256xf32>
    %2127 = vector.extract_strided_slice %2118 {offsets = [0, 0], sizes = [2, 4], strides = [1, 1]} : vector<24x4xf32> to vector<2x4xf32>
    %2128 = vector.extract_strided_slice %2127 {offsets = [0, 0], sizes = [2, 1], strides = [1, 1]} : vector<2x4xf32> to vector<2x1xf32>
    %2129 = vector.extract_strided_slice %2126 {offsets = [0, 0], sizes = [1, 256], strides = [1, 1]} : vector<4x256xf32> to vector<1x256xf32>
    %2130 = vector.broadcast %2128 : vector<2x1xf32> to vector<2x256xf32>
    %2131 = vector.broadcast %2129 : vector<1x256xf32> to vector<2x256xf32>
    %2132 = arith.mulf %2130, %2131 : vector<2x256xf32>
    %2133 = vector.extract_strided_slice %2127 {offsets = [0, 1], sizes = [2, 1], strides = [1, 1]} : vector<2x4xf32> to vector<2x1xf32>
    %2134 = vector.extract_strided_slice %2126 {offsets = [1, 0], sizes = [1, 256], strides = [1, 1]} : vector<4x256xf32> to vector<1x256xf32>
    %2135 = vector.broadcast %2133 : vector<2x1xf32> to vector<2x256xf32>
    %2136 = vector.broadcast %2134 : vector<1x256xf32> to vector<2x256xf32>
    %2137 = arith.mulf %2135, %2136 : vector<2x256xf32>
    %2138 = arith.addf %2132, %2137 : vector<2x256xf32>
    %2139 = vector.extract_strided_slice %2127 {offsets = [0, 2], sizes = [2, 1], strides = [1, 1]} : vector<2x4xf32> to vector<2x1xf32>
    %2140 = vector.extract_strided_slice %2126 {offsets = [2, 0], sizes = [1, 256], strides = [1, 1]} : vector<4x256xf32> to vector<1x256xf32>
    %2141 = vector.broadcast %2139 : vector<2x1xf32> to vector<2x256xf32>
    %2142 = vector.broadcast %2140 : vector<1x256xf32> to vector<2x256xf32>
    %2143 = arith.mulf %2141, %2142 : vector<2x256xf32>
    %2144 = arith.addf %2138, %2143 : vector<2x256xf32>
    %2145 = vector.extract_strided_slice %2127 {offsets = [0, 3], sizes = [2, 1], strides = [1, 1]} : vector<2x4xf32> to vector<2x1xf32>
    %2146 = vector.extract_strided_slice %2126 {offsets = [3, 0], sizes = [1, 256], strides = [1, 1]} : vector<4x256xf32> to vector<1x256xf32>
    %2147 = vector.broadcast %2145 : vector<2x1xf32> to vector<2x256xf32>
    %2148 = vector.broadcast %2146 : vector<1x256xf32> to vector<2x256xf32>
    %2149 = arith.mulf %2147, %2148 : vector<2x256xf32>
    %2150 = arith.addf %2144, %2149 : vector<2x256xf32>
    %2151 = vector.extract_strided_slice %2117 {offsets = [0, 2], sizes = [2, 1], strides = [1, 1]} : vector<4x10xf32> to vector<2x1xf32>
    %2152 = vector.broadcast %2151 : vector<2x1xf32> to vector<2x256xf32>
    %2153 = arith.addf %2150, %2152 : vector<2x256xf32>
    %2154 = vector.extract_strided_slice %2117 {offsets = [0, 3], sizes = [2, 1], strides = [1, 1]} : vector<4x10xf32> to vector<2x1xf32>
    %2155 = vector.broadcast %2154 : vector<2x1xf32> to vector<2x256xf32>
    %2156 = arith.mulf %2153, %2155 : vector<2x256xf32>
    %2157 = vector.extract_strided_slice %2117 {offsets = [0, 4], sizes = [2, 1], strides = [1, 1]} : vector<4x10xf32> to vector<2x1xf32>
    %2158 = vector.broadcast %2157 : vector<2x1xf32> to vector<2x256xf32>
    %2159 = arith.addf %2156, %2158 : vector<2x256xf32>
    %cst_158 = arith.constant 0.000000e+00 : f32
    %2160 = vector.broadcast %cst_158 : f32 to vector<2x256xf32>
    %2161 = arith.maximumf %2159, %2160 : vector<2x256xf32>
    %cst_159 = arith.constant 0.000000e+00 : f32
    %2162 = vector.broadcast %cst_159 : f32 to vector<2x256xf32>
    %2163 = vector.extract_strided_slice %2117 {offsets = [0, 5], sizes = [2, 1], strides = [1, 1]} : vector<4x10xf32> to vector<2x1xf32>
    %2164 = vector.broadcast %2163 : vector<2x1xf32> to vector<2x256xf32>
    %2165 = arith.addf %2162, %2164 : vector<2x256xf32>
    %c17_i32 = arith.constant 17 : i32
    %2166 = tpu.dynamic_rotate %2161 by %c17_i32 dim 1 : vector<2x256xf32>, i32 -> vector<2x256xf32>
    %2167 = vector.extract_strided_slice %4 {offsets = [0, 0], sizes = [1, 256], strides = [1, 1]} : vector<9x256xi1> to vector<1x256xi1>
    %cst_160 = arith.constant 0.000000e+00 : f32
    %2168 = vector.shape_cast %2167 : vector<1x256xi1> to vector<1x256xi1>
    %2169 = vector.broadcast %2168 : vector<1x256xi1> to vector<2x256xi1>
    %2170 = vector.broadcast %cst_160 : f32 to vector<2x256xf32>
    %2171 = arith.select %2169, %2166, %2170 : vector<2x256xi1>, vector<2x256xf32>
    %2172 = vector.extract_strided_slice %2118 {offsets = [2, 0], sizes = [2, 2], strides = [1, 1]} : vector<24x4xf32> to vector<2x2xf32>
    %2173 = vector.extract_strided_slice %2172 {offsets = [0, 0], sizes = [2, 1], strides = [1, 1]} : vector<2x2xf32> to vector<2x1xf32>
    %2174 = vector.extract_strided_slice %2171 {offsets = [0, 0], sizes = [1, 256], strides = [1, 1]} : vector<2x256xf32> to vector<1x256xf32>
    %2175 = vector.broadcast %2173 : vector<2x1xf32> to vector<2x256xf32>
    %2176 = vector.broadcast %2174 : vector<1x256xf32> to vector<2x256xf32>
    %2177 = arith.mulf %2175, %2176 : vector<2x256xf32>
    %2178 = vector.extract_strided_slice %2172 {offsets = [0, 1], sizes = [2, 1], strides = [1, 1]} : vector<2x2xf32> to vector<2x1xf32>
    %2179 = vector.extract_strided_slice %2171 {offsets = [1, 0], sizes = [1, 256], strides = [1, 1]} : vector<2x256xf32> to vector<1x256xf32>
    %2180 = vector.broadcast %2178 : vector<2x1xf32> to vector<2x256xf32>
    %2181 = vector.broadcast %2179 : vector<1x256xf32> to vector<2x256xf32>
    %2182 = arith.mulf %2180, %2181 : vector<2x256xf32>
    %2183 = arith.addf %2177, %2182 : vector<2x256xf32>
    %2184 = arith.addf %2165, %2183 : vector<2x256xf32>
    %c16_i32 = arith.constant 16 : i32
    %2185 = tpu.dynamic_rotate %2161 by %c16_i32 dim 1 : vector<2x256xf32>, i32 -> vector<2x256xf32>
    %2186 = vector.extract_strided_slice %4 {offsets = [1, 0], sizes = [1, 256], strides = [1, 1]} : vector<9x256xi1> to vector<1x256xi1>
    %cst_161 = arith.constant 0.000000e+00 : f32
    %2187 = vector.shape_cast %2186 : vector<1x256xi1> to vector<1x256xi1>
    %2188 = vector.broadcast %2187 : vector<1x256xi1> to vector<2x256xi1>
    %2189 = vector.broadcast %cst_161 : f32 to vector<2x256xf32>
    %2190 = arith.select %2188, %2185, %2189 : vector<2x256xi1>, vector<2x256xf32>
    %2191 = vector.extract_strided_slice %2118 {offsets = [4, 0], sizes = [2, 2], strides = [1, 1]} : vector<24x4xf32> to vector<2x2xf32>
    %2192 = vector.extract_strided_slice %2191 {offsets = [0, 0], sizes = [2, 1], strides = [1, 1]} : vector<2x2xf32> to vector<2x1xf32>
    %2193 = vector.extract_strided_slice %2190 {offsets = [0, 0], sizes = [1, 256], strides = [1, 1]} : vector<2x256xf32> to vector<1x256xf32>
    %2194 = vector.broadcast %2192 : vector<2x1xf32> to vector<2x256xf32>
    %2195 = vector.broadcast %2193 : vector<1x256xf32> to vector<2x256xf32>
    %2196 = arith.mulf %2194, %2195 : vector<2x256xf32>
    %2197 = vector.extract_strided_slice %2191 {offsets = [0, 1], sizes = [2, 1], strides = [1, 1]} : vector<2x2xf32> to vector<2x1xf32>
    %2198 = vector.extract_strided_slice %2190 {offsets = [1, 0], sizes = [1, 256], strides = [1, 1]} : vector<2x256xf32> to vector<1x256xf32>
    %2199 = vector.broadcast %2197 : vector<2x1xf32> to vector<2x256xf32>
    %2200 = vector.broadcast %2198 : vector<1x256xf32> to vector<2x256xf32>
    %2201 = arith.mulf %2199, %2200 : vector<2x256xf32>
    %2202 = arith.addf %2196, %2201 : vector<2x256xf32>
    %2203 = arith.addf %2184, %2202 : vector<2x256xf32>
    %c15_i32_162 = arith.constant 15 : i32
    %2204 = tpu.dynamic_rotate %2161 by %c15_i32_162 dim 1 : vector<2x256xf32>, i32 -> vector<2x256xf32>
    %2205 = vector.extract_strided_slice %4 {offsets = [2, 0], sizes = [1, 256], strides = [1, 1]} : vector<9x256xi1> to vector<1x256xi1>
    %cst_163 = arith.constant 0.000000e+00 : f32
    %2206 = vector.shape_cast %2205 : vector<1x256xi1> to vector<1x256xi1>
    %2207 = vector.broadcast %2206 : vector<1x256xi1> to vector<2x256xi1>
    %2208 = vector.broadcast %cst_163 : f32 to vector<2x256xf32>
    %2209 = arith.select %2207, %2204, %2208 : vector<2x256xi1>, vector<2x256xf32>
    %2210 = vector.extract_strided_slice %2118 {offsets = [6, 0], sizes = [2, 2], strides = [1, 1]} : vector<24x4xf32> to vector<2x2xf32>
    %2211 = vector.extract_strided_slice %2210 {offsets = [0, 0], sizes = [2, 1], strides = [1, 1]} : vector<2x2xf32> to vector<2x1xf32>
    %2212 = vector.extract_strided_slice %2209 {offsets = [0, 0], sizes = [1, 256], strides = [1, 1]} : vector<2x256xf32> to vector<1x256xf32>
    %2213 = vector.broadcast %2211 : vector<2x1xf32> to vector<2x256xf32>
    %2214 = vector.broadcast %2212 : vector<1x256xf32> to vector<2x256xf32>
    %2215 = arith.mulf %2213, %2214 : vector<2x256xf32>
    %2216 = vector.extract_strided_slice %2210 {offsets = [0, 1], sizes = [2, 1], strides = [1, 1]} : vector<2x2xf32> to vector<2x1xf32>
    %2217 = vector.extract_strided_slice %2209 {offsets = [1, 0], sizes = [1, 256], strides = [1, 1]} : vector<2x256xf32> to vector<1x256xf32>
    %2218 = vector.broadcast %2216 : vector<2x1xf32> to vector<2x256xf32>
    %2219 = vector.broadcast %2217 : vector<1x256xf32> to vector<2x256xf32>
    %2220 = arith.mulf %2218, %2219 : vector<2x256xf32>
    %2221 = arith.addf %2215, %2220 : vector<2x256xf32>
    %2222 = arith.addf %2203, %2221 : vector<2x256xf32>
    %c1_i32_164 = arith.constant 1 : i32
    %2223 = tpu.dynamic_rotate %2161 by %c1_i32_164 dim 1 : vector<2x256xf32>, i32 -> vector<2x256xf32>
    %2224 = vector.extract_strided_slice %4 {offsets = [3, 0], sizes = [1, 256], strides = [1, 1]} : vector<9x256xi1> to vector<1x256xi1>
    %cst_165 = arith.constant 0.000000e+00 : f32
    %2225 = vector.shape_cast %2224 : vector<1x256xi1> to vector<1x256xi1>
    %2226 = vector.broadcast %2225 : vector<1x256xi1> to vector<2x256xi1>
    %2227 = vector.broadcast %cst_165 : f32 to vector<2x256xf32>
    %2228 = arith.select %2226, %2223, %2227 : vector<2x256xi1>, vector<2x256xf32>
    %2229 = vector.extract_strided_slice %2118 {offsets = [8, 0], sizes = [2, 2], strides = [1, 1]} : vector<24x4xf32> to vector<2x2xf32>
    %2230 = vector.extract_strided_slice %2229 {offsets = [0, 0], sizes = [2, 1], strides = [1, 1]} : vector<2x2xf32> to vector<2x1xf32>
    %2231 = vector.extract_strided_slice %2228 {offsets = [0, 0], sizes = [1, 256], strides = [1, 1]} : vector<2x256xf32> to vector<1x256xf32>
    %2232 = vector.broadcast %2230 : vector<2x1xf32> to vector<2x256xf32>
    %2233 = vector.broadcast %2231 : vector<1x256xf32> to vector<2x256xf32>
    %2234 = arith.mulf %2232, %2233 : vector<2x256xf32>
    %2235 = vector.extract_strided_slice %2229 {offsets = [0, 1], sizes = [2, 1], strides = [1, 1]} : vector<2x2xf32> to vector<2x1xf32>
    %2236 = vector.extract_strided_slice %2228 {offsets = [1, 0], sizes = [1, 256], strides = [1, 1]} : vector<2x256xf32> to vector<1x256xf32>
    %2237 = vector.broadcast %2235 : vector<2x1xf32> to vector<2x256xf32>
    %2238 = vector.broadcast %2236 : vector<1x256xf32> to vector<2x256xf32>
    %2239 = arith.mulf %2237, %2238 : vector<2x256xf32>
    %2240 = arith.addf %2234, %2239 : vector<2x256xf32>
    %2241 = arith.addf %2222, %2240 : vector<2x256xf32>
    %2242 = vector.extract_strided_slice %2118 {offsets = [10, 0], sizes = [2, 2], strides = [1, 1]} : vector<24x4xf32> to vector<2x2xf32>
    %2243 = vector.extract_strided_slice %2242 {offsets = [0, 0], sizes = [2, 1], strides = [1, 1]} : vector<2x2xf32> to vector<2x1xf32>
    %2244 = vector.extract_strided_slice %2161 {offsets = [0, 0], sizes = [1, 256], strides = [1, 1]} : vector<2x256xf32> to vector<1x256xf32>
    %2245 = vector.broadcast %2243 : vector<2x1xf32> to vector<2x256xf32>
    %2246 = vector.broadcast %2244 : vector<1x256xf32> to vector<2x256xf32>
    %2247 = arith.mulf %2245, %2246 : vector<2x256xf32>
    %2248 = vector.extract_strided_slice %2242 {offsets = [0, 1], sizes = [2, 1], strides = [1, 1]} : vector<2x2xf32> to vector<2x1xf32>
    %2249 = vector.extract_strided_slice %2161 {offsets = [1, 0], sizes = [1, 256], strides = [1, 1]} : vector<2x256xf32> to vector<1x256xf32>
    %2250 = vector.broadcast %2248 : vector<2x1xf32> to vector<2x256xf32>
    %2251 = vector.broadcast %2249 : vector<1x256xf32> to vector<2x256xf32>
    %2252 = arith.mulf %2250, %2251 : vector<2x256xf32>
    %2253 = arith.addf %2247, %2252 : vector<2x256xf32>
    %2254 = arith.addf %2241, %2253 : vector<2x256xf32>
    %c255_i32_166 = arith.constant 255 : i32
    %2255 = tpu.dynamic_rotate %2161 by %c255_i32_166 dim 1 : vector<2x256xf32>, i32 -> vector<2x256xf32>
    %2256 = vector.extract_strided_slice %4 {offsets = [5, 0], sizes = [1, 256], strides = [1, 1]} : vector<9x256xi1> to vector<1x256xi1>
    %cst_167 = arith.constant 0.000000e+00 : f32
    %2257 = vector.shape_cast %2256 : vector<1x256xi1> to vector<1x256xi1>
    %2258 = vector.broadcast %2257 : vector<1x256xi1> to vector<2x256xi1>
    %2259 = vector.broadcast %cst_167 : f32 to vector<2x256xf32>
    %2260 = arith.select %2258, %2255, %2259 : vector<2x256xi1>, vector<2x256xf32>
    %2261 = vector.extract_strided_slice %2118 {offsets = [12, 0], sizes = [2, 2], strides = [1, 1]} : vector<24x4xf32> to vector<2x2xf32>
    %2262 = vector.extract_strided_slice %2261 {offsets = [0, 0], sizes = [2, 1], strides = [1, 1]} : vector<2x2xf32> to vector<2x1xf32>
    %2263 = vector.extract_strided_slice %2260 {offsets = [0, 0], sizes = [1, 256], strides = [1, 1]} : vector<2x256xf32> to vector<1x256xf32>
    %2264 = vector.broadcast %2262 : vector<2x1xf32> to vector<2x256xf32>
    %2265 = vector.broadcast %2263 : vector<1x256xf32> to vector<2x256xf32>
    %2266 = arith.mulf %2264, %2265 : vector<2x256xf32>
    %2267 = vector.extract_strided_slice %2261 {offsets = [0, 1], sizes = [2, 1], strides = [1, 1]} : vector<2x2xf32> to vector<2x1xf32>
    %2268 = vector.extract_strided_slice %2260 {offsets = [1, 0], sizes = [1, 256], strides = [1, 1]} : vector<2x256xf32> to vector<1x256xf32>
    %2269 = vector.broadcast %2267 : vector<2x1xf32> to vector<2x256xf32>
    %2270 = vector.broadcast %2268 : vector<1x256xf32> to vector<2x256xf32>
    %2271 = arith.mulf %2269, %2270 : vector<2x256xf32>
    %2272 = arith.addf %2266, %2271 : vector<2x256xf32>
    %2273 = arith.addf %2254, %2272 : vector<2x256xf32>
    %c241_i32 = arith.constant 241 : i32
    %2274 = tpu.dynamic_rotate %2161 by %c241_i32 dim 1 : vector<2x256xf32>, i32 -> vector<2x256xf32>
    %2275 = vector.extract_strided_slice %4 {offsets = [6, 0], sizes = [1, 256], strides = [1, 1]} : vector<9x256xi1> to vector<1x256xi1>
    %cst_168 = arith.constant 0.000000e+00 : f32
    %2276 = vector.shape_cast %2275 : vector<1x256xi1> to vector<1x256xi1>
    %2277 = vector.broadcast %2276 : vector<1x256xi1> to vector<2x256xi1>
    %2278 = vector.broadcast %cst_168 : f32 to vector<2x256xf32>
    %2279 = arith.select %2277, %2274, %2278 : vector<2x256xi1>, vector<2x256xf32>
    %2280 = vector.extract_strided_slice %2118 {offsets = [14, 0], sizes = [2, 2], strides = [1, 1]} : vector<24x4xf32> to vector<2x2xf32>
    %2281 = vector.extract_strided_slice %2280 {offsets = [0, 0], sizes = [2, 1], strides = [1, 1]} : vector<2x2xf32> to vector<2x1xf32>
    %2282 = vector.extract_strided_slice %2279 {offsets = [0, 0], sizes = [1, 256], strides = [1, 1]} : vector<2x256xf32> to vector<1x256xf32>
    %2283 = vector.broadcast %2281 : vector<2x1xf32> to vector<2x256xf32>
    %2284 = vector.broadcast %2282 : vector<1x256xf32> to vector<2x256xf32>
    %2285 = arith.mulf %2283, %2284 : vector<2x256xf32>
    %2286 = vector.extract_strided_slice %2280 {offsets = [0, 1], sizes = [2, 1], strides = [1, 1]} : vector<2x2xf32> to vector<2x1xf32>
    %2287 = vector.extract_strided_slice %2279 {offsets = [1, 0], sizes = [1, 256], strides = [1, 1]} : vector<2x256xf32> to vector<1x256xf32>
    %2288 = vector.broadcast %2286 : vector<2x1xf32> to vector<2x256xf32>
    %2289 = vector.broadcast %2287 : vector<1x256xf32> to vector<2x256xf32>
    %2290 = arith.mulf %2288, %2289 : vector<2x256xf32>
    %2291 = arith.addf %2285, %2290 : vector<2x256xf32>
    %2292 = arith.addf %2273, %2291 : vector<2x256xf32>
    %c240_i32_169 = arith.constant 240 : i32
    %2293 = tpu.dynamic_rotate %2161 by %c240_i32_169 dim 1 : vector<2x256xf32>, i32 -> vector<2x256xf32>
    %2294 = vector.extract_strided_slice %4 {offsets = [7, 0], sizes = [1, 256], strides = [1, 1]} : vector<9x256xi1> to vector<1x256xi1>
    %cst_170 = arith.constant 0.000000e+00 : f32
    %2295 = vector.shape_cast %2294 : vector<1x256xi1> to vector<1x256xi1>
    %2296 = vector.broadcast %2295 : vector<1x256xi1> to vector<2x256xi1>
    %2297 = vector.broadcast %cst_170 : f32 to vector<2x256xf32>
    %2298 = arith.select %2296, %2293, %2297 : vector<2x256xi1>, vector<2x256xf32>
    %2299 = vector.extract_strided_slice %2118 {offsets = [16, 0], sizes = [2, 2], strides = [1, 1]} : vector<24x4xf32> to vector<2x2xf32>
    %2300 = vector.extract_strided_slice %2299 {offsets = [0, 0], sizes = [2, 1], strides = [1, 1]} : vector<2x2xf32> to vector<2x1xf32>
    %2301 = vector.extract_strided_slice %2298 {offsets = [0, 0], sizes = [1, 256], strides = [1, 1]} : vector<2x256xf32> to vector<1x256xf32>
    %2302 = vector.broadcast %2300 : vector<2x1xf32> to vector<2x256xf32>
    %2303 = vector.broadcast %2301 : vector<1x256xf32> to vector<2x256xf32>
    %2304 = arith.mulf %2302, %2303 : vector<2x256xf32>
    %2305 = vector.extract_strided_slice %2299 {offsets = [0, 1], sizes = [2, 1], strides = [1, 1]} : vector<2x2xf32> to vector<2x1xf32>
    %2306 = vector.extract_strided_slice %2298 {offsets = [1, 0], sizes = [1, 256], strides = [1, 1]} : vector<2x256xf32> to vector<1x256xf32>
    %2307 = vector.broadcast %2305 : vector<2x1xf32> to vector<2x256xf32>
    %2308 = vector.broadcast %2306 : vector<1x256xf32> to vector<2x256xf32>
    %2309 = arith.mulf %2307, %2308 : vector<2x256xf32>
    %2310 = arith.addf %2304, %2309 : vector<2x256xf32>
    %2311 = arith.addf %2292, %2310 : vector<2x256xf32>
    %c239_i32 = arith.constant 239 : i32
    %2312 = tpu.dynamic_rotate %2161 by %c239_i32 dim 1 : vector<2x256xf32>, i32 -> vector<2x256xf32>
    %2313 = vector.extract_strided_slice %4 {offsets = [8, 0], sizes = [1, 256], strides = [1, 1]} : vector<9x256xi1> to vector<1x256xi1>
    %cst_171 = arith.constant 0.000000e+00 : f32
    %2314 = vector.shape_cast %2313 : vector<1x256xi1> to vector<1x256xi1>
    %2315 = vector.broadcast %2314 : vector<1x256xi1> to vector<2x256xi1>
    %2316 = vector.broadcast %cst_171 : f32 to vector<2x256xf32>
    %2317 = arith.select %2315, %2312, %2316 : vector<2x256xi1>, vector<2x256xf32>
    %2318 = vector.extract_strided_slice %2118 {offsets = [18, 0], sizes = [2, 2], strides = [1, 1]} : vector<24x4xf32> to vector<2x2xf32>
    %2319 = vector.extract_strided_slice %2318 {offsets = [0, 0], sizes = [2, 1], strides = [1, 1]} : vector<2x2xf32> to vector<2x1xf32>
    %2320 = vector.extract_strided_slice %2317 {offsets = [0, 0], sizes = [1, 256], strides = [1, 1]} : vector<2x256xf32> to vector<1x256xf32>
    %2321 = vector.broadcast %2319 : vector<2x1xf32> to vector<2x256xf32>
    %2322 = vector.broadcast %2320 : vector<1x256xf32> to vector<2x256xf32>
    %2323 = arith.mulf %2321, %2322 : vector<2x256xf32>
    %2324 = vector.extract_strided_slice %2318 {offsets = [0, 1], sizes = [2, 1], strides = [1, 1]} : vector<2x2xf32> to vector<2x1xf32>
    %2325 = vector.extract_strided_slice %2317 {offsets = [1, 0], sizes = [1, 256], strides = [1, 1]} : vector<2x256xf32> to vector<1x256xf32>
    %2326 = vector.broadcast %2324 : vector<2x1xf32> to vector<2x256xf32>
    %2327 = vector.broadcast %2325 : vector<1x256xf32> to vector<2x256xf32>
    %2328 = arith.mulf %2326, %2327 : vector<2x256xf32>
    %2329 = arith.addf %2323, %2328 : vector<2x256xf32>
    %2330 = arith.addf %2311, %2329 : vector<2x256xf32>
    %2331 = vector.extract_strided_slice %2117 {offsets = [0, 6], sizes = [2, 1], strides = [1, 1]} : vector<4x10xf32> to vector<2x1xf32>
    %2332 = vector.broadcast %2331 : vector<2x1xf32> to vector<2x256xf32>
    %2333 = arith.mulf %2330, %2332 : vector<2x256xf32>
    %2334 = vector.extract_strided_slice %2117 {offsets = [0, 7], sizes = [2, 1], strides = [1, 1]} : vector<4x10xf32> to vector<2x1xf32>
    %2335 = vector.broadcast %2334 : vector<2x1xf32> to vector<2x256xf32>
    %2336 = arith.addf %2333, %2335 : vector<2x256xf32>
    %cst_172 = arith.constant 0.000000e+00 : f32
    %2337 = vector.broadcast %cst_172 : f32 to vector<2x256xf32>
    %2338 = arith.maximumf %2336, %2337 : vector<2x256xf32>
    %2339 = vector.extract_strided_slice %2118 {offsets = [20, 0], sizes = [4, 2], strides = [1, 1]} : vector<24x4xf32> to vector<4x2xf32>
    %2340 = vector.extract_strided_slice %2339 {offsets = [0, 0], sizes = [4, 1], strides = [1, 1]} : vector<4x2xf32> to vector<4x1xf32>
    %2341 = vector.extract_strided_slice %2338 {offsets = [0, 0], sizes = [1, 256], strides = [1, 1]} : vector<2x256xf32> to vector<1x256xf32>
    %2342 = vector.broadcast %2340 : vector<4x1xf32> to vector<4x256xf32>
    %2343 = vector.broadcast %2341 : vector<1x256xf32> to vector<4x256xf32>
    %2344 = arith.mulf %2342, %2343 : vector<4x256xf32>
    %2345 = vector.extract_strided_slice %2339 {offsets = [0, 1], sizes = [4, 1], strides = [1, 1]} : vector<4x2xf32> to vector<4x1xf32>
    %2346 = vector.extract_strided_slice %2338 {offsets = [1, 0], sizes = [1, 256], strides = [1, 1]} : vector<2x256xf32> to vector<1x256xf32>
    %2347 = vector.broadcast %2345 : vector<4x1xf32> to vector<4x256xf32>
    %2348 = vector.broadcast %2346 : vector<1x256xf32> to vector<4x256xf32>
    %2349 = arith.mulf %2347, %2348 : vector<4x256xf32>
    %2350 = arith.addf %2344, %2349 : vector<4x256xf32>
    %2351 = vector.extract_strided_slice %2117 {offsets = [0, 8], sizes = [4, 1], strides = [1, 1]} : vector<4x10xf32> to vector<4x1xf32>
    %2352 = vector.broadcast %2351 : vector<4x1xf32> to vector<4x256xf32>
    %2353 = arith.addf %2350, %2352 : vector<4x256xf32>
    %2354 = arith.addf %2353, %1 : vector<4x256xf32>
    %c0_173 = arith.constant 0 : index
    %c0_174 = arith.constant 0 : index
    %2355 = vector.load %arg4[%c0_173, %c0_174] : memref<64x256xf32, #tpu.memory_space<vmem>>, vector<64x256xf32>
    %cst_175 = arith.constant dense<0.000000e+00> : vector<4x256xf32>
    %2356 = tpu.matmul %2116, %2355, %cst_175 {dimension_numbers = #tpu.dot_dimension_numbers<[1], [0], [0], [1], [0, 0, 1, 1], [], []>} : vector<4x64xf32>, vector<64x256xf32>, vector<4x256xf32> -> vector<4x256xf32>
    %2357 = arith.addf %2354, %2356 : vector<4x256xf32>
    %c0_176 = arith.constant 0 : index
    %c0_177 = arith.constant 0 : index
    %c0_178 = arith.constant 0 : index
    %2358 = vector.load %arg23[%c0_176, %c0_177, %c0_178] : memref<1x4x256xf32, #tpu.memory_space<vmem>>, vector<1x4x256xf32>
    %2359 = vector.shape_cast %2358 : vector<1x4x256xf32> to vector<4x256xf32>
    %2360 = vector.shape_cast %2357 : vector<4x256xf32> to vector<1x4x256xf32>
    tpu.vector_store %arg23[%c0_176, %c0_177, %c0_178], %2360 {strides = array<i32>} : memref<1x4x256xf32, #tpu.memory_space<vmem>>, vector<1x4x256xf32>,
    return
  }
  func.func @transform_0(%arg0: i32) -> (i32, i32) {
    %c0_i32 = arith.constant 0 : i32
    %c0_i32_0 = arith.constant 0 : i32
    %c0_i32_1 = arith.constant 0 : i32
    return %c0_i32, %c0_i32_0 : i32, i32
  }
  func.func @transform_1(%arg0: i32) -> (i32, i32) {
    %c0_i32 = arith.constant 0 : i32
    %c0_i32_0 = arith.constant 0 : i32
    %c0_i32_1 = arith.constant 0 : i32
    return %c0_i32, %c0_i32_0 : i32, i32
  }
  func.func @transform_2(%arg0: i32) -> (i32, i32) {
    %c0_i32 = arith.constant 0 : i32
    %c0_i32_0 = arith.constant 0 : i32
    %c0_i32_1 = arith.constant 0 : i32
    return %c0_i32, %c0_i32_0 : i32, i32
  }
  func.func @transform_3(%arg0: i32) -> (i32, i32) {
    %c0_i32 = arith.constant 0 : i32
    %c0_i32_0 = arith.constant 0 : i32
    %c0_i32_1 = arith.constant 0 : i32
    return %c0_i32, %c0_i32_0 : i32, i32
  }
  func.func @transform_4(%arg0: i32) -> (i32, i32) {
    %c0_i32 = arith.constant 0 : i32
    %c0_i32_0 = arith.constant 0 : i32
    %c0_i32_1 = arith.constant 0 : i32
    return %c0_i32, %c0_i32_0 : i32, i32
  }
  func.func @transform_5(%arg0: i32) -> (i32, i32) {
    %c0_i32 = arith.constant 0 : i32
    %c0_i32_0 = arith.constant 0 : i32
    %c0_i32_1 = arith.constant 0 : i32
    return %c0_i32, %c0_i32_0 : i32, i32
  }
  func.func @transform_6(%arg0: i32) -> (i32, i32) {
    %c0_i32 = arith.constant 0 : i32
    %c0_i32_0 = arith.constant 0 : i32
    %c0_i32_1 = arith.constant 0 : i32
    return %c0_i32, %c0_i32_0 : i32, i32
  }
  func.func @transform_7(%arg0: i32) -> (i32, i32) {
    %c0_i32 = arith.constant 0 : i32
    %c0_i32_0 = arith.constant 0 : i32
    %c0_i32_1 = arith.constant 0 : i32
    return %c0_i32, %c0_i32_0 : i32, i32
  }
  func.func @transform_8(%arg0: i32) -> (i32, i32) {
    %c0_i32 = arith.constant 0 : i32
    %c0_i32_0 = arith.constant 0 : i32
    %c0_i32_1 = arith.constant 0 : i32
    return %c0_i32, %c0_i32_0 : i32, i32
  }
  func.func @transform_9(%arg0: i32) -> (i32, i32) {
    %c0_i32 = arith.constant 0 : i32
    %c0_i32_0 = arith.constant 0 : i32
    %c0_i32_1 = arith.constant 0 : i32
    return %c0_i32, %c0_i32_0 : i32, i32
  }
  func.func @transform_10(%arg0: i32) -> (i32, i32) {
    %c0_i32 = arith.constant 0 : i32
    %c0_i32_0 = arith.constant 0 : i32
    %c0_i32_1 = arith.constant 0 : i32
    return %c0_i32, %c0_i32_0 : i32, i32
  }
  func.func @transform_11(%arg0: i32) -> (i32, i32) {
    %c0_i32 = arith.constant 0 : i32
    %c0_i32_0 = arith.constant 0 : i32
    %c0_i32_1 = arith.constant 0 : i32
    return %c0_i32, %c0_i32_0 : i32, i32
  }
  func.func @transform_12(%arg0: i32) -> (i32, i32) {
    %c0_i32 = arith.constant 0 : i32
    %c0_i32_0 = arith.constant 0 : i32
    %c0_i32_1 = arith.constant 0 : i32
    return %c0_i32, %c0_i32_0 : i32, i32
  }
  func.func @transform_13(%arg0: i32) -> (i32, i32) {
    %c0_i32 = arith.constant 0 : i32
    %c0_i32_0 = arith.constant 0 : i32
    %c0_i32_1 = arith.constant 0 : i32
    return %c0_i32, %c0_i32_0 : i32, i32
  }
  func.func @transform_14(%arg0: i32) -> (i32, i32) {
    %c0_i32 = arith.constant 0 : i32
    %c0_i32_0 = arith.constant 0 : i32
    %c0_i32_1 = arith.constant 0 : i32
    return %c0_i32, %c0_i32_0 : i32, i32
  }
  func.func @transform_15(%arg0: i32) -> (i32, i32) {
    %c0_i32 = arith.constant 0 : i32
    %c0_i32_0 = arith.constant 0 : i32
    %c0_i32_1 = arith.constant 0 : i32
    return %c0_i32, %c0_i32_0 : i32, i32
  }
  func.func @transform_16(%arg0: i32) -> (i32, i32) {
    %c0_i32 = arith.constant 0 : i32
    %c0_i32_0 = arith.constant 0 : i32
    %c0_i32_1 = arith.constant 0 : i32
    return %c0_i32, %c0_i32_0 : i32, i32
  }
  func.func @transform_17(%arg0: i32) -> (i32, i32) {
    %c0_i32 = arith.constant 0 : i32
    %c0_i32_0 = arith.constant 0 : i32
    %c0_i32_1 = arith.constant 0 : i32
    return %c0_i32, %c0_i32_0 : i32, i32
  }
  func.func @transform_18(%arg0: i32) -> (i32, i32) {
    %c0_i32 = arith.constant 0 : i32
    %c0_i32_0 = arith.constant 0 : i32
    %c0_i32_1 = arith.constant 0 : i32
    return %c0_i32, %c0_i32_0 : i32, i32
  }
  func.func @transform_19(%arg0: i32) -> (i32, i32) {
    %c0_i32 = arith.constant 0 : i32
    %c0_i32_0 = arith.constant 0 : i32
    %c0_i32_1 = arith.constant 0 : i32
    return %c0_i32, %c0_i32_0 : i32, i32
  }
  func.func @transform_20(%arg0: i32) -> (i32, i32) {
    %c0_i32 = arith.constant 0 : i32
    %c0_i32_0 = arith.constant 0 : i32
    %c0_i32_1 = arith.constant 0 : i32
    return %c0_i32, %c0_i32_0 : i32, i32
  }
  func.func @transform_21(%arg0: i32) -> (i32, i32, i32) {
    %c0_i32 = arith.constant 0 : i32
    %c0_i32_0 = arith.constant 0 : i32
    %c0_i32_1 = arith.constant 0 : i32
    return %arg0, %c0_i32, %c0_i32_0 : i32, i32, i32
  }
  func.func @transform_22(%arg0: i32) -> (i32, i32, i32) {
    %c0_i32 = arith.constant 0 : i32
    %c0_i32_0 = arith.constant 0 : i32
    %c0_i32_1 = arith.constant 0 : i32
    return %arg0, %c0_i32, %c0_i32_0 : i32, i32, i32
  }
}

</mosaic_0001>

<bundles_post_ra>
// kernel: tpu_custom_call.1
= control target key start
LH: loop header
LB: loop body
LE: loop exit
PB: predicated region body
PF: predicated region fallthrough
CT: control target
= control target key end

     0   :  { %s8396_s0 = inlined_call_operand.vmem [shape: f32[9,256], index: 0, kind: input, shape index: {}]   ;;  %s8397_s1 = inlined_call_operand.vmem [shape: f32[9,64], index: 1, kind: input, shape index: {}]   ;;  %s8398_s2 = inlined_call_operand.vmem [shape: f32[256,64], index: 2, kind: input, shape index: {}]   ;;  %s8399_s3 = inlined_call_operand.vmem [shape: f32[64,256], index: 3, kind: input, shape index: {}]   ;;  %s8400_s4 = inlined_call_operand.vmem [shape: f32[9,16], index: 4, kind: input, shape index: {}]   ;;  %s8401_s5 = inlined_call_operand.vmem [shape: f32[64,16], index: 5, kind: input, shape index: {}]   ;;  %s8402_s6 = inlined_call_operand.vmem [shape: f32[16,64], index: 6, kind: input, shape index: {}]   ;;  %s8403_s7 = inlined_call_operand.vmem [shape: f32[4,10], index: 7, kind: input, shape index: {}]   ;;  %s8404_s8 = inlined_call_operand.vmem [shape: f32[24,4], index: 8, kind: input, shape index: {}]   ;;  %s8405_s9 = inlined_call_operand.vmem [shape: f32[6,10], index: 9, kind: input, shape index: {}]   ;;  %s8406_s10 = inlined_call_operand.vmem [shape: f32[42,4], index: 10, kind: input, shape index: {}]   ;;  %s8407_s11 = inlined_call_operand.vmem [shape: f32[6,10], index: 11, kind: input, shape index: {}]   ;;  %s8408_s12 = inlined_call_operand.vmem [shape: f32[28,6], index: 12, kind: input, shape index: {}]   ;;  %s8409_s13 = inlined_call_operand.vmem [shape: f32[6,10], index: 13, kind: input, shape index: {}]   ;;  %s8410_s14 = inlined_call_operand.vmem [shape: f32[36,6], index: 14, kind: input, shape index: {}]   ;;  %s8411_s15 = inlined_call_operand.vmem [shape: f32[8,10], index: 15, kind: input, shape index: {}]   ;;  %s8412_s16 = inlined_call_operand.vmem [shape: f32[56,6], index: 16, kind: input, shape index: {}]   ;;  %s8413_s17 = inlined_call_operand.vmem [shape: f32[8,10], index: 17, kind: input, shape index: {}]   ;;  %s8414_s18 = inlined_call_operand.vmem [shape: f32[42,8], index: 18, kind: input, shape index: {}]   ;;  %s8415_s19 = inlined_call_operand.vmem [shape: f32[8,10], index: 19, kind: input, shape index: {}]   ;;  %s8416_s20 = inlined_call_operand.vmem [shape: f32[48,8], index: 20, kind: input, shape index: {}]   ;;  %s8417_s21 = inlined_call_operand.vmem [shape: f32[2,4,256], index: 21, kind: input, shape index: {}]   ;;  %s8418_s22 = inlined_call_operand.hbm [shape: f32[2,4,256], index: 22, kind: output, shape index: {}]  }
   0x1   :  { %8555 = sst [smem:[#allocation27_spill]] %s8396_s0 }
   0x2   :  { %8556 = sst [smem:[#allocation28_spill]] %s8397_s1 }
   0x3   :  { %8557 = sst [smem:[#allocation29_spill]] %s8398_s2 }
   0x4   :  { %8558 = sst [smem:[#allocation30_spill]] %s8399_s3 }
   0x5   :  { %8559 = sst [smem:[#allocation31_spill]] %s8400_s4 }
   0x6   :  { %8560 = sst [smem:[#allocation32_spill]] %s8401_s5 }
   0x7   :  { %8561 = sst [smem:[#allocation33_spill]] %s8402_s6 }
   0x8   :  { %8562 = sst [smem:[#allocation34_spill]] %s8405_s9 }
   0x9   :  { %8563 = sst [smem:[#allocation35_spill]] %s8406_s10 }
   0xa   :  { %8564 = sst [smem:[#allocation36_spill]] %s8409_s13 }
   0xb   :  { %8565 = sst [smem:[#allocation37_spill]] %s8411_s15 }
   0xc   :  { %8566 = sst [smem:[#allocation38_spill]] %s8412_s16 }
   0xd   :  { %8567 = sst [smem:[#allocation39_spill]] %s8415_s19 }
   0xe   :  { %8568 = sst [smem:[#allocation40_spill]] %s8417_s21 }
   0xf   :  { %27 = vsyncpa [#allocation3], 0 }
  0x10   :  { %29 = vsyncpa [#allocation3 + $0x1], 0  ;;  %s5878_s3 = smov 0   ;;  %s5880_s28 = smov 0  }
  0x11   :  { %s5882_s29 = smov 0   ;;  %s5884_s30 = smov 0  }
  0x12 LB: > { %8569 = sst [smem:[#allocation5_spill]] %s5713_s3  ;;  %s5899_s4 = sadd.s32 4294967295, %s5725_s30   ;;  %s5725_s30 = sphi %s5884_s30, %s8709_s30   ;;  %s5721_s29 = sphi %s5882_s29, %s8711_s29   ;;  %s5717_s28 = sphi %s5880_s28, %s8713_s28   ;;  %s5713_s3 = sphi %s5878_s3, %s8712_s3  }
  0x13   : > { %8570 = sst [smem:[#allocation6_spill]] %s5721_s29  ;;  %s5309_s0 = sadd.s32 4294967294, %s5725_s30  }
  0x14   : > { %8571 = sst [smem:[#allocation7_spill]] %s5725_s30  ;;  %s5903_s23 = sadd.s32 1, %s5725_s30  }
  0x15   : > { %8572 = sst [smem:[#allocation8_spill]] %s5903_s23  ;;  %s509_s1 = sadd.s32 1, %s5721_s29 }
  0x16   : > { %s506_s5 = ssub.s32 %s5725_s30, %s5903_s23  ;;  %p519_p0 = scmp.ne.s32.totalorder %s5721_s29, %s5717_s28 }
  0x17   : > { %p507_p1 = scmp.eq.s32.totalorder %s506_s5, 0  ;;  %p520_p2 = scmp.eq.s32.totalorder %s5899_s4, 1 }
  0x18   : > { %p525_p3 = scmp.ne.s32.totalorder %s5717_s28, %s5713_s3  ;;  %p526_p4 = scmp.eq.s32.totalorder %s5309_s0, 1 }
  0x19   : > { %s5914_s24 = scalar_select %p507_p1, %s5721_s29, %s509_s1  }
  0x1a   : > { %p5916_p5 = por %p520_p2, %p519_p0  ;;  %p5920_p6 = por %p526_p4, %p525_p3 }
  0x1b   : > { %8573 = sst [smem:[#allocation9_spill]] %s5914_s24  ;;  %p5312_p7 = scmp.ge.s32.totalorder %s5725_s30, 1 }
  0x1c   : > { %s8575_s25 = scalar_select %p5920_p6, 1, 0 }
  0x1d   : > { %p615_p8 = scmp.lt.s32.totalorder %s5725_s30, 3 }
  0x1e   : > { %8576 = sst [smem:[#allocation10_spill]] %s8575_s25 }
  0x1f   : > { %p616_p9 = pnand %p5312_p7, %p615_p8 }
  0x21   : > { %619 = sbr.rel (%p616_p9) target bundleno = 4368 (0x1110), region = 108 }
  0x26   : > { %p677_p10 = scmp.lt.s32.totalorder %s5899_s4, 1  ;;  %s8577_s21 = sld [smem:[#allocation40_spill]]  ;;  %v702_v22 = vlaneseq  ;;  %v8470_v43 = vmov 0   ;;  %v8474_v44 = vmov 1   ;;  %v8484_v47 = vmov 2  }
  0x27   : > { %s8430_s5 = smov 127   ;;  %s8578_s23 = sld [smem:[#allocation29_spill]]  ;;  %5473 = vset.pattern.permute.xlu0 %v8470_v43  ;;  %5474 = vset.pattern.permute.xlu1 %v8474_v44  ;;  %v8472_v48 = vmov 3   ;;  %v8489_v49 = vmov 4   ;;  %vm912_vm2 = vcmask 1048064   ;;  %vm1007_vm4 = vcmask 1041408  }
  0x28   : > { %s678_s26 = scalar_select %p677_p10, %s5899_s4, 1  ;;  %v6014_v27 = vand.u32 127, %v702_v22  ;;  %vm1118_vm6 = vcmask 1040384   ;;  %vm5748_vm7 = vmmov 0   ;;  %vm1445_vm8 = vcmask 523264  }
  0x29   : > { %s8579_s25 = smov 127   ;;  %s8581_s9 = sld [smem:[#allocation34_spill]]  ;;  %vm1619_vm9 = vcmask 1047680   ;;  %vm3977_vm12 = vcmask 130048  }
  0x2a   : > { %s5324_s2 = sshll.u32 %s678_s26, 3  ;;  %8580 = vst [vmem:[#allocation11_spill] sm:$0xff] %v6014_v27  ;;  %vm704_vm0 = vcmp.lt.s32.totalorder %v6014_v27, 127  ;;  %s8582_s10 = sld [smem:[#allocation35_spill]]  ;;  %vm719_vm1 = vcmp.lt.s32.totalorder %v6014_v27, 112 }
  0x2b   : > { %s8458_s24 = smov 64   ;;  %s8452_s29 = smov 72  }
  0x2c   : > { %s5931_s1 = scalar_lea.vmem %s8577_s21, %s5324_s2  ;;  %s8434_s21 = smov 112  }
  0x2d   : > { %v5934_v0 = vld [vmem:[%s5931_s1] sm:$0xff]  ;;  %v758_v2 = vld [vmem:[%s8578_s23 + $0xf8] sm:$0xff]  ;;  %v757_v4 = vld [vmem:[%s8578_s23 + $0xf0] sm:$0xff]  ;;  %s8454_s30 = smov 73   ;;  %s8450_s26 = smov 71  }
  0x2e   : > { %698 = vrot.lane.b32.xlu0 %v5934_v0, %s8430_s5  ;;  %v696_v1 = vcombine.high %v5934_v0, %v5934_v0  ;;  %v742_v3 = vld [vmem:[%s8578_s23 + $0x78] sm:$0xff]  ;;  %5326 = vmatprep.subr.mxu0 %v758_v2  ;;  %v741_v5 = vld [vmem:[%s8578_s23 + $0x70] sm:$0xff]  ;;  %v756_v6 = vld [vmem:[%s8578_s23 + $0xe8] sm:$0xff]  ;;  %s8436_s2 = smov 119   ;;  %s8448_s27 = smov 65  }
  0x2f   : > { %5327 = vmatpush3.msra.mxu0 %v742_v3  ;;  %v740_v7 = vld [vmem:[%s8578_s23 + $0x68] sm:$0xff]  ;;  %v755_v8 = vld [vmem:[%s8578_s23 + $0xe0] sm:$0xff]  ;;  %v754_v10 = vld [vmem:[%s8578_s23 + $0xd8] sm:$0xff]  ;;  %s8446_s3 = smov 121   ;;  %s8456_s5 = smov 120  }
  0x30   : > { %5328 = vmatprep.subr.mxu0 %v757_v4  ;;  %v739_v9 = vld [vmem:[%s8578_s23 + $0x60] sm:$0xff]  ;;  %v738_v11 = vld [vmem:[%s8578_s23 + $0x58] sm:$0xff]  ;;  %v753_v12 = vld [vmem:[%s8578_s23 + $0xd0] sm:$0xff]  ;;  %s8592_s15 = sld [smem:[#allocation37_spill]]  ;;  %s8594_s0 = smov 120  }
  0x31   : > { %5329 = vmatpush3.msra.mxu0 %v741_v5  ;;  %v737_v13 = vld [vmem:[%s8578_s23 + $0x50] sm:$0xff]  ;;  %v752_v14 = vld [vmem:[%s8578_s23 + $0xc8] sm:$0xff]  ;;  %v751_v16 = vld [vmem:[%s8578_s23 + $0xc0] sm:$0xff]  ;;  %s8593_s16 = sld [smem:[#allocation38_spill]] }
  0x32   : > { %700 = vrot.lane.b32.xlu0 %v696_v1, %s8579_s25  ;;  %5330 = vmatprep.subr.mxu0 %v756_v6  ;;  %v736_v15 = vld [vmem:[%s8578_s23 + $0x48] sm:$0xff]  ;;  %v735_v17 = vld [vmem:[%s8578_s23 + $0x40] sm:$0xff]  ;;  %v750_v18 = vld [vmem:[%s8578_s23 + $0xb8] sm:$0xff]  ;;  %s8600_s19 = sld [smem:[#allocation39_spill]] }
  0x33   : > { %5331 = vmatpush3.msra.mxu0 %v740_v7  ;;  %v734_v19 = vld [vmem:[%s8578_s23 + $0x38] sm:$0xff]  ;;  %v749_v20 = vld [vmem:[%s8578_s23 + $0xb0] sm:$0xff]  ;;  %v748_v23 = vld [vmem:[%s8578_s23 + $0xa8] sm:$0xff]  ;;  %s8636_s13 = sld [smem:[#allocation36_spill]] }
  0x34   : > { %5332 = vmatprep.subr.mxu0 %v755_v8  ;;  %v733_v21 = vld [vmem:[%s8578_s23 + $0x30] sm:$0xff]  ;;  %v732_v24 = vld [vmem:[%s8578_s23 + $0x28] sm:$0xff]  ;;  %v747_v25 = vld [vmem:[%s8578_s23 + $0xa0] sm:$0xff] }
  0x35   : > { %5333 = vmatpush3.msra.mxu0 %v739_v9  ;;  %v731_v26 = vld [vmem:[%s8578_s23 + $0x20] sm:$0xff]  ;;  %v746_v29 = vld [vmem:[%s8578_s23 + $0x98] sm:$0xff]  ;;  %v745_v31 = vld [vmem:[%s8578_s23 + $0x90] sm:$0xff] }
  0x36   : > { %5334 = vmatprep.subr.mxu0 %v754_v10  ;;  %v730_v30 = vld [vmem:[%s8578_s23 + $0x18] sm:$0xff]  ;;  %v729_v32 = vld [vmem:[%s8578_s23 + $0x10] sm:$0xff]  ;;  %v744_v33 = vld [vmem:[%s8578_s23 + $0x88] sm:$0xff] }
  0x37   : > { %5335 = vmatpush3.msra.mxu0 %v738_v11  ;;  %v728_v34 = vld [vmem:[%s8578_s23 + $0x8] sm:$0xff]  ;;  %v743_v36 = vld [vmem:[%s8578_s23 + $0x80] sm:$0xff] }
  0x38   : > { %5336 = vmatprep.subr.mxu0 %v753_v12  ;;  %v727_v39 = vld [vmem:[%s8578_s23] sm:$0xff]  ;;  %v6073_v50 = vld [vmem:[%s8582_s10 + $0x8] sm:$0xff] }
  0x39   : > { %5337 = vmatpush3.msra.mxu0 %v737_v13  ;;  %v6050_v42 = vld [vmem:[%s8581_s9] sm:$0x3f]  ;;  %s8630_s9 = smov 125  }
  0x3a   : > { %5338 = vmatprep.subr.mxu0 %v752_v14  ;;  %841 = vperm.xlu0 %5473, %v6050_v42   ;;  %v833_v46 = vld [vmem:[%s8582_s10] sm:$0xff] }
  0x3b   : > { %5339 = vmatpush3.msra.mxu0 %v736_v15 }
  0x3c   : > { %5340 = vmatprep.subr.mxu0 %v751_v16 }
  0x3d   : > { %5341 = vmatpush3.msra.mxu0 %v735_v17 }
  0x3e   : > { %5342 = vmatprep.subr.mxu0 %v750_v18  ;;  %5476 = vset.pattern.permute.xlu0 %v8474_v44 }
  0x3f   : > { %5343 = vmatpush3.msra.mxu0 %v734_v19  ;;  %862 = vperm.xlu0 %5476, %v833_v46  }
  0x40   : > { %5344 = vmatprep.subr.mxu0 %v749_v20 }
  0x41   : > { %5345 = vmatpush3.msra.mxu0 %v733_v21 }
  0x42   : > { %5346 = vmatprep.subr.mxu0 %v748_v23 }
  0x43   : > { %5347 = vmatpush3.msra.mxu0 %v732_v24  ;;  %5479 = vset.pattern.permute.xlu0 %v8484_v47 }
  0x44   : > { %5348 = vmatprep.subr.mxu0 %v747_v25  ;;  %892 = vperm.xlu0 %5479, %v6050_v42  }
  0x45   : > { %5349 = vmatpush3.msra.mxu0 %v731_v26 }
  0x46   : > { %5350 = vmatprep.subr.mxu0 %v746_v29 }
  0x47   : > { %5351 = vmatpush3.msra.mxu0 %v730_v30  ;;  %v835_v30 = vld [vmem:[%s8582_s10 + $0x10] sm:$0xff] }
  0x48   : > { %5352 = vmatprep.subr.mxu0 %v745_v31  ;;  %5481 = vset.pattern.permute.xlu0 %v8470_v43  ;;  %v8476_v31 = vmov 5  }
  0x49   : > { %5353 = vmatpush3.msra.mxu0 %v729_v32  ;;  %v836_v32 = vld [vmem:[%s8582_s10 + $0x18] sm:$0xff] }
  0x4a   : > { %5354 = vmatprep.subr.mxu0 %v744_v33  ;;  %v8444_v33 = vmov 6  }
  0x4b   : > { %5355 = vmatpush3.msra.mxu0 %v728_v34 }
  0x4c   : > { %5356 = vmatprep.subr.mxu0 %v743_v36  ;;  %v8442_v36 = vmov 7  }
  0x4d   : > { %5357 = vmatpush3.msra.mxu0 %v727_v39 }
  0xa0   : > { %v699_v28 = vpop.permute.xlu0 %698 }
  0xa4   : > { %v701_v35 = vpop.permute.xlu0 %700 }
  0xa5   : > { %v705_v37 = vsel %vm704_vm0, %v699_v28, %v701_v35  ;;  %v706_v38 = vsel %vm704_vm0, %v701_v35, %v699_v28 }
  0xa6   : > { %v709_v40 = vcombine.low %v705_v37, %v706_v38  ;;  %v837_v37 = vld [vmem:[%s8582_s10 + $0x20] sm:$0xff] }
  0xa8   : > { %v711_v41 = vmax.f32 %v5934_v0, %v709_v40  ;;  %v6088_v0 = vshrl.u32 %v702_v22, 7 }
  0xaa   : > { %715 = vrot.lane.b32.xlu1 %v711_v41, %s8434_s21  ;;  %v713_v45 = vcombine.high %v711_v41, %v711_v41  ;;  %8583 = vst [vmem:[#allocation12_spill] sm:$0xff] %v6088_v0  ;;  %v6094_v4 = vsub.s32 0, %v6088_v0  ;;  %v6097_v5 = vsub.s32 1, %v6088_v0  ;;  %v6100_v6 = vsub.s32 2, %v6088_v0 }
  0xab   : > { %v6105_v9 = vsub.s32 3, %v6088_v0 }
  0xae   : > { %717 = vrot.lane.b32.xlu1 %v713_v45, %s8434_s21  ;;  %s8462_s21 = smov 117  }
  0xb2   : > { %846 = vperm.xlu1 %5474, %v6050_v42  }
  0xb5   : > { %v842_v62 = vpop.permute.xlu0 %841 }
  0xb6   : > { %5475 = vset.pattern.permute.xlu1 %v8470_v43 }
  0xb7   : > { %853 = vperm.xlu1 %5475, %v833_v46  }
  0xba   : > { %v6102_v8 = vpop.permute.xlu0 %862 }
  0xbb   : > { %5477 = vset.pattern.permute.xlu1 %v8484_v47 }
  0xbc   : > { %872 = vperm.xlu1 %5477, %v833_v46  }
  0xbf   : > { %v893_v22 = vpop.permute.xlu0 %892 }
  0xc0   : > { %5478 = vset.pattern.permute.xlu1 %v8472_v48 }
  0xc1   : > { %882 = vperm.xlu1 %5478, %v833_v46  }
  0xc5   : > { %897 = vperm.xlu1 %5478, %v6050_v42  }
  0xc9   : > { %5480 = vset.pattern.permute.xlu1 %v8489_v49 }
  0xca   : > { %902 = vperm.xlu1 %5480, %v6050_v42  }
  0xce   : > { %5482 = vset.pattern.permute.xlu1 %v8474_v44 }
  0xcf   : > { %982 = vperm.xlu1 %5482, %v6073_v50  }
  0xd3   : > { %5483 = vset.pattern.permute.xlu1 %v8484_v47 }
 0x11c   : > { %v716_v51 = vpop.permute.xlu1 %715 }
 0x120   : > { %v718_v52 = vpop.permute.xlu1 %717 }
 0x121   : > { %v720_v53 = vsel %vm719_vm1, %v716_v51, %v718_v52  ;;  %v721_v54 = vsel %vm719_vm1, %v718_v52, %v716_v51 }
 0x122   : > { %v724_v55 = vcombine.low %v720_v53, %v721_v54  ;;  %v838_v54 = vld [vmem:[%s8582_s10 + $0x28] sm:$0x3]  ;;  %s8631_s10 = smov 124  }
 0x124   : > { %v726_v56 = vmax.f32 %v711_v41, %v724_v55  ;;  %v8438_v55 = vmov 8  }
 0x126   : > { %v760_v57 = vcombine.high %v726_v56, %v726_v56 }
 0x128   : > { %826 = vmatprep.mubr.f32.mxu0 %v760_v57  ;;  %v8440_v57 = vmov 9  }
 0x129   : > { %827 = vmatmul.mubr.f32.vlgmr.msra.gmra.mxu0 %v726_v56 }
 0x12d   : > { %v847_v58 = vpop.permute.xlu1 %846 }
 0x132   : > { %v6083_v60 = vpop.permute.xlu1 %853 }
 0x137   : > { %v6091_v2 = vpop.permute.xlu1 %872 }
 0x13c   : > { %v883_v13 = vpop.permute.xlu1 %882 }
 0x140   : > { %v898_v21 = vpop.permute.xlu1 %897 }
 0x145   : > { %v903_v25 = vpop.permute.xlu1 %902 }
 0x14a   : > { %v6144_v38 = vpop.permute.xlu1 %982 }
 0x1e9   : > { %v5358_v59 = vpop.f32.mrf.mxu0 }
 0x1eb   : > { %v5359_v61 = vpop.f32.mrf.mxu0 }
 0x1ec   : > { %v6085_v63 = vadd.f32 %v5359_v61, %v5358_v59 }
 0x1ee   : > { %v844_v1 = vmul.f32 %v6085_v63, %v842_v62 }
 0x1f0   : > { %v849_v3 = vadd.f32 %v847_v58, %v844_v1 }
 0x1f2   : > { %v850_v7 = vmax.f32 %v849_v3, 0.0 }
 0x1f4   : > { %v878_v10 = vrot.slane %v850_v7, %v6100_v6  ;;  %v868_v11 = vrot.slane %v850_v7, %v6097_v5  ;;  %v859_v12 = vrot.slane %v850_v7, %v6094_v4  ;;  %v888_v14 = vrot.slane %v850_v7, %v6105_v9 }
 0x1f6   : > { %v869_v15 = vmul.f32 %v868_v11, %v6102_v8  ;;  %v860_v16 = vmul.f32 %v859_v12, %v6083_v60  ;;  %v879_v17 = vmul.f32 %v878_v10, %v6091_v2  ;;  %v889_v19 = vmul.f32 %v888_v14, %v883_v13 }
 0x1f8   : > { %v870_v18 = vadd.f32 %v869_v15, %v860_v16 }
 0x1fa   : > { %v880_v20 = vadd.f32 %v879_v17, %v870_v18 }
 0x1fc   : > { %v890_v23 = vadd.f32 %v889_v19, %v880_v20 }
 0x1fe   : > { %v895_v24 = vadd.f32 %v893_v22, %v890_v23 }
 0x200   : > { %v900_v26 = vmul.f32 %v898_v21, %v895_v24 }
 0x202   : > { %v905_v28 = vadd.f32 %v903_v25, %v900_v26 }
 0x204   : > { %v6114_v29 = vmax.f32 %v905_v28, 0.0 }
 0x206   : > { %913 = vrot.lane.b32.xlu0 %v6114_v29, %s8458_s24 }
 0x20a   : > { %972 = vperm.xlu0 %5481, %v6073_v50  }
 0x20e   : > { %1083 = vperm.xlu0 %5481, %v835_v30  }
 0x212   : > { %5485 = vset.pattern.permute.xlu0 %v8476_v31 }
 0x213   : > { %908 = vperm.xlu0 %5485, %v6050_v42  }
 0x217   : > { %5488 = vset.pattern.permute.xlu0 %v8484_v47 }
 0x218   : > { %1225 = vperm.xlu0 %5488, %v836_v32  }
 0x21c   : > { %5489 = vset.pattern.permute.xlu0 %v8444_v33 }
 0x21d   : > { %1271 = vperm.xlu0 %5489, %v6050_v42  }
 0x221   : > { %5490 = vset.pattern.permute.xlu0 %v8474_v44 }
 0x222   : > { %1215 = vperm.xlu0 %5490, %v836_v32  }
 0x278   : > { %v914_v34 = vpop.permute.xlu0 %913 }
 0x279   : > { %v915_v35 = vsel %vm912_vm2, %v914_v34, %v6114_v29 }
 0x27a   : > { %916 = vrot.lane.b32.xlu1 %v915_v35, %s8458_s24 }
 0x27e   : > { %994 = vperm.xlu1 %5483, %v6073_v50  }
 0x282   : > { %5484 = vset.pattern.permute.xlu1 %v8474_v44 }
 0x283   : > { %1093 = vperm.xlu1 %5484, %v835_v30  }
 0x285   : > { %v6183_v56 = vpop.permute.xlu0 %972 }
 0x287   : > { %5486 = vset.pattern.permute.xlu1 %v8484_v47 }
 0x288   : > { %1105 = vperm.xlu1 %5486, %v835_v30  }
 0x289   : > { %v6190_v59 = vpop.permute.xlu0 %1083 }
 0x28c   : > { %5487 = vset.pattern.permute.xlu1 %v8470_v43 }
 0x28d   : > { %1206 = vperm.xlu1 %5487, %v836_v32  }
 0x28e   : > { %v6194_v62 = vpop.permute.xlu0 %908 }
 0x291   : > { %5491 = vset.pattern.permute.xlu1 %v8442_v36 }
 0x292   : > { %1276 = vperm.xlu1 %5491, %v6050_v42  }
 0x293   : > { %v6198_v3 = vpop.permute.xlu0 %1225 }
 0x296   : > { %5492 = vset.pattern.permute.xlu1 %v8470_v43 }
 0x297   : > { %1283 = vperm.xlu1 %5492, %v837_v37  }
 0x298   : > { %v6202_v10 = vpop.permute.xlu0 %1271 }
 0x2ec   : > { %v917_v39 = vpop.permute.xlu1 %916 }
 0x2ed   : > { %v918_v40 = vsel %vm912_vm2, %v917_v39, %v6114_v29 }
 0x2ee   : > { %960 = vrot.lane.b32.xlu0 %v918_v40, %s8452_s29  ;;  %924 = vrot.lane.b32.xlu1 %v918_v40, %s8454_s30  ;;  %v922_v41 = vrot.slane %v918_v40, 1  ;;  %v923_v45 = vrot.slane %v918_v40, 2  ;;  %v957_v46 = vrot.slane %v918_v40, 7  ;;  %v1013_v50 = vrot.slane %v918_v40, 6 }
 0x2ef   : > { %v1047_v51 = vrot.slane %v918_v40, 5  ;;  %v1125_v52 = vrot.slane %v918_v40, 4  ;;  %v1124_v53 = vrot.slane %v918_v40, 3 }
 0x2f2   : > { %1018 = vrot.lane.b32.xlu1 %v918_v40, %s8450_s26  ;;  %926 = vrot.lane.b32.xlu0 %v922_v41, %s8454_s30 }
 0x2f6   : > { %1237 = vrot.lane.b32.xlu1 %v918_v40, %s8436_s2  ;;  %928 = vrot.lane.b32.xlu0 %v923_v45, %s8454_s30  ;;  %s8591_s30 = smov 64  }
 0x2f9   : > { %v6187_v58 = vpop.permute.xlu1 %994 }
 0x2fa   : > { %958 = vrot.lane.b32.xlu1 %v957_v46, %s8452_s29  ;;  %1014 = vrot.lane.b32.xlu0 %v1013_v50, %s8450_s26 }
 0x2fe   : > { %962 = vrot.lane.b32.xlu1 %v922_v41, %s8452_s29  ;;  %1050 = vrot.lane.b32.xlu0 %v1013_v50, %s8448_s27  ;;  %v6192_v61 = vpop.permute.xlu1 %1093  ;;  %v6241_v50 = vsub.s32 7, %v6088_v0  ;;  %s8460_s29 = smov 16  }
 0x302   : > { %1016 = vrot.lane.b32.xlu1 %v957_v46, %s8450_s26  ;;  %1052 = vrot.lane.b32.xlu0 %v957_v46, %s8448_s27  ;;  %v6238_v46 = vsub.s32 6, %v6088_v0  ;;  %s8482_s26 = smov 123  }
 0x303   : > { %v6196_v1 = vpop.permute.xlu1 %1105 }
 0x306   : > { %1048 = vrot.lane.b32.xlu1 %v1047_v51, %s8448_s27  ;;  %1128 = vrot.lane.b32.xlu0 %v1125_v52, %s8579_s25 }
 0x308   : > { %v6200_v7 = vpop.permute.xlu1 %1206 }
 0x30a   : > { %1126 = vrot.lane.b32.xlu1 %v1124_v53, %s8579_s25  ;;  %1159 = vrot.lane.b32.xlu0 %v923_v45, %s8446_s3 }
 0x30d   : > { %v6204_v11 = vpop.permute.xlu1 %1276 }
 0x30e   : > { %1130 = vrot.lane.b32.xlu1 %v1047_v51, %s8579_s25  ;;  %1163 = vrot.lane.b32.xlu0 %v1125_v52, %s8446_s3 }
 0x312   : > { %1161 = vrot.lane.b32.xlu1 %v1124_v53, %s8446_s3  ;;  %1196 = vrot.lane.b32.xlu0 %v1124_v53, %s8456_s5  ;;  %v6208_v12 = vpop.permute.xlu1 %1283  ;;  %s8589_s3 = sld [smem:[#allocation32_spill]] }
 0x316   : > { %1192 = vrot.lane.b32.xlu1 %v922_v41, %s8456_s5  ;;  %1293 = vperm.xlu0 %5490, %v837_v37  }
 0x318   : > { %s8590_s27 = smov %s8589_s3 }
 0x31a   : > { %1194 = vrot.lane.b32.xlu1 %v923_v45, %s8456_s5  ;;  %5494 = vset.pattern.permute.xlu0 %v8484_v47  ;;  %s8510_s5 = smov 115  }
 0x31b   : > { %1305 = vperm.xlu0 %5494, %v837_v37  }
 0x31e   : > { %1239 = vrot.lane.b32.xlu1 %v922_v41, %s8436_s2 }
 0x31f   : > { %5497 = vset.pattern.permute.xlu0 %v8472_v48 }
 0x320   : > { %1363 = vperm.xlu0 %5497, %v838_v54  }
 0x322   : > { %1241 = vrot.lane.b32.xlu1 %v923_v45, %s8436_s2  ;;  %s8584_s2 = sld [smem:[#allocation28_spill]] }
 0x324   : > { %5500 = vset.pattern.permute.xlu0 %v8470_v43 }
 0x326   : > { %1325 = vperm.xlu1 %5492, %v838_v54  }
 0x328   : > { %v6215_v21 = vld [vmem:[%s8584_s2] sm:$0xff] }
 0x329   : > { %8585 = vst [vmem:[#allocation13_spill] sm:$0xff] %v6215_v21  ;;  %vm693_vm3 = vcmp.ne.f32.partialorder %v6215_v21, 0.0 }
 0x32a   : > { %5493 = vset.pattern.permute.xlu1 %v8474_v44 }
 0x32b   : > { %1335 = vperm.xlu1 %5493, %v838_v54  }
 0x32f   : > { %5495 = vset.pattern.permute.xlu1 %v8484_v47 }
 0x330   : > { %1347 = vperm.xlu1 %5495, %v838_v54  }
 0x334   : > { %5496 = vset.pattern.permute.xlu1 %v8472_v48 }
 0x335   : > { %1359 = vperm.xlu1 %5496, %v837_v37   ;;  %v6231_v37 = vsub.s32 5, %v6088_v0 }
 0x339   : > { %5498 = vset.pattern.permute.xlu1 %v8438_v55 }
 0x33a   : > { %1317 = vperm.xlu1 %5498, %v6050_v42  }
 0x33e   : > { %5499 = vset.pattern.permute.xlu1 %v8440_v57 }
 0x33f   : > { %1384 = vperm.xlu1 %5499, %v6050_v42   ;;  %v6206_v42 = vpop.permute.xlu0 %1215 }
 0x343   : > { %5501 = vset.pattern.permute.xlu1 %v8474_v44 }
 0x360   : > { %v925_v13 = vpop.permute.xlu1 %924  ;;  %v961_v14 = vpop.permute.xlu0 %960 }
 0x361   : > { %v933_v30 = vsel %vm693_vm3, %v925_v13, 0.0  ;;  %v968_v32 = vsel %vm693_vm3, %v961_v14, 0.0 }
 0x362   : > { %v939_v51 = vrot.slane %v933_v30, %v6094_v4  ;;  %v988_v52 = vrot.slane %v968_v32, %v6097_v5 }
 0x364   : > { %v1019_v15 = vpop.permute.xlu1 %1018  ;;  %v927_v16 = vpop.permute.xlu0 %926 }
 0x365   : > { %v934_v26 = vsel %vm693_vm3, %v927_v16, 0.0 }
 0x366   : > { %v944_v39 = vrot.slane %v934_v26, %v6094_v4 }
 0x368   : > { %v6210_v17 = vpop.permute.xlu1 %1237  ;;  %v929_v18 = vpop.permute.xlu0 %928  ;;  %v945_v26 = vmul.f32 %v944_v39, %v6102_v8 }
 0x369   : > { %v935_v34 = vsel %vm693_vm3, %v929_v18, 0.0  ;;  %v1089_v18 = vrot.slane %v6114_v29, %v6094_v4 }
 0x36a   : > { %v950_v53 = vrot.slane %v935_v34, %v6094_v4  ;;  %v940_v34 = vmul.f32 %v939_v51, %v6083_v60 }
 0x36c   : > { %v959_v19 = vpop.permute.xlu1 %958  ;;  %v1015_v20 = vpop.permute.xlu0 %1014  ;;  %v951_v39 = vmul.f32 %v950_v53, %v6091_v2  ;;  %v946_v51 = vadd.f32 %v945_v26, %v940_v34 }
 0x36d   : > { %v967_v28 = vsel %vm693_vm3, %v959_v19, 0.0  ;;  %v1023_v54 = vsel %vm693_vm3, %v1015_v20, 0.0  ;;  %v1099_v19 = vrot.slane %v6114_v29, %v6097_v5 }
 0x36e   : > { %v978_v40 = vrot.slane %v967_v28, %v6097_v5  ;;  %v952_v33 = vadd.f32 %v951_v39, %v946_v51 }
 0x370   : > { %v963_v22 = vpop.permute.xlu1 %962  ;;  %v1051_v23 = vpop.permute.xlu0 %1050  ;;  %v979_v20 = vmul.f32 %v978_v40, %v6083_v60  ;;  %v980_v28 = vmul.f32 %v978_v40, %v6183_v56 }
 0x371   : > { %v969_v35 = vsel %vm693_vm3, %v963_v22, 0.0  ;;  %v1025_v22 = vsel %vm693_vm3, %v1019_v15, 0.0  ;;  %v1058_v30 = vsel %vm693_vm3, %v1051_v23, 0.0  ;;  %v1111_v23 = vrot.slane %v6114_v29, %v6100_v6 }
 0x372   : > { %v1000_v13 = vrot.slane %v969_v35, %v6097_v5  ;;  %v989_v35 = vmul.f32 %v988_v52, %v6102_v8  ;;  %v1040_v57 = vrot.slane %v1025_v22, %v6100_v6  ;;  %v1068_v60 = vrot.slane %v1058_v30, %v6105_v9 }
 0x373   : > { %v1091_v30 = vmul.f32 %v1089_v18, %v6190_v59 }
 0x374   : > { %v1017_v24 = vpop.permute.xlu1 %1016  ;;  %v1053_v25 = vpop.permute.xlu0 %1052  ;;  %v1001_v55 = vmul.f32 %v1000_v13, %v6091_v2  ;;  %v1002_v40 = vmul.f32 %v1000_v13, %v6187_v58  ;;  %v1090_v2 = vmul.f32 %v1089_v18, %v6183_v56  ;;  %v1100_v13 = vmul.f32 %v1099_v19, %v6144_v38 }
 0x375   : > { %v1024_v41 = vsel %vm693_vm3, %v1017_v24, 0.0 }
 0x376   : > { %v1034_v24 = vrot.slane %v1024_v41, %v6100_v6  ;;  %v990_v41 = vmul.f32 %v988_v52, %v6144_v38  ;;  %v1059_v52 = vsel %vm693_vm3, %v1053_v25, 0.0 }
 0x377   : > { %v1074_v25 = vrot.slane %v1059_v52, %v6105_v9 }
 0x378   : > { %v1049_v45 = vpop.permute.xlu1 %1048  ;;  %v1129_v16 = vpop.permute.xlu0 %1128  ;;  %v1035_v8 = vmul.f32 %v1034_v24, %v6144_v38 }
 0x379   : > { %v1057_v14 = vsel %vm693_vm3, %v1049_v45, 0.0  ;;  %v1029_v45 = vrot.slane %v1023_v54, %v6100_v6  ;;  %v991_v54 = vadd.f32 %v989_v35, %v979_v20  ;;  %v1069_v20 = vmul.f32 %v1068_v60, %v6144_v38 }
 0x37a   : > { %v1063_v15 = vrot.slane %v1057_v14, %v6105_v9  ;;  %v992_v14 = vadd.f32 %v990_v41, %v980_v28  ;;  %v1101_v35 = vmul.f32 %v1099_v19, %v6192_v61  ;;  %v1041_v41 = vmul.f32 %v1040_v57, %v6187_v58  ;;  %v6300_v19 = vld [vmem:[%s8584_s2 + $0x8] sm:$0x1]  ;;  %s8629_s2 = smov 123  }
 0x37b   : > { %v1030_v29 = vmul.f32 %v1029_v45, %v6183_v56  ;;  %v1003_v24 = vadd.f32 %v1001_v55, %v991_v54  ;;  %8586 = vst [vmem:[#allocation14_spill] sm:$0xff] %v6300_v19  ;;  %v1113_v60 = vmul.f32 %v1111_v23, %v6196_v1  ;;  %v1102_v54 = vadd.f32 %v1100_v13, %v1090_v2 }
 0x37c   : > { %v1127_v32 = vpop.permute.xlu1 %1126  ;;  %v1160_v53 = vpop.permute.xlu0 %1159  ;;  %v1064_v22 = vmul.f32 %v1063_v15, %v6183_v56  ;;  %v1004_v26 = vadd.f32 %v1002_v40, %v992_v14  ;;  %v1136_v56 = vsel %vm693_vm3, %v1129_v16, 0.0  ;;  %vm694_vm5 = vcmp.ne.f32.partialorder %v6300_v19, 0.0 }
 0x37d   : > { %v1036_v28 = vadd.f32 %v1035_v8, %v1030_v29  ;;  %v1135_v34 = vsel %vm693_vm3, %v1127_v32, 0.0  ;;  %v1168_v55 = vsel %vm693_vm3, %v1160_v53, 0.0  ;;  %v1008_v57 = vrot.slane %v1003_v24, 6 }
 0x37e   : > { %v1070_v45 = vadd.f32 %v1069_v20, %v1064_v22  ;;  %v1009_v32 = vrot.slane %v1004_v26, 6  ;;  %v1141_v16 = vrot.slane %v1135_v34, %v6231_v37  ;;  %v954_v8 = vrot.slane %v952_v33, 3 }
 0x37f   : > { %v1042_v51 = vadd.f32 %v1041_v41, %v1036_v28  ;;  %v1146_v14 = vrot.slane %v1136_v56, %v6231_v37  ;;  %v1174_v52 = vrot.slane %v1168_v55, %v6238_v46  ;;  %v1103_v22 = vadd.f32 %v1101_v35, %v1091_v30 }
 0x380   : > { %v1131_v36 = vpop.permute.xlu1 %1130  ;;  %v1164_v39 = vpop.permute.xlu0 %1163  ;;  %v1112_v33 = vmul.f32 %v1111_v23, %v6187_v58  ;;  %v1010_v20 = vsel %vm1007_vm4, %v1008_v57, %v1009_v32  ;;  %v1142_v2 = vmul.f32 %v1141_v16, %v6190_v59 }
 0x381   : > { %v1137_v38 = vsel %vm693_vm3, %v1131_v36, 0.0  ;;  %v1075_v36 = vmul.f32 %v1074_v25, %v6187_v58  ;;  %v1170_v26 = vsel %vm693_vm3, %v1164_v39, 0.0  ;;  %v1115_v28 = vadd.f32 %v1113_v60, %v1103_v22 }
 0x382   : > { %v1152_v53 = vrot.slane %v1137_v38, %v6231_v37  ;;  %v956_v25 = vadd.f32 %v954_v8, %v6194_v62  ;;  %v1044_v34 = vrot.slane %v1042_v51, 1  ;;  %v1147_v35 = vmul.f32 %v1146_v14, %v6192_v61 }
 0x383   : > { %v1076_v24 = vadd.f32 %v1075_v36, %v1070_v45  ;;  %v1175_v41 = vmul.f32 %v1174_v52, %v6190_v59  ;;  %v1185_v58 = vrot.slane %v1170_v26, %v6238_v46  ;;  %v1246_v45 = vsel %vm694_vm5, %v6210_v17, 0.0 }
 0x384   : > { %v1162_v18 = vpop.permute.xlu1 %1161  ;;  %v1153_v56 = vmul.f32 %v1152_v53, %v6196_v1  ;;  %v1197_v23 = vpop.permute.xlu0 %1196  ;;  %v1012_v55 = vadd.f32 %v1010_v20, %v956_v25  ;;  %v1114_v32 = vadd.f32 %v1112_v33, %v1102_v54  ;;  %v1120_v51 = vrot.slane %v1115_v28, 7 }
 0x385   : > { %v1169_v15 = vsel %vm693_vm3, %v1162_v18, 0.0  ;;  %v1078_v62 = vrot.slane %v1076_v24, 4  ;;  %v1203_v39 = vsel %vm693_vm3, %v1197_v23, 0.0  ;;  %v1186_v17 = vmul.f32 %v1185_v58, %v6196_v1 }
 0x386   : > { %v1179_v40 = vrot.slane %v1169_v15, %v6238_v46  ;;  %v1148_v15 = vadd.f32 %v1147_v35, %v1142_v2  ;;  %v1046_v16 = vadd.f32 %v1044_v34, %v1012_v55  ;;  %v1252_v36 = vrot.slane %v1246_v45, %v6094_v4 }
 0x387   : > { %v1231_v54 = vrot.slane %v1203_v39, %v6241_v50  ;;  %v1119_v24 = vrot.slane %v1114_v32, 7  ;;  %v1341_v39 = vrot.slane %v6085_v63, %v6097_v5 }
 0x388   : > { %v1193_v29 = vpop.permute.xlu1 %1192  ;;  %v1180_v13 = vmul.f32 %v1179_v40, %v6192_v61  ;;  %v1154_v40 = vadd.f32 %v1153_v56, %v1148_v15  ;;  %v1080_v14 = vadd.f32 %v1078_v62, %v1046_v16  ;;  %v1253_v2 = vmul.f32 %v1252_v36, %v6200_v7 }
 0x389   : > { %v1201_v30 = vsel %vm693_vm3, %v1193_v29, 0.0 }
 0x38a   : > { %v1181_v57 = vadd.f32 %v1180_v13, %v1175_v41  ;;  %v1212_v61 = vrot.slane %v1201_v30, %v6241_v50  ;;  %v1156_v26 = vrot.slane %v1154_v40, 2  ;;  %v1121_v13 = vsel %vm1118_vm6, %v1119_v24, %v1120_v51 }
 0x38b   : > { %v1123_v25 = vadd.f32 %v1121_v13, %v1080_v14  ;;  %v1232_v30 = vmul.f32 %v1231_v54, %v6198_v3 }
 0x38c   : > { %v1195_v18 = vpop.permute.xlu1 %1194  ;;  %v1187_v53 = vadd.f32 %v1186_v17, %v1181_v57  ;;  %v1213_v29 = vmul.f32 %v1212_v61, %v6200_v7  ;;  %v1331_v17 = vrot.slane %v6085_v63, %v6094_v4 }
 0x38d   : > { %v1202_v38 = vsel %vm693_vm3, %v1195_v18, 0.0  ;;  %v1158_v41 = vadd.f32 %v1156_v26, %v1123_v25 }
 0x38e   : > { %v1221_v59 = vrot.slane %v1202_v38, %v6241_v50  ;;  %v1189_v34 = vrot.slane %v1187_v53, 5  ;;  %v1332_v53 = vmul.f32 %v1331_v17, %v6208_v12 }
 0x390   : > { %v1222_v60 = vmul.f32 %v1221_v59, %v6206_v42  ;;  %v1240_v8 = vpop.permute.xlu1 %1239  ;;  %v1191_v18 = vadd.f32 %v1189_v34, %v1158_v41 }
 0x391   : > { %v1247_v52 = vsel %vm694_vm5, %v1240_v8, 0.0  ;;  %v1294_v61 = vpop.permute.xlu0 %1293  ;;  %v1353_v8 = vrot.slane %v6085_v63, %v6100_v6 }
 0x392   : > { %v1257_v22 = vrot.slane %v1247_v52, %v6094_v4  ;;  %v1223_v1 = vadd.f32 %v1222_v60, %v1213_v29  ;;  %v1342_v36 = vmul.f32 %v1341_v39, %v1294_v61 }
 0x394   : > { %v1258_v33 = vmul.f32 %v1257_v22, %v6206_v42  ;;  %v1242_v20 = vpop.permute.xlu1 %1241  ;;  %v1233_v56 = vadd.f32 %v1232_v30, %v1223_v1 }
 0x395   : > { %v1248_v28 = vsel %vm694_vm5, %v1242_v20, 0.0  ;;  %v1344_v20 = vadd.f32 %v1342_v36, %v1332_v53 }
 0x396   : > { %v1263_v35 = vrot.slane %v1248_v28, %v6094_v4  ;;  %v1259_v58 = vadd.f32 %v1258_v33, %v1253_v2  ;;  %v1234_v55 = vadd.f32 %v1233_v56, %v1191_v18  ;;  %v1306_v40 = vpop.permute.xlu0 %1305  ;;  %v1369_v2 = vrot.slane %v6085_v63, %v6105_v9 }
 0x397   : > { %v1354_v54 = vmul.f32 %v1353_v8, %v1306_v40 }
 0x398   : > { %v1264_v23 = vmul.f32 %v1263_v35, %v6198_v3 }
 0x399   : > { %v1356_v34 = vadd.f32 %v1354_v54, %v1344_v20  ;;  %v1436_v20 = vld [vmem:[%s8590_s27 + $0x20] sm:$0xff] }
 0x39a   : > { %v1265_v45 = vadd.f32 %v1264_v23, %v1259_v58 }
 0x39b   : > { %v1364_v26 = vpop.permute.xlu0 %1363 }
 0x39c   : > { %v1267_v62 = vrot.slane %v1265_v45, 3  ;;  %v1371_v30 = vmul.f32 %v1369_v2, %v1364_v26  ;;  %v8468_v26 = vmov 0.0  }
 0x39d   : > { %5373 = vmatprep.subr.mxu1 %v8468_v26  ;;  %5389 = vmatprep.mubr.msk.f32.mxu1 %vm5748_vm7, %v8468_v26 }
 0x39e   : > { %v1269_v38 = vadd.f32 %v1267_v62, %v1234_v55 }
 0x3a0   : > { %v1274_v15 = vmul.f32 %v6202_v10, %v1269_v38 }
 0x3a1   : > { %v1326_v57 = vpop.permute.xlu1 %1325 }
 0x3a2   : > { %v1279_v59 = vadd.f32 %v6204_v11, %v1274_v15  ;;  %v1333_v14 = vmul.f32 %v1331_v17, %v1326_v57 }
 0x3a4   : > { %v1280_v32 = vmax.f32 %v1279_v59, 0.0 }
 0x3a6   : > { %v1336_v16 = vpop.permute.xlu1 %1335  ;;  %v1289_v51 = vrot.slane %v1280_v32, %v6094_v4  ;;  %v1299_v10 = vrot.slane %v1280_v32, %v6097_v5  ;;  %v1311_v28 = vrot.slane %v1280_v32, %v6100_v6 }
 0x3a7   : > { %v1343_v60 = vmul.f32 %v1341_v39, %v1336_v16 }
 0x3a8   : > { %v1291_v22 = vmul.f32 %v1289_v51, %v6208_v12  ;;  %v1301_v24 = vmul.f32 %v1299_v10, %v1294_v61  ;;  %v1290_v1 = vmul.f32 %v1289_v51, %v6200_v7  ;;  %v1300_v33 = vmul.f32 %v1299_v10, %v6206_v42 }
 0x3a9   : > { %v1345_v29 = vadd.f32 %v1343_v60, %v1333_v14  ;;  %v1312_v23 = vmul.f32 %v1311_v28, %v6198_v3  ;;  %v1313_v7 = vmul.f32 %v1311_v28, %v1306_v40 }
 0x3aa   : > { %v1303_v41 = vadd.f32 %v1301_v24, %v1291_v22  ;;  %v1302_v56 = vadd.f32 %v1300_v33, %v1290_v1  ;;  %v1439_v24 = vld [vmem:[%s8589_s3 + $0x38] sm:$0xff]  ;;  %v1438_v1 = vld [vmem:[%s8590_s27 + $0x30] sm:$0xff]  ;;  %v1437_v33 = vld [vmem:[%s8590_s27 + $0x28] sm:$0xff]  ;;  %s8466_s3 = smov 116  }
 0x3ab   : > { %v1348_v11 = vpop.permute.xlu1 %1347  ;;  %5374 = vmatpush3.msra.mxu1 %v1439_v24 }
 0x3ac   : > { %v1355_v52 = vmul.f32 %v1353_v8, %v1348_v11  ;;  %v1315_v45 = vadd.f32 %v1313_v7, %v1303_v41  ;;  %v1314_v55 = vadd.f32 %v1312_v23, %v1302_v56  ;;  %5375 = vmatprep.subr.mxu1 %v8468_v26  ;;  %v6446_v23 = vld [vmem:[%s8593_s16 + $0x10] sm:$0xff] }
 0x3ad   : > { %5376 = vmatpush3.msra.mxu1 %v1438_v1 }
 0x3ae   : > { %v1357_v13 = vadd.f32 %v1355_v52, %v1345_v29  ;;  %5377 = vmatprep.subr.mxu1 %v8468_v26 }
 0x3af   : > { %5378 = vmatpush3.msra.mxu1 %v1437_v33 }
 0x3b0   : > { %v1360_v25 = vpop.permute.xlu1 %1359  ;;  %v1373_v12 = vadd.f32 %v1371_v30, %v1357_v13  ;;  %5379 = vmatprep.subr.mxu1 %v8468_v26  ;;  %v1432_v30 = vld [vmem:[%s8590_s27] sm:$0xff] }
 0x3b1   : > { %v1370_v35 = vmul.f32 %v1369_v2, %v1360_v25  ;;  %v1435_v2 = vld [vmem:[%s8590_s27 + $0x18] sm:$0xff]  ;;  %5380 = vmatpush3.msra.mxu1 %v1436_v20  ;;  %v1434_v25 = vld [vmem:[%s8590_s27 + $0x10] sm:$0xff] }
 0x3b2   : > { %v1377_v63 = vrot.slane %v1373_v12, 6  ;;  %5381 = vmatprep.subr.mxu1 %v8468_v26  ;;  %v1519_v12 = vld [vmem:[%s8593_s16] sm:$0xff] }
 0x3b3   : > { %v1372_v58 = vadd.f32 %v1370_v35, %v1356_v34  ;;  %5382 = vmatpush3.msra.mxu1 %v1435_v2  ;;  %v1433_v34 = vld [vmem:[%s8590_s27 + $0x8] sm:$0xff]  ;;  %v6428_v35 = vld [vmem:[%s8592_s15] sm:$0xff]  ;;  %s8659_s15 = smov 115  }
 0x3b4   : > { %5383 = vmatprep.subr.mxu1 %v8468_v26 }
 0x3b5   : > { %v1376_v18 = vrot.slane %v1372_v58, 6  ;;  %v1318_v42 = vpop.permute.xlu1 %1317  ;;  %5384 = vmatpush3.msra.mxu1 %v1434_v25 }
 0x3b6   : > { %v1319_v62 = vrot.slane %v1318_v42, 2  ;;  %5385 = vmatprep.subr.mxu1 %v8468_v26 }
 0x3b7   : > { %v1378_v57 = vsel %vm1007_vm4, %v1376_v18, %v1377_v63  ;;  %5386 = vmatpush3.msra.mxu1 %v1433_v34  ;;  %v6467_v63 = vld [vmem:[%s8593_s16 + $0x20] sm:$0xff] }
 0x3b8   : > { %v1321_v38 = vadd.f32 %v1319_v62, %v1314_v55  ;;  %v1322_v15 = vadd.f32 %v1319_v62, %v1315_v45  ;;  %5387 = vmatprep.subr.mxu1 %v8468_v26 }
 0x3b9   : > { %5388 = vmatpush3.msra.mxu1 %v1432_v30 }
 0x3ba   : > { %v1385_v61 = vpop.permute.xlu1 %1384  ;;  %v1381_v59 = vadd.f32 %v1376_v18, %v1321_v38  ;;  %v1382_v32 = vadd.f32 %v1378_v57, %v1322_v15  ;;  %5392 = vmatprep.subr.mxu1 %v8468_v26  ;;  %v6473_v38 = vld [vmem:[%s8593_s16 + $0x8] sm:$0xff]  ;;  %v6480_v15 = vld [vmem:[%s8593_s16 + $0x18] sm:$0xff] }
 0x3bb   : > { %v1386_v16 = vrot.slane %v1385_v61, 2 }
 0x3bd   : > { %v6367_v39 = vadd.f32 %v1386_v16, %v1381_v59  ;;  %v6369_v17 = vadd.f32 %v1386_v16, %v1382_v32 }
 0x3bf   : > { %8587 = vst [vmem:[#allocation15_spill] sm:$0xff] %v6367_v39  ;;  %8588 = vst [vmem:[#allocation16_spill] sm:$0xff] %v6369_v17  ;;  %v1396_v3 = vrot.slane %v6367_v39, 6  ;;  %v1397_v40 = vrot.slane %v6369_v17, 6 }
 0x3c1   : > { %v1398_v60 = vsel %vm1007_vm4, %v1396_v3, %v1397_v40 }
 0x3c2   : > { %1400 = vrot.lane.b32.xlu0 %v1398_v60, %s8458_s24 }
 0x434   : > { %v1401_v8 = vpop.permute.xlu0 %1400 }
 0x435   : > { %v1402_v51 = vsel %vm912_vm2, %v1401_v8, %v1398_v60 }
 0x436   : > { %1403 = vrot.lane.b32.xlu1 %v1402_v51, %s8458_s24 }
 0x4a8   : > { %v1404_v10 = vpop.permute.xlu1 %1403 }
 0x4a9   : > { %v1405_v36 = vsel %vm912_vm2, %v1404_v10, %v1398_v60 }
 0x4aa   : > { %v1407_v14 = vrot.slane %v1405_v36, 2 }
 0x4ac   : > { %1408 = vrot.lane.b32.xlu0 %v1407_v14, %s8579_s25 }
 0x51e   : > { %v1409_v11 = vpop.permute.xlu0 %1408 }
 0x51f   : > { %v6380_v52 = vmax.f32 %v6367_v39, %v1409_v11  ;;  %v6383_v53 = vmax.f32 %v6369_v17, %v1409_v11 }
 0x521   : > { %v1415_v54 = vrot.slane %v6380_v52, 6  ;;  %v1416_v29 = vrot.slane %v6383_v53, 6 }
 0x523   : > { %v1417_v22 = vsel %vm1007_vm4, %v1415_v54, %v1416_v29  ;;  %v6501_v29 = vsub.s32 4, %v6088_v0  ;;  %v8609_v0 = vmov 1  }
 0x524   : > { %1419 = vrot.lane.b32.xlu1 %v1417_v22, %s8458_s24  ;;  %s8464_s24 = smov 113  }
 0x525   : > { %8596 = vst [vmem:[#allocation18_spill] sm:$0xff] %v6501_v29 }
 0x596   : > { %v1420_v13 = vpop.permute.xlu1 %1419 }
 0x597   : > { %v1421_v28 = vsel %vm912_vm2, %v1420_v13, %v1417_v22 }
 0x598   : > { %1422 = vrot.lane.b32.xlu0 %v1421_v28, %s8591_s30 }
 0x59c   : > { %1528 = vperm.xlu0 %5500, %v6428_v35  }
 0x5a0   : > { %5503 = vset.pattern.permute.xlu0 %v8474_v44 }
 0x5a1   : > { %1549 = vperm.xlu0 %5503, %v1519_v12  }
 0x5a5   : > { %5506 = vset.pattern.permute.xlu0 %v8489_v49 }
 0x5a6   : > { %1579 = vperm.xlu0 %5506, %v1519_v12  }
 0x5aa   : > { %5509 = vset.pattern.permute.xlu0 %v8472_v48 }
 0x5ab   : > { %1604 = vperm.xlu0 %5509, %v6428_v35  }
 0x5af   : > { %5514 = vset.pattern.permute.xlu0 %v8474_v44 }
 0x5b0   : > { %1805 = vperm.xlu0 %5514, %v6446_v23  }
 0x5b4   : > { %1990 = vperm.xlu0 %5514, %v6467_v63  }
 0x5b8   : > { %5521 = vset.pattern.permute.xlu0 %v8484_v47 }
 0x5b9   : > { %1713 = vperm.xlu0 %5521, %v6473_v38  }
 0x5bd   : > { %1900 = vperm.xlu0 %5521, %v6480_v15  }
 0x60a   : > { %v1423_v41 = vpop.permute.xlu0 %1422 }
 0x60b   : > { %v1424_v56 = vsel %vm912_vm2, %v1423_v41, %v1417_v22 }
 0x60c   : > { %v1426_v58 = vrot.slane %v1424_v56, 2 }
 0x60e   : > { %1427 = vrot.lane.b32.xlu1 %v1426_v58, %s8594_s0 }
 0x612   : > { %1533 = vperm.xlu1 %5501, %v6428_v35  }
 0x616   : > { %5502 = vset.pattern.permute.xlu1 %v8470_v43 }
 0x617   : > { %1540 = vperm.xlu1 %5502, %v1519_v12   ;;  %v1529_v59 = vpop.permute.xlu0 %1528 }
 0x61b   : > { %5504 = vset.pattern.permute.xlu1 %v8484_v47 }
 0x61c   : > { %1559 = vperm.xlu1 %5504, %v1519_v12   ;;  %v6492_v10 = vpop.permute.xlu0 %1549 }
 0x620   : > { %5505 = vset.pattern.permute.xlu1 %v8472_v48 }
 0x621   : > { %1569 = vperm.xlu1 %5505, %v1519_v12   ;;  %v1580_v20 = vpop.permute.xlu0 %1579 }
 0x625   : > { %5507 = vset.pattern.permute.xlu1 %v8476_v31 }
 0x626   : > { %1589 = vperm.xlu1 %5507, %v1519_v12   ;;  %v1605_v58 = vpop.permute.xlu0 %1604 }
 0x62a   : > { %5508 = vset.pattern.permute.xlu1 %v8484_v47 }
 0x62b   : > { %1599 = vperm.xlu1 %5508, %v6428_v35  }
 0x62f   : > { %5510 = vset.pattern.permute.xlu1 %v8489_v49 }
 0x630   : > { %1609 = vperm.xlu1 %5510, %v6428_v35  }
 0x634   : > { %5511 = vset.pattern.permute.xlu1 %v8474_v44 }
 0x680   : > { %v1428_v7 = vpop.permute.xlu1 %1427 }
 0x681   : > { %v1430_v18 = vmax.f32 %v6380_v52, %v1428_v7  ;;  %v1431_v42 = vmax.f32 %v6383_v53, %v1428_v7 }
 0x683   : > { %v1442_v45 = vrot.slane %v1430_v18, 6  ;;  %v1443_v55 = vrot.slane %v1431_v42, 6 }
 0x685   : > { %v1444_v62 = vsel %vm1007_vm4, %v1442_v45, %v1443_v55 }
 0x686   : > { %5390 = vmatmul.mubr.msk.f32.vlgmr.msra.gmra.mxu1 %vm1445_vm8, %v1444_v62  ;;  %v8597_v62 = vmov 6  }
 0x687   : > { %5396 = vmatprep.mubr.msk.f32.mxu1 %vm5748_vm7, %v8468_v26 }
 0x68d   : > { %v1534_v57 = vpop.permute.xlu1 %1533 }
 0x692   : > { %v6483_v61 = vpop.permute.xlu1 %1540 }
 0x697   : > { %v6487_v16 = vpop.permute.xlu1 %1559 }
 0x69c   : > { %v6490_v51 = vpop.permute.xlu1 %1569 }
 0x6a1   : > { %v1590_v33 = vpop.permute.xlu1 %1589 }
 0x6a6   : > { %v1600_v30 = vpop.permute.xlu1 %1599 }
 0x6ab   : > { %v1610_v18 = vpop.permute.xlu1 %1609 }
 0x746   : > { %v6485_v32 = vpop.f32.mrf.mxu1 }
 0x747   : > { %8595 = vst [vmem:[#allocation17_spill] sm:$0xff] %v6485_v32  ;;  %v1531_v3 = vmul.f32 %v1529_v59, %v6485_v32 }
 0x748   : > { %v5391_v40 = vpop.f32.mrf.mxu1 }
 0x749   : > { %v1536_v60 = vadd.f32 %v1534_v57, %v1531_v3  ;;  %v8598_v3 = vmov 7   ;;  %v6550_v40 = vpop.permute.xlu0 %1805 }
 0x74b   : > { %v1537_v8 = vmax.f32 %v1536_v60, 0.0 }
 0x74d   : > { %v1546_v36 = vrot.slane %v1537_v8, %v6094_v4  ;;  %v1555_v14 = vrot.slane %v1537_v8, %v6097_v5  ;;  %v1565_v11 = vrot.slane %v1537_v8, %v6100_v6  ;;  %v1575_v52 = vrot.slane %v1537_v8, %v6105_v9  ;;  %v6552_v60 = vpop.permute.xlu0 %1990 }
 0x74e   : > { %v1585_v1 = vrot.slane %v1537_v8, %v6501_v29  ;;  %v1595_v28 = vrot.slane %v1537_v8, %v6231_v37 }
 0x74f   : > { %v1547_v53 = vmul.f32 %v1546_v36, %v6483_v61  ;;  %v1556_v54 = vmul.f32 %v1555_v14, %v6492_v10  ;;  %v1566_v22 = vmul.f32 %v1565_v11, %v6487_v16  ;;  %v1576_v2 = vmul.f32 %v1575_v52, %v6490_v51 }
 0x750   : > { %v1586_v34 = vmul.f32 %v1585_v1, %v1580_v20  ;;  %v1596_v41 = vmul.f32 %v1595_v28, %v1590_v33  ;;  %v1524_v33 = vld [vmem:[%s8593_s16 + $0x28] sm:$0xff] }
 0x751   : > { %v1557_v24 = vadd.f32 %v1556_v54, %v1547_v53  ;;  %v6554_v8 = vpop.permute.xlu0 %1713 }
 0x753   : > { %v1567_v13 = vadd.f32 %v1566_v22, %v1557_v24 }
 0x755   : > { %v1577_v25 = vadd.f32 %v1576_v2, %v1567_v13  ;;  %v6556_v36 = vpop.permute.xlu0 %1900 }
 0x757   : > { %v1587_v56 = vadd.f32 %v1586_v34, %v1577_v25  ;;  %v8599_v25 = vmov 9   ;;  %v2188_v34 = vld [vmem:[%s8416_s20] sm:$0xff] }
 0x759   : > { %v1597_v12 = vadd.f32 %v1596_v41, %v1587_v56 }
 0x75b   : > { %v1602_v7 = vadd.f32 %v1600_v30, %v1597_v12  ;;  %v6632_v12 = vld [vmem:[%s8600_s19] sm:$0xff]  ;;  %s8677_s19 = smov 73  }
 0x75c   : > { %8601 = vst [vmem:[#allocation19_spill] sm:$0xff] %v6632_v12 }
 0x75d   : > { %v1607_v42 = vmul.f32 %v1605_v58, %v1602_v7 }
 0x75f   : > { %v1612_v45 = vadd.f32 %v1610_v18, %v1607_v42  ;;  %v8602_v18 = vmov 8  }
 0x761   : > { %v6507_v55 = vmax.f32 %v1612_v45, 0.0 }
 0x763   : > { %1620 = vrot.lane.b32.xlu1 %v6507_v55, %s8460_s29 }
 0x767   : > { %1703 = vperm.xlu1 %5511, %v6473_v38  }
 0x76b   : > { %5512 = vset.pattern.permute.xlu1 %v8472_v48 }
 0x76c   : > { %1723 = vperm.xlu1 %5512, %v6473_v38  }
 0x770   : > { %5513 = vset.pattern.permute.xlu1 %v8470_v43 }
 0x771   : > { %1796 = vperm.xlu1 %5513, %v6446_v23  }
 0x775   : > { %5515 = vset.pattern.permute.xlu1 %v8476_v31 }
 0x776   : > { %1615 = vperm.xlu1 %5515, %v6428_v35  }
 0x77a   : > { %5516 = vset.pattern.permute.xlu1 %v8484_v47 }
 0x77b   : > { %1815 = vperm.xlu1 %5516, %v6446_v23  }
 0x77f   : > { %5517 = vset.pattern.permute.xlu1 %v8472_v48 }
 0x780   : > { %1825 = vperm.xlu1 %5517, %v6446_v23   ;;  %v6535_v23 = vld [vmem:[%s8593_s16 + $0x30] sm:$0xff]  ;;  %s5761_s16 = smov 111  }
 0x784   : > { %5518 = vset.pattern.permute.xlu1 %v8474_v44 }
 0x785   : > { %1890 = vperm.xlu1 %5518, %v6480_v15  }
 0x789   : > { %5519 = vset.pattern.permute.xlu1 %v8472_v48 }
 0x78a   : > { %1910 = vperm.xlu1 %5519, %v6480_v15  }
 0x78e   : > { %5520 = vset.pattern.permute.xlu1 %v8470_v43 }
 0x78f   : > { %1981 = vperm.xlu1 %5520, %v6467_v63  }
 0x793   : > { %5522 = vset.pattern.permute.xlu1 %v8472_v48 }
 0x794   : > { %2010 = vperm.xlu1 %5522, %v6467_v63  }
 0x798   : > { %5523 = vset.pattern.permute.xlu1 %v8597_v62 }
 0x799   : > { %2066 = vperm.xlu1 %5523, %v6428_v35  }
 0x79d   : > { %5526 = vset.pattern.permute.xlu1 %v8470_v43 }
 0x79e   : > { %2123 = vperm.xlu1 %5526, %v6535_v23  }
 0x7a2   : > { %5527 = vset.pattern.permute.xlu1 %v8474_v44 }
 0x7a3   : > { %2132 = vperm.xlu1 %5527, %v6535_v23  }
 0x7d5   : > { %v1621_v57 = vpop.permute.xlu1 %1620 }
 0x7d6   : > { %v1622_v59 = vsel %vm1619_vm9, %v1621_v57, %v6507_v55 }
 0x7d7   : > { %1623 = vrot.lane.b32.xlu0 %v1622_v59, %s8460_s29  ;;  %s8480_s29 = smov 125  }
 0x7db   : > { %2000 = vperm.xlu0 %5521, %v6467_v63  }
 0x7df   : > { %5524 = vset.pattern.permute.xlu0 %v8598_v3 }
 0x7e0   : > { %2071 = vperm.xlu0 %5524, %v6428_v35  }
 0x7e2   : > { %v6582_v24 = vpop.permute.xlu1 %1703 }
 0x7e4   : > { %5525 = vset.pattern.permute.xlu0 %v8470_v43 }
 0x7e5   : > { %1694 = vperm.xlu0 %5525, %v6473_v38  }
 0x7e7   : > { %v6586_v1 = vpop.permute.xlu1 %1723 }
 0x7e9   : > { %1881 = vperm.xlu0 %5525, %v6480_v15  }
 0x7ec   : > { %v6595_v20 = vpop.permute.xlu1 %1796 }
 0x7f1   : > { %v6598_v2 = vpop.permute.xlu1 %1615 }
 0x7f6   : > { %v6602_v13 = vpop.permute.xlu1 %1815 }
 0x7fb   : > { %v6608_v28 = vpop.permute.xlu1 %1825 }
 0x800   : > { %v6615_v30 = vpop.permute.xlu1 %1890 }
 0x805   : > { %v6620_v41 = vpop.permute.xlu1 %1910 }
 0x80a   : > { %v6626_v56 = vpop.permute.xlu1 %1981 }
 0x80f   : > { %v6637_v58 = vpop.permute.xlu1 %2010 }
 0x814   : > { %v6646_v45 = vpop.permute.xlu1 %2066 }
 0x815   : > { %8604 = vst [vmem:[#allocation21_spill] sm:$0xff] %v6646_v45 }
 0x819   : > { %v6652_v57 = vpop.permute.xlu1 %2123 }
 0x81a   : > { %8605 = vst [vmem:[#allocation22_spill] sm:$0xff] %v6652_v57 }
 0x849   : > { %v1624_v14 = vpop.permute.xlu0 %1623 }
 0x84a   : > { %v1625_v63 = vsel %vm1619_vm9, %v1624_v14, %v6507_v55  ;;  %v6658_v14 = vpop.permute.xlu1 %2132 }
 0x84b   : > { %1738 = vrot.lane.b32.xlu0 %v1625_v63, %s8510_s5  ;;  %1632 = vrot.lane.b32.xlu1 %v1625_v63, %s8462_s21  ;;  %v1629_v38 = vrot.slane %v1625_v63, 1  ;;  %v1675_v15 = vrot.slane %v1625_v63, 7  ;;  %v1630_v11 = vrot.slane %v1625_v63, 2  ;;  %v1631_v52 = vrot.slane %v1625_v63, 3  ;;  %8606 = vst [vmem:[#allocation23_spill] sm:$0xff] %v6658_v14 }
 0x84c   : > { %v1733_v53 = vrot.slane %v1625_v63, 6  ;;  %v1777_v54 = vrot.slane %v1625_v63, 5  ;;  %v1862_v22 = vrot.slane %v1625_v63, 4 }
 0x84f   : > { %1678 = vrot.lane.b32.xlu1 %v1625_v63, %s8466_s3  ;;  %1634 = vrot.lane.b32.xlu0 %v1629_v38, %s8462_s21 }
 0x853   : > { %1784 = vrot.lane.b32.xlu1 %v1625_v63, %s8464_s24  ;;  %1676 = vrot.lane.b32.xlu0 %v1675_v15, %s8466_s3 }
 0x856   : > { %v6639_v7 = vpop.permute.xlu0 %2000 }
 0x857   : > { %2022 = vrot.lane.b32.xlu1 %v1625_v63, %s8482_s26  ;;  %1680 = vrot.lane.b32.xlu0 %v1629_v38, %s8466_s3 }
 0x85b   : > { %1636 = vrot.lane.b32.xlu1 %v1630_v11, %s8462_s21  ;;  %1740 = vrot.lane.b32.xlu0 %v1629_v38, %s8510_s5  ;;  %v6644_v42 = vpop.permute.xlu0 %2071 }
 0x85c   : > { %8603 = vst [vmem:[#allocation20_spill] sm:$0xff] %v6644_v42 }
 0x85f   : > { %1638 = vrot.lane.b32.xlu1 %v1631_v52, %s8462_s21  ;;  %1780 = vrot.lane.b32.xlu0 %v1733_v53, %s8464_s24  ;;  %s8478_s21 = smov 124  }
 0x863   : > { %1734 = vrot.lane.b32.xlu1 %v1733_v53, %s8510_s5  ;;  %1782 = vrot.lane.b32.xlu0 %v1675_v15, %s8464_s24 }
 0x867   : > { %1736 = vrot.lane.b32.xlu1 %v1675_v15, %s8510_s5  ;;  %1863 = vrot.lane.b32.xlu0 %v1631_v52, %s8579_s25 }
 0x86b   : > { %1682 = vrot.lane.b32.xlu1 %v1630_v11, %s8466_s3  ;;  %1867 = vrot.lane.b32.xlu0 %v1777_v54, %s8579_s25  ;;  %s8626_s3 = smov 117  }
 0x86f   : > { %1778 = vrot.lane.b32.xlu1 %v1777_v54, %s8464_s24  ;;  %1924 = vrot.lane.b32.xlu0 %v1862_v22, %s8480_s29  ;;  %s8627_s24 = smov 116  }
 0x873   : > { %1865 = vrot.lane.b32.xlu1 %v1862_v22, %s8579_s25  ;;  %1963 = vrot.lane.b32.xlu0 %v1629_v38, %s8478_s21 }
 0x877   : > { %1920 = vrot.lane.b32.xlu1 %v1630_v11, %s8480_s29  ;;  %1967 = vrot.lane.b32.xlu0 %v1631_v52, %s8478_s21 }
 0x87b   : > { %1922 = vrot.lane.b32.xlu1 %v1631_v52, %s8480_s29  ;;  %2026 = vrot.lane.b32.xlu0 %v1630_v11, %s8482_s26 }
 0x87f   : > { %1869 = vrot.lane.b32.xlu1 %v1733_v53, %s8579_s25  ;;  %2028 = vrot.lane.b32.xlu0 %v1631_v52, %s8482_s26 }
 0x883   : > { %1926 = vrot.lane.b32.xlu1 %v1777_v54, %s8480_s29  ;;  %2078 = vperm.xlu0 %5525, %v1524_v33   ;;  %s8617_s29 = smov 16  }
 0x887   : > { %1965 = vrot.lane.b32.xlu1 %v1630_v11, %s8478_s21  ;;  %5529 = vset.pattern.permute.xlu0 %v8484_v47 }
 0x888   : > { %2097 = vperm.xlu0 %5529, %v1524_v33  }
 0x88b   : > { %2024 = vrot.lane.b32.xlu1 %v1629_v38, %s8482_s26  ;;  %s8608_s26 = sld [smem:[#allocation31_spill]] }
 0x88c   : > { %5531 = vset.pattern.permute.xlu0 %v8489_v49 }
 0x88d   : > { %2162 = vperm.xlu0 %5531, %v6535_v23  }
 0x88f   : > { %1969 = vrot.lane.b32.xlu1 %v1862_v22, %s8478_s21  ;;  %s8628_s21 = smov 113  }
 0x891   : > { %5534 = vset.pattern.permute.xlu0 %v8599_v25 }
 0x892   : > { %2183 = vperm.xlu0 %5534, %v6428_v35  }
 0x893   : > { %2087 = vperm.xlu1 %5527, %v1524_v33  }
 0x896   : > { %5537 = vset.pattern.permute.xlu0 %v8470_v43 }
 0x897   : > { %5528 = vset.pattern.permute.xlu1 %v8484_v47  ;;  %2208 = vperm.xlu0 %5537, %v2188_v34  }
 0x898   : > { %2142 = vperm.xlu1 %5528, %v6535_v23  }
 0x89b   : > { %5539 = vset.pattern.permute.xlu0 %v8472_v48 }
 0x89c   : > { %5530 = vset.pattern.permute.xlu1 %v8472_v48  ;;  %2237 = vperm.xlu0 %5539, %v2188_v34  }
 0x89d   : > { %2152 = vperm.xlu1 %5530, %v6535_v23  }
 0x8a0   : > { %5542 = vset.pattern.permute.xlu0 %v8597_v62  ;;  %v1843_v62 = vrot.slane %v6507_v55, %v6097_v5 }
 0x8a1   : > { %2107 = vperm.xlu1 %5530, %v1524_v33   ;;  %2267 = vperm.xlu0 %5542, %v2188_v34  }
 0x8a2   : > { %v1844_v32 = vmul.f32 %v1843_v62, %v6550_v40 }
 0x8a5   : > { %5532 = vset.pattern.permute.xlu1 %v8476_v31  ;;  %5545 = vset.pattern.permute.xlu0 %v8472_v48 }
 0x8a6   : > { %2172 = vperm.xlu1 %5532, %v6535_v23   ;;  %2292 = vperm.xlu0 %5545, %v6632_v12   ;;  %v6650_v23 = vpop.permute.xlu0 %1694 }
 0x8aa   : > { %5533 = vset.pattern.permute.xlu1 %v8602_v18  ;;  %5547 = vset.pattern.permute.xlu0 %v8470_v43  ;;  %v6656_v59 = vpop.permute.xlu0 %1881 }
 0x8ab   : > { %2117 = vperm.xlu1 %5533, %v6428_v35  }
 0x8af   : > { %5535 = vset.pattern.permute.xlu1 %v8470_v43 }
 0x8b0   : > { %2196 = vperm.xlu1 %5535, %v6632_v12  }
 0x8b4   : > { %5536 = vset.pattern.permute.xlu1 %v8474_v44 }
 0x8b5   : > { %2201 = vperm.xlu1 %5536, %v6632_v12  }
 0x8b9   : > { %2217 = vperm.xlu1 %5536, %v2188_v34  }
 0x8bd   : > { %v1633_v35 = vpop.permute.xlu1 %1632  ;;  %5538 = vset.pattern.permute.xlu1 %v8484_v47  ;;  %v1739_v63 = vpop.permute.xlu0 %1738 }
 0x8be   : > { %2227 = vperm.xlu1 %5538, %v2188_v34  }
 0x8c1   : > { %v1679_v38 = vpop.permute.xlu1 %1678  ;;  %v1635_v15 = vpop.permute.xlu0 %1634 }
 0x8c2   : > { %5540 = vset.pattern.permute.xlu1 %v8489_v49 }
 0x8c3   : > { %2247 = vperm.xlu1 %5540, %v2188_v34  }
 0x8c5   : > { %v6662_v11 = vpop.permute.xlu1 %1784  ;;  %v1677_v52 = vpop.permute.xlu0 %1676 }
 0x8c7   : > { %5541 = vset.pattern.permute.xlu1 %v8476_v31  ;;  %v6677_v31 = vld [vmem:[%s8416_s20 + $0x8] sm:$0xff] }
 0x8c8   : > { %2257 = vperm.xlu1 %5541, %v2188_v34   ;;  %8607 = vst [vmem:[#allocation24_spill] sm:$0xff] %v6677_v31  ;;  %2379 = vperm.xlu0 %5547, %v6677_v31  }
 0x8c9   : > { %v6665_v53 = vpop.permute.xlu1 %2022  ;;  %v1681_v54 = vpop.permute.xlu0 %1680 }
 0x8cc   : > { %5543 = vset.pattern.permute.xlu1 %v8598_v3 }
 0x8cd   : > { %v1637_v22 = vpop.permute.xlu1 %1636  ;;  %2277 = vperm.xlu1 %5543, %v2188_v34   ;;  %v6668_v33 = vpop.permute.xlu0 %1740  ;;  %v6683_v34 = vld [vmem:[%s8608_s26] sm:$0xff] }
 0x8ce   : > { %vm1392_vm10 = vcmp.ne.f32.partialorder %v6683_v34, 0.0 }
 0x8cf   : > { %v1645_v21 = vsel %vm1392_vm10, %v1635_v15, 0.0  ;;  %v1644_v25 = vsel %vm1392_vm10, %v1633_v35, 0.0  ;;  %v1646_v17 = vsel %vm1392_vm10, %v1637_v22, 0.0  ;;  %v1688_v29 = vsel %vm1392_vm10, %v1677_v52, 0.0 }
 0x8d0   : > { %v1656_v39 = vrot.slane %v1645_v21, %v6094_v4  ;;  %v1662_v35 = vrot.slane %v1646_v17, %v6094_v4  ;;  %v1838_v21 = vrot.slane %v6507_v55, %v6094_v4  ;;  %v1748_v17 = vsel %vm1392_vm10, %v1739_v63, 0.0 }
 0x8d1   : > { %v1639_v26 = vpop.permute.xlu1 %1638  ;;  %5544 = vset.pattern.permute.xlu1 %v8484_v47  ;;  %v1781_v43 = vpop.permute.xlu0 %1780  ;;  %v1689_v52 = vsel %vm1392_vm10, %v1679_v38, 0.0  ;;  %v1700_v45 = vrot.slane %v1688_v29, %v6097_v5  ;;  %v1764_v62 = vrot.slane %v1748_v17, %v6100_v6 }
 0x8d2   : > { %2287 = vperm.xlu1 %5544, %v6632_v12   ;;  %v1647_v15 = vsel %vm1392_vm10, %v1639_v26, 0.0  ;;  %v1855_v26 = vrot.slane %v6507_v55, %v6105_v9  ;;  %v1657_v57 = vmul.f32 %v1656_v39, %v6492_v10  ;;  %v1663_v63 = vmul.f32 %v1662_v35, %v6487_v16 }
 0x8d3   : > { %v1839_v10 = vmul.f32 %v1838_v21, %v6595_v20  ;;  %v1709_v29 = vrot.slane %v1689_v52, %v6097_v5 }
 0x8d4   : > { %v1856_v52 = vmul.f32 %v1855_v26, %v6608_v28 }
 0x8d5   : > { %v1735_v48 = vpop.permute.xlu1 %1734  ;;  %v1783_v44 = vpop.permute.xlu0 %1782 }
 0x8d6   : > { %5546 = vset.pattern.permute.xlu1 %v8489_v49  ;;  %v1746_v22 = vsel %vm1392_vm10, %v1735_v48, 0.0  ;;  %v1668_v48 = vrot.slane %v1647_v15, %v6094_v4 }
 0x8d7   : > { %2297 = vperm.xlu1 %5546, %v6632_v12   ;;  %v1651_v12 = vrot.slane %v1644_v25, %v6094_v4 }
 0x8d9   : > { %v1737_v47 = vpop.permute.xlu1 %1736  ;;  %v6685_v27 = vpop.permute.xlu0 %1863  ;;  %v1652_v42 = vmul.f32 %v1651_v12, %v6483_v61  ;;  %v1791_v61 = vsel %vm1392_vm10, %v1781_v43, 0.0 }
 0x8da   : > { %v1747_v18 = vsel %vm1392_vm10, %v1737_v47, 0.0  ;;  %v1849_v47 = vrot.slane %v6507_v55, %v6100_v6  ;;  %v1690_v55 = vsel %vm1392_vm10, %v1681_v54, 0.0  ;;  %v1669_v54 = vmul.f32 %v1668_v48, %v6490_v51 }
 0x8db   : > { %5548 = vset.pattern.permute.xlu1 %v8609_v0  ;;  %v1758_v25 = vrot.slane %v1747_v18, %v6100_v6  ;;  %v1753_v18 = vrot.slane %v1746_v22, %v6100_v6  ;;  %v1658_v15 = vadd.f32 %v1657_v57, %v1652_v42  ;;  %v1719_v22 = vrot.slane %v1690_v55, %v6097_v5 }
 0x8dc   : > { %v1850_v35 = vmul.f32 %v1849_v47, %v6602_v13  ;;  %v1749_v42 = vsel %vm1392_vm10, %v6668_v33, 0.0  ;;  %v1811_v51 = vrot.slane %v1791_v61, %v6105_v9  ;;  %v1845_v57 = vadd.f32 %v1844_v32, %v1839_v10 }
 0x8dd   : > { %v1683_v49 = vpop.permute.xlu1 %1682  ;;  %v6689_v19 = vpop.permute.xlu0 %1867  ;;  %v1759_v12 = vmul.f32 %v1758_v25, %v6582_v24  ;;  %v1754_v21 = vmul.f32 %v1753_v18, %v6650_v23  ;;  %v1701_v25 = vmul.f32 %v1700_v45, %v6650_v23  ;;  %v1664_v17 = vadd.f32 %v1663_v63, %v1658_v15 }
 0x8de   : > { %v1691_v16 = vsel %vm1392_vm10, %v1683_v49, 0.0  ;;  %v1792_v49 = vsel %vm1392_vm10, %v1783_v44, 0.0  ;;  %v1765_v18 = vmul.f32 %v1764_v62, %v6554_v8  ;;  %v1710_v45 = vmul.f32 %v1709_v29, %v6582_v24  ;;  %v6770_v24 = vld [vmem:[%s8608_s26 + $0x8] sm:$0x1] }
 0x8df   : > { %v1760_v47 = vadd.f32 %v1759_v12, %v1754_v21  ;;  %v1729_v48 = vrot.slane %v1691_v16, %v6097_v5  ;;  %v1670_v23 = vadd.f32 %v1669_v54, %v1664_v17  ;;  %v1720_v63 = vmul.f32 %v1719_v22, %v6554_v8 }
 0x8e0   : > { %v1770_v33 = vrot.slane %v1749_v42, %v6100_v6  ;;  %v1851_v10 = vadd.f32 %v1850_v35, %v1845_v57  ;;  %v1711_v61 = vadd.f32 %v1710_v45, %v1701_v25  ;;  %v1812_v26 = vmul.f32 %v1811_v51, %v6550_v40 }
 0x8e1   : > { %v1779_v3 = vpop.permute.xlu1 %1778  ;;  %v6705_v31 = vpop.permute.xlu0 %1924  ;;  %v1821_v62 = vrot.slane %v1792_v49, %v6105_v9  ;;  %v1766_v8 = vadd.f32 %v1765_v18, %v1760_v47  ;;  %v1730_v12 = vmul.f32 %v1729_v48, %v6586_v1  ;;  %v1793_v40 = vsel %vm1392_vm10, %v6662_v11, 0.0 }
 0x8e2   : > { %v1790_v39 = vsel %vm1392_vm10, %v1779_v3, 0.0  ;;  %v6777_v15 = vadd.f32 %v1856_v52, %v1851_v10  ;;  %v1672_v54 = vrot.slane %v1670_v23, 4  ;;  %v1721_v22 = vadd.f32 %v1720_v63, %v1711_v61 }
 0x8e3   : > { %v1802_v43 = vrot.slane %v1790_v39, %v6105_v9  ;;  %v1771_v21 = vmul.f32 %v1770_v33, %v6586_v1  ;;  %vm1393_vm11 = vcmp.ne.f32.partialorder %v6770_v24, 0.0  ;;  %v1831_v17 = vrot.slane %v1793_v40, %v6105_v9 }
 0x8e4   : > { %v1822_v42 = vmul.f32 %v1821_v62, %v6602_v13  ;;  %v1731_v51 = vadd.f32 %v1730_v12, %v1721_v22  ;;  %v1674_v49 = vadd.f32 %v1672_v54, %v6598_v2  ;;  %v1877_v47 = vsel %vm1392_vm10, %v6689_v19, 0.0 }
 0x8e5   : > { %v1866_v14 = vpop.permute.xlu1 %1865  ;;  %v6739_v38 = vpop.permute.xlu0 %1963  ;;  %v1803_v32 = vmul.f32 %v1802_v43, %v6595_v20  ;;  %v1772_v1 = vadd.f32 %v1771_v21, %v1766_v8  ;;  %v1832_v33 = vmul.f32 %v1831_v17, %v6608_v28  ;;  %v1906_v10 = vrot.slane %v1877_v47, %v6231_v37 }
 0x8e6   : > { %v1876_v20 = vsel %vm1392_vm10, %v1866_v14, 0.0  ;;  %v1875_v14 = vsel %vm1392_vm10, %v6685_v27, 0.0  ;;  %v6798_v27 = vld [vmem:[%s8416_s20 + $0x18] sm:$0xff]  ;;  %v1975_v19 = vsel %vm1392_vm10, %v6739_v38, 0.0  ;;  %v2034_v61 = vsel %vm1393_vm11, %v6665_v53, 0.0 }
 0x8e7   : > { %v1813_v43 = vadd.f32 %v1812_v26, %v1803_v32  ;;  %v1896_v11 = vrot.slane %v1876_v20, %v6231_v37  ;;  %2566 = vperm.xlu0 %5547, %v6798_v27   ;;  %v1774_v32 = vrot.slane %v1772_v1, 4  ;;  %v1987_v28 = vrot.slane %v1975_v19, %v6241_v50 }
 0x8e8   : > { %v1907_v22 = vmul.f32 %v1906_v10, %v6556_v36 }
 0x8e9   : > { %v1921_v3 = vpop.permute.xlu1 %1920  ;;  %v1968_v39 = vpop.permute.xlu0 %1967  ;;  %v1823_v13 = vadd.f32 %v1822_v42, %v1813_v43  ;;  %v1897_v23 = vmul.f32 %v1896_v11, %v6615_v30 }
 0x8ea   : > { %v1932_v29 = vsel %vm1392_vm10, %v1921_v3, 0.0  ;;  %v1934_v3 = vsel %vm1392_vm10, %v6705_v31, 0.0  ;;  %v1887_v31 = vrot.slane %v1875_v14, %v6231_v37  ;;  %v1977_v53 = vsel %vm1392_vm10, %v1968_v39, 0.0 }
 0x8eb   : > { %v1939_v25 = vrot.slane %v1932_v29, %v6238_v46  ;;  %v1950_v18 = vrot.slane %v1934_v3, %v6238_v46  ;;  %5554 = vset.pattern.permute.xlu0 %v8609_v0  ;;  %v1833_v8 = vadd.f32 %v1832_v33, %v1823_v13  ;;  %v2006_v17 = vrot.slane %v1977_v53, %v6241_v50 }
 0x8ed   : > { %v1923_v55 = vpop.permute.xlu1 %1922  ;;  %v2027_v57 = vpop.permute.xlu0 %2026  ;;  %v1951_v12 = vmul.f32 %v1950_v18, %v6556_v36 }
 0x8ee   : > { %v1933_v44 = vsel %vm1392_vm10, %v1923_v55, 0.0  ;;  %v1940_v55 = vmul.f32 %v1939_v25, %v6656_v59  ;;  %v2036_v21 = vsel %vm1393_vm11, %v2027_v57, 0.0  ;;  %v1988_v25 = vmul.f32 %v1987_v28, %v6626_v56  ;;  %v8611_v28 = vld [vmem:[#allocation20_spill] sm:$0xff] }
 0x8ef   : > { %v1944_v16 = vrot.slane %v1933_v44, %v6238_v46  ;;  %v1732_v44 = vadd.f32 %v1731_v51, %v1674_v49  ;;  %v2052_v1 = vrot.slane %v2036_v21, %v6094_v4  ;;  %v1859_v49 = vrot.slane %v6777_v15, 4  ;;  %v8613_v21 = vld [vmem:[#allocation23_spill] sm:$0xff] }
 0x8f1   : > { %v1870_v35 = vpop.permute.xlu1 %1869  ;;  %v1945_v48 = vmul.f32 %v1944_v16, %v6615_v30  ;;  %v1888_v30 = vmul.f32 %v1887_v31, %v6656_v59  ;;  %v2029_v20 = vpop.permute.xlu0 %2028  ;;  %v2041_v16 = vrot.slane %v2034_v61, %v6094_v4  ;;  %v2053_v19 = vmul.f32 %v2052_v1, %v6639_v7 }
 0x8f2   : > { %v1878_v45 = vsel %vm1392_vm10, %v1870_v35, 0.0  ;;  %v1776_v35 = vadd.f32 %v1774_v32, %v1732_v44  ;;  %v2037_v43 = vsel %vm1393_vm11, %v2029_v20, 0.0 }
 0x8f3   : > { %v1946_v26 = vadd.f32 %v1945_v48, %v1940_v55  ;;  %v1916_v62 = vrot.slane %v1878_v45, %v6231_v37  ;;  %v1898_v40 = vadd.f32 %v1897_v23, %v1888_v30  ;;  %v2058_v31 = vrot.slane %v2037_v43, %v6094_v4 }
 0x8f4   : > { %v1834_v42 = vadd.f32 %v1833_v8, %v1776_v35  ;;  %v2042_v47 = vmul.f32 %v2041_v16, %v6626_v56  ;;  %v2007_v45 = vmul.f32 %v2006_v17, %v6639_v7  ;;  %v8610_v8 = vld [vmem:[#allocation21_spill] sm:$0xff] }
 0x8f5   : > { %v1927_v52 = vpop.permute.xlu1 %1926  ;;  %v1917_v14 = vmul.f32 %v1916_v62, %v6620_v41  ;;  %v1952_v3 = vadd.f32 %v1951_v12, %v1946_v26  ;;  %v1908_v51 = vadd.f32 %v1907_v22, %v1898_v40  ;;  %v2059_v33 = vmul.f32 %v2058_v31, %v6637_v58 }
 0x8f6   : > { %v1935_v2 = vsel %vm1392_vm10, %v1927_v52, 0.0 }
 0x8f7   : > { %v1956_v63 = vrot.slane %v1935_v2, %v6238_v46  ;;  %v1918_v48 = vadd.f32 %v1917_v14, %v1908_v51  ;;  %v1861_v2 = vadd.f32 %v1859_v49, %v1834_v42 }
 0x8f9   : > { %v1966_v38 = vpop.permute.xlu1 %1965  ;;  %v1957_v59 = vmul.f32 %v1956_v63, %v6620_v41  ;;  %v1919_v56 = vadd.f32 %v1918_v48, %v1861_v2  ;;  %v8615_v48 = vld [vmem:[#allocation18_spill] sm:$0xff] }
 0x8fa   : > { %v1976_v29 = vsel %vm1392_vm10, %v1966_v38, 0.0 }
 0x8fb   : > { %v1996_v54 = vrot.slane %v1976_v29, %v6241_v50  ;;  %v1958_v57 = vadd.f32 %v1957_v59, %v1952_v3  ;;  %v8612_v59 = vld [vmem:[#allocation17_spill] sm:$0xff] }
 0x8fc   : > { %v2129_v22 = vrot.slane %v8612_v59, %v6094_v4  ;;  %v2148_v43 = vrot.slane %v8612_v59, %v6100_v6 }
 0x8fd   : > { %v1997_v39 = vmul.f32 %v1996_v54, %v6552_v60  ;;  %v2025_v11 = vpop.permute.xlu1 %2024  ;;  %v1960_v55 = vrot.slane %v1958_v57, 4  ;;  %v2138_v54 = vrot.slane %v8612_v59, %v6097_v5 }
 0x8fe   : > { %v2035_v36 = vsel %vm1393_vm11, %v2025_v11, 0.0  ;;  %v2079_v53 = vpop.permute.xlu0 %2078  ;;  %v8614_v11 = vld [vmem:[#allocation22_spill] sm:$0xff] }
 0x8ff   : > { %v2046_v41 = vrot.slane %v2035_v36, %v6094_v4  ;;  %v1998_v52 = vadd.f32 %v1997_v39, %v1988_v25  ;;  %v1962_v10 = vadd.f32 %v1960_v55, %v1919_v56  ;;  %v2139_v14 = vmul.f32 %v2138_v54, %v8613_v21 }
 0x900   : > { %v2158_v39 = vrot.slane %v8612_v59, %v6105_v9  ;;  %v2130_v25 = vmul.f32 %v2129_v22, %v8614_v11 }
 0x901   : > { %v2047_v13 = vmul.f32 %v2046_v41, %v6552_v60  ;;  %v1970_v18 = vpop.permute.xlu1 %1969  ;;  %v2008_v44 = vadd.f32 %v2007_v45, %v1998_v52  ;;  %v2168_v52 = vrot.slane %v8612_v59, %v8615_v48 }
 0x902   : > { %v1978_v23 = vsel %vm1392_vm10, %v1970_v18, 0.0  ;;  %v2140_v51 = vadd.f32 %v2139_v14, %v2130_v25 }
 0x903   : > { %v2048_v63 = vadd.f32 %v2047_v13, %v2042_v47  ;;  %v2016_v15 = vrot.slane %v1978_v23, %v6241_v50  ;;  %v2098_v3 = vpop.permute.xlu0 %2097  ;;  %v2178_v23 = vrot.slane %v8612_v59, %v6231_v37 }
 0x905   : > { %v2054_v32 = vadd.f32 %v2053_v19, %v2048_v63  ;;  %v2017_v60 = vmul.f32 %v2016_v15, %v6637_v58 }
 0x907   : > { %v2060_v61 = vadd.f32 %v2059_v33, %v2054_v32  ;;  %v2018_v30 = vadd.f32 %v2017_v60, %v2008_v44 }
 0x908   : > { %v2163_v13 = vpop.permute.xlu0 %2162 }
 0x909   : > { %v2062_v26 = vrot.slane %v2060_v61, 4  ;;  %v2019_v62 = vadd.f32 %v2018_v30, %v1962_v10  ;;  %v2169_v55 = vmul.f32 %v2168_v52, %v2163_v13 }
 0x90b   : > { %v2064_v38 = vadd.f32 %v2062_v26, %v2019_v62 }
 0x90d   : > { %v2069_v12 = vmul.f32 %v8610_v8, %v2064_v38  ;;  %v2184_v10 = vpop.permute.xlu0 %2183 }
 0x90e   : > { %v2088_v7 = vpop.permute.xlu1 %2087 }
 0x90f   : > { %v2074_v20 = vadd.f32 %v8611_v28, %v2069_v12 }
 0x911   : > { %v2075_v29 = vmax.f32 %v2074_v20, 0.0 }
 0x913   : > { %v2143_v40 = vpop.permute.xlu1 %2142  ;;  %v2084_v16 = vrot.slane %v2075_v29, %v6094_v4  ;;  %v2093_v58 = vrot.slane %v2075_v29, %v6097_v5  ;;  %v2103_v57 = vrot.slane %v2075_v29, %v6100_v6  ;;  %v2113_v47 = vrot.slane %v2075_v29, %v6105_v9  ;;  %v6886_v29 = vpop.permute.xlu0 %2208 }
 0x914   : > { %v2149_v36 = vmul.f32 %v2148_v43, %v2143_v40 }
 0x915   : > { %v2085_v17 = vmul.f32 %v2084_v16, %v2079_v53  ;;  %v2094_v42 = vmul.f32 %v2093_v58, %v2088_v7  ;;  %v2104_v18 = vmul.f32 %v2103_v57, %v2098_v3 }
 0x916   : > { %v2150_v31 = vadd.f32 %v2149_v36, %v2140_v51 }
 0x917   : > { %v2095_v49 = vadd.f32 %v2094_v42, %v2085_v17  ;;  %v6895_v21 = vpop.permute.xlu0 %2237 }
 0x918   : > { %v2153_v35 = vpop.permute.xlu1 %2152 }
 0x919   : > { %v2159_v41 = vmul.f32 %v2158_v39, %v2153_v35  ;;  %v2105_v15 = vadd.f32 %v2104_v18, %v2095_v49 }
 0x91b   : > { %v2160_v45 = vadd.f32 %v2159_v41, %v2150_v31 }
 0x91c   : > { %v2108_v1 = vpop.permute.xlu1 %2107  ;;  %v2268_v42 = vpop.permute.xlu0 %2267 }
 0x91d   : > { %v2114_v2 = vmul.f32 %v2113_v47, %v2108_v1  ;;  %v2170_v33 = vadd.f32 %v2169_v55, %v2160_v45 }
 0x91f   : > { %v2115_v56 = vadd.f32 %v2114_v2, %v2105_v15  ;;  %v8618_v15 = vld [vmem:[#allocation24_spill] sm:$0xff] }
 0x921   : > { %v2173_v19 = vpop.permute.xlu1 %2172  ;;  %v2293_v45 = vpop.permute.xlu0 %2292 }
 0x922   : > { %v2179_v63 = vmul.f32 %v2178_v23, %v2173_v19 }
 0x924   : > { %v2180_v44 = vadd.f32 %v2179_v63, %v2170_v33  ;;  %v8619_v33 = vmov 3  }
 0x926   : > { %v2118_v32 = vpop.permute.xlu1 %2117 }
 0x927   : > { %v2120_v60 = vadd.f32 %v2118_v32, %v2115_v56  ;;  %v2190_v56 = vld [vmem:[%s8416_s20 + $0x10] sm:$0xff]  ;;  %v8620_v32 = vmov 0  }
 0x929   : > { %v2181_v61 = vadd.f32 %v2180_v44, %v2120_v60  ;;  %v8621_v44 = vmov 5   ;;  %v8622_v60 = vld [vmem:[#allocation19_spill] sm:$0xff] }
 0x92b   : > { %v6879_v30 = vadd.f32 %v2184_v10, %v2181_v61  ;;  %v2197_v26 = vpop.permute.xlu1 %2196  ;;  %v8623_v10 = vmov 2   ;;  %v2192_v61 = vld [vmem:[%s8416_s20 + $0x20] sm:$0xff] }
 0x92d   : > { %8616 = vst [vmem:[#allocation21_spill] sm:$0xff] %v6879_v30  ;;  %v2199_v62 = vmul.f32 %v2197_v26, %v6879_v30  ;;  %v8624_v26 = vmov 6  }
 0x930   : > { %v2202_v38 = vpop.permute.xlu1 %2201 }
 0x931   : > { %v2204_v8 = vadd.f32 %v2202_v38, %v2199_v62 }
 0x933   : > { %v2205_v12 = vmax.f32 %v2204_v8, 0.0  ;;  %v8625_v8 = vmov 7  }
 0x934   : > { %v6882_v7 = vpop.permute.xlu1 %2217 }
 0x935   : > { %v2214_v28 = vrot.slane %v2205_v12, %v6094_v4  ;;  %v2223_v20 = vrot.slane %v2205_v12, %v6097_v5  ;;  %v2233_v59 = vrot.slane %v2205_v12, %v6100_v6  ;;  %v2243_v58 = vrot.slane %v2205_v12, %v6105_v9 }
 0x936   : > { %v2253_v3 = vrot.slane %v2205_v12, %v8615_v48  ;;  %v2273_v25 = vrot.slane %v2205_v12, %v6238_v46  ;;  %v2263_v17 = vrot.slane %v2205_v12, %v6231_v37  ;;  %v2283_v49 = vrot.slane %v2205_v12, %v6241_v50 }
 0x937   : > { %v2215_v40 = vmul.f32 %v2214_v28, %v6886_v29  ;;  %v2224_v53 = vmul.f32 %v2223_v20, %v6882_v7  ;;  %v2244_v14 = vmul.f32 %v2243_v58, %v6895_v21 }
 0x938   : > { %v2274_v57 = vmul.f32 %v2273_v25, %v2268_v42  ;;  %v8633_v42 = vmov 4  }
 0x939   : > { %v2225_v54 = vadd.f32 %v2224_v53, %v2215_v40  ;;  %v6891_v16 = vpop.permute.xlu1 %2227 }
 0x93a   : > { %v2234_v35 = vmul.f32 %v2233_v59, %v6891_v16 }
 0x93c   : > { %v2235_v22 = vadd.f32 %v2234_v35, %v2225_v54 }
 0x93e   : > { %v2248_v43 = vpop.permute.xlu1 %2247  ;;  %v2245_v39 = vadd.f32 %v2244_v14, %v2235_v22 }
 0x93f   : > { %v2254_v11 = vmul.f32 %v2253_v3, %v2248_v43  ;;  %v2193_v43 = vld [vmem:[%s8416_s20 + $0x28] sm:$0xff]  ;;  %v6980_v3 = vld [vmem:[%s8413_s17] sm:$0xff] }
 0x940   : > { %8632 = vst [vmem:[#allocation20_spill] sm:$0xff] %v6980_v3 }
 0x941   : > { %v2255_v1 = vadd.f32 %v2254_v11, %v2245_v39  ;;  %v6991_v11 = vld [vmem:[%s8414_s18] sm:$0xff] }
 0x943   : > { %v2258_v36 = vpop.permute.xlu1 %2257  ;;  %v6934_v12 = vpop.permute.xlu0 %2379 }
 0x944   : > { %v2264_v51 = vmul.f32 %v2263_v17, %v2258_v36 }
 0x946   : > { %v2265_v41 = vadd.f32 %v2264_v51, %v2255_v1 }
 0x948   : > { %v2278_v31 = vpop.permute.xlu1 %2277  ;;  %v2275_v47 = vadd.f32 %v2274_v57, %v2265_v41  ;;  %v7018_v57 = vld [vmem:[%s8410_s14] sm:$0xff] }
 0x949   : > { %v2284_v52 = vmul.f32 %v2283_v49, %v2278_v31  ;;  %8634 = vst [vmem:[#allocation17_spill] sm:$0xff] %v7018_v57  ;;  %v8635_v31 = vmov 8  }
 0x94b   : > { %v2285_v13 = vadd.f32 %v2284_v52, %v2275_v47  ;;  %v7030_v47 = vld [vmem:[%s8636_s13] sm:$0x3f] }
 0x94c   : > { %8637 = vst [vmem:[#allocation23_spill] sm:$0xff] %v7030_v47 }
 0x94d   : > { %v2288_v18 = vpop.permute.xlu1 %2287 }
 0x94e   : > { %v2290_v2 = vadd.f32 %v2288_v18, %v2285_v13  ;;  %v7046_v18 = vld [vmem:[%s8414_s18 + $0x8] sm:$0xff] }
 0x94f   : > { %8638 = vst [vmem:[#allocation22_spill] sm:$0xff] %v7046_v18 }
 0x950   : > { %v2295_v23 = vmul.f32 %v2293_v45, %v2290_v2 }
 0x952   : > { %v2298_v19 = vpop.permute.xlu1 %2297 }
 0x953   : > { %v2300_v55 = vadd.f32 %v2298_v19, %v2295_v23  ;;  %v7057_v23 = vld [vmem:[%s8414_s18 + $0x18] sm:$0xff] }
 0x954   : > { %8639 = vst [vmem:[#allocation24_spill] sm:$0xff] %v7057_v23 }
 0x955   : > { %v6902_v63 = vmax.f32 %v2300_v55, 0.0 }
 0x957   : > { %2307 = vrot.lane.b32.xlu1 %v6902_v63, %s8617_s29 }
 0x95b   : > { %2388 = vperm.xlu1 %5548, %v8618_v15  }
 0x95f   : > { %5549 = vset.pattern.permute.xlu1 %v8619_v33 }
 0x960   : > { %2408 = vperm.xlu1 %5549, %v8618_v15  }
 0x962   : > { %v6936_v28 = vpop.permute.xlu0 %2566 }
 0x964   : > { %5550 = vset.pattern.permute.xlu1 %v8620_v32 }
 0x965   : > { %2481 = vperm.xlu1 %5550, %v2190_v56  }
 0x969   : > { %5551 = vset.pattern.permute.xlu1 %v8621_v44 }
 0x96a   : > { %2303 = vperm.xlu1 %5551, %v8622_v60  }
 0x96e   : > { %5552 = vset.pattern.permute.xlu1 %v8623_v10 }
 0x96f   : > { %2500 = vperm.xlu1 %5552, %v2190_v56  }
 0x973   : > { %5553 = vset.pattern.permute.xlu1 %v8619_v33 }
 0x974   : > { %2510 = vperm.xlu1 %5553, %v2190_v56  }
 0x978   : > { %5555 = vset.pattern.permute.xlu1 %v8609_v0 }
 0x979   : > { %2575 = vperm.xlu1 %5555, %v6798_v27  }
 0x97d   : > { %5556 = vset.pattern.permute.xlu1 %v8619_v33 }
 0x97e   : > { %2595 = vperm.xlu1 %5556, %v6798_v27  }
 0x982   : > { %5557 = vset.pattern.permute.xlu1 %v8620_v32 }
 0x983   : > { %2666 = vperm.xlu1 %5557, %v2192_v61  }
 0x987   : > { %5559 = vset.pattern.permute.xlu1 %v8619_v33 }
 0x988   : > { %2695 = vperm.xlu1 %5559, %v2192_v61  }
 0x98c   : > { %5560 = vset.pattern.permute.xlu1 %v8624_v26 }
 0x9c9   : > { %v2308_v62 = vpop.permute.xlu1 %2307 }
 0x9ca   : > { %v2309_v38 = vsel %vm1619_vm9, %v2308_v62, %v6902_v63 }
 0x9cb   : > { %2310 = vrot.lane.b32.xlu0 %v2309_v38, %s8617_s29  ;;  %v7081_v38 = vld [vmem:[%s8414_s18 + $0x20] sm:$0xff] }
 0x9cc   : > { %8641 = vst [vmem:[#allocation25_spill] sm:$0xff] %v7081_v38 }
 0x9cf   : > { %2490 = vperm.xlu0 %5554, %v2190_v56  }
 0x9d3   : > { %2675 = vperm.xlu0 %5554, %v2192_v61  }
 0x9d6   : > { %v6970_v14 = vpop.permute.xlu1 %2388 }
 0x9d7   : > { %5558 = vset.pattern.permute.xlu0 %v8623_v10 }
 0x9d8   : > { %2398 = vperm.xlu0 %5558, %v8618_v15  }
 0x9db   : > { %v6982_v39 = vpop.permute.xlu1 %2408 }
 0x9dc   : > { %2585 = vperm.xlu0 %5558, %v6798_v27  }
 0x9e0   : > { %2685 = vperm.xlu0 %5558, %v2192_v61   ;;  %v6993_v25 = vpop.permute.xlu1 %2481 }
 0x9e4   : > { %5561 = vset.pattern.permute.xlu0 %v8625_v8 }
 0x9e5   : > { %v6998_v17 = vpop.permute.xlu1 %2303 }
 0x9ea   : > { %v7003_v36 = vpop.permute.xlu1 %2500 }
 0x9ef   : > { %v7009_v1 = vpop.permute.xlu1 %2510 }
 0x9f4   : > { %v7021_v41 = vpop.permute.xlu1 %2575 }
 0x9f9   : > { %v7035_v52 = vpop.permute.xlu1 %2595 }
 0x9fe   : > { %v7049_v45 = vpop.permute.xlu1 %2666 }
 0xa03   : > { %v7062_v19 = vpop.permute.xlu1 %2695 }
 0xa3d   : > { %v2311_v20 = vpop.permute.xlu0 %2310 }
 0xa3e   : > { %v2312_v40 = vsel %vm1619_vm9, %v2311_v20, %v6902_v63 }
 0xa3f   : > { %2423 = vrot.lane.b32.xlu0 %v2312_v40, %s8510_s5  ;;  %2317 = vrot.lane.b32.xlu1 %v2312_v40, %s8626_s3  ;;  %v2314_v53 = vrot.slane %v2312_v40, 1  ;;  %v2360_v27 = vrot.slane %v2312_v40, 7  ;;  %v2315_v59 = vrot.slane %v2312_v40, 2  ;;  %v2316_v54 = vrot.slane %v2312_v40, 3 }
 0xa40   : > { %v2418_v58 = vrot.slane %v2312_v40, 6  ;;  %v2462_v35 = vrot.slane %v2312_v40, 5  ;;  %v2547_v22 = vrot.slane %v2312_v40, 4 }
 0xa43   : > { %2363 = vrot.lane.b32.xlu1 %v2312_v40, %s8627_s24  ;;  %2319 = vrot.lane.b32.xlu0 %v2314_v53, %s8626_s3 }
 0xa47   : > { %2469 = vrot.lane.b32.xlu1 %v2312_v40, %s8628_s21  ;;  %2361 = vrot.lane.b32.xlu0 %v2360_v27, %s8627_s24 }
 0xa4a   : > { %v7011_v51 = vpop.permute.xlu0 %2490 }
 0xa4b   : > { %2705 = vrot.lane.b32.xlu1 %v2312_v40, %s8629_s2  ;;  %2365 = vrot.lane.b32.xlu0 %v2314_v53, %s8627_s24 }
 0xa4e   : > { %v7023_v49 = vpop.permute.xlu0 %2675 }
 0xa4f   : > { %2321 = vrot.lane.b32.xlu1 %v2315_v59, %s8626_s3  ;;  %2425 = vrot.lane.b32.xlu0 %v2314_v53, %s8510_s5 }
 0xa53   : > { %2323 = vrot.lane.b32.xlu1 %v2316_v54, %s8626_s3  ;;  %2465 = vrot.lane.b32.xlu0 %v2418_v58, %s8628_s21  ;;  %v7037_v13 = vpop.permute.xlu0 %2398 }
 0xa57   : > { %2419 = vrot.lane.b32.xlu1 %v2418_v58, %s8510_s5  ;;  %2467 = vrot.lane.b32.xlu0 %v2360_v27, %s8628_s21  ;;  %v7051_v2 = vpop.permute.xlu0 %2585 }
 0xa5b   : > { %2421 = vrot.lane.b32.xlu1 %v2360_v27, %s8510_s5  ;;  %2548 = vrot.lane.b32.xlu0 %v2316_v54, %s8579_s25  ;;  %v7064_v55 = vpop.permute.xlu0 %2685  ;;  %s8689_s5 = smov 119  }
 0xa5f   : > { %2367 = vrot.lane.b32.xlu1 %v2315_v59, %s8627_s24  ;;  %2552 = vrot.lane.b32.xlu0 %v2462_v35, %s8579_s25 }
 0xa63   : > { %2463 = vrot.lane.b32.xlu1 %v2462_v35, %s8628_s21  ;;  %2609 = vrot.lane.b32.xlu0 %v2547_v22, %s8630_s9 }
 0xa67   : > { %2550 = vrot.lane.b32.xlu1 %v2547_v22, %s8579_s25  ;;  %2648 = vrot.lane.b32.xlu0 %v2314_v53, %s8631_s10 }
 0xa6b   : > { %2605 = vrot.lane.b32.xlu1 %v2315_v59, %s8630_s9  ;;  %2652 = vrot.lane.b32.xlu0 %v2316_v54, %s8631_s10 }
 0xa6f   : > { %2607 = vrot.lane.b32.xlu1 %v2316_v54, %s8630_s9  ;;  %2709 = vrot.lane.b32.xlu0 %v2315_v59, %s8629_s2 }
 0xa73   : > { %2554 = vrot.lane.b32.xlu1 %v2418_v58, %s8579_s25  ;;  %2711 = vrot.lane.b32.xlu0 %v2316_v54, %s8629_s2  ;;  %v7101_v58 = vld [vmem:[%s8414_s18 + $0x28] sm:$0x3] }
 0xa74   : > { %8642 = vst [vmem:[#allocation26_spill] sm:$0xff] %v7101_v58 }
 0xa77   : > { %2611 = vrot.lane.b32.xlu1 %v2462_v35, %s8630_s9  ;;  %2754 = vperm.xlu0 %5561, %v8622_v60  }
 0xa7b   : > { %2650 = vrot.lane.b32.xlu1 %v2315_v59, %s8631_s10  ;;  %5564 = vset.pattern.permute.xlu0 %v8623_v10 }
 0xa7c   : > { %2780 = vperm.xlu0 %5564, %v2193_v43  }
 0xa7f   : > { %2707 = vrot.lane.b32.xlu1 %v2314_v53, %s8629_s2 }
 0xa80   : > { %5567 = vset.pattern.permute.xlu0 %v8620_v32 }
 0xa81   : > { %2814 = vperm.xlu0 %5567, %v6980_v3  }
 0xa83   : > { %2654 = vrot.lane.b32.xlu1 %v2547_v22, %s8631_s10 }
 0xa85   : > { %5570 = vset.pattern.permute.xlu0 %v8609_v0 }
 0xa86   : > { %2835 = vperm.xlu0 %5570, %v6991_v11  }
 0xa87   : > { %2749 = vperm.xlu1 %5560, %v8622_v60  }
 0xa8a   : > { %5573 = vset.pattern.permute.xlu0 %v8633_v42 }
 0xa8b   : > { %5562 = vset.pattern.permute.xlu1 %v8620_v32  ;;  %2865 = vperm.xlu0 %5573, %v6991_v11  }
 0xa8c   : > { %2761 = vperm.xlu1 %5562, %v2193_v43  }
 0xa8f   : > { %5576 = vset.pattern.permute.xlu0 %v8625_v8 }
 0xa90   : > { %5563 = vset.pattern.permute.xlu1 %v8609_v0  ;;  %2895 = vperm.xlu0 %5576, %v6991_v11  }
 0xa91   : > { %2770 = vperm.xlu1 %5563, %v2193_v43  }
 0xa94   : > { %5579 = vset.pattern.permute.xlu0 %v8633_v42 }
 0xa95   : > { %5565 = vset.pattern.permute.xlu1 %v8619_v33  ;;  %2915 = vperm.xlu0 %5579, %v6980_v3  }
 0xa96   : > { %2790 = vperm.xlu1 %5565, %v2193_v43  }
 0xa99   : > { %3524 = vperm.xlu0 %5579, %v7018_v57  }
 0xa9a   : > { %5566 = vset.pattern.permute.xlu1 %v8635_v31 }
 0xa9b   : > { %2800 = vperm.xlu1 %5566, %v8622_v60   ;;  %v7073_v60 = vld [vmem:[%s8414_s18 + $0x10] sm:$0xff] }
 0xa9c   : > { %8640 = vst [vmem:[#allocation19_spill] sm:$0xff] %v7073_v60 }
 0xa9d   : > { %5587 = vset.pattern.permute.xlu0 %v8619_v33 }
 0xa9e   : > { %3549 = vperm.xlu0 %5587, %v7030_v47  }
 0xa9f   : > { %5568 = vset.pattern.permute.xlu1 %v8609_v0 }
 0xaa0   : > { %2819 = vperm.xlu1 %5568, %v6980_v3  }
 0xaa2   : > { %5588 = vset.pattern.permute.xlu0 %v8623_v10 }
 0xaa3   : > { %3504 = vperm.xlu0 %5588, %v7018_v57  }
 0xaa4   : > { %5569 = vset.pattern.permute.xlu1 %v8620_v32 }
 0xaa5   : > { %2826 = vperm.xlu1 %5569, %v6991_v11  }
 0xaa7   : > { %3004 = vperm.xlu0 %5588, %v7046_v18  }
 0xaa9   : > { %5571 = vset.pattern.permute.xlu1 %v8623_v10 }
 0xaaa   : > { %2845 = vperm.xlu1 %5571, %v6991_v11  }
 0xaab   : > { %3233 = vperm.xlu0 %5588, %v7057_v23  }
 0xaae   : > { %5572 = vset.pattern.permute.xlu1 %v8619_v33 }
 0xaaf   : > { %2855 = vperm.xlu1 %5572, %v6991_v11   ;;  %5591 = vset.pattern.permute.xlu0 %v8620_v32 }
 0xab0   : > { %3468 = vperm.xlu0 %5591, %v7030_v47  }
 0xab1   : > { %v2318_v15 = vpop.permute.xlu1 %2317  ;;  %v2424_v56 = vpop.permute.xlu0 %2423 }
 0xab3   : > { %5574 = vset.pattern.permute.xlu1 %v8621_v44 }
 0xab4   : > { %2875 = vperm.xlu1 %5574, %v6991_v11   ;;  %3092 = vperm.xlu0 %5591, %v7073_v60  }
 0xab5   : > { %v2364_v61 = vpop.permute.xlu1 %2363  ;;  %v2320_v62 = vpop.permute.xlu0 %2319 }
 0xab8   : > { %5575 = vset.pattern.permute.xlu1 %v8624_v26  ;;  %3289 = vperm.xlu0 %5591, %v7081_v38  }
 0xab9   : > { %v7085_v20 = vpop.permute.xlu1 %2469  ;;  %2885 = vperm.xlu1 %5575, %v6991_v11   ;;  %v2362_v40 = vpop.permute.xlu0 %2361 }
 0xabc   : > { %5592 = vset.pattern.permute.xlu0 %v8609_v0 }
 0xabd   : > { %v7089_v53 = vpop.permute.xlu1 %2705  ;;  %5577 = vset.pattern.permute.xlu1 %v8623_v10  ;;  %3494 = vperm.xlu0 %5592, %v7018_v57   ;;  %v2366_v27 = vpop.permute.xlu0 %2365 }
 0xabe   : > { %2905 = vperm.xlu1 %5577, %v6980_v3   ;;  %v2375_v30 = vsel %vm1392_vm10, %v2366_v27, 0.0 }
 0xac1   : > { %v2322_v59 = vpop.permute.xlu1 %2321  ;;  %3223 = vperm.xlu0 %5592, %v7057_v23   ;;  %v7095_v54 = vpop.permute.xlu0 %2425  ;;  %v2330_v23 = vsel %vm1392_vm10, %v2320_v62, 0.0 }
 0xac2   : > { %5578 = vset.pattern.permute.xlu1 %v8619_v33  ;;  %v2331_v42 = vsel %vm1392_vm10, %v2322_v59, 0.0  ;;  %v2523_v59 = vrot.slane %v6902_v63, %v6094_v4 }
 0xac3   : > { %2910 = vperm.xlu1 %5578, %v6980_v3   ;;  %v2347_v62 = vrot.slane %v2331_v42, %v6094_v4  ;;  %v2433_v42 = vsel %vm1392_vm10, %v2424_v56, 0.0 }
 0xac5   : > { %v2324_v35 = vpop.permute.xlu1 %2323  ;;  %3341 = vperm.xlu0 %5592, %v7101_v58   ;;  %v2466_v22 = vpop.permute.xlu0 %2465  ;;  %v2348_v56 = vmul.f32 %v2347_v62, %v6891_v16 }
 0xac7   : > { %5580 = vset.pattern.permute.xlu1 %v8609_v0 }
 0xac8   : > { %3475 = vperm.xlu1 %5580, %v7030_v47  }
 0xac9   : > { %v2420_v43 = vpop.permute.xlu1 %2419  ;;  %v2468_v11 = vpop.permute.xlu0 %2467  ;;  %5597 = vset.pattern.permute.xlu0 %v8625_v8  ;;  %v2329_v8 = vsel %vm1392_vm10, %v2318_v15, 0.0 }
 0xaca   : > { %3282 = vperm.xlu0 %5597, %v6980_v3   ;;  %v2431_v15 = vsel %vm1392_vm10, %v2420_v43, 0.0 }
 0xacc   : > { %5581 = vset.pattern.permute.xlu1 %v8620_v32  ;;  %v2341_v32 = vrot.slane %v2330_v23, %v6094_v4  ;;  %v2528_v23 = vrot.slane %v6902_v63, %v6097_v5 }
 0xacd   : > { %v2422_v31 = vpop.permute.xlu1 %2421  ;;  %v7110_v26 = vpop.permute.xlu0 %2548 }
 0xace   : > { %5598 = vset.pattern.permute.xlu0 %v8621_v44  ;;  %v2432_v47 = vsel %vm1392_vm10, %v2422_v31, 0.0  ;;  %v2332_v44 = vsel %vm1392_vm10, %v2324_v35, 0.0  ;;  %v2373_v31 = vsel %vm1392_vm10, %v2362_v40, 0.0  ;;  %v2534_v35 = vrot.slane %v6902_v63, %v6100_v6 }
 0xacf   : > { %2921 = vperm.xlu0 %5598, %v6980_v3   ;;  %v2336_v3 = vrot.slane %v2329_v8, %v6094_v4  ;;  %v2443_v8 = vrot.slane %v2432_v47, %v6100_v6  ;;  %v2342_v33 = vmul.f32 %v2341_v32, %v6882_v7  ;;  %v2353_v43 = vrot.slane %v2332_v44, %v6094_v4 }
 0xad0   : > { %v2529_v18 = vmul.f32 %v2528_v23, %v7011_v51  ;;  %v2374_v40 = vsel %vm1392_vm10, %v2364_v61, 0.0  ;;  %v2438_v47 = vrot.slane %v2431_v15, %v6100_v6  ;;  %v2385_v48 = vrot.slane %v2373_v31, %v6097_v5 }
 0xad1   : > { %v2368_v58 = vpop.permute.xlu1 %2367  ;;  %v7114_v38 = vpop.permute.xlu0 %2552  ;;  %v2337_v57 = vmul.f32 %v2336_v3, %v6886_v29  ;;  %v2524_v32 = vmul.f32 %v2523_v59, %v6993_v25  ;;  %v2449_v44 = vrot.slane %v2433_v42, %v6100_v6  ;;  %v2476_v29 = vsel %vm1392_vm10, %v2466_v22, 0.0 }
 0xad2   : > { %v2444_v3 = vmul.f32 %v2443_v8, %v6970_v14  ;;  %v2394_v15 = vrot.slane %v2374_v40, %v6097_v5  ;;  %v2354_v27 = vmul.f32 %v2353_v43, %v6895_v21  ;;  %v2376_v16 = vsel %vm1392_vm10, %v2368_v58, 0.0 }
 0xad3   : > { %v2343_v23 = vadd.f32 %v2342_v33, %v2337_v57  ;;  %v2530_v62 = vadd.f32 %v2529_v18, %v2524_v32  ;;  %v2404_v59 = vrot.slane %v2375_v30, %v6097_v5  ;;  %v2439_v31 = vmul.f32 %v2438_v47, %v6934_v12 }
 0xad4   : > { %v2386_v8 = vmul.f32 %v2385_v48, %v6934_v12  ;;  %v2434_v33 = vsel %vm1392_vm10, %v7095_v54, 0.0  ;;  %v2496_v21 = vrot.slane %v2476_v29, %v6105_v9  ;;  %v2540_v57 = vrot.slane %v6902_v63, %v6105_v9 }
 0xad5   : > { %v2464_v10 = vpop.permute.xlu1 %2463  ;;  %v7128_v60 = vpop.permute.xlu0 %2609  ;;  %v2349_v42 = vadd.f32 %v2348_v56, %v2343_v23  ;;  %v2477_v18 = vsel %vm1392_vm10, %v2468_v11, 0.0  ;;  %v2445_v30 = vadd.f32 %v2444_v3, %v2439_v31  ;;  %v2414_v58 = vrot.slane %v2376_v16, %v6097_v5 }
 0xad6   : > { %v2475_v7 = vsel %vm1392_vm10, %v2464_v10, 0.0  ;;  %v2535_v43 = vmul.f32 %v2534_v35, %v7003_v36  ;;  %v2450_v48 = vmul.f32 %v2449_v44, %v7037_v13  ;;  %v2395_v12 = vmul.f32 %v2394_v15, %v6970_v14 }
 0xad7   : > { %v2487_v22 = vrot.slane %v2475_v7, %v6105_v9  ;;  %v2355_v40 = vadd.f32 %v2354_v27, %v2349_v42  ;;  %v2405_v54 = vmul.f32 %v2404_v59, %v7037_v13  ;;  %v2455_v56 = vrot.slane %v2434_v33, %v6100_v6 }
 0xad8   : > { %v2536_v32 = vadd.f32 %v2535_v43, %v2530_v62  ;;  %v2396_v29 = vadd.f32 %v2395_v12, %v2386_v8  ;;  %v2497_v35 = vmul.f32 %v2496_v21, %v7011_v51  ;;  %v2506_v44 = vrot.slane %v2477_v18, %v6105_v9 }
 0xad9   : > { %v2551_v0 = vpop.permute.xlu1 %2550  ;;  %v7162_v61 = vpop.permute.xlu0 %2648  ;;  %v2488_v63 = vmul.f32 %v2487_v22, %v6993_v25  ;;  %v2451_v3 = vadd.f32 %v2450_v48, %v2445_v30  ;;  %v2415_v14 = vmul.f32 %v2414_v58, %v6982_v39  ;;  %v2541_v25 = vmul.f32 %v2540_v57, %v7009_v1 }
 0xada   : > { %v2561_v13 = vsel %vm1392_vm10, %v2551_v0, 0.0  ;;  %v2478_v23 = vsel %vm1392_vm10, %v7085_v20, 0.0  ;;  %v2357_v27 = vrot.slane %v2355_v40, 4  ;;  %v2406_v62 = vadd.f32 %v2405_v54, %v2396_v29 }
 0xadb   : > { %v2456_v59 = vmul.f32 %v2455_v56, %v6982_v39  ;;  %v2560_v0 = vsel %vm1392_vm10, %v7110_v26, 0.0  ;;  %v2498_v31 = vadd.f32 %v2497_v35, %v2488_v63  ;;  %v7205_v22 = vadd.f32 %v2541_v25, %v2536_v32 }
 0xadc   : > { %v2581_v20 = vrot.slane %v2561_v13, %v6231_v37  ;;  %v2516_v42 = vrot.slane %v2478_v23, %v6105_v9  ;;  %v2507_v33 = vmul.f32 %v2506_v44, %v7003_v36  ;;  %v2416_v21 = vadd.f32 %v2415_v14, %v2406_v62 }
 0xadd   : > { %v2606_v10 = vpop.permute.xlu1 %2605  ;;  %v2653_v7 = vpop.permute.xlu0 %2652  ;;  %v2457_v39 = vadd.f32 %v2456_v59, %v2451_v3  ;;  %v2359_v26 = vadd.f32 %v2357_v27, %v6998_v17  ;;  %v2572_v18 = vrot.slane %v2560_v0, %v6231_v37  ;;  %v2562_v30 = vsel %vm1392_vm10, %v7114_v38, 0.0 }
 0xade   : > { %v2617_v15 = vsel %vm1392_vm10, %v2606_v10, 0.0  ;;  %v2619_v10 = vsel %vm1392_vm10, %v7128_v60, 0.0  ;;  %v2508_v43 = vadd.f32 %v2507_v33, %v2498_v31  ;;  %v2582_v17 = vmul.f32 %v2581_v20, %v7021_v41 }
 0xadf   : > { %v2624_v8 = vrot.slane %v2617_v15, %v6238_v46  ;;  %v2635_v48 = vrot.slane %v2619_v10, %v6238_v46  ;;  %v2660_v40 = vsel %vm1392_vm10, %v7162_v61, 0.0  ;;  %v2517_v54 = vmul.f32 %v2516_v42, %v7009_v1 }
 0xae0   : > { %v2459_v56 = vrot.slane %v2457_v39, 4  ;;  %v2417_v63 = vadd.f32 %v2416_v21, %v2359_v26  ;;  %v2717_v32 = vsel %vm1393_vm11, %v7089_v53, 0.0  ;;  %v2672_v14 = vrot.slane %v2660_v40, %v6241_v50 }
 0xae1   : > { %v2608_v47 = vpop.permute.xlu1 %2607  ;;  %v2710_v57 = vpop.permute.xlu0 %2709  ;;  %v2625_v38 = vmul.f32 %v2624_v8, %v6936_v28  ;;  %v2518_v44 = vadd.f32 %v2517_v54, %v2508_v43  ;;  %v2636_v3 = vmul.f32 %v2635_v48, %v7051_v2  ;;  %v2662_v25 = vsel %vm1392_vm10, %v2653_v7, 0.0 }
 0xae2   : > { %v2618_v11 = vsel %vm1392_vm10, %v2608_v47, 0.0  ;;  %v2724_v23 = vrot.slane %v2717_v32, %v6094_v4  ;;  %v2461_v27 = vadd.f32 %v2459_v56, %v2417_v63  ;;  %v2673_v10 = vmul.f32 %v2672_v14, %v7049_v45 }
 0xae3   : > { %v2629_v51 = vrot.slane %v2618_v11, %v6238_v46  ;;  %v2591_v11 = vrot.slane %v2562_v30, %v6231_v37  ;;  %v2691_v20 = vrot.slane %v2662_v25, %v6241_v50  ;;  %v2544_v21 = vrot.slane %v7205_v22, 4 }
 0xae4   : > { %v2519_v8 = vadd.f32 %v2518_v44, %v2461_v27  ;;  %v2725_v26 = vmul.f32 %v2724_v23, %v7049_v45 }
 0xae5   : > { %v2555_v16 = vpop.permute.xlu1 %2554  ;;  %v2630_v60 = vmul.f32 %v2629_v51, %v7021_v41  ;;  %v2573_v41 = vmul.f32 %v2572_v18, %v6936_v28  ;;  %v2712_v1 = vpop.permute.xlu0 %2711  ;;  %v2592_v51 = vmul.f32 %v2591_v11, %v7051_v2  ;;  %v2692_v43 = vmul.f32 %v2691_v20, %v7064_v55 }
 0xae6   : > { %v2563_v36 = vsel %vm1392_vm10, %v2555_v16, 0.0  ;;  %v2719_v16 = vsel %vm1393_vm11, %v2710_v57, 0.0  ;;  %v2720_v59 = vsel %vm1393_vm11, %v2712_v1, 0.0  ;;  %v2546_v48 = vadd.f32 %v2544_v21, %v2519_v8 }
 0xae7   : > { %v2631_v29 = vadd.f32 %v2630_v60, %v2625_v38  ;;  %v2601_v35 = vrot.slane %v2563_v36, %v6231_v37  ;;  %v2583_v15 = vadd.f32 %v2582_v17, %v2573_v41  ;;  %v2735_v42 = vrot.slane %v2719_v16, %v6094_v4 }
 0xae8   : > { %v2741_v57 = vrot.slane %v2720_v59, %v6094_v4 }
 0xae9   : > { %v2612_v58 = vpop.permute.xlu1 %2611  ;;  %v2602_v62 = vmul.f32 %v2601_v35, %v7035_v52  ;;  %v2637_v0 = vadd.f32 %v2636_v3, %v2631_v29  ;;  %v2593_v33 = vadd.f32 %v2592_v51, %v2583_v15 }
 0xaea   : > { %v2620_v12 = vsel %vm1392_vm10, %v2612_v58, 0.0  ;;  %v2742_v38 = vmul.f32 %v2741_v57, %v7062_v19 }
 0xaeb   : > { %v2641_v47 = vrot.slane %v2620_v12, %v6238_v46  ;;  %v2603_v18 = vadd.f32 %v2602_v62, %v2593_v33  ;;  %v2736_v12 = vmul.f32 %v2735_v42, %v7064_v55 }
 0xaed   : > { %v2651_v61 = vpop.permute.xlu1 %2650  ;;  %v2642_v53 = vmul.f32 %v2641_v47, %v7035_v52  ;;  %v2604_v45 = vadd.f32 %v2603_v18, %v2546_v48 }
 0xaee   : > { %v2661_v13 = vsel %vm1392_vm10, %v2651_v61, 0.0 }
 0xaef   : > { %v2681_v28 = vrot.slane %v2661_v13, %v6241_v50  ;;  %v2643_v39 = vadd.f32 %v2642_v53, %v2637_v0 }
 0xaf1   : > { %v2682_v7 = vmul.f32 %v2681_v28, %v7023_v49  ;;  %v2708_v31 = vpop.permute.xlu1 %2707  ;;  %v2645_v17 = vrot.slane %v2643_v39, 4 }
 0xaf2   : > { %v2718_v2 = vsel %vm1393_vm11, %v2708_v31, 0.0  ;;  %v2755_v55 = vpop.permute.xlu0 %2754 }
 0xaf3   : > { %v2729_v52 = vrot.slane %v2718_v2, %v6094_v4  ;;  %v2683_v30 = vadd.f32 %v2682_v7, %v2673_v10  ;;  %v2647_v63 = vadd.f32 %v2645_v17, %v2604_v45  ;;  %v8643_v10 = vld [vmem:[#allocation21_spill] sm:$0xff] }
 0xaf5   : > { %v2730_v60 = vmul.f32 %v2729_v52, %v7023_v49  ;;  %v2655_v58 = vpop.permute.xlu1 %2654  ;;  %v2693_v47 = vadd.f32 %v2692_v43, %v2683_v30 }
 0xaf6   : > { %v2663_v36 = vsel %vm1392_vm10, %v2655_v58, 0.0 }
 0xaf7   : > { %v2731_v40 = vadd.f32 %v2730_v60, %v2725_v26  ;;  %v2701_v22 = vrot.slane %v2663_v36, %v6241_v50  ;;  %v2781_v28 = vpop.permute.xlu0 %2780 }
 0xaf9   : > { %v2702_v54 = vmul.f32 %v2701_v22, %v7062_v19  ;;  %v2737_v49 = vadd.f32 %v2736_v12, %v2731_v40  ;;  %v8644_v22 = vld [vmem:[#allocation18_spill] sm:$0xff] }
 0xafb   : > { %v2703_v56 = vadd.f32 %v2702_v54, %v2693_v47  ;;  %v2743_v11 = vadd.f32 %v2742_v38, %v2737_v49 }
 0xafc   : > { %v2815_v8 = vpop.permute.xlu0 %2814 }
 0xafd   : > { %v2704_v32 = vadd.f32 %v2703_v56, %v2647_v63  ;;  %v2745_v41 = vrot.slane %v2743_v11, 4 }
 0xaff   : > { %v2747_v29 = vadd.f32 %v2745_v41, %v2704_v32 }
 0xb01   : > { %v7283_v26 = vpop.permute.xlu0 %2835 }
 0xb02   : > { %v2750_v35 = vpop.permute.xlu1 %2749 }
 0xb03   : > { %v2752_v61 = vmul.f32 %v2750_v35, %v2747_v29 }
 0xb05   : > { %v2757_v44 = vadd.f32 %v2755_v55, %v2752_v61 }
 0xb06   : > { %v2866_v47 = vpop.permute.xlu0 %2865 }
 0xb07   : > { %v2758_v3 = vmax.f32 %v2757_v44, 0.0  ;;  %v2762_v14 = vpop.permute.xlu1 %2761 }
 0xb09   : > { %v2767_v1 = vrot.slane %v2758_v3, %v6094_v4  ;;  %v2776_v13 = vrot.slane %v2758_v3, %v6097_v5  ;;  %v2786_v15 = vrot.slane %v2758_v3, %v6100_v6  ;;  %v2796_v51 = vrot.slane %v2758_v3, %v6105_v9 }
 0xb0b   : > { %v2768_v25 = vmul.f32 %v2767_v1, %v2762_v14  ;;  %v2787_v27 = vmul.f32 %v2786_v15, %v2781_v28  ;;  %v2896_v55 = vpop.permute.xlu0 %2895 }
 0xb0c   : > { %v2771_v19 = vpop.permute.xlu1 %2770 }
 0xb0d   : > { %v2777_v53 = vmul.f32 %v2776_v13, %v2771_v19 }
 0xb0f   : > { %v2778_v23 = vadd.f32 %v2777_v53, %v2768_v25 }
 0xb10   : > { %v2916_v25 = vpop.permute.xlu0 %2915 }
 0xb11   : > { %v2791_v16 = vpop.permute.xlu1 %2790  ;;  %v2788_v62 = vadd.f32 %v2787_v27, %v2778_v23  ;;  %v8645_v23 = vld [vmem:[#allocation17_spill] sm:$0xff]  ;;  %v8646_v27 = vld [vmem:[#allocation22_spill] sm:$0xff] }
 0xb12   : > { %v2797_v59 = vmul.f32 %v2796_v51, %v2791_v16  ;;  %v8647_v51 = vmov 1   ;;  %v8648_v16 = vmov 3  }
 0xb14   : > { %v2798_v0 = vadd.f32 %v2797_v59, %v2788_v62  ;;  %v8649_v62 = vld [vmem:[#allocation19_spill] sm:$0xff]  ;;  %v8650_v59 = vmov 5  }
 0xb16   : > { %v2801_v7 = vpop.permute.xlu1 %2800 }
 0xb17   : > { %v2803_v31 = vadd.f32 %v2801_v7, %v2798_v0  ;;  %v8651_v0 = vmov 2   ;;  %v8652_v7 = vld [vmem:[#allocation23_spill] sm:$0xff] }
 0xb19   : > { %v7276_v20 = vadd.f32 %v2803_v31, %v8643_v10  ;;  %v8653_v31 = vmov 4   ;;  %v8654_v10 = vmov 0  }
 0xb1b   : > { %v2820_v2 = vpop.permute.xlu1 %2819  ;;  %v2817_v42 = vmul.f32 %v2815_v8, %v7276_v20  ;;  %v8655_v8 = vld [vmem:[#allocation24_spill] sm:$0xff] }
 0xb1d   : > { %v2822_v33 = vadd.f32 %v2820_v2, %v2817_v42  ;;  %v8656_v2 = vld [vmem:[#allocation25_spill] sm:$0xff]  ;;  %v8657_v42 = vld [vmem:[#allocation26_spill] sm:$0xff] }
 0xb1f   : > { %v2823_v39 = vmax.f32 %v2822_v33, 0.0 }
 0xb20   : > { %v7279_v52 = vpop.permute.xlu1 %2826 }
 0xb21   : > { %v2832_v21 = vrot.slane %v2823_v39, %v6094_v4  ;;  %v2841_v57 = vrot.slane %v2823_v39, %v6097_v5  ;;  %v2851_v58 = vrot.slane %v2823_v39, %v6100_v6  ;;  %v2861_v36 = vrot.slane %v2823_v39, %v6105_v9 }
 0xb22   : > { %v2871_v38 = vrot.slane %v2823_v39, %v8644_v22  ;;  %v2881_v56 = vrot.slane %v2823_v39, %v6231_v37  ;;  %v2891_v32 = vrot.slane %v2823_v39, %v6238_v46  ;;  %v2901_v41 = vrot.slane %v2823_v39, %v6241_v50 }
 0xb23   : > { %v2833_v18 = vmul.f32 %v2832_v21, %v7279_v52  ;;  %v2842_v30 = vmul.f32 %v2841_v57, %v7283_v26 }
 0xb24   : > { %v2872_v49 = vmul.f32 %v2871_v38, %v2866_v47  ;;  %v2902_v3 = vmul.f32 %v2901_v41, %v2896_v55 }
 0xb25   : > { %v7287_v60 = vpop.permute.xlu1 %2845  ;;  %v2843_v48 = vadd.f32 %v2842_v30, %v2833_v18 }
 0xb26   : > { %v2852_v43 = vmul.f32 %v2851_v58, %v7287_v60 }
 0xb28   : > { %v2853_v17 = vadd.f32 %v2852_v43, %v2843_v48 }
 0xb2a   : > { %v2856_v12 = vpop.permute.xlu1 %2855 }
 0xb2b   : > { %v2862_v40 = vmul.f32 %v2861_v36, %v2856_v12 }
 0xb2d   : > { %v2863_v45 = vadd.f32 %v2862_v40, %v2853_v17 }
 0xb2f   : > { %v2876_v54 = vpop.permute.xlu1 %2875  ;;  %v2873_v63 = vadd.f32 %v2872_v49, %v2863_v45 }
 0xb30   : > { %v2882_v11 = vmul.f32 %v2881_v56, %v2876_v54 }
 0xb32   : > { %v2883_v35 = vadd.f32 %v2882_v11, %v2873_v63 }
 0xb34   : > { %v2886_v29 = vpop.permute.xlu1 %2885 }
 0xb35   : > { %v2892_v61 = vmul.f32 %v2891_v32, %v2886_v29  ;;  %v7369_v32 = vpop.permute.xlu0 %3524 }
 0xb37   : > { %v2893_v44 = vadd.f32 %v2892_v61, %v2883_v35 }
 0xb39   : > { %v2906_v14 = vpop.permute.xlu1 %2905  ;;  %v2903_v1 = vadd.f32 %v2902_v3, %v2893_v44  ;;  %v7374_v29 = vpop.permute.xlu0 %3549 }
 0xb3b   : > { %v2908_v13 = vadd.f32 %v2906_v14, %v2903_v1 }
 0xb3d   : > { %v7379_v55 = vpop.permute.xlu0 %3504 }
 0xb3e   : > { %v2911_v15 = vpop.permute.xlu1 %2910  ;;  %8660 = vst [vmem:[#allocation18_spill] sm:$0xff] %v7379_v55 }
 0xb3f   : > { %v2913_v19 = vmul.f32 %v2911_v15, %v2908_v13  ;;  %v8661_v15 = vmov 6  }
 0xb41   : > { %v2918_v53 = vadd.f32 %v2916_v25, %v2913_v19  ;;  %v7384_v44 = vpop.permute.xlu0 %3004  ;;  %v8662_v25 = vld [vmem:[#allocation20_spill] sm:$0xff] }
 0xb43   : > { %v7296_v28 = vmax.f32 %v2918_v53, 0.0  ;;  %v7325_v33 = vpop.permute.xlu1 %3475 }
 0xb44   : > { %v3477_v53 = vrot.slane %v7325_v33, 2 }
 0xb45   : > { %2925 = vrot.lane.b32.xlu1 %v7296_v28, %s8617_s29  ;;  %v7389_v14 = vpop.permute.xlu0 %3233 }
 0xb49   : > { %3485 = vperm.xlu1 %5581, %v8645_v23   ;;  %v3469_v13 = vpop.permute.xlu0 %3468 }
 0xb4a   : > { %v3470_v19 = vrot.slane %v3469_v13, 2 }
 0xb4d   : > { %2982 = vperm.xlu1 %5581, %v8646_v27  }
 0xb51   : > { %5582 = vset.pattern.permute.xlu1 %v8647_v51 }
 0xb52   : > { %2992 = vperm.xlu1 %5582, %v8646_v27  }
 0xb56   : > { %5583 = vset.pattern.permute.xlu1 %v8648_v16 }
 0xb57   : > { %3514 = vperm.xlu1 %5583, %v8645_v23  }
 0xb5b   : > { %5584 = vset.pattern.permute.xlu1 %v8647_v51 }
 0xb5c   : > { %3102 = vperm.xlu1 %5584, %v8649_v62  }
 0xb60   : > { %5585 = vset.pattern.permute.xlu1 %v8650_v59 }
 0xb61   : > { %3534 = vperm.xlu1 %5585, %v8645_v23   ;;  %v8663_v23 = vld [vmem:[#allocation15_spill] sm:$0xff] }
 0xb62   : > { %v3472_v27 = vmul.f32 %v3470_v19, %v8663_v23 }
 0xb65   : > { %5586 = vset.pattern.permute.xlu1 %v8651_v0 }
 0xb66   : > { %3114 = vperm.xlu1 %5586, %v8649_v62   ;;  %v7401_v62 = vpop.permute.xlu0 %3092 }
 0xb6a   : > { %3544 = vperm.xlu1 %5586, %v8652_v7   ;;  %v7408_v33 = vpop.permute.xlu0 %3289 }
 0xb6e   : > { %5589 = vset.pattern.permute.xlu1 %v8653_v31 }
 0xb6f   : > { %3554 = vperm.xlu1 %5589, %v8652_v7   ;;  %v3479_v7 = vadd.f32 %v3477_v53, %v3472_v27 }
 0xb73   : > { %5590 = vset.pattern.permute.xlu1 %v8654_v10 }
 0xb74   : > { %3214 = vperm.xlu1 %5590, %v8655_v8   ;;  %v8664_v8 = vld [vmem:[#allocation16_spill] sm:$0xff] }
 0xb78   : > { %5593 = vset.pattern.permute.xlu1 %v8647_v51 }
 0xb79   : > { %3299 = vperm.xlu1 %5593, %v8656_v2  }
 0xb7d   : > { %5594 = vset.pattern.permute.xlu1 %v8654_v10 }
 0xb7e   : > { %3331 = vperm.xlu1 %5594, %v8657_v42  }
 0xb82   : > { %5595 = vset.pattern.permute.xlu1 %v8651_v0 }
 0xb83   : > { %3311 = vperm.xlu1 %5595, %v8656_v2  }
 0xb87   : > { %3353 = vperm.xlu1 %5595, %v8657_v42  }
 0xb8b   : > { %5596 = vset.pattern.permute.xlu1 %v8648_v16 }
 0xbb7   : > { %v2926_v39 = vpop.permute.xlu1 %2925 }
 0xbb8   : > { %v2927_v21 = vsel %vm1619_vm9, %v2926_v39, %v7296_v28  ;;  %v3473_v39 = vmul.f32 %v3470_v19, %v8664_v8 }
 0xbb9   : > { %2928 = vrot.lane.b32.xlu1 %v2927_v21, %s8617_s29  ;;  %v8665_v21 = vmov 8  }
 0xbbd   : > { %3365 = vperm.xlu1 %5596, %v8656_v2  }
 0xbc1   : > { %3369 = vperm.xlu1 %5596, %v8657_v42  }
 0xbc4   : > { %v7336_v57 = vpop.permute.xlu1 %3485 }
 0xbc5   : > { %5599 = vset.pattern.permute.xlu1 %v8653_v31  ;;  %8658 = vst [vmem:[#allocation21_spill] sm:$0xff] %v7336_v57 }
 0xbc6   : > { %3381 = vperm.xlu1 %5599, %v8656_v2  }
 0xbc8   : > { %v7338_v18 = vpop.permute.xlu1 %2982 }
 0xbca   : > { %3385 = vperm.xlu1 %5599, %v8657_v42  }
 0xbcd   : > { %v7340_v30 = vpop.permute.xlu1 %2992 }
 0xbce   : > { %5601 = vset.pattern.permute.xlu1 %v8650_v59 }
 0xbd2   : > { %v7342_v58 = vpop.permute.xlu1 %3514 }
 0xbd7   : > { %v7344_v43 = vpop.permute.xlu1 %3102 }
 0xbdc   : > { %v7346_v48 = vpop.permute.xlu1 %3534 }
 0xbe1   : > { %v7348_v36 = vpop.permute.xlu1 %3114 }
 0xbe5   : > { %v7350_v12 = vpop.permute.xlu1 %3544 }
 0xbea   : > { %v7352_v17 = vpop.permute.xlu1 %3554 }
 0xbef   : > { %v7354_v40 = vpop.permute.xlu1 %3214 }
 0xbf4   : > { %v7356_v38 = vpop.permute.xlu1 %3299 }
 0xbf9   : > { %v7358_v45 = vpop.permute.xlu1 %3331 }
 0xbfe   : > { %v7360_v47 = vpop.permute.xlu1 %3311 }
 0xc02   : > { %v7362_v54 = vpop.permute.xlu1 %3353 }
 0xc2b   : > { %v2929_v49 = vpop.permute.xlu1 %2928 }
 0xc2c   : > { %v2930_v56 = vsel %vm1619_vm9, %v2929_v49, %v7296_v28  ;;  %v3480_v49 = vadd.f32 %v3477_v53, %v3473_v39 }
 0xc2d   : > { %2934 = vrot.lane.b32.xlu1 %v2930_v56, %s8626_s3  ;;  %v2967_v63 = vrot.slane %v2930_v56, 7  ;;  %v2933_v11 = vrot.slane %v2930_v56, 2  ;;  %v3022_v41 = vrot.slane %v2930_v56, 6  ;;  %v2932_v35 = vrot.slane %v2930_v56, 1 }
 0xc2e   : > { %v3132_v61 = vrot.slane %v2930_v56, 3  ;;  %v3133_v3 = vrot.slane %v2930_v56, 4  ;;  %v3056_v1 = vrot.slane %v2930_v56, 5 }
 0xc2f   : > { %2968 = vrot.lane.b32.xlu0 %v2967_v63, %s8627_s24 }
 0xc31   : > { %2970 = vrot.lane.b32.xlu1 %v2930_v56, %s8627_s24 }
 0xc33   : > { %2938 = vrot.lane.b32.xlu0 %v2933_v11, %s8626_s3 }
 0xc35   : > { %3027 = vrot.lane.b32.xlu1 %v2930_v56, %s8659_s15 }
 0xc37   : > { %3059 = vrot.lane.b32.xlu0 %v3022_v41, %s8628_s21 }
 0xc39   : > { %3243 = vrot.lane.b32.xlu1 %v2930_v56, %s8629_s2  ;;  %v3481_v56 = vmax.f32 %v3479_v7, 0.0 }
 0xc3b   : > { %3061 = vrot.lane.b32.xlu0 %v2967_v63, %s8628_s21 }
 0xc3d   : > { %2936 = vrot.lane.b32.xlu1 %v2932_v35, %s8626_s3 }
 0xc3f   : > { %3134 = vrot.lane.b32.xlu0 %v3132_v61, %s8579_s25 }
 0xc41   : > { %2972 = vrot.lane.b32.xlu1 %v2932_v35, %s8627_s24  ;;  %s8683_s24 = smov 65  }
 0xc43   : > { %3169 = vrot.lane.b32.xlu0 %v3132_v61, %s8630_s9 }
 0xc45   : > { %3023 = vrot.lane.b32.xlu1 %v3022_v41, %s8659_s15  ;;  %v3491_v41 = vrot.slane %v3481_v56, %v6238_v46 }
 0xc47   : > { %3171 = vrot.lane.b32.xlu0 %v3133_v3, %s8630_s9 }
 0xc49   : > { %3025 = vrot.lane.b32.xlu1 %v2967_v63, %s8659_s15  ;;  %v3482_v63 = vmax.f32 %v3480_v49, 0.0  ;;  %s8678_s15 = smov 72  }
 0xc4b   : > { %3204 = vrot.lane.b32.xlu0 %v3132_v61, %s8631_s10  ;;  %v3500_v61 = vrot.slane %v3481_v56, %v6241_v50  ;;  %v3510_v19 = vrot.slane %v3482_v63, %v6094_v4  ;;  %v3520_v27 = vrot.slane %v3482_v63, %v6097_v5  ;;  %v3530_v56 = vrot.slane %v3482_v63, %v6100_v6 }
 0xc4d   : > { %3057 = vrot.lane.b32.xlu1 %v3056_v1, %s8628_s21  ;;  %v3511_v7 = vmul.f32 %v3510_v19, %v7379_v55  ;;  %v3521_v39 = vmul.f32 %v3520_v27, %v7342_v58  ;;  %v8667_v19 = vmov 7  }
 0xc4f   : > { %3397 = vperm.xlu0 %5598, %v8656_v2  }
 0xc51   : > { %3136 = vrot.lane.b32.xlu1 %v3133_v3, %s8579_s25  ;;  %v3492_v3 = vmul.f32 %v3491_v41, %v7336_v57 }
 0xc53   : > { %5600 = vset.pattern.permute.xlu0 %v8661_v15 }
 0xc54   : > { %3277 = vperm.xlu0 %5600, %v8662_v25  }
 0xc55   : > { %3138 = vrot.lane.b32.xlu1 %v3056_v1, %s8579_s25  ;;  %v7415_v1 = vpop.permute.xlu0 %3494 }
 0xc56   : > { %8666 = vst [vmem:[#allocation17_spill] sm:$0xff] %v7415_v1  ;;  %v3501_v13 = vmul.f32 %v3500_v61, %v7415_v1 }
 0xc58   : > { %3417 = vperm.xlu0 %5600, %v8657_v42   ;;  %v3502_v53 = vadd.f32 %v3501_v13, %v3492_v3  ;;  %v3531_v3 = vmul.f32 %v3530_v56, %v7369_v32 }
 0xc59   : > { %3167 = vrot.lane.b32.xlu1 %v2933_v11, %s8630_s9  ;;  %v7462_v27 = vpop.permute.xlu0 %3223  ;;  %s8680_s9 = smov 71  }
 0xc5a   : > { %v3512_v49 = vadd.f32 %v3511_v7, %v3502_v53 }
 0xc5c   : > { %5604 = vset.pattern.permute.xlu0 %v8665_v21  ;;  %v3522_v41 = vadd.f32 %v3521_v39, %v3512_v49 }
 0xc5d   : > { %3200 = vrot.lane.b32.xlu1 %v2932_v35, %s8631_s10  ;;  %3323 = vperm.xlu0 %5604, %v8662_v25   ;;  %v7466_v39 = vpop.permute.xlu0 %3341 }
 0xc5e   : > { %v3532_v13 = vadd.f32 %v3531_v3, %v3522_v41 }
 0xc61   : > { %3202 = vrot.lane.b32.xlu1 %v2933_v11, %s8631_s10  ;;  %5607 = vset.pattern.permute.xlu0 %v8651_v0  ;;  %v7470_v56 = vpop.permute.xlu0 %3282  ;;  %s8686_s10 = smov 121  }
 0xc65   : > { %3245 = vrot.lane.b32.xlu1 %v2932_v35, %s8629_s2  ;;  %v3540_v35 = vrot.slane %v3482_v63, %v6105_v9  ;;  %v8668_v63 = vmov 9  }
 0xc67   : > { %v3541_v61 = vmul.f32 %v3540_v35, %v7346_v48  ;;  %v7472_v35 = vpop.permute.xlu0 %2921 }
 0xc69   : > { %3247 = vrot.lane.b32.xlu1 %v2933_v11, %s8629_s2  ;;  %v3542_v11 = vadd.f32 %v3541_v61, %v3532_v13  ;;  %s8670_s2 = sld [smem:[#allocation33_spill]] }
 0xc6b   : > { %v3547_v58 = vadd.f32 %v7350_v12, %v3542_v11 }
 0xc6d   : > { %3401 = vperm.xlu1 %5601, %v8657_v42   ;;  %v3552_v53 = vmul.f32 %v7374_v29, %v3547_v58  ;;  %v7457_v29 = vpop.permute.xlu1 %3365 }
 0xc6f   : > { %v3557_v48 = vadd.f32 %v7352_v17, %v3552_v53  ;;  %v3971_v12 = vld [vmem:[%s8670_s2 + $0x8] sm:$0xff] }
 0xc70   : > { %5393 = vmatpush3.msra.mxu1 %v3971_v12  ;;  %v7454_v17 = vld [vmem:[%s8410_s14 + $0x8] sm:$0xff] }
 0xc71   : > { %5602 = vset.pattern.permute.xlu1 %v8661_v15  ;;  %v7439_v32 = vmax.f32 %v3557_v48, 0.0  ;;  %8672 = vst [vmem:[#allocation19_spill] sm:$0xff] %v7454_v17 }
 0xc72   : > { %3413 = vperm.xlu1 %5602, %v8656_v2  }
 0xc73   : > { %8669 = vst [vmem:[#allocation22_spill] sm:$0xff] %v7439_v32 }
 0xc76   : > { %5603 = vset.pattern.permute.xlu1 %v8667_v19 }
 0xc77   : > { %3429 = vperm.xlu1 %5603, %v8656_v2   ;;  %v3970_v2 = vld [vmem:[%s8670_s2] sm:$0xff]  ;;  %s5760_s2 = smov 1  }
 0xc7b   : > { %3433 = vperm.xlu1 %5603, %v8657_v42   ;;  %v8671_v42 = vmov 0.0  }
 0xc7c   : > { %5394 = vmatprep.subr.mxu1 %v8671_v42 }
 0xc7d   : > { %5395 = vmatpush3.msra.mxu1 %v3970_v2 }
 0xc7f   : > { %5605 = vset.pattern.permute.xlu1 %v8668_v63 }
 0xc80   : > { %3454 = vperm.xlu1 %5605, %v8662_v25   ;;  %v7460_v25 = vpop.permute.xlu1 %3369 }
 0xc84   : > { %3564 = vrot.lane.b32.xlu1 %v7439_v32, %s8591_s30  ;;  %v7464_v7 = vpop.permute.xlu1 %3381 }
 0xc85   : > { %5606 = vset.pattern.permute.xlu1 %v8654_v10 }
 0xc88   : > { %3621 = vperm.xlu1 %5606, %v7454_v17   ;;  %v7468_v49 = vpop.permute.xlu1 %3385 }
 0xc89   : > { %8673 = vst [vmem:[#allocation23_spill] sm:$0xff] %v7468_v49 }
 0xc8c   : > { %5610 = vset.pattern.permute.xlu1 %v8647_v51 }
 0xc9f   : > { %v2935_v41 = vpop.permute.xlu1 %2934 }
 0xca0   : > { %v2943_v23 = vsel %vm1392_vm10, %v2935_v41, 0.0 }
 0xca1   : > { %v2969_v3 = vpop.permute.xlu0 %2968  ;;  %v2949_v16 = vrot.slane %v2943_v23, %v6094_v4 }
 0xca2   : > { %v2977_v21 = vsel %vm1392_vm10, %v2969_v3, 0.0 }
 0xca3   : > { %v2971_v61 = vpop.permute.xlu1 %2970  ;;  %v2950_v23 = vmul.f32 %v2949_v16, %v7279_v52 }
 0xca4   : > { %v2978_v55 = vsel %vm1392_vm10, %v2971_v61, 0.0  ;;  %v2988_v61 = vrot.slane %v2977_v21, %v6097_v5  ;;  %v3098_v21 = vrot.slane %v7296_v28, %v6094_v4 }
 0xca5   : > { %v2939_v58 = vpop.permute.xlu0 %2938  ;;  %v2998_v31 = vrot.slane %v2978_v55, %v6097_v5 }
 0xca6   : > { %v2989_v16 = vmul.f32 %v2988_v61, %v7279_v52  ;;  %v3100_v32 = vmul.f32 %v3098_v21, %v7401_v62 }
 0xca7   : > { %v3028_v13 = vpop.permute.xlu1 %3027 }
 0xca9   : > { %v3060_v48 = vpop.permute.xlu0 %3059 }
 0xcab   : > { %v7474_v11 = vpop.permute.xlu1 %3243 }
 0xcad   : > { %v3062_v63 = vpop.permute.xlu0 %3061 }
 0xcaf   : > { %v2937_v53 = vpop.permute.xlu1 %2936 }
 0xcb0   : > { %v2944_v8 = vsel %vm1392_vm10, %v2937_v53, 0.0  ;;  %v2945_v53 = vsel %vm1392_vm10, %v2939_v58, 0.0 }
 0xcb1   : > { %v2954_v1 = vrot.slane %v2944_v8, %v6094_v4  ;;  %v3135_v41 = vpop.permute.xlu0 %3134  ;;  %v2960_v58 = vrot.slane %v2945_v53, %v6094_v4 }
 0xcb3   : > { %v2973_v12 = vpop.permute.xlu1 %2972  ;;  %v2955_v0 = vmul.f32 %v2954_v1, %v7283_v26  ;;  %v3000_v1 = vmul.f32 %v2998_v31, %v7340_v30  ;;  %v2961_v52 = vmul.f32 %v2960_v58, %v7287_v60 }
 0xcb4   : > { %v2979_v19 = vsel %vm1392_vm10, %v2973_v12, 0.0  ;;  %v2999_v12 = vmul.f32 %v2998_v31, %v7283_v26  ;;  %v3034_v26 = vsel %vm1392_vm10, %v3028_v13, 0.0 }
 0xcb5   : > { %v3010_v3 = vrot.slane %v2979_v19, %v6097_v5  ;;  %v2956_v53 = vadd.f32 %v2955_v0, %v2950_v23  ;;  %v3170_v17 = vpop.permute.xlu0 %3169 }
 0xcb6   : > { %v3001_v42 = vadd.f32 %v2999_v12, %v2989_v16 }
 0xcb7   : > { %v3024_v2 = vpop.permute.xlu1 %3023  ;;  %v3011_v10 = vmul.f32 %v3010_v3, %v7287_v60  ;;  %v3012_v31 = vmul.f32 %v3010_v3, %v7384_v44  ;;  %v2962_v49 = vadd.f32 %v2961_v52, %v2956_v53 }
 0xcb8   : > { %v3032_v59 = vsel %vm1392_vm10, %v3024_v2, 0.0  ;;  %v2990_v2 = vmul.f32 %v2988_v61, %v7338_v18  ;;  %v3068_v61 = vsel %vm1392_vm10, %v3062_v63, 0.0 }
 0xcb9   : > { %v3013_v58 = vadd.f32 %v3011_v10, %v3001_v42  ;;  %v3177_v10 = vsel %vm1392_vm10, %v3170_v17, 0.0  ;;  %v3172_v42 = vpop.permute.xlu0 %3171 }
 0xcba   : > { %v3002_v0 = vadd.f32 %v3000_v1, %v2990_v2 }
 0xcbb   : > { %v3026_v57 = vpop.permute.xlu1 %3025 }
 0xcbc   : > { %v3033_v8 = vsel %vm1392_vm10, %v3026_v57, 0.0  ;;  %v3067_v57 = vsel %vm1392_vm10, %v3060_v48, 0.0  ;;  %v3038_v48 = vrot.slane %v3032_v59, %v6100_v6  ;;  %v3120_v59 = vrot.slane %v7296_v28, %v6100_v6 }
 0xcbd   : > { %v3043_v19 = vrot.slane %v3033_v8, %v6100_v6  ;;  %v3108_v8 = vrot.slane %v7296_v28, %v6097_v5  ;;  %v3077_v13 = vrot.slane %v3067_v57, %v6105_v9  ;;  %v3014_v1 = vadd.f32 %v3012_v31, %v3002_v0 }
 0xcbe   : > { %v3039_v57 = vmul.f32 %v3038_v48, %v7338_v18  ;;  %v2964_v31 = vrot.slane %v2962_v49, 3  ;;  %v3121_v0 = vmul.f32 %v3120_v59, %v7384_v44  ;;  %v3122_v17 = vmul.f32 %v3120_v59, %v7348_v36 }
 0xcbf   : > { %v3058_v15 = vpop.permute.xlu1 %3057  ;;  %v3044_v23 = vmul.f32 %v3043_v19, %v7340_v30  ;;  %v3109_v60 = vmul.f32 %v3108_v8, %v7340_v30  ;;  %v3110_v16 = vmul.f32 %v3108_v8, %v7344_v43  ;;  %v3078_v63 = vmul.f32 %v3077_v13, %v7340_v30 }
 0xcc0   : > { %v3066_v55 = vsel %vm1392_vm10, %v3058_v15, 0.0  ;;  %v3083_v19 = vrot.slane %v3068_v61, %v6105_v9  ;;  %v3018_v52 = vrot.slane %v3014_v1, 6  ;;  %v3099_v61 = vmul.f32 %v3098_v21, %v7338_v18 }
 0xcc1   : > { %v3072_v51 = vrot.slane %v3066_v55, %v6105_v9  ;;  %v3049_v55 = vrot.slane %v3034_v26, %v6100_v6  ;;  %v3045_v53 = vadd.f32 %v3044_v23, %v3039_v57  ;;  %v3187_v23 = vrot.slane %v3177_v10, %v6238_v46 }
 0xcc2   : > { %v3112_v1 = vadd.f32 %v3110_v16, %v3100_v32  ;;  %v2966_v57 = vadd.f32 %v2964_v31, %v7472_v35  ;;  %v3111_v59 = vadd.f32 %v3109_v60, %v3099_v61 }
 0xcc3   : > { %v3137_v15 = vpop.permute.xlu1 %3136  ;;  %v3073_v12 = vmul.f32 %v3072_v51, %v7338_v18  ;;  %v3050_v28 = vmul.f32 %v3049_v55, %v7384_v44  ;;  %v3143_v51 = vsel %vm1392_vm10, %v3135_v41, 0.0  ;;  %v3084_v55 = vmul.f32 %v3083_v19, %v7384_v44  ;;  %v3205_v19 = vpop.permute.xlu0 %3204 }
 0xcc4   : > { %v3144_v26 = vsel %vm1392_vm10, %v3137_v15, 0.0  ;;  %v3017_v15 = vrot.slane %v3013_v58, 6  ;;  %v3149_v49 = vrot.slane %v3143_v51, %v6231_v37  ;;  %v3124_v21 = vadd.f32 %v3122_v17, %v3112_v1 }
 0xcc5   : > { %v3079_v48 = vadd.f32 %v3078_v63, %v3073_v12  ;;  %v3154_v13 = vrot.slane %v3144_v26, %v6231_v37  ;;  %v3178_v63 = vsel %vm1392_vm10, %v3172_v42, 0.0  ;;  %v3188_v16 = vmul.f32 %v3187_v23, %v7344_v43 }
 0xcc6   : > { %v3019_v44 = vsel %vm1007_vm4, %v3017_v15, %v3018_v52  ;;  %v3150_v32 = vmul.f32 %v3149_v49, %v7401_v62  ;;  %v3193_v60 = vrot.slane %v3178_v63, %v6238_v46  ;;  %v3211_v31 = vsel %vm1392_vm10, %v3205_v19, 0.0 }
 0xcc7   : > { %v3139_v3 = vpop.permute.xlu1 %3138  ;;  %v3085_v26 = vadd.f32 %v3084_v55, %v3079_v48  ;;  %v3155_v51 = vmul.f32 %v3154_v13, %v7344_v43  ;;  %v3123_v15 = vadd.f32 %v3121_v0, %v3111_v59  ;;  %v3128_v49 = vrot.slane %v3124_v21, 7 }
 0xcc8   : > { %v3145_v30 = vsel %vm1392_vm10, %v3139_v3, 0.0  ;;  %v3051_v3 = vadd.f32 %v3050_v28, %v3045_v53  ;;  %v3252_v28 = vsel %vm1393_vm11, %v7474_v11, 0.0  ;;  %v3194_v52 = vmul.f32 %v3193_v60, %v7348_v36 }
 0xcc9   : > { %v3160_v12 = vrot.slane %v3145_v30, %v6231_v37  ;;  %v3087_v48 = vrot.slane %v3085_v26, 4  ;;  %v3258_v61 = vrot.slane %v3252_v28, %v6094_v4  ;;  %v3239_v34 = vrot.slane %v3211_v31, %v6241_v50 }
 0xcca   : > { %v3053_v10 = vrot.slane %v3051_v3, 1 }
 0xccb   : > { %v3168_v2 = vpop.permute.xlu1 %3167  ;;  %v3161_v42 = vmul.f32 %v3160_v12, %v7348_v36  ;;  %v3127_v36 = vrot.slane %v3123_v15, 7  ;;  %v3259_v59 = vmul.f32 %v3258_v61, %v7354_v40 }
 0xccc   : > { %v3176_v8 = vsel %vm1392_vm10, %v3168_v2, 0.0  ;;  %v3021_v2 = vadd.f32 %v3019_v44, %v2966_v57 }
 0xccd   : > { %v3182_v41 = vrot.slane %v3176_v8, %v6238_v46  ;;  %v3129_v44 = vsel %vm1118_vm6, %v3127_v36, %v3128_v49  ;;  %v3407_v36 = vrot.slane %v7276_v20, %v6231_v37 }
 0xcce   : > { %v3055_v13 = vadd.f32 %v3053_v10, %v3021_v2  ;;  %v3398_v10 = vpop.permute.xlu0 %3397  ;;  %v3347_v2 = vrot.slane %v7276_v20, %v6097_v5 }
 0xccf   : > { %v3201_v58 = vpop.permute.xlu1 %3200  ;;  %v3183_v18 = vmul.f32 %v3182_v41, %v7401_v62  ;;  %v3156_v62 = vadd.f32 %v3155_v51, %v3150_v32  ;;  %v3240_v51 = vmul.f32 %v3239_v34, %v7389_v14 }
 0xcd0   : > { %v3209_v35 = vsel %vm1392_vm10, %v3201_v58, 0.0  ;;  %v3089_v3 = vadd.f32 %v3087_v48, %v3055_v13  ;;  %v3337_v48 = vrot.slane %v7276_v20, %v6094_v4 }
 0xcd1   : > { %v3189_v30 = vadd.f32 %v3188_v16, %v3183_v18  ;;  %v3220_v8 = vrot.slane %v3209_v35, %v6241_v50  ;;  %v3162_v41 = vadd.f32 %v3161_v42, %v3156_v62  ;;  %v3359_v62 = vrot.slane %v7276_v20, %v6100_v6 }
 0xcd2   : > { %v3131_v18 = vadd.f32 %v3129_v44, %v3089_v3  ;;  %v3278_v13 = vpop.permute.xlu0 %3277 }
 0xcd3   : > { %v3203_v53 = vpop.permute.xlu1 %3202  ;;  %v3195_v12 = vadd.f32 %v3194_v52, %v3189_v30  ;;  %v3221_v58 = vmul.f32 %v3220_v8, %v7354_v40  ;;  %v3164_v1 = vrot.slane %v3162_v41, 2  ;;  %v3338_v8 = vmul.f32 %v3337_v48, %v7408_v33 }
 0xcd4   : > { %v3210_v11 = vsel %vm1392_vm10, %v3203_v53, 0.0  ;;  %v3360_v15 = vmul.f32 %v3359_v62, %v7360_v47  ;;  %v3375_v52 = vrot.slane %v7276_v20, %v6105_v9  ;;  %v3391_v41 = vrot.slane %v7276_v20, %v8644_v22 }
 0xcd5   : > { %v3229_v43 = vrot.slane %v3210_v11, %v6241_v50  ;;  %v3197_v21 = vrot.slane %v3195_v12, 5  ;;  %v3166_v32 = vadd.f32 %v3164_v1, %v3131_v18  ;;  %v3348_v11 = vmul.f32 %v3347_v2, %v7356_v38 }
 0xcd6   : > { %v3361_v61 = vmul.f32 %v3359_v62, %v7362_v54  ;;  %v3376_v34 = vmul.f32 %v3375_v52, %v7457_v29  ;;  %v3423_v54 = vrot.slane %v7276_v20, %v6238_v46 }
 0xcd7   : > { %v3230_v17 = vmul.f32 %v3229_v43, %v7462_v27  ;;  %v3246_v55 = vpop.permute.xlu1 %3245  ;;  %v3199_v42 = vadd.f32 %v3197_v21, %v3166_v32  ;;  %v3339_v43 = vmul.f32 %v3337_v48, %v7358_v45  ;;  %v3350_v49 = vadd.f32 %v3348_v11, %v3338_v8 }
 0xcd8   : > { %v3253_v23 = vsel %vm1393_vm11, %v3246_v55, 0.0  ;;  %v3349_v55 = vmul.f32 %v3347_v2, %v7466_v39 }
 0xcd9   : > { %v3263_v0 = vrot.slane %v3253_v23, %v6094_v4  ;;  %v3231_v57 = vadd.f32 %v3230_v17, %v3221_v58  ;;  %v3362_v12 = vadd.f32 %v3360_v15, %v3350_v49  ;;  %v3377_v58 = vmul.f32 %v3375_v52, %v7460_v25 }
 0xcda   : > { %v3351_v3 = vadd.f32 %v3349_v55, %v3339_v43 }
 0xcdb   : > { %v3264_v63 = vmul.f32 %v3263_v0, %v7462_v27  ;;  %v3248_v26 = vpop.permute.xlu1 %3247  ;;  %v3241_v35 = vadd.f32 %v3240_v51, %v3231_v57  ;;  %v3392_v0 = vmul.f32 %v3391_v41, %v7464_v7  ;;  %v3378_v39 = vadd.f32 %v3376_v34, %v3362_v12  ;;  %v3418_v7 = vpop.permute.xlu0 %3417 }
 0xcdc   : > { %v3254_v19 = vsel %vm1393_vm11, %v3248_v26, 0.0  ;;  %v3363_v57 = vadd.f32 %v3361_v61, %v3351_v3  ;;  %v3408_v26 = vmul.f32 %v3407_v36, %v3398_v10  ;;  %v3425_v62 = vmul.f32 %v3423_v54, %v3418_v7 }
 0xcdd   : > { %v3269_v28 = vrot.slane %v3254_v19, %v6094_v4  ;;  %v3265_v16 = vadd.f32 %v3264_v63, %v3259_v59  ;;  %v3242_v31 = vadd.f32 %v3241_v35, %v3199_v42  ;;  %v8674_v63 = vld [vmem:[#allocation23_spill] sm:$0xff]  ;;  %v3394_v19 = vadd.f32 %v3392_v0, %v3378_v39 }
 0xcde   : > { %v3393_v29 = vmul.f32 %v3391_v41, %v8674_v63  ;;  %v3379_v25 = vadd.f32 %v3377_v58, %v3363_v57  ;;  %v3439_v42 = vrot.slane %v7276_v20, %v6241_v50  ;;  %v8675_v58 = vld [vmem:[#allocation22_spill] sm:$0xff]  ;;  %v8676_v39 = vmov 0.0  }
 0xcdf   : > { %v3270_v60 = vmul.f32 %v3269_v28, %v7389_v14  ;;  %v3410_v10 = vadd.f32 %v3408_v26, %v3394_v19  ;;  %v3324_v11 = vpop.permute.xlu0 %3323  ;;  %v3463_v19 = vld [vmem:[%s8410_s14 + $0x10] sm:$0xff]  ;;  %v8682_v7 = vmov 1  }
 0xce0   : > { %v3325_v8 = vrot.slane %v3324_v11, 2  ;;  %v8691_v11 = vmov 3  }
 0xce1   : > { %v3271_v53 = vadd.f32 %v3270_v60, %v3265_v16  ;;  %v3395_v60 = vadd.f32 %v3393_v29, %v3379_v25  ;;  %v8681_v25 = vmov 0  }
 0xce3   : > { %v3273_v24 = vrot.slane %v3271_v53, 3 }
 0xce5   : > { %v3275_v30 = vadd.f32 %v3273_v24, %v3242_v31 }
 0xce7   : > { %v3280_v17 = vmul.f32 %v3278_v13, %v3275_v30 }
 0xce8   : > { %v3402_v23 = vpop.permute.xlu1 %3401 }
 0xce9   : > { %v3285_v45 = vadd.f32 %v7470_v56, %v3280_v17  ;;  %v3409_v51 = vmul.f32 %v3407_v36, %v3402_v23 }
 0xceb   : > { %v3286_v1 = vmax.f32 %v3285_v45, 0.0  ;;  %v3411_v31 = vadd.f32 %v3409_v51, %v3395_v60  ;;  %v8684_v51 = vmov 5   ;;  %v8687_v60 = vmov 6  }
 0xced   : > { %v3414_v59 = vpop.permute.xlu1 %3413  ;;  %v3295_v56 = vrot.slane %v3286_v1, %v6094_v4  ;;  %v3305_v44 = vrot.slane %v3286_v1, %v6097_v5  ;;  %v3317_v16 = vrot.slane %v3286_v1, %v6100_v6  ;;  %v3427_v15 = vadd.f32 %v3425_v62, %v3411_v31 }
 0xcee   : > { %v3424_v18 = vmul.f32 %v3423_v54, %v3414_v59  ;;  %v8679_v59 = vld [vmem:[#allocation19_spill] sm:$0xff]  ;;  %v8690_v31 = vmov 4  }
 0xcef   : > { %v3296_v21 = vmul.f32 %v3295_v56, %v7354_v40  ;;  %v3306_v28 = vmul.f32 %v3305_v44, %v7462_v27  ;;  %v3297_v32 = vmul.f32 %v3295_v56, %v7408_v33  ;;  %v3307_v35 = vmul.f32 %v3305_v44, %v7356_v38 }
 0xcf0   : > { %v3426_v24 = vadd.f32 %v3424_v18, %v3410_v10  ;;  %v3318_v27 = vmul.f32 %v3317_v16, %v7389_v14  ;;  %v3319_v38 = vmul.f32 %v3317_v16, %v7360_v47  ;;  %v5663_v18 = vld [vmem:[%s8636_s13] sm:$0x3f]  ;;  %v3464_v16 = vld [vmem:[%s8410_s14 + $0x18] sm:$0xff]  ;;  %v8688_v10 = vmov 7   ;;  %s674_s13 = sand.u32 1, %s5717_s28  }
 0xcf1   : > { %v3308_v2 = vadd.f32 %v3306_v28, %v3296_v21  ;;  %v3309_v40 = vadd.f32 %v3307_v35, %v3297_v32  ;;  %v8685_v32 = vmov 2  }
 0xcf2   : > { %v3430_v53 = vpop.permute.xlu1 %3429 }
 0xcf3   : > { %v3440_v48 = vmul.f32 %v3439_v42, %v3430_v53  ;;  %v3320_v30 = vadd.f32 %v3318_v27, %v3308_v2  ;;  %v3321_v20 = vadd.f32 %v3319_v38, %v3309_v40  ;;  %v7684_v53 = vld [vmem:[%s8407_s11] sm:$0x3f]  ;;  %v8692_v40 = vmov 8  }
 0xcf4   : > { %v4056_v2 = vld [vmem:[%s8408_s12] sm:$0xff] }
 0xcf5   : > { %v3442_v33 = vadd.f32 %v3440_v48, %v3426_v24  ;;  %v3327_v17 = vadd.f32 %v3325_v8, %v3320_v30  ;;  %v3328_v61 = vadd.f32 %v3325_v8, %v3321_v20 }
 0xcf6   : > { %v3434_v43 = vpop.permute.xlu1 %3433 }
 0xcf7   : > { %v3441_v52 = vmul.f32 %v3439_v42, %v3434_v43  ;;  %v3446_v13 = vrot.slane %v3442_v33, 6  ;;  %v3465_v42 = vld [vmem:[%s8410_s14 + $0x20] sm:$0xf] }
 0xcf9   : > { %v3443_v41 = vadd.f32 %v3441_v52, %v3427_v15  ;;  %v3451_v34 = vadd.f32 %v3446_v13, %v3327_v17 }
 0xcfb   : > { %v3447_v55 = vrot.slane %v3443_v41, 6  ;;  %v3455_v49 = vpop.permute.xlu1 %3454 }
 0xcfc   : > { %v3456_v23 = vrot.slane %v3455_v49, 2 }
 0xcfd   : > { %v3448_v14 = vsel %vm1007_vm4, %v3446_v13, %v3447_v55 }
 0xcfe   : > { %v3452_v45 = vadd.f32 %v3448_v14, %v3328_v61  ;;  %v3458_v3 = vadd.f32 %v3456_v23, %v3451_v34 }
 0xcff   : > { %v3565_v12 = vpop.permute.xlu1 %3564 }
 0xd00   : > { %v3459_v47 = vadd.f32 %v3456_v23, %v3452_v45  ;;  %v3566_v0 = vsel %vm912_vm2, %v3565_v12, %v8675_v58  ;;  %v3974_v36 = vrot.slane %v3458_v3, 6 }
 0xd01   : > { %3567 = vrot.lane.b32.xlu0 %v3566_v0, %s8591_s30 }
 0xd02   : > { %v3975_v1 = vrot.slane %v3459_v47, 6 }
 0xd03   : > { %v7706_v27 = vpop.permute.xlu1 %3621 }
 0xd04   : > { %v3976_v57 = vsel %vm1007_vm4, %v3974_v36, %v3975_v1 }
 0xd05   : > { %5397 = vmatmul.mubr.msk.f32.vlgmr.msra.gmra.mxu1 %vm3977_vm12, %v3976_v57 }
 0xd06   : > { %5215 = vmatprep.mubr.f32.mxu1 %v8676_v39 }
 0xd73   : > { %v3568_v54 = vpop.permute.xlu0 %3567 }
 0xd74   : > { %v3569_v63 = vsel %vm912_vm2, %v3568_v54, %v8675_v58 }
 0xd75   : > { %3573 = vrot.lane.b32.xlu1 %v3569_v63, %s8677_s19  ;;  %v3606_v29 = vrot.slane %v3569_v63, 7  ;;  %v3571_v26 = vrot.slane %v3569_v63, 1  ;;  %v3661_v56 = vrot.slane %v3569_v63, 6  ;;  %v3572_v44 = vrot.slane %v3569_v63, 2 }
 0xd76   : > { %v3695_v21 = vrot.slane %v3569_v63, 5  ;;  %v3772_v28 = vrot.slane %v3569_v63, 4  ;;  %v3771_v35 = vrot.slane %v3569_v63, 3 }
 0xd77   : > { %3607 = vrot.lane.b32.xlu0 %v3606_v29, %s8678_s15 }
 0xd79   : > { %3575 = vrot.lane.b32.xlu1 %v3571_v26, %s8677_s19 }
 0xd7b   : > { %3643 = vperm.xlu0 %5607, %v8679_v59  }
 0xd7d   : > { %3609 = vrot.lane.b32.xlu1 %v3569_v63, %s8678_s15 }
 0xd7f   : > { %3662 = vrot.lane.b32.xlu0 %v3661_v56, %s8680_s9 }
 0xd80   : > { %5608 = vset.pattern.permute.xlu0 %v8681_v25 }
 0xd81   : > { %3577 = vrot.lane.b32.xlu1 %v3572_v44, %s8677_s19 }
 0xd83   : > { %3731 = vperm.xlu0 %5608, %v3463_v19  }
 0xd85   : > { %3611 = vrot.lane.b32.xlu1 %v3571_v26, %s8678_s15 }
 0xd87   : > { %5609 = vset.pattern.permute.xlu0 %v8682_v7 }
 0xd88   : > { %3631 = vperm.xlu0 %5609, %v8679_v59  }
 0xd89   : > { %3664 = vrot.lane.b32.xlu1 %v3606_v29, %s8680_s9 }
 0xd8c   : > { %3666 = vrot.lane.b32.xlu0 %v3569_v63, %s8680_s9 }
 0xd8d   : > { %3741 = vperm.xlu1 %5610, %v3463_v19  }
 0xd90   : > { %3698 = vrot.lane.b32.xlu0 %v3661_v56, %s8683_s24 }
 0xd91   : > { %5611 = vset.pattern.permute.xlu1 %v8684_v51 }
 0xd92   : > { %3560 = vperm.xlu1 %5611, %v5663_v18  }
 0xd94   : > { %3700 = vrot.lane.b32.xlu0 %v3606_v29, %s8683_s24 }
 0xd96   : > { %3696 = vrot.lane.b32.xlu1 %v3695_v21, %s8683_s24 }
 0xd97   : > { %5612 = vset.pattern.permute.xlu1 %v8685_v32 }
 0xd98   : > { %3775 = vrot.lane.b32.xlu0 %v3772_v28, %s8579_s25 }
 0xd9a   : > { %3753 = vperm.xlu1 %5612, %v3463_v19  }
 0xd9c   : > { %3806 = vrot.lane.b32.xlu0 %v3572_v44, %s8686_s10 }
 0xd9e   : > { %3773 = vrot.lane.b32.xlu1 %v3771_v35, %s8579_s25 }
 0xd9f   : > { %5613 = vset.pattern.permute.xlu1 %v8681_v25 }
 0xda0   : > { %3810 = vrot.lane.b32.xlu0 %v3772_v28, %s8686_s10 }
 0xda2   : > { %3777 = vrot.lane.b32.xlu1 %v3695_v21, %s8579_s25 }
 0xda4   : > { %3862 = vperm.xlu0 %5609, %v3464_v16  }
 0xda6   : > { %3808 = vrot.lane.b32.xlu1 %v3771_v35, %s8686_s10 }
 0xda8   : > { %5614 = vset.pattern.permute.xlu0 %v8685_v32 }
 0xda9   : > { %3872 = vperm.xlu0 %5614, %v3464_v16  }
 0xdaa   : > { %3853 = vperm.xlu1 %5613, %v3464_v16  }
 0xdad   : > { %3843 = vrot.lane.b32.xlu0 %v3771_v35, %s8594_s0  ;;  %v8695_v35 = vld [vmem:[#allocation21_spill] sm:$0xff] }
 0xdae   : > { %3839 = vrot.lane.b32.xlu1 %v3571_v26, %s8594_s0  ;;  %5615 = vset.pattern.permute.xlu0 %v8687_v60 }
 0xdaf   : > { %5616 = vset.pattern.permute.xlu1 %v8688_v10 }
 0xdb1   : > { %3916 = vperm.xlu0 %5615, %v5663_v18  }
 0xdb2   : > { %3841 = vrot.lane.b32.xlu1 %v3572_v44, %s8594_s0 }
 0xdb5   : > { %5618 = vset.pattern.permute.xlu0 %v8682_v7 }
 0xdb6   : > { %3882 = vrot.lane.b32.xlu1 %v3569_v63, %s8689_s5  ;;  %3938 = vperm.xlu0 %5618, %v3465_v42  }
 0xdba   : > { %3884 = vrot.lane.b32.xlu1 %v3571_v26, %s8689_s5  ;;  %5621 = vset.pattern.permute.xlu0 %v8681_v25 }
 0xdbb   : > { %4062 = vperm.xlu0 %5621, %v7684_v53  }
 0xdbe   : > { %3886 = vrot.lane.b32.xlu1 %v3572_v44, %s8689_s5 }
 0xdbf   : > { %5624 = vset.pattern.permute.xlu0 %v8682_v7 }
 0xdc0   : > { %4088 = vperm.xlu0 %5624, %v4056_v2  }
 0xdc2   : > { %3921 = vperm.xlu1 %5616, %v5663_v18  }
 0xdc4   : > { %5627 = vset.pattern.permute.xlu0 %v8690_v31 }
 0xdc5   : > { %v7694_v24 = vpop.f32.mrf.mxu1  ;;  %4118 = vperm.xlu0 %5627, %v4056_v2  }
 0xdc6   : > { %5617 = vset.pattern.permute.xlu1 %v8681_v25 }
 0xdc7   : > { %v5398_v48 = vpop.f32.mrf.mxu1  ;;  %3928 = vperm.xlu1 %5617, %v3465_v42  }
 0xdc9   : > { %5630 = vset.pattern.permute.xlu0 %v8691_v11 }
 0xdca   : > { %4143 = vperm.xlu0 %5630, %v7684_v53  }
 0xdcb   : > { %5619 = vset.pattern.permute.xlu1 %v8685_v32 }
 0xdcc   : > { %3950 = vperm.xlu1 %5619, %v3465_v42  }
 0xdce   : > { %5633 = vset.pattern.permute.xlu0 %v8681_v25 }
 0xdd0   : > { %5620 = vset.pattern.permute.xlu1 %v8692_v40 }
 0xdd1   : > { %3962 = vperm.xlu1 %5620, %v5663_v18   ;;  %v8694_v18 = vld [vmem:[#allocation17_spill] sm:$0xff] }
 0xdd5   : > { %5622 = vset.pattern.permute.xlu1 %v8682_v7 }
 0xdd6   : > { %4069 = vperm.xlu1 %5622, %v7684_v53  }
 0xdda   : > { %5623 = vset.pattern.permute.xlu1 %v8681_v25 }
 0xddb   : > { %4079 = vperm.xlu1 %5623, %v4056_v2  }
 0xddf   : > { %5625 = vset.pattern.permute.xlu1 %v8685_v32 }
 0xde0   : > { %4098 = vperm.xlu1 %5625, %v4056_v2  }
 0xde4   : > { %5626 = vset.pattern.permute.xlu1 %v8691_v11 }
 0xde5   : > { %4108 = vperm.xlu1 %5626, %v4056_v2  }
 0xde7   : > { %v3574_v62 = vpop.permute.xlu1 %3573 }
 0xde8   : > { %v3582_v0 = vsel %vm693_vm3, %v3574_v62, 0.0 }
 0xde9   : > { %5628 = vset.pattern.permute.xlu1 %v8684_v51  ;;  %v3608_v38 = vpop.permute.xlu0 %3607  ;;  %v3588_v26 = vrot.slane %v3582_v0, %v6094_v4 }
 0xdea   : > { %4128 = vperm.xlu1 %5628, %v4056_v2   ;;  %v3616_v36 = vsel %vm693_vm3, %v3608_v38, 0.0 }
 0xdeb   : > { %v3576_v33 = vpop.permute.xlu1 %3575  ;;  %v3627_v59 = vrot.slane %v3616_v36, %v6097_v5  ;;  %v3589_v16 = vmul.f32 %v3588_v26, %v8695_v35  ;;  %v3737_v26 = vrot.slane %v8675_v58, %v6094_v4 }
 0xdec   : > { %v3583_v12 = vsel %vm693_vm3, %v3576_v33, 0.0  ;;  %v8696_v33 = vld [vmem:[#allocation18_spill] sm:$0xff] }
 0xded   : > { %v3593_v54 = vrot.slane %v3583_v12, %v6094_v4  ;;  %v3628_v42 = vmul.f32 %v3627_v59, %v8695_v35  ;;  %v3629_v12 = vmul.f32 %v3627_v59, %v7706_v27 }
 0xdee   : > { %5629 = vset.pattern.permute.xlu1 %v8685_v32 }
 0xdef   : > { %4138 = vperm.xlu1 %5629, %v7684_v53   ;;  %v3610_v30 = vpop.permute.xlu1 %3609  ;;  %v3594_v21 = vmul.f32 %v3593_v54, %v8694_v18 }
 0xdf0   : > { %v3617_v47 = vsel %vm693_vm3, %v3610_v30, 0.0 }
 0xdf1   : > { %v3637_v63 = vrot.slane %v3617_v47, %v6097_v5 }
 0xdf3   : > { %5631 = vset.pattern.permute.xlu1 %v8690_v31  ;;  %v3578_v43 = vpop.permute.xlu1 %3577  ;;  %v3638_v28 = vmul.f32 %v3637_v63, %v8694_v18 }
 0xdf4   : > { %4148 = vperm.xlu1 %5631, %v7684_v53   ;;  %v3584_v1 = vsel %vm693_vm3, %v3578_v43, 0.0 }
 0xdf5   : > { %v3599_v56 = vrot.slane %v3584_v1, %v6094_v4  ;;  %v3640_v36 = vadd.f32 %v3638_v28, %v3628_v42  ;;  %v3595_v1 = vadd.f32 %v3594_v21, %v3589_v16 }
 0xdf6   : > { %v7714_v8 = vpop.permute.xlu0 %3643 }
 0xdf7   : > { %v3612_v52 = vpop.permute.xlu1 %3611  ;;  %v3600_v38 = vmul.f32 %v3599_v56, %v8696_v33 }
 0xdf8   : > { %5632 = vset.pattern.permute.xlu1 %v8684_v51  ;;  %v3618_v29 = vsel %vm693_vm3, %v3612_v52, 0.0 }
 0xdf9   : > { %v3649_v44 = vrot.slane %v3618_v29, %v6097_v5  ;;  %v3601_v59 = vadd.f32 %v3600_v38, %v3595_v1 }
 0xdfa   : > { %v3663_v15 = vpop.permute.xlu0 %3662 }
 0xdfb   : > { %v3665_v41 = vpop.permute.xlu1 %3664  ;;  %v3671_v30 = vsel %vm693_vm3, %v3663_v15, 0.0  ;;  %v3650_v47 = vmul.f32 %v3649_v44, %v8696_v33  ;;  %v3651_v56 = vmul.f32 %v3649_v44, %v7714_v8 }
 0xdfc   : > { %v3672_v43 = vsel %vm693_vm3, %v3665_v41, 0.0  ;;  %v3677_v15 = vrot.slane %v3671_v30, %v6100_v6 }
 0xdfd   : > { %v3652_v18 = vadd.f32 %v3650_v47, %v3640_v36 }
 0xdfe   : > { %v7717_v13 = vpop.permute.xlu0 %3731  ;;  %v3678_v44 = vmul.f32 %v3677_v15, %v7706_v27 }
 0xe03   : > { %v7719_v20 = vpop.permute.xlu0 %3631 }
 0xe04   : > { %v3639_v2 = vmul.f32 %v3637_v63, %v7719_v20  ;;  %v3682_v63 = vrot.slane %v3672_v43, %v6100_v6 }
 0xe06   : > { %v3641_v41 = vadd.f32 %v3639_v2, %v3629_v12  ;;  %v3683_v21 = vmul.f32 %v3682_v63, %v7719_v20  ;;  %v3738_v2 = vmul.f32 %v3737_v26, %v7706_v27 }
 0xe07   : > { %v3667_v17 = vpop.permute.xlu0 %3666 }
 0xe08   : > { %v7721_v55 = vpop.permute.xlu1 %3741  ;;  %v3673_v52 = vsel %vm693_vm3, %v3667_v17, 0.0  ;;  %v3759_v17 = vrot.slane %v8675_v58, %v6100_v6  ;;  %v3653_v30 = vadd.f32 %v3651_v56, %v3641_v41  ;;  %v3684_v36 = vadd.f32 %v3683_v21, %v3678_v44 }
 0xe09   : > { %v3688_v29 = vrot.slane %v3673_v52, %v6100_v6  ;;  %v3603_v52 = vrot.slane %v3601_v59, 3 }
 0xe0a   : > { %v3760_v42 = vmul.f32 %v3759_v17, %v7714_v8 }
 0xe0b   : > { %v3699_v49 = vpop.permute.xlu0 %3698  ;;  %v3689_v38 = vmul.f32 %v3688_v29, %v7714_v8  ;;  %v3657_v29 = vrot.slane %v3653_v30, 6 }
 0xe0c   : > { %v3706_v0 = vsel %vm693_vm3, %v3699_v49, 0.0 }
 0xe0d   : > { %v7723_v61 = vpop.permute.xlu1 %3560  ;;  %v3716_v49 = vrot.slane %v3706_v0, %v6105_v9  ;;  %v3656_v0 = vrot.slane %v3652_v18, 6  ;;  %v3690_v41 = vadd.f32 %v3689_v38, %v3684_v36 }
 0xe0e   : > { %v3605_v59 = vadd.f32 %v3603_v52, %v7723_v61 }
 0xe0f   : > { %v3701_v34 = vpop.permute.xlu0 %3700  ;;  %v3717_v43 = vmul.f32 %v3716_v49, %v7719_v20  ;;  %v3658_v30 = vsel %vm1007_vm4, %v3656_v0, %v3657_v29 }
 0xe10   : > { %v3707_v28 = vsel %vm693_vm3, %v3701_v34, 0.0 }
 0xe11   : > { %v3697_v23 = vpop.permute.xlu1 %3696  ;;  %v3722_v12 = vrot.slane %v3707_v28, %v6105_v9 }
 0xe12   : > { %v3705_v48 = vsel %vm693_vm3, %v3697_v23, 0.0 }
 0xe13   : > { %v7725_v14 = vpop.permute.xlu0 %3775  ;;  %v3711_v54 = vrot.slane %v3705_v48, %v6105_v9  ;;  %v3747_v48 = vrot.slane %v8675_v58, %v6097_v5  ;;  %v3723_v56 = vmul.f32 %v3722_v12, %v7714_v8  ;;  %v3692_v8 = vrot.slane %v3690_v41, 1 }
 0xe15   : > { %v7727_v45 = vpop.permute.xlu1 %3753  ;;  %v3712_v33 = vmul.f32 %v3711_v54, %v7706_v27  ;;  %v3748_v58 = vmul.f32 %v3747_v48, %v7719_v20 }
 0xe16   : > { %v3761_v18 = vmul.f32 %v3759_v17, %v7727_v45  ;;  %v3660_v17 = vadd.f32 %v3658_v30, %v3605_v59 }
 0xe17   : > { %v3807_v57 = vpop.permute.xlu0 %3806  ;;  %v3718_v54 = vadd.f32 %v3717_v43, %v3712_v33  ;;  %v3750_v33 = vadd.f32 %v3748_v58, %v3738_v2 }
 0xe18   : > { %v3815_v27 = vsel %vm693_vm3, %v3807_v57, 0.0  ;;  %v3739_v57 = vmul.f32 %v3737_v26, %v7717_v13 }
 0xe19   : > { %v3774_v39 = vpop.permute.xlu1 %3773  ;;  %v3724_v44 = vadd.f32 %v3723_v56, %v3718_v54  ;;  %v3762_v0 = vadd.f32 %v3760_v42, %v3750_v33 }
 0xe1a   : > { %v3782_v47 = vsel %vm693_vm3, %v3774_v39, 0.0  ;;  %v3749_v39 = vmul.f32 %v3747_v48, %v7721_v55 }
 0xe1b   : > { %v3811_v62 = vpop.permute.xlu0 %3810  ;;  %v3788_v20 = vrot.slane %v3782_v47, %v6231_v37  ;;  %v3726_v54 = vrot.slane %v3724_v44, 4  ;;  %v3766_v42 = vrot.slane %v3762_v0, 7 }
 0xe1c   : > { %v3817_v21 = vsel %vm693_vm3, %v3811_v62, 0.0  ;;  %v3751_v38 = vadd.f32 %v3749_v39, %v3739_v57 }
 0xe1d   : > { %v3778_v19 = vpop.permute.xlu1 %3777  ;;  %v3832_v62 = vrot.slane %v3817_v21, %v6238_v46 }
 0xe1e   : > { %v3784_v15 = vsel %vm693_vm3, %v3778_v19, 0.0  ;;  %v3763_v12 = vadd.f32 %v3761_v18, %v3751_v38 }
 0xe1f   : > { %v7778_v35 = vpop.permute.xlu0 %3862  ;;  %v3799_v28 = vrot.slane %v3784_v15, %v6231_v37  ;;  %v3833_v41 = vmul.f32 %v3832_v62, %v7727_v45 }
 0xe20   : > { %v3767_v29 = vrot.slane %v3763_v12, 7 }
 0xe21   : > { %v3809_v23 = vpop.permute.xlu1 %3808  ;;  %v3800_v47 = vmul.f32 %v3799_v28, %v7727_v45 }
 0xe22   : > { %v3816_v34 = vsel %vm693_vm3, %v3809_v23, 0.0  ;;  %v3783_v23 = vsel %vm693_vm3, %v7725_v14, 0.0  ;;  %v3821_v14 = vrot.slane %v3815_v27, %v6238_v46 }
 0xe23   : > { %v3826_v63 = vrot.slane %v3816_v34, %v6238_v46  ;;  %v3793_v19 = vrot.slane %v3783_v23, %v6231_v37  ;;  %v3789_v34 = vmul.f32 %v3788_v20, %v7717_v13 }
 0xe24   : > { %v7806_v49 = vpop.permute.xlu0 %3872  ;;  %v3822_v43 = vmul.f32 %v3821_v14, %v7717_v13 }
 0xe25   : > { %v7780_v16 = vpop.permute.xlu1 %3853  ;;  %v3827_v26 = vmul.f32 %v3826_v63, %v7721_v55  ;;  %v3794_v52 = vmul.f32 %v3793_v19, %v7721_v55  ;;  %v3694_v63 = vadd.f32 %v3692_v8, %v3660_v17 }
 0xe27   : > { %v3828_v23 = vadd.f32 %v3827_v26, %v3822_v43  ;;  %v3795_v15 = vadd.f32 %v3794_v52, %v3789_v34  ;;  %v3728_v56 = vadd.f32 %v3726_v54, %v3694_v63 }
 0xe28   : > { %v3844_v58 = vpop.permute.xlu0 %3843 }
 0xe29   : > { %v3840_v1 = vpop.permute.xlu1 %3839  ;;  %v3801_v20 = vadd.f32 %v3800_v47, %v3795_v15  ;;  %v3834_v14 = vadd.f32 %v3833_v41, %v3828_v23 }
 0xe2a   : > { %v3848_v2 = vsel %vm693_vm3, %v3840_v1, 0.0  ;;  %v3850_v1 = vsel %vm693_vm3, %v3844_v58, 0.0 }
 0xe2b   : > { %v3859_v13 = vrot.slane %v3848_v2, %v6241_v50  ;;  %v3878_v18 = vrot.slane %v3850_v1, %v6241_v50  ;;  %v3836_v43 = vrot.slane %v3834_v14, 5 }
 0xe2c   : > { %v3917_v23 = vpop.permute.xlu0 %3916 }
 0xe2d   : > { %v3842_v48 = vpop.permute.xlu1 %3841  ;;  %v3860_v45 = vmul.f32 %v3859_v13, %v7780_v16  ;;  %v3879_v30 = vmul.f32 %v3878_v18, %v7806_v49 }
 0xe2e   : > { %v3849_v61 = vsel %vm693_vm3, %v3842_v48, 0.0  ;;  %v3803_v48 = vrot.slane %v3801_v20, 2 }
 0xe2f   : > { %v3868_v36 = vrot.slane %v3849_v61, %v6241_v50  ;;  %v3768_v61 = vsel %vm1118_vm6, %v3766_v42, %v3767_v29 }
 0xe30   : > { %v3770_v38 = vadd.f32 %v3768_v61, %v3728_v56 }
 0xe31   : > { %v3883_v27 = vpop.permute.xlu1 %3882  ;;  %v3869_v57 = vmul.f32 %v3868_v36, %v7778_v35 }
 0xe32   : > { %v3891_v39 = vsel %vm694_vm5, %v3883_v27, 0.0  ;;  %v3805_v12 = vadd.f32 %v3803_v48, %v3770_v38 }
 0xe33   : > { %v3897_v21 = vrot.slane %v3891_v39, %v6094_v4  ;;  %v3870_v33 = vadd.f32 %v3869_v57, %v3860_v45  ;;  %v3939_v39 = vpop.permute.xlu0 %3938 }
 0xe34   : > { %v3838_v58 = vadd.f32 %v3836_v43, %v3805_v12 }
 0xe35   : > { %v3885_v59 = vpop.permute.xlu1 %3884  ;;  %v3898_v34 = vmul.f32 %v3897_v21, %v7780_v16  ;;  %v3880_v47 = vadd.f32 %v3879_v30, %v3870_v33  ;;  %v4051_v30 = vrot.slane %v7694_v24, 2 }
 0xe36   : > { %v3892_v19 = vsel %vm694_vm5, %v3885_v59, 0.0 }
 0xe37   : > { %v3902_v28 = vrot.slane %v3892_v19, %v6094_v4  ;;  %v3881_v27 = vadd.f32 %v3880_v47, %v3838_v58  ;;  %v4063_v61 = vpop.permute.xlu0 %4062 }
 0xe39   : > { %v3903_v44 = vmul.f32 %v3902_v28, %v7778_v35  ;;  %v3887_v26 = vpop.permute.xlu1 %3886 }
 0xe3a   : > { %v3893_v8 = vsel %vm694_vm5, %v3887_v26, 0.0 }
 0xe3b   : > { %v3908_v17 = vrot.slane %v3893_v8, %v6094_v4  ;;  %v3904_v62 = vadd.f32 %v3903_v44, %v3898_v34  ;;  %v8698_v34 = vld [vmem:[#allocation15_spill] sm:$0xff] }
 0xe3d   : > { %v3909_v2 = vmul.f32 %v3908_v17, %v7806_v49  ;;  %v3922_v52 = vpop.permute.xlu1 %3921 }
 0xe3f   : > { %v3910_v36 = vadd.f32 %v3909_v2, %v3904_v62  ;;  %v4064_v62 = vrot.slane %v4063_v61, 2 }
 0xe41   : > { %v3912_v0 = vrot.slane %v3910_v36, 3 }
 0xe42   : > { %v3929_v54 = vpop.permute.xlu1 %3928 }
 0xe43   : > { %v3914_v15 = vadd.f32 %v3912_v0, %v3881_v27 }
 0xe45   : > { %v3919_v13 = vmul.f32 %v3917_v23, %v3914_v15 }
 0xe47   : > { %v3924_v63 = vadd.f32 %v3922_v52, %v3919_v13  ;;  %v3951_v41 = vpop.permute.xlu1 %3950 }
 0xe49   : > { %v3925_v1 = vmax.f32 %v3924_v63, 0.0 }
 0xe4b   : > { %v3934_v29 = vrot.slane %v3925_v1, %v6094_v4  ;;  %v3944_v20 = vrot.slane %v3925_v1, %v6097_v5  ;;  %v3956_v57 = vrot.slane %v3925_v1, %v6100_v6 }
 0xe4c   : > { %v3963_v59 = vpop.permute.xlu1 %3962 }
 0xe4d   : > { %v3936_v42 = vmul.f32 %v3934_v29, %v3929_v54  ;;  %v3945_v56 = vmul.f32 %v3944_v20, %v7778_v35  ;;  %v3946_v14 = vmul.f32 %v3944_v20, %v3939_v39  ;;  %v3935_v19 = vmul.f32 %v3934_v29, %v7780_v16  ;;  %v8699_v35 = vld [vmem:[#allocation16_spill] sm:$0xff]  ;;  %v7867_v54 = vpop.permute.xlu0 %4088 }
 0xe4e   : > { %v3957_v18 = vmul.f32 %v3956_v57, %v7806_v49  ;;  %v3958_v45 = vmul.f32 %v3956_v57, %v3951_v41  ;;  %v3964_v26 = vrot.slane %v3963_v59, 2 }
 0xe4f   : > { %v3948_v21 = vadd.f32 %v3946_v14, %v3936_v42  ;;  %v3947_v28 = vadd.f32 %v3945_v56, %v3935_v19 }
 0xe51   : > { %v4070_v48 = vpop.permute.xlu1 %4069  ;;  %v3959_v33 = vadd.f32 %v3957_v18, %v3947_v28  ;;  %v3960_v44 = vadd.f32 %v3958_v45, %v3948_v21  ;;  %v4119_v59 = vpop.permute.xlu0 %4118 }
 0xe52   : > { %v4071_v52 = vrot.slane %v4070_v48, 2 }
 0xe53   : > { %v3966_v8 = vadd.f32 %v3964_v26, %v3959_v33  ;;  %v3967_v38 = vadd.f32 %v3964_v26, %v3960_v44 }
 0xe55   : > { %v3968_v17 = vadd.f32 %v3966_v8, %v8698_v34  ;;  %v3969_v43 = vadd.f32 %v3967_v38, %v8699_v35  ;;  %v4144_v44 = vpop.permute.xlu0 %4143  ;;  %v4057_v34 = vld [vmem:[%s8408_s12 + $0x8] sm:$0xff] }
 0xe56   : > { %v7859_v16 = vpop.permute.xlu1 %4079 }
 0xe57   : > { %v7861_v49 = vadd.f32 %v4051_v30, %v3968_v17  ;;  %v7863_v2 = vadd.f32 %v4051_v30, %v3969_v43  ;;  %v4058_v17 = vld [vmem:[%s8408_s12 + $0x10] sm:$0xff] }
 0xe59   : > { %v4066_v12 = vmul.f32 %v4064_v62, %v7861_v49  ;;  %v4067_v47 = vmul.f32 %v4064_v62, %v7863_v2  ;;  %v4419_v3 = vrot.slane %v7861_v49, %v6238_v46 }
 0xe5b   : > { %v4099_v58 = vpop.permute.xlu1 %4098  ;;  %v4073_v36 = vadd.f32 %v4071_v52, %v4066_v12  ;;  %v4074_v27 = vadd.f32 %v4071_v52, %v4067_v47 }
 0xe5d   : > { %v4075_v24 = vmax.f32 %v4073_v36, 0.0  ;;  %v4076_v0 = vmax.f32 %v4074_v27, 0.0 }
 0xe5f   : > { %v4085_v23 = vrot.slane %v4075_v24, %v6238_v46  ;;  %v4094_v15 = vrot.slane %v4075_v24, %v6241_v50  ;;  %v4104_v13 = vrot.slane %v4076_v0, %v6094_v4  ;;  %v4114_v39 = vrot.slane %v4076_v0, %v6097_v5 }
 0xe60   : > { %v4109_v63 = vpop.permute.xlu1 %4108  ;;  %v4124_v57 = vrot.slane %v4076_v0, %v6100_v6  ;;  %v4134_v45 = vrot.slane %v4076_v0, %v6105_v9 }
 0xe61   : > { %v4086_v41 = vmul.f32 %v4085_v23, %v7859_v16  ;;  %v4095_v1 = vmul.f32 %v4094_v15, %v7867_v54  ;;  %v4105_v20 = vmul.f32 %v4104_v13, %v4099_v58  ;;  %v4115_v56 = vmul.f32 %v4114_v39, %v4109_v63  ;;  %v4059_v23 = vld [vmem:[%s8408_s12 + $0x18] sm:$0xf]  ;;  %v4482_v13 = vld [vmem:[%s8404_s8] sm:$0xff] }
 0xe62   : > { %v4125_v19 = vmul.f32 %v4124_v57, %v4119_v59  ;;  %v8700_v15 = vmov 9  }
 0xe63   : > { %v4096_v29 = vadd.f32 %v4095_v1, %v4086_v41 }
 0xe65   : > { %v4106_v42 = vadd.f32 %v4105_v20, %v4096_v29  ;;  %v4129_v14 = vpop.permute.xlu1 %4128  ;;  %v7949_v20 = vld [vmem:[%s8403_s7] sm:$0xf] }
 0xe66   : > { %v4135_v21 = vmul.f32 %v4134_v45, %v4129_v14 }
 0xe67   : > { %v4116_v18 = vadd.f32 %v4115_v56, %v4106_v42 }
 0xe69   : > { %v4126_v28 = vadd.f32 %v4125_v19, %v4116_v18 }
 0xe6a   : > { %v4139_v48 = vpop.permute.xlu1 %4138 }
 0xe6b   : > { %v4136_v33 = vadd.f32 %v4135_v21, %v4126_v28 }
 0xe6d   : > { %v4141_v26 = vadd.f32 %v4139_v48, %v4136_v33 }
 0xe6f   : > { %v4149_v61 = vpop.permute.xlu1 %4148  ;;  %v4146_v8 = vmul.f32 %v4144_v44, %v4141_v26 }
 0xe71   : > { %v4151_v38 = vadd.f32 %v4149_v61, %v4146_v8 }
 0xe73   : > { %v7877_v30 = vmax.f32 %v4151_v38, 0.0 }
 0xe75   : > { %4158 = vrot.lane.b32.xlu1 %v7877_v30, %s8591_s30 }
 0xe79   : > { %4154 = vperm.xlu1 %5632, %v7684_v53  }
 0xe7d   : > { %5634 = vset.pattern.permute.xlu1 %v8682_v7 }
 0xe7e   : > { %4257 = vperm.xlu1 %5634, %v4057_v34  }
 0xe82   : > { %5635 = vset.pattern.permute.xlu1 %v8681_v25 }
 0xe83   : > { %4341 = vperm.xlu1 %5635, %v4058_v17  }
 0xee7   : > { %v4159_v35 = vpop.permute.xlu1 %4158 }
 0xee8   : > { %v4160_v43 = vsel %vm912_vm2, %v4159_v35, %v7877_v30 }
 0xee9   : > { %4161 = vrot.lane.b32.xlu0 %v4160_v43, %s8591_s30 }
 0xeed   : > { %4248 = vperm.xlu0 %5633, %v4057_v34  }
 0xef1   : > { %5636 = vset.pattern.permute.xlu0 %v8682_v7 }
 0xef2   : > { %4350 = vperm.xlu0 %5636, %v4058_v17  }
 0xef4   : > { %v4155_v21 = vpop.permute.xlu1 %4154 }
 0xef6   : > { %5637 = vset.pattern.permute.xlu0 %v8687_v60 }
 0xef9   : > { %v7998_v28 = vpop.permute.xlu1 %4257 }
 0xefe   : > { %v8004_v44 = vpop.permute.xlu1 %4341 }
 0xf5b   : > { %v4162_v62 = vpop.permute.xlu0 %4161 }
 0xf5c   : > { %v4163_v52 = vsel %vm912_vm2, %v4162_v62, %v7877_v30 }
 0xf5d   : > { %4192 = vrot.lane.b32.xlu0 %v4163_v52, %s8678_s15  ;;  %4166 = vrot.lane.b32.xlu1 %v4163_v52, %s8677_s19  ;;  %v4189_v12 = vrot.slane %v4163_v52, 7  ;;  %v4165_v47 = vrot.slane %v4163_v52, 1  ;;  %v4237_v58 = vrot.slane %v4163_v52, 5  ;;  %v4213_v36 = vrot.slane %v4163_v52, 6 }
 0xf5e   : > { %v4282_v27 = vrot.slane %v4163_v52, 3  ;;  %v4307_v24 = vrot.slane %v4163_v52, 2  ;;  %v4283_v0 = vrot.slane %v4163_v52, 4 }
 0xf61   : > { %4360 = vrot.lane.b32.xlu0 %v4163_v52, %s8689_s5  ;;  %4190 = vrot.lane.b32.xlu1 %v4189_v12, %s8678_s15  ;;  %s8705_s15 = sld [smem:[#allocation27_spill]] }
 0xf65   : > { %4216 = vrot.lane.b32.xlu1 %v4189_v12, %s8680_s9  ;;  %4168 = vrot.lane.b32.xlu0 %v4165_v47, %s8677_s19  ;;  %s5236_s19 = scalar_lea.sflag [#allocation3], %s674_s13 }
 0xf68   : > { %v8000_v48 = vpop.permute.xlu0 %4248 }
 0xf69   : > { %4238 = vrot.lane.b32.xlu1 %v4237_v58, %s8683_s24  ;;  %4214 = vrot.lane.b32.xlu0 %v4213_v36, %s8680_s9 }
 0xf6d   : > { %4284 = vrot.lane.b32.xlu1 %v4282_v27, %s8579_s25  ;;  %4240 = vrot.lane.b32.xlu0 %v4213_v36, %s8683_s24  ;;  %v8002_v33 = vpop.permute.xlu0 %4350  ;;  %s5759_s24 = smov 15  }
 0xf71   : > { %4308 = vrot.lane.b32.xlu1 %v4307_v24, %s8686_s10  ;;  %4286 = vrot.lane.b32.xlu0 %v4283_v0, %s8579_s25 }
 0xf75   : > { %4413 = vperm.xlu1 %5635, %v4059_v23   ;;  %4310 = vrot.lane.b32.xlu0 %v4282_v27, %s8686_s10  ;;  %s8701_s10 = sld [smem:[#allocation30_spill]] }
 0xf79   : > { %5638 = vset.pattern.permute.xlu1 %v8682_v7  ;;  %4384 = vperm.xlu0 %5637, %v7684_v53  }
 0xf7a   : > { %4422 = vperm.xlu1 %5638, %v4059_v23  }
 0xf7b   : > { %v5146_v63 = vld [vmem:[%s8701_s10 + $0x78] sm:$0xff]  ;;  %v5145_v41 = vld [vmem:[%s8701_s10 + $0x70] sm:$0xff]  ;;  %v5144_v1 = vld [vmem:[%s8701_s10 + $0x68] sm:$0xff] }
 0xf7c   : > { %5167 = vmatprep.subr.mxu1 %v5146_v63  ;;  %v5143_v39 = vld [vmem:[%s8701_s10 + $0x60] sm:$0xff]  ;;  %v5142_v29 = vld [vmem:[%s8701_s10 + $0x58] sm:$0xff]  ;;  %v5141_v57 = vld [vmem:[%s8701_s10 + $0x50] sm:$0xff] }
 0xf7d   : > { %5639 = vset.pattern.permute.xlu0 %v8688_v10  ;;  %5168 = vmatpush1.msra.mxu1 %v5145_v41  ;;  %v5140_v59 = vld [vmem:[%s8701_s10 + $0x48] sm:$0xff]  ;;  %v5139_v42 = vld [vmem:[%s8701_s10 + $0x40] sm:$0xff]  ;;  %v5137_v56 = vld [vmem:[%s8701_s10 + $0x30] sm:$0xff] }
 0xf7e   : > { %4331 = vrot.lane.b32.xlu1 %v4165_v47, %s8594_s0  ;;  %4389 = vperm.xlu0 %5639, %v7684_v53   ;;  %v5136_v14 = vld [vmem:[%s8701_s10 + $0x28] sm:$0xff]  ;;  %v5134_v19 = vld [vmem:[%s8701_s10 + $0x18] sm:$0xff]  ;;  %v5133_v18 = vld [vmem:[%s8701_s10 + $0x10] sm:$0xff] }
 0xf7f   : > { %5640 = vset.pattern.permute.xlu1 %v8685_v32  ;;  %5169 = vmatprep.subr.mxu1 %v5144_v1  ;;  %v5131_v45 = vld [vmem:[%s8701_s10] sm:$0xff] }
 0xf80   : > { %5170 = vmatpush1.msra.mxu1 %v5143_v39 }
 0xf81   : > { %5171 = vmatprep.subr.mxu1 %v5142_v29 }
 0xf82   : > { %4333 = vrot.lane.b32.xlu1 %v4307_v24, %s8594_s0  ;;  %5642 = vset.pattern.permute.xlu0 %v8690_v31  ;;  %s5762_s0 = smov [#allocation2]  }
 0xf83   : > { %4452 = vperm.xlu0 %5642, %v4059_v23   ;;  %5172 = vmatpush1.msra.mxu1 %v5141_v57 }
 0xf84   : > { %5173 = vmatprep.subr.mxu1 %v5140_v59 }
 0xf85   : > { %5174 = vmatpush1.msra.mxu1 %v5139_v42 }
 0xf86   : > { %4362 = vrot.lane.b32.xlu1 %v4165_v47, %s8689_s5 }
 0xf87   : > { %5645 = vset.pattern.permute.xlu0 %v8700_v15 }
 0xf88   : > { %4476 = vperm.xlu0 %5645, %v7684_v53  }
 0xf8a   : > { %4432 = vperm.xlu1 %5640, %v4059_v23  }
 0xf8c   : > { %5648 = vset.pattern.permute.xlu0 %v8681_v25 }
 0xf8d   : > { %4513 = vperm.xlu0 %5648, %v4482_v13  }
 0xf8e   : > { %5641 = vset.pattern.permute.xlu1 %v8691_v11 }
 0xf8f   : > { %4442 = vperm.xlu1 %5641, %v4059_v23  }
 0xf91   : > { %5650 = vset.pattern.permute.xlu0 %v8691_v11 }
 0xf92   : > { %4590 = vperm.xlu0 %5650, %v4482_v13  }
 0xf93   : > { %5643 = vset.pattern.permute.xlu1 %v8684_v51 }
 0xf94   : > { %4462 = vperm.xlu1 %5643, %v4059_v23  }
 0xf96   : > { %5652 = vset.pattern.permute.xlu0 %v8690_v31  ;;  %v5138_v31 = vld [vmem:[%s8701_s10 + $0x38] sm:$0xff] }
 0xf97   : > { %4628 = vperm.xlu0 %5652, %v7949_v20   ;;  %5175 = vmatprep.subr.mxu1 %v5138_v31 }
 0xf98   : > { %5644 = vset.pattern.permute.xlu1 %v8692_v40  ;;  %5176 = vmatpush1.msra.mxu1 %v5137_v56 }
 0xf99   : > { %4406 = vperm.xlu1 %5644, %v7684_v53   ;;  %5177 = vmatprep.subr.mxu1 %v5136_v14  ;;  %v5135_v53 = vld [vmem:[%s8701_s10 + $0x20] sm:$0xff] }
 0xf9a   : > { %5178 = vmatpush1.msra.mxu1 %v5135_v53 }
 0xf9b   : > { %5653 = vset.pattern.permute.xlu0 %v8684_v51  ;;  %5179 = vmatprep.subr.mxu1 %v5134_v19  ;;  %v5132_v51 = vld [vmem:[%s8701_s10 + $0x8] sm:$0xff] }
 0xf9c   : > { %5180 = vmatpush1.msra.mxu1 %v5133_v18 }
 0xf9d   : > { %5646 = vset.pattern.permute.xlu1 %v8681_v25  ;;  %5181 = vmatprep.subr.mxu1 %v5132_v51 }
 0xf9e   : > { %4487 = vperm.xlu1 %5646, %v7949_v20   ;;  %5182 = vmatpush1.msra.mxu1 %v5131_v45 }
 0xfa2   : > { %5647 = vset.pattern.permute.xlu1 %v8682_v7 }
 0xfa3   : > { %4499 = vperm.xlu1 %5647, %v7949_v20  }
 0xfa7   : > { %4538 = vperm.xlu1 %5647, %v4482_v13  }
 0xfab   : > { %5649 = vset.pattern.permute.xlu1 %v8685_v32 }
 0xfac   : > { %4564 = vperm.xlu1 %5649, %v4482_v13  }
 0xfb0   : > { %4616 = vperm.xlu1 %5649, %v7949_v20  }
 0xfb4   : > { %5651 = vset.pattern.permute.xlu1 %v8691_v11 }
 0xfb5   : > { %4622 = vperm.xlu1 %5651, %v7949_v20  }
 0xfb9   : > { %5655 = vset.pattern.permute.xlu1 %v8682_v7 }
 0xfcf   : > { %v4193_v26 = vpop.permute.xlu0 %4192  ;;  %v4167_v32 = vpop.permute.xlu1 %4166 }
 0xfd0   : > { %v4172_v43 = vsel %vm693_vm3, %v4167_v32, 0.0  ;;  %v4197_v27 = vsel %vm693_vm3, %v4193_v26, 0.0 }
 0xfd1   : > { %v4177_v52 = vrot.slane %v4172_v43, %v6094_v4  ;;  %v4206_v13 = vrot.slane %v4197_v27, %v6097_v5 }
 0xfd3   : > { %v8006_v61 = vpop.permute.xlu0 %4360  ;;  %v4191_v8 = vpop.permute.xlu1 %4190  ;;  %v4178_v0 = vmul.f32 %v4177_v52, %v7859_v16  ;;  %v4207_v59 = vmul.f32 %v4206_v13, %v7867_v54 }
 0xfd4   : > { %v4196_v47 = vsel %vm693_vm3, %v4191_v8, 0.0 }
 0xfd5   : > { %v4201_v23 = vrot.slane %v4196_v47, %v6097_v5 }
 0xfd7   : > { %v4169_v38 = vpop.permute.xlu0 %4168  ;;  %v4217_v11 = vpop.permute.xlu1 %4216  ;;  %v4202_v29 = vmul.f32 %v4201_v23, %v7859_v16 }
 0xfd8   : > { %v4173_v17 = vsel %vm693_vm3, %v4169_v38, 0.0  ;;  %v4221_v15 = vsel %vm693_vm3, %v4217_v11, 0.0 }
 0xfd9   : > { %v4182_v62 = vrot.slane %v4173_v17, %v6094_v4  ;;  %v4230_v57 = vrot.slane %v4221_v15, %v6100_v6  ;;  %v4208_v53 = vadd.f32 %v4207_v59, %v4202_v29 }
 0xfdb   : > { %v4215_v34 = vpop.permute.xlu0 %4214  ;;  %v4239_v35 = vpop.permute.xlu1 %4238  ;;  %v4183_v36 = vmul.f32 %v4182_v62, %v7867_v54  ;;  %v4231_v19 = vmul.f32 %v4230_v57, %v7867_v54  ;;  %v4210_v11 = vrot.slane %v4208_v53, 4 }
 0xfdc   : > { %v4220_v24 = vsel %vm693_vm3, %v4215_v34, 0.0  ;;  %v4244_v51 = vsel %vm693_vm3, %v4239_v35, 0.0  ;;  %v4270_v35 = vrot.slane %v7877_v30, %v6094_v4 }
 0xfdd   : > { %v4184_v63 = vadd.f32 %v4183_v36, %v4178_v0  ;;  %v4225_v41 = vrot.slane %v4220_v24, %v6100_v6  ;;  %v4254_v54 = vrot.slane %v4244_v51, %v6105_v9  ;;  %v4428_v51 = vrot.slane %v7861_v49, %v6241_v50 }
 0xfde   : > { %v4271_v36 = vmul.f32 %v4270_v35, %v8000_v48 }
 0xfdf   : > { %v4241_v12 = vpop.permute.xlu0 %4240  ;;  %v4285_v58 = vpop.permute.xlu1 %4284  ;;  %v4186_v42 = vrot.slane %v4184_v63, 2  ;;  %v4226_v31 = vmul.f32 %v4225_v41, %v7859_v16  ;;  %v4255_v27 = vmul.f32 %v4254_v54, %v8000_v48 }
 0xfe0   : > { %v4245_v56 = vsel %vm693_vm3, %v4241_v12, 0.0  ;;  %v4290_v16 = vsel %vm693_vm3, %v4285_v58, 0.0  ;;  %v4275_v58 = vrot.slane %v7877_v30, %v6097_v5 }
 0xfe1   : > { %v4188_v26 = vadd.f32 %v4186_v42, %v4155_v21  ;;  %v4232_v32 = vadd.f32 %v4231_v19, %v4226_v31  ;;  %v4263_v8 = vrot.slane %v4245_v56, %v6105_v9  ;;  %v4295_v21 = vrot.slane %v4290_v16, %v6231_v37 }
 0xfe2   : > { %v4276_v15 = vmul.f32 %v4275_v58, %v7998_v28  ;;  %v4366_v42 = vsel %vm694_vm5, %v8006_v61, 0.0 }
 0xfe3   : > { %v4287_v1 = vpop.permute.xlu0 %4286  ;;  %v4309_v39 = vpop.permute.xlu1 %4308  ;;  %v4212_v62 = vadd.f32 %v4210_v11, %v4188_v26  ;;  %v4234_v52 = vrot.slane %v4232_v32, 6  ;;  %v4264_v12 = vmul.f32 %v4263_v8, %v7998_v28  ;;  %v4296_v41 = vmul.f32 %v4295_v21, %v8000_v48 }
 0xfe4   : > { %v4291_v45 = vsel %vm693_vm3, %v4287_v1, 0.0  ;;  %v4314_v43 = vsel %vm693_vm3, %v4309_v39, 0.0  ;;  %v4277_v39 = vadd.f32 %v4276_v15, %v4271_v36 }
 0xfe5   : > { %v4300_v34 = vrot.slane %v4291_v45, %v6231_v37  ;;  %v4319_v0 = vrot.slane %v4314_v43, %v6238_v46  ;;  %v4236_v13 = vadd.f32 %v4234_v52, %v4212_v62  ;;  %v4265_v63 = vadd.f32 %v4264_v12, %v4255_v27 }
 0xfe6   : > { %v4279_v45 = vrot.slane %v4277_v39, 2  ;;  %v4438_v43 = vrot.slane %v7863_v2, %v6094_v4 }
 0xfe7   : > { %v4311_v18 = vpop.permute.xlu0 %4310  ;;  %v4301_v24 = vmul.f32 %v4300_v34, %v7998_v28  ;;  %v4320_v57 = vmul.f32 %v4319_v0, %v8000_v48  ;;  %v4266_v53 = vadd.f32 %v4265_v63, %v4236_v13  ;;  %v4371_v48 = vrot.slane %v4366_v42, %v6094_v4 }
 0xfe8   : > { %v4315_v38 = vsel %vm693_vm3, %v4311_v18, 0.0  ;;  %v4458_v13 = vrot.slane %v7863_v2, %v6100_v6 }
 0xfe9   : > { %v4324_v47 = vrot.slane %v4315_v38, %v6238_v46  ;;  %v4302_v29 = vadd.f32 %v4301_v24, %v4296_v41  ;;  %v4281_v38 = vadd.f32 %v4279_v45, %v4266_v53  ;;  %v4372_v62 = vmul.f32 %v4371_v48, %v8004_v44 }
 0xfeb   : > { %v4325_v1 = vmul.f32 %v4324_v47, %v7998_v28  ;;  %v4304_v26 = vrot.slane %v4302_v29, 4  ;;  %v4468_v29 = vrot.slane %v7863_v2, %v6105_v9 }
 0xfed   : > { %v4326_v19 = vadd.f32 %v4325_v1, %v4320_v57  ;;  %v4306_v52 = vadd.f32 %v4304_v26, %v4281_v38 }
 0xfef   : > { %v4328_v11 = vrot.slane %v4326_v19, 6 }
 0xff0   : > { %v4414_v14 = vpop.permute.xlu1 %4413 }
 0xff1   : > { %v4420_v35 = vmul.f32 %v4419_v3, %v4414_v14  ;;  %v4330_v58 = vadd.f32 %v4328_v11, %v4306_v52  ;;  %v4448_v14 = vrot.slane %v7863_v2, %v6097_v5  ;;  %v8097_v52 = vld [vmem:[%s5931_s1] sm:$0xff]  ;;  %s5758_s1 = smov 17  }
 0xff4   : > { %v4385_v31 = vpop.permute.xlu0 %4384 }
 0xff5   : > { %v4423_v17 = vpop.permute.xlu1 %4422 }
 0xff6   : > { %v4429_v8 = vmul.f32 %v4428_v51, %v4423_v17 }
 0xff8   : > { %v4430_v55 = vadd.f32 %v4429_v8, %v4420_v35  ;;  %v8702_v8 = vld [vmem:[#allocation12_spill] sm:$0xff] }
 0xff9   : > { %v4332_v23 = vpop.permute.xlu1 %4331  ;;  %v4390_v21 = vpop.permute.xlu0 %4389 }
 0xffa   : > { %v4337_v30 = vsel %vm693_vm3, %v4332_v23, 0.0 }
 0xffb   : > { %v4347_v28 = vrot.slane %v4337_v30, %v6241_v50 }
 0xffd   : > { %v4334_v59 = vpop.permute.xlu1 %4333  ;;  %v4348_v54 = vmul.f32 %v4347_v28, %v8004_v44 }
 0xffe   : > { %v4338_v56 = vsel %vm693_vm3, %v4334_v59, 0.0  ;;  %v4453_v23 = vpop.permute.xlu0 %4452 }
 0xfff   : > { %v4356_v18 = vrot.slane %v4338_v56, %v6241_v50  ;;  %v4459_v1 = vmul.f32 %v4458_v13, %v4453_v23  ;;  %v5757_v56 = vmov 839922192  }
0x1000   : > { %v4490_v53 = vunpack.c.l.s4 %v5757_v56 }
0x1001   : > { %v4357_v32 = vmul.f32 %v4356_v18, %v8002_v33  ;;  %v4363_v61 = vpop.permute.xlu1 %4362 }
0x1002   : > { %v4367_v16 = vsel %vm694_vm5, %v4363_v61, 0.0  ;;  %v4491_v48 = vunpack.c.0.s8 %v4490_v53 }
0x1003   : > { %v4376_v34 = vrot.slane %v4367_v16, %v6094_v4  ;;  %v4358_v12 = vadd.f32 %v4357_v32, %v4348_v54  ;;  %v4477_v2 = vpop.permute.xlu0 %4476 }
0x1004   : > { %v4494_v16 = vsub.s32 %v4491_v48, %v8702_v8 }
0x1005   : > { %v4377_v49 = vmul.f32 %v4376_v34, %v8002_v33  ;;  %v4433_v17 = vpop.permute.xlu1 %4432  ;;  %v4359_v24 = vadd.f32 %v4358_v12, %v4330_v58  ;;  %v4478_v34 = vrot.slane %v4477_v2, 4 }
0x1006   : > { %v4439_v47 = vmul.f32 %v4438_v43, %v4433_v17 }
0x1007   : > { %v4378_v36 = vadd.f32 %v4377_v49, %v4372_v62 }
0x1008   : > { %v4440_v27 = vadd.f32 %v4439_v47, %v4430_v55  ;;  %v8103_v47 = vpop.permute.xlu0 %4513 }
0x1009   : > { %v4380_v0 = vrot.slane %v4378_v36, 2 }
0x100a   : > { %v4443_v15 = vpop.permute.xlu1 %4442 }
0x100b   : > { %v4382_v63 = vadd.f32 %v4380_v0, %v4359_v24  ;;  %v4449_v41 = vmul.f32 %v4448_v14, %v4443_v15 }
0x100d   : > { %v4387_v30 = vmul.f32 %v4385_v31, %v4382_v63  ;;  %v4450_v39 = vadd.f32 %v4449_v41, %v4440_v27 }
0x100f   : > { %v4460_v57 = vadd.f32 %v4459_v1, %v4450_v39  ;;  %v4463_v59 = vpop.permute.xlu1 %4462  ;;  %v4392_v42 = vadd.f32 %v4390_v21, %v4387_v30 }
0x1010   : > { %v4469_v19 = vmul.f32 %v4468_v29, %v4463_v59 }
0x1011   : > { %v4393_v28 = vmax.f32 %v4392_v42, 0.0 }
0x1012   : > { %v4470_v18 = vadd.f32 %v4469_v19, %v4460_v57  ;;  %v4591_v19 = vpop.permute.xlu0 %4590 }
0x1013   : > { %v4397_v51 = vrot.slane %v4393_v28, %v6094_v4  ;;  %v4402_v45 = vrot.slane %v4393_v28, %v6097_v5 }
0x1014   : > { %v4407_v26 = vpop.permute.xlu1 %4406  ;;  %v4472_v38 = vrot.slane %v4470_v18, 4 }
0x1015   : > { %v4398_v31 = vmul.f32 %v4397_v51, %v8004_v44  ;;  %v4403_v32 = vmul.f32 %v4402_v45, %v8002_v33  ;;  %v4408_v3 = vrot.slane %v4407_v26, 4 }
0x1017   : > { %v4404_v61 = vadd.f32 %v4403_v32, %v4398_v31 }
0x1019   : > { %v4410_v11 = vadd.f32 %v4408_v3, %v4404_v61  ;;  %v4488_v54 = vpop.permute.xlu1 %4487 }
0x101a   : > { %v4495_v35 = vrot.slane %v4488_v54, %v4494_v16 }
0x101b   : > { %v4474_v21 = vadd.f32 %v4472_v38, %v4410_v11  ;;  %v4629_v11 = vpop.permute.xlu0 %4628 }
0x101c   : > { %v4497_v12 = vmul.f32 %v8097_v52, %v4495_v35 }
0x101d   : > { %v4480_v43 = vadd.f32 %v4478_v34, %v4474_v21 }
0x101e   : > { %v4500_v62 = vpop.permute.xlu1 %4499 }
0x101f   : > { %v5148_v44 = vrot.slane %v4480_v43, 4  ;;  %v4507_v49 = vrot.slane %v4500_v62, %v4494_v16 }
0x1021   : > { %v4509_v33 = vadd.f32 %v4507_v49, %v4497_v12  ;;  %5318 = vmatmul.mubr.msk.f32.vlgmr.msra.gmra.mxu1 %vm1445_vm8, %v5148_v44  ;;  %v4483_v12 = vld [vmem:[%s8404_s8 + $0x8] sm:$0xff]  ;;  %v8704_v44 = vld [vmem:[#allocation11_spill] sm:$0xff] }
0x1022   : > { %v8101_v17 = vpop.permute.xlu1 %4538  ;;  %vm4644_vm13 = vcmp.lt.s32.totalorder %v8704_v44, 17  ;;  %vm4697_vm14 = vcmp.lt.s32.totalorder %v8704_v44, 16  ;;  %vm4746_vm2 = vcmp.lt.s32.totalorder %v8704_v44, 15  ;;  %vm4797_vm4 = vcmp.lt.s32.totalorder %v8704_v44, 1 }
0x1023   : > { %v4510_v55 = vmax.f32 %v4509_v33, 0.0  ;;  %vm4931_vm5 = vcmp.lt.s32.totalorder %v8704_v44, 113 }
0x1025   : > { %v4520_v58 = vrot.slane %v4510_v55, %v6094_v4  ;;  %v4524_v36 = vrot.slane %v4510_v55, %v8644_v22  ;;  %v4544_v27 = vrot.slane %v4510_v55, %v6097_v5  ;;  %v4548_v24 = vrot.slane %v4510_v55, %v6231_v37 }
0x1026   : > { %v4570_v0 = vrot.slane %v4510_v55, %v6100_v6  ;;  %v4574_v14 = vrot.slane %v4510_v55, %v6238_v46  ;;  %v4596_v23 = vrot.slane %v4510_v55, %v6105_v9  ;;  %v4600_v15 = vrot.slane %v4510_v55, %v6241_v50 }
0x1027   : > { %v4530_v13 = vrot.slane %v4520_v58, %v6094_v4  ;;  %v4534_v63 = vrot.slane %v4524_v36, %v6094_v4  ;;  %v4554_v41 = vrot.slane %v4544_v27, %v6097_v5  ;;  %v4558_v22 = vrot.slane %v4548_v24, %v6097_v5  ;;  %v4565_v1 = vpop.permute.xlu1 %4564 }
0x1028   : > { %v4580_v30 = vrot.slane %v4570_v0, %v6100_v6  ;;  %v4584_v39 = vrot.slane %v4574_v14, %v6100_v6  ;;  %v4606_v29 = vrot.slane %v4596_v23, %v6105_v9  ;;  %v4610_v57 = vrot.slane %v4600_v15, %v6105_v9 }
0x1029   : > { %v4535_v59 = vmul.f32 %v4530_v13, %v8103_v47  ;;  %v4536_v42 = vmul.f32 %v4534_v63, %v8103_v47  ;;  %v4559_v56 = vmul.f32 %v4554_v41, %v8101_v17  ;;  %v4560_v53 = vmul.f32 %v4558_v22, %v8101_v17 }
0x102a   : > { %v4585_v51 = vmul.f32 %v4580_v30, %v4565_v1  ;;  %v4586_v45 = vmul.f32 %v4584_v39, %v4565_v1  ;;  %v4611_v32 = vmul.f32 %v4606_v29, %v4591_v19  ;;  %v4612_v2 = vmul.f32 %v4610_v57, %v4591_v19 }
0x102b   : > { %v4561_v28 = vadd.f32 %v4559_v56, %v4535_v59  ;;  %v4562_v18 = vadd.f32 %v4560_v53, %v4536_v42  ;;  %v4617_v48 = vpop.permute.xlu1 %4616 }
0x102d   : > { %v4587_v26 = vadd.f32 %v4585_v51, %v4561_v28  ;;  %v4588_v31 = vadd.f32 %v4586_v45, %v4562_v18 }
0x102f   : > { %v4613_v61 = vadd.f32 %v4611_v32, %v4587_v26  ;;  %v4614_v3 = vadd.f32 %v4612_v2, %v4588_v31 }
0x1030   : > { %v4623_v8 = vpop.permute.xlu1 %4622 }
0x1031   : > { %v4619_v16 = vadd.f32 %v4617_v48, %v4613_v61  ;;  %v4620_v38 = vadd.f32 %v4617_v48, %v4614_v3 }
0x1033   : > { %v4625_v54 = vmul.f32 %v4623_v8, %v4619_v16  ;;  %v4626_v34 = vmul.f32 %v4623_v8, %v4620_v38 }
0x1035   : > { %v4631_v35 = vadd.f32 %v4629_v11, %v4625_v54  ;;  %v4632_v21 = vadd.f32 %v4629_v11, %v4626_v34 }
0x1037   : > { %v8125_v43 = vmax.f32 %v4631_v35, 0.0  ;;  %v8130_v62 = vmax.f32 %v4632_v21, 0.0 }
0x1039   : > { %4693 = vrot.lane.b32.xlu0 %v8125_v43, %s8617_s29  ;;  %4640 = vrot.lane.b32.xlu1 %v8125_v43, %s5758_s1 }
0x103d   : > { %4742 = vrot.lane.b32.xlu0 %v8125_v43, %s5759_s24  ;;  %4642 = vrot.lane.b32.xlu1 %v8130_v62, %s5758_s1  ;;  %s5669_s1 = sshll.u32 %s5762_s0, 4  ;;  %s5670_s1 = int_to_ptr.vmem [resolvable:$false] %s5669_s1 }
0x1041   : > { %4636 = vperm.xlu0 %5653, %v7949_v20   ;;  %4695 = vrot.lane.b32.xlu1 %v8130_v62, %s8617_s29  ;;  %s8703_s29 = smov 112  }
0x1045   : > { %5654 = vset.pattern.permute.xlu0 %v8681_v25  ;;  %4744 = vrot.lane.b32.xlu1 %v8130_v62, %s5759_s24 }
0x1046   : > { %4816 = vperm.xlu0 %5654, %v4483_v12  }
0x1049   : > { %4793 = vrot.lane.b32.xlu1 %v8125_v43, %s5760_s2 }
0x104a   : > { %4879 = vrot.lane.b32.xlu0 %v8130_v62, %s8579_s25 }
0x104b   : > { %5657 = vset.pattern.permute.xlu0 %v8682_v7  ;;  %v4484_v7 = vld [vmem:[%s8404_s8 + $0x10] sm:$0xff] }
0x104d   : > { %4795 = vrot.lane.b32.xlu1 %v8130_v62, %s5760_s2  ;;  %s5313_s2 = sshll.u32 %s674_s13, 3 }
0x104e   : > { %4929 = vrot.lane.b32.xlu0 %v8130_v62, %s8628_s21 }
0x1051   : > { %4830 = vperm.xlu1 %5655, %v4483_v12  }
0x1052   : > { %4980 = vrot.lane.b32.xlu0 %v8130_v62, %s8703_s29 }
0x1055   : > { %4877 = vrot.lane.b32.xlu1 %v8125_v43, %s8579_s25 }
0x1056   : > { %5033 = vrot.lane.b32.xlu0 %v8130_v62, %s5761_s16  ;;  %5656 = vset.pattern.permute.xlu1 %v8681_v25 }
0x1059   : > { %4927 = vrot.lane.b32.xlu1 %v8125_v43, %s8628_s21 }
0x105a   : > { %5014 = vperm.xlu0 %5657, %v4484_v7  }
0x105d   : > { %4978 = vrot.lane.b32.xlu1 %v8125_v43, %s8703_s29  ;;  %s5325_s29 = sshll.u32 %s5899_s4, 7  ;;  %s5671_s4 = scalar_lea.vmem %s5670_s1, 256 }
0x105e   : > { %5660 = vset.pattern.permute.xlu0 %v8692_v40  ;;  %v8173_v40 = vld [vmem:[%s8705_s15 + $0x8] sm:$0xff]  ;;  %s5248_s21 = scalar_lea.hbm %s8418_s22, %s5325_s29 }
0x105f   : > { %5121 = vperm.xlu0 %5660, %v7949_v20   ;;  %vm688_vm15 = vcmp.ne.f32.partialorder %v8173_v40, 0.0 }
0x1061   : > { %5031 = vrot.lane.b32.xlu1 %v8125_v43, %s5761_s16  ;;  %s676_s16 = scalar_lea.vmem [#allocation2], %s5313_s2 }
0x1062   : > { %s5250_s3 = sshll.u32 %s676_s16, 4  ;;  %s5251_s3 = int_to_ptr.vmem [resolvable:$true] %s5250_s3 }
0x1063   : > { %s5665_s9 = scalar_lea.vmem %s5251_s3, 128  ;;  %p5672_p0 = scmp.lt.s32.totalorder %s5251_s3, %s5670_s1 }
0x1064   : > { %p5666_p11 = scmp.ne.s32.totalorder %s5251_s3, %s5665_s9  ;;  %p5673_p1 = scmp.lt.s32.totalorder %s5671_s4, %s5665_s9 }
0x1065   : > { %5000 = vperm.xlu1 %5656, %v4484_v7  }
0x1066   : > { %p5667_p12 = pnand %p5666_p11, %p5916_p5  ;;  %p5674_p2 = por %p5673_p1, %p5672_p0 }
0x1068   : > { %p5668_p13 = pneg %p5667_p12 }
0x1069   : > { %5658 = vset.pattern.permute.xlu1 %v8687_v60  ;;  %v8179_v60 = vld [vmem:[%s8705_s15] sm:$0xff] }
0x106a   : > { %5085 = vperm.xlu1 %5658, %v7949_v20   ;;  %vm687_vm3 = vcmp.ne.f32.partialorder %v8179_v60, 0.0  ;;  %p5675_p3 = pnand %p5674_p2, %p5668_p13 }
0x106e   : > { %5659 = vset.pattern.permute.xlu1 %v8688_v10 }
0x106f   : > { %5091 = vperm.xlu1 %5659, %v7949_v20  }
0x10ab   : > { %v4641_v25 = vpop.permute.xlu1 %4640  ;;  %v4694_v58 = vpop.permute.xlu0 %4693 }
0x10af   : > { %v4643_v49 = vpop.permute.xlu1 %4642  ;;  %v4743_v23 = vpop.permute.xlu0 %4742 }
0x10b0   : > { %v4645_v33 = vsel %vm4644_vm13, %v4641_v25, %v4643_v49  ;;  %v4646_v55 = vsel %vm4644_vm13, %v4643_v49, %v4641_v25 }
0x10b1   : > { %v4654_v36 = vrot.slane %v4645_v33, 1  ;;  %v4653_v10 = vrot.slane %v4646_v55, 1  ;;  %v4660_v0 = vsel %vm688_vm15, %v4645_v33, 0.0  ;;  %v4659_v30 = vsel %vm687_vm3, %v4646_v55, 0.0 }
0x10b2   : > { %v4670_v39 = vrot.slane %v4660_v0, %v6094_v4  ;;  %v4666_v51 = vrot.slane %v4659_v30, %v6094_v4 }
0x10b3   : > { %v4696_v20 = vpop.permute.xlu1 %4695  ;;  %v4662_v14 = vsel %vm688_vm15, %v4654_v36, 0.0  ;;  %v4661_v15 = vsel %vm687_vm3, %v4653_v10, 0.0 }
0x10b4   : > { %v4698_v27 = vsel %vm4697_vm14, %v4694_v58, %v4696_v20  ;;  %v4699_v24 = vsel %vm4697_vm14, %v4696_v20, %v4694_v58  ;;  %v4680_v29 = vrot.slane %v4662_v14, %v6094_v4  ;;  %v4676_v57 = vrot.slane %v4661_v15, %v6094_v4 }
0x10b5   : > { %v4703_v13 = vrot.slane %v4698_v27, 7  ;;  %v4702_v41 = vrot.slane %v4699_v24, 7  ;;  %v4711_v53 = vsel %vm688_vm15, %v4698_v27, 0.0  ;;  %v4672_v26 = vmul.f32 %v4670_v39, %v8103_v47 }
0x10b6   : > { %v4682_v32 = vmul.f32 %v4680_v29, %v8101_v17  ;;  %v4710_v2 = vsel %vm687_vm3, %v4699_v24, 0.0  ;;  %v4729_v3 = vrot.slane %v4711_v53, %v6097_v5  ;;  %v4681_v8 = vmul.f32 %v4676_v57, %v8101_v17 }
0x10b7   : > { %v4745_v63 = vpop.permute.xlu1 %4744  ;;  %v4709_v56 = vsel %vm688_vm15, %v4703_v13, 0.0  ;;  %v4708_v45 = vsel %vm687_vm3, %v4702_v41, 0.0  ;;  %v4671_v35 = vmul.f32 %v4666_v51, %v8103_v47  ;;  %v4725_v7 = vrot.slane %v4710_v2, %v6097_v5 }
0x10b8   : > { %v4747_v22 = vsel %vm4746_vm2, %v4743_v23, %v4745_v63  ;;  %v4748_v1 = vsel %vm4746_vm2, %v4745_v63, %v4743_v23  ;;  %v4719_v61 = vrot.slane %v4709_v56, %v6097_v5  ;;  %v4715_v16 = vrot.slane %v4708_v45, %v6097_v5 }
0x10b9   : > { %v4752_v59 = vrot.slane %v4747_v22, 6  ;;  %v4754_v42 = vrot.slane %v4747_v22, 7  ;;  %v4751_v19 = vrot.slane %v4748_v1, 6  ;;  %v4753_v28 = vrot.slane %v4748_v1, 7 }
0x10ba   : > { %v4684_v25 = vadd.f32 %v4682_v32, %v4672_v26  ;;  %v4721_v55 = vmul.f32 %v4719_v61, %v8103_v47  ;;  %v4720_v20 = vmul.f32 %v4715_v16, %v8103_v47  ;;  %v4731_v27 = vmul.f32 %v4729_v3, %v8101_v17 }
0x10bb   : > { %v4794_v18 = vpop.permute.xlu1 %4793  ;;  %v4760_v48 = vsel %vm688_vm15, %v4752_v59, 0.0  ;;  %v4762_v31 = vsel %vm688_vm15, %v4754_v42, 0.0  ;;  %v4759_v38 = vsel %vm687_vm3, %v4751_v19, 0.0  ;;  %v4761_v11 = vsel %vm687_vm3, %v4753_v28, 0.0 }
0x10bc   : > { %v4770_v54 = vrot.slane %v4760_v48, %v6100_v6  ;;  %v4780_v21 = vrot.slane %v4762_v31, %v6100_v6  ;;  %v4637_v12 = vpop.permute.xlu0 %4636  ;;  %v4766_v58 = vrot.slane %v4759_v38, %v6100_v6  ;;  %v4776_v36 = vrot.slane %v4761_v11, %v6100_v6 }
0x10bd   : > { %v4683_v0 = vadd.f32 %v4681_v8, %v4671_v35  ;;  %v4730_v63 = vmul.f32 %v4725_v7, %v8101_v17  ;;  %v4688_v41 = vrot.slane %v4684_v25, 2  ;;  %v4733_v1 = vadd.f32 %v4731_v27, %v4721_v55 }
0x10be   : > { %v4772_v24 = vmul.f32 %v4770_v54, %v8103_v47  ;;  %v4782_v14 = vmul.f32 %v4780_v21, %v8101_v17  ;;  %v4771_v22 = vmul.f32 %v4766_v58, %v8103_v47  ;;  %v4781_v6 = vmul.f32 %v4776_v36, %v8101_v17 }
0x10bf   : > { %v4796_v34 = vpop.permute.xlu1 %4795  ;;  %v4687_v29 = vrot.slane %v4683_v0, 2  ;;  %v4732_v57 = vadd.f32 %v4730_v63, %v4720_v20  ;;  %v4854_v53 = vrot.slane %v8130_v62, %v6094_v4  ;;  %v4692_v19 = vadd.f32 %v4688_v41, %v4637_v12 }
0x10c0   : > { %v4798_v49 = vsel %vm4797_vm4, %v4794_v18, %v4796_v34  ;;  %v4799_v33 = vsel %vm4797_vm4, %v4796_v34, %v4794_v18  ;;  %v4784_v59 = vadd.f32 %v4782_v14, %v4772_v24  ;;  %v4737_v28 = vrot.slane %v4733_v1, 4 }
0x10c1   : > { %v4803_v10 = vrot.slane %v4798_v49, 5  ;;  %v4802_v23 = vrot.slane %v4799_v33, 5  ;;  %v4804_v15 = vrot.slane %v4799_v33, 6  ;;  %v4805_v13 = vrot.slane %v4798_v49, 6  ;;  %v8239_v39 = vpop.permute.xlu0 %4816 }
0x10c2   : > { %v4783_v18 = vadd.f32 %v4781_v6, %v4771_v22  ;;  %v4864_v51 = vrot.slane %v8130_v62, %v6097_v5  ;;  %v4860_v31 = vrot.slane %v8125_v43, %v6097_v5  ;;  %v4691_v32 = vadd.f32 %v4687_v29, %v4637_v12 }
0x10c3   : > { %v4811_v30 = vsel %vm688_vm15, %v4803_v10, 0.0  ;;  %v4810_v42 = vsel %vm687_vm3, %v4802_v23, 0.0  ;;  %v4812_v56 = vsel %vm687_vm3, %v4804_v15, 0.0  ;;  %v4813_v47 = vsel %vm688_vm15, %v4805_v13, 0.0  ;;  %v8277_v15 = vld [vmem:[%s8705_s15 + $0x10] sm:$0x1] }
0x10c4   : > { %v4826_v17 = vrot.slane %v4811_v30, %v6105_v9  ;;  %v4822_v45 = vrot.slane %v4810_v42, %v6105_v9  ;;  %v4836_v48 = vrot.slane %v4812_v56, %v6105_v9  ;;  %v4840_v26 = vrot.slane %v4813_v47, %v6105_v9 }
0x10c5   : > { %v4736_v2 = vrot.slane %v4732_v57, 4  ;;  %v4788_v61 = vrot.slane %v4784_v59, 6  ;;  %v4880_v3 = vpop.permute.xlu0 %4879  ;;  %v4856_v16 = vmul.f32 %v4854_v53, %v8239_v39  ;;  %v4741_v9 = vadd.f32 %v4737_v28, %v4692_v19  ;;  %v8290_v57 = vld [vmem:[%s8705_s15 + $0x18] sm:$0x1] }
0x10c6   : > { %v4828_v38 = vmul.f32 %v4826_v17, %v8239_v39  ;;  %v4787_v34 = vrot.slane %v4783_v18, 6  ;;  %v4850_v35 = vrot.slane %v8125_v43, %v6094_v4  ;;  %v4827_v21 = vmul.f32 %v4822_v45, %v8239_v39 }
0x10c7   : > { %v4740_v49 = vadd.f32 %v4736_v2, %v4691_v32  ;;  %v4792_v58 = vadd.f32 %v4788_v61, %v4741_v9  ;;  %vm689_vm6 = vcmp.ne.f32.partialorder %v8277_v15, 0.0  ;;  %vm690_vm7 = vcmp.ne.f32.partialorder %v8290_v57, 0.0 }
0x10c8   : > { %v4855_v55 = vmul.f32 %v4850_v35, %v8239_v39 }
0x10c9   : > { %v4930_v20 = vpop.permute.xlu0 %4929  ;;  %v4791_v23 = vadd.f32 %v4787_v34, %v4740_v49 }
0x10cc   : > { %v8257_v8 = vpop.permute.xlu1 %4830 }
0x10cd   : > { %v4841_v62 = vmul.f32 %v4836_v48, %v8257_v8  ;;  %v4842_v11 = vmul.f32 %v4840_v26, %v8257_v8  ;;  %v4866_v54 = vmul.f32 %v4864_v51, %v8257_v8  ;;  %v4865_v25 = vmul.f32 %v4860_v31, %v8257_v8 }
0x10cf   : > { %v4844_v12 = vadd.f32 %v4842_v11, %v4828_v38  ;;  %v4868_v7 = vadd.f32 %v4866_v54, %v4856_v16  ;;  %v4843_v43 = vadd.f32 %v4841_v62, %v4827_v21  ;;  %v4867_v41 = vadd.f32 %v4865_v25, %v4855_v55 }
0x10d0   : > { %v4878_v33 = vpop.permute.xlu1 %4877 }
0x10d1   : > { %v4881_v36 = vsel %vm704_vm0, %v4878_v33, %v4880_v3  ;;  %v4882_v10 = vsel %vm704_vm0, %v4880_v3, %v4878_v33  ;;  %v4846_v13 = vadd.f32 %v4844_v12, %v4792_v58  ;;  %v4872_v63 = vrot.slane %v4868_v7, 2 }
0x10d2   : > { %v4885_v27 = vrot.slane %v4881_v36, 3  ;;  %v4886_v24 = vrot.slane %v4882_v10, 3  ;;  %v4887_v0 = vrot.slane %v4881_v36, 4  ;;  %v4888_v14 = vrot.slane %v4882_v10, 4 }
0x10d3   : > { %vm5035_vm0 = vcmp.lt.s32.totalorder %v8704_v44, 111  ;;  %v4845_v19 = vadd.f32 %v4843_v43, %v4791_v23  ;;  %v4876_v16 = vadd.f32 %v4872_v63, %v4846_v13  ;;  %v4871_v38 = vrot.slane %v4867_v41, 2 }
0x10d4   : > { %v4893_v22 = vsel %vm687_vm3, %v4885_v27, 0.0  ;;  %v4894_v6 = vsel %vm688_vm15, %v4886_v24, 0.0  ;;  %v4895_v1 = vsel %vm687_vm3, %v4887_v0, 0.0  ;;  %v4896_v30 = vsel %vm688_vm15, %v4888_v14, 0.0  ;;  %v4928_v29 = vpop.permute.xlu1 %4927 }
0x10d5   : > { %v4900_v59 = vrot.slane %v4893_v22, %v6231_v37  ;;  %v4904_v42 = vrot.slane %v4894_v6, %v6231_v37  ;;  %v4910_v56 = vrot.slane %v4895_v1, %v6231_v37  ;;  %v4914_v47 = vrot.slane %v4896_v30, %v6231_v37  ;;  %v4981_v37 = vpop.permute.xlu0 %4980 }
0x10d6   : > { %v4932_v17 = vsel %vm4931_vm5, %v4928_v29, %v4930_v20  ;;  %v4933_v53 = vsel %vm4931_vm5, %v4930_v20, %v4928_v29  ;;  %v4875_v14 = vadd.f32 %v4871_v38, %v4845_v19 }
0x10d7   : > { %v4905_v28 = vmul.f32 %v4900_v59, %v8239_v39  ;;  %v4906_v18 = vmul.f32 %v4904_v42, %v8239_v39  ;;  %v4915_v51 = vmul.f32 %v4910_v56, %v8257_v8  ;;  %v4916_v45 = vmul.f32 %v4914_v47, %v8257_v8 }
0x10d8   : > { %v4936_v48 = vrot.slane %v4932_v17, 2  ;;  %v4937_v26 = vrot.slane %v4933_v53, 2  ;;  %v4938_v31 = vrot.slane %v4932_v17, 3  ;;  %v4939_v32 = vrot.slane %v4933_v53, 3  ;;  %v4979_v2 = vpop.permute.xlu1 %4978 }
0x10d9   : > { %v4982_v61 = vsel %vm719_vm1, %v4979_v2, %v4981_v37  ;;  %v4983_v3 = vsel %vm719_vm1, %v4981_v37, %v4979_v2  ;;  %v4917_v34 = vadd.f32 %v4915_v51, %v4905_v28  ;;  %v4918_v35 = vadd.f32 %v4916_v45, %v4906_v18  ;;  %v5034_v20 = vpop.permute.xlu0 %5033 }
0x10da   : > { %v4944_v62 = vsel %vm687_vm3, %v4936_v48, 0.0  ;;  %v4945_v11 = vsel %vm688_vm15, %v4937_v26, 0.0  ;;  %v4946_v54 = vsel %vm687_vm3, %v4938_v31, 0.0  ;;  %v4947_v9 = vsel %vm688_vm15, %v4939_v32, 0.0 }
0x10db   : > { %v4951_v21 = vrot.slane %v4944_v62, %v6238_v46  ;;  %v4955_v12 = vrot.slane %v4945_v11, %v6238_v46  ;;  %v4961_v7 = vrot.slane %v4946_v54, %v6238_v46  ;;  %v4965_v25 = vrot.slane %v4947_v9, %v6238_v46 }
0x10dc   : > { %v4986_v49 = vrot.slane %v4982_v61, 1  ;;  %v4987_v33 = vrot.slane %v4983_v3, 1  ;;  %v5032_v55 = vpop.permute.xlu1 %5031  ;;  %v4988_v10 = vrot.slane %v4982_v61, 2  ;;  %v4989_v43 = vrot.slane %v4983_v3, 2 }
0x10dd   : > { %v4956_v58 = vmul.f32 %v4951_v21, %v8239_v39  ;;  %v4957_v36 = vmul.f32 %v4955_v12, %v8239_v39  ;;  %v4966_v27 = vmul.f32 %v4961_v7, %v8257_v8  ;;  %v4967_v24 = vmul.f32 %v4965_v25, %v8257_v8  ;;  %v5015_v47 = vpop.permute.xlu0 %5014 }
0x10de   : > { %v4994_v0 = vsel %vm687_vm3, %v4986_v49, 0.0  ;;  %v4921_v23 = vrot.slane %v4917_v34, 4  ;;  %v4922_v46 = vrot.slane %v4918_v35, 4  ;;  %v4996_v13 = vsel %vm687_vm3, %v4988_v10, 0.0 }
0x10df   : > { %v4997_v63 = vsel %vm688_vm15, %v4989_v43, 0.0  ;;  %v4968_v39 = vadd.f32 %v4966_v27, %v4956_v58  ;;  %v4969_v41 = vadd.f32 %v4967_v24, %v4957_v36  ;;  %v4995_v22 = vsel %vm688_vm15, %v4987_v33, 0.0 }
0x10e0   : > { %v5006_v6 = vrot.slane %v4994_v0, %v6241_v50  ;;  %v5001_v8 = vpop.permute.xlu1 %5000  ;;  %v5020_v1 = vrot.slane %v4996_v13, %v6241_v50  ;;  %v5024_v30 = vrot.slane %v4997_v63, %v6241_v50  ;;  %v5036_v29 = vsel %vm5035_vm0, %v5032_v55, %v5034_v20 }
0x10e1   : > { %v5037_v60 = vsel %vm5035_vm0, %v5034_v20, %v5032_v55  ;;  %v5044_v59 = vrot.slane %v5036_v29, 1  ;;  %v5050_v56 = vsel %vm689_vm6, %v5036_v29, 0.0  ;;  %v5010_v17 = vrot.slane %v4995_v22, %v6241_v50  ;;  %v5122_v27 = vpop.permute.xlu0 %5121 }
0x10e2   : > { %v5045_v42 = vrot.slane %v5037_v60, 1  ;;  %v5051_v40 = vsel %vm690_vm7, %v5037_v60, 0.0  ;;  %v5057_v53 = vrot.slane %v5050_v56, %v6094_v4  ;;  %v5011_v28 = vmul.f32 %v5006_v6, %v5001_v8 }
0x10e3   : > { %v5061_v19 = vrot.slane %v5051_v40, %v6094_v4  ;;  %v5052_v44 = vsel %vm689_vm6, %v5044_v59, 0.0  ;;  %v4972_v51 = vrot.slane %v4968_v39, 6  ;;  %v4973_v45 = vrot.slane %v4969_v41, 6 }
0x10e4   : > { %v5053_v18 = vsel %vm690_vm7, %v5045_v42, 0.0  ;;  %v5067_v37 = vrot.slane %v5052_v44, %v6094_v4  ;;  %v5012_v26 = vmul.f32 %v5010_v17, %v5001_v8  ;;  %v5025_v31 = vmul.f32 %v5020_v1, %v5015_v47 }
0x10e5   : > { %v5071_v48 = vrot.slane %v5053_v18, %v6094_v4  ;;  %v4926_v50 = vadd.f32 %v4922_v46, %v4876_v16  ;;  %v5026_v32 = vmul.f32 %v5024_v30, %v5015_v47  ;;  %v5062_v2 = vmul.f32 %v5057_v53, %v5001_v8  ;;  %v5086_v54 = vpop.permute.xlu1 %5085  ;;  %v5217_v46 = vpop.f32.mrf.mxu1 }
0x10e6   : > { %v5063_v61 = vmul.f32 %v5061_v19, %v5001_v8  ;;  %v5027_v3 = vadd.f32 %v5025_v31, %v5011_v28  ;;  %v5072_v38 = vmul.f32 %v5067_v37, %v5015_v47  ;;  %v4925_v15 = vadd.f32 %v4921_v23, %v4875_v14 }
0x10e7   : > { %v5073_v62 = vmul.f32 %v5071_v48, %v5015_v47  ;;  %v5028_v11 = vadd.f32 %v5026_v32, %v5012_v26  ;;  %v4977_v57 = vadd.f32 %v4973_v45, %v4926_v50  ;;  %v5123_v13 = vrot.slane %v5122_v27, 4  ;;  %v5219_v29 = vpop.f32.mrf.mxu1 }
0x10e8   : > { %v5074_v9 = vadd.f32 %v5072_v38, %v5062_v2  ;;  %v4976_v35 = vadd.f32 %v4972_v51, %v4925_v15  ;;  %v5127_v6 = vcombine.low %v8097_v52, %v8097_v52  ;;  %v5224_v59 = vrot.slane %v5217_v46, 4 }
0x10e9   : > { %v5075_v34 = vadd.f32 %v5073_v62, %v5063_v61  ;;  %v5030_v21 = vadd.f32 %v5028_v11, %v4977_v57 }
0x10ea   : > { %v5078_v12 = vrot.slane %v5074_v9, 2  ;;  %v5029_v25 = vadd.f32 %v5027_v3, %v4976_v35  ;;  %v5092_v33 = vpop.permute.xlu1 %5091 }
0x10eb   : > { %v5079_v7 = vrot.slane %v5075_v34, 2 }
0x10ec   : > { %v5082_v16 = vadd.f32 %v5078_v12, %v5029_v25 }
0x10ed   : > { %v5083_v49 = vadd.f32 %v5079_v7, %v5030_v21 }
0x10ee   : > { %v5088_v55 = vmul.f32 %v5086_v54, %v5082_v16 }
0x10ef   : > { %v5089_v58 = vmul.f32 %v5086_v54, %v5083_v49 }
0x10f0   : > { %v5094_v36 = vadd.f32 %v5092_v33, %v5088_v55 }
0x10f1   : > { %v5095_v10 = vadd.f32 %v5092_v33, %v5089_v58 }
0x10f2   : > { %v5096_v43 = vmax.f32 %v5094_v36, 0.0 }
0x10f3   : > { %v5097_v20 = vmax.f32 %v5095_v10, 0.0 }
0x10f4   : > { %v5101_v24 = vrot.slane %v5096_v43, %v6094_v4  ;;  %v5111_v14 = vrot.slane %v5096_v43, %v6097_v5 }
0x10f5   : > { %v5105_v0 = vrot.slane %v5097_v20, %v6094_v4  ;;  %v5115_v23 = vrot.slane %v5097_v20, %v6097_v5  ;;  %v5225_v5 = vrot.slane %v5219_v29, 4 }
0x10f6   : > { %v5106_v63 = vmul.f32 %v5101_v24, %v5001_v8  ;;  %v5116_v41 = vmul.f32 %v5111_v14, %v5015_v47 }
0x10f7   : > { %v5107_v39 = vmul.f32 %v5105_v0, %v5001_v8  ;;  %v5117_v22 = vmul.f32 %v5115_v23, %v5015_v47 }
0x10f8   : > { %v5118_v1 = vadd.f32 %v5116_v41, %v5106_v63 }
0x10f9   : > { %v5119_v30 = vadd.f32 %v5117_v22, %v5107_v39 }
0x10fa   : > { %v5125_v4 = vadd.f32 %v5123_v13, %v5118_v1 }
0x10fb   : > { %v5126_v60 = vadd.f32 %v5123_v13, %v5119_v30 }
0x10fc   : > { %v5129_v42 = vadd.f32 %v5127_v6, %v5125_v4 }
0x10fd   : > { %v5130_v56 = vadd.f32 %v8097_v52, %v5126_v60 }
0x10fe   : > { %v5228_v8 = vadd.f32 %v5224_v59, %v5129_v42 }
0x10ff   : > { %v5229_v40 = vadd.f32 %v5225_v5, %v5130_v56 }
0x1101   : > { %v5232_v47 = vcombine.high %v5228_v8, %v5229_v40 }
0x1103   : > { %5234 = vst [vmem:[%s676_s16] sm:$0xff] %v5232_v47 }
0x1104   : > { %5678 = shalt.err (!%p5675_p3)
}
0x1105   : > { %s5679_s24 = scalar_lea.hbm %s5248_s21, 128  ;;  %s5683_s2 = scalar_lea.hbm %s8418_s22, 256 }
0x1106   : > { %p5680_p4 = scmp.ne.s32.totalorder %s5248_s21, %s5679_s24  ;;  %p5684_p9 = scmp.lt.s32.totalorder %s5248_s21, %s8418_s22 }
0x1107   : > { %p5685_p10 = scmp.lt.s32.totalorder %s5683_s2, %s5679_s24 }
0x1108   : > { %p5681_p7 = pnand %p5680_p4, %p5916_p5 }
0x1109   : > { %p5686_p11 = por %p5685_p10, %p5684_p9 }
0x110a   : > { %p5682_p8 = pneg %p5681_p7 }
0x110c   : > { %p5687_p12 = pnand %p5686_p11, %p5682_p8 }
0x110e   : > { %5690 = shalt.err (!%p5687_p12)
}
0x110f   : > { %5399 = dma.vmem_to_hbm [thread:$0]  (%p5916_p5), %s5251_s3, 128, %s5248_s21, %s5236_s19  }
0x1110 PF: > { %s8706_s30 = sld [smem:[#allocation7_spill]] }
0x1111   : > { %s8707_s25 = sld [smem:[#allocation5_spill]] }
0x1116   : > { %p5405_p13 = scmp.ge.s32.totalorder %s8706_s30, 2 }
0x1117   : > { %s5262_s0 = sand.u32 1, %s8707_s25  }
0x1118   : > { %p5402_p0 = pnand %p5405_p13, %p5920_p6  ;;  %s5263_s1 = scalar_lea.sflag [#allocation3], %s5262_s0 }
0x111a   : > { %p5403_p1 = pneg %p5402_p0 }
0x111c   : > { %5708 = dma.done.wait (%p5403_p1), %s5263_s1, 128  }
0x111d   : > { %5710 = vsyncadd (%p5403_p1), %s5263_s1, 4294967168  ;;  %s8709_s30 = sld [smem:[#allocation8_spill]]  ;;  %s8712_s3 = smov %s5717_s28 }
0x111e   : > { %s8710_s4 = sld [smem:[#allocation6_spill]] }
0x111f   : > { %s8711_s29 = sld [smem:[#allocation9_spill]] }
0x1123   : > { %p32_p2 = scmp.ge.s32.totalorder %s8709_s30, 4  }
0x1124   : > { %s8713_s28 = smov %s8710_s4 }
0x1125   :  { %34 = sbr.rel (!%p32_p2) target bundleno = 18 (0x12), region = 143 }
0x112a   :  { %5268 = vsyncpa [#allocation3], 1 }
0x112b   :  { %5270 = vsyncpa [#allocation3 + $0x1], 1 }

</bundles_post_ra>
